<compile_context>
chip_gen: v7x
topology: tpu7x:2x2x1
jax: 0.10.0
libtpu: 0.0.40
codegen_flags: <defaults>
</compile_context>

<pallas_src>
import math
import functools
import warnings

import jax
import jax.numpy as jnp
from jax import lax
from jax.experimental import pallas as pl
from jax.experimental.pallas import tpu as pltpu


def _rel_pos_bias_kernel(table_ref, qk_ref, out_ref, bias_ref, *,
                         causal, num_buckets, max_distance):
    """Grid = (num_q_tiles, batch); batch is the innermost (sequential) axis.

    table_ref : (heads, num_buckets) f32 in SMEM, already multiplied by scale.
    qk_ref    : (1, heads, block_q, k_len) input tile in VMEM.
    out_ref   : same block shape, aliased onto the qk_dots HBM buffer.
    bias_ref  : (heads, block_q, k_len) VMEM scratch; persists across grid
                steps and is rebuilt only when the q-tile changes (batch == 0).
    """
    heads, block_q, k_len = bias_ref.shape

    # program_id must be read OUTSIDE the pl.when body (no lowering for the
    # primitive inside a cond sub-jaxpr in interpret mode); close over values.
    q_tile = pl.program_id(0)
    batch_idx = pl.program_id(1)

    # ---- build the relative-position bias for this q-tile (once per tile) ----
    @pl.when(batch_idx == 0)
    def _build_bias():
        q_off = q_tile * block_q
        q_pos = q_off + lax.broadcasted_iota(jnp.int32, (block_q, k_len), 0)
        k_pos = lax.broadcasted_iota(jnp.int32, (block_q, k_len), 1)
        n = q_pos - k_pos                       # n = -(k - q) = -relative_position

        if not causal:
            nb = num_buckets // 2
            ret = jnp.where(n < 0, nb, 0).astype(jnp.int32)
            n = jnp.abs(n)
        else:
            nb = num_buckets
            ret = jnp.zeros((block_q, k_len), jnp.int32)
            n = jnp.maximum(n, 0)

        max_exact = nb // 2
        is_small = n < max_exact
        # Clamp to >= 1 before the log (avoids -inf); masked by is_small anyway.
        nf = jnp.maximum(n, 1).astype(jnp.float32)
        log_ratio = jnp.log(nf / max_exact) / math.log(max_distance / max_exact)
        # float->int32 truncates toward zero, matching torch .long()
        val_if_large = max_exact + (log_ratio * (nb - max_exact)).astype(jnp.int32)
        val_if_large = jnp.minimum(val_if_large, nb - 1)
        bucket = ret + jnp.where(is_small, n, val_if_large)   # (block_q, k_len) i32

        # Embedding "gather": per-bucket masks computed ONCE and reused for all
        # heads (cuts the build's VALU work ~1.8x vs. compare-per-head).
        masks = [bucket == b for b in range(1, num_buckets)]
        for h in range(heads):
            acc = jnp.full((block_q, k_len), table_ref[h, 0], dtype=jnp.float32)
            for b, m in zip(range(1, num_buckets), masks):
                acc = jnp.where(m, table_ref[h, b], acc)
            bias_ref[h] = acc.astype(bias_ref.dtype)

    # ---- hot path: streaming add, cast only at the store ----
    out_ref[0] = (qk_ref[0] + bias_ref[...]).astype(out_ref.dtype)


def _vmem_budgets():
    """(block-picking budget, vmem_limit_bytes), derived from the actual part.

    128 MiB parts (v5e/v6e) -> ~92 MiB pick budget / ~109 MiB limit.
    64 MiB-per-core parts (v7x) or no TPU attached -> ~46 MiB / ~54 MiB.
    """
    cap = 64 * 1024 * 1024
    try:
        if jax.default_backend() == "tpu":
            cap = int(pltpu.get_tpu_info().vmem_capacity_bytes)
    except Exception:
        pass
    return int(cap * 0.72), int(cap * 0.85)


def _pick_block_q(q_len, heads, k_len, qk_itemsize, bias_itemsize,
                  budget_bytes, in_buffers):
    """Largest q-tile whose *honest* VMEM footprint fits the budget.

    Footprint = in_buffers x input tile + 2 x output tile + bias scratch
                + ~3 (block_q, k_len) build temporaries (bucket/mask/f32 acc).
    Prefers >= 2 q-tiles (the only megacore-shardable axis, v7x) and keeps
    block_q a multiple of the dtype's native sublane packing.
    """
    if qk_itemsize >= 4:
        min_bq = 8
    elif qk_itemsize == 2:
        min_bq = 16
    else:
        min_bq = 32

    def fits(bq):
        tile = heads * bq * k_len * qk_itemsize
        bias = heads * bq * k_len * bias_itemsize
        temps = 3 * bq * k_len * 4
        return (in_buffers + 2) * tile + bias + temps <= budget_bytes

    cands = [c for c in (1024, 512, 256, 128, 64, 32, 16, 8)
             if min_bq <= c <= q_len]
    for need_two_tiles in (True, False):
        for bq in cands:
            if q_len % bq == 0 and fits(bq) and not (need_two_tiles and 2 * bq > q_len):
                return bq
    if fits(q_len):          # tiny / awkward q_len: one full tile (allowed)
        return q_len
    for bq in cands:         # ragged last tile (grid uses cdiv), budget-checked
        if fits(bq):
            return bq
    return min(min_bq, q_len)


@functools.partial(jax.jit,
                   static_argnames=("causal", "num_buckets", "max_distance"),
                   donate_argnums=(0,))
def relative_position_bias(qk_dots, emb_weight, scale, *,
                           causal=False, num_buckets=32, max_distance=128):
    """qk_dots: (b, h, i, j); emb_weight: (num_buckets, heads) (nn.Embedding.weight)."""
    b, h, i, j = qk_dots.shape

    eff_buckets = num_buckets if causal else num_buckets // 2
    if eff_buckets < 2:
        raise ValueError("num_buckets too small for the T5 bucketing formula "
                         "(need >= 4 non-causal / >= 2 causal).")
    if max_distance <= eff_buckets // 2:
        raise ValueError("max_distance must exceed num_buckets'//2 (log range).")

    # (heads, num_buckets) with `scale` folded in -> no per-element multiply in-kernel.
    table = jnp.asarray(emb_weight, jnp.float32).T * scale

    # bf16 scratch + bf16 add when the input is bf16 (halves resident scratch,
    # bf16-native VPU on v6e/v7x); f32 otherwise.
    bias_dtype = jnp.bfloat16 if qk_dots.dtype == jnp.bfloat16 else jnp.float32

    # Deeper input pipelining (hide the per-q-tile build) when available.
    use_buffered = hasattr(pl, "Buffered") and jax.default_backend() == "tpu"
    in_buffers = 3 if use_buffered else 2

    pick_budget, vmem_limit = _vmem_budgets()
    block_q = _pick_block_q(i, h, j, qk_dots.dtype.itemsize,
                            jnp.dtype(bias_dtype).itemsize,
                            pick_budget, in_buffers)
    grid = (pl.cdiv(i, block_q), b)     # batch innermost: bias reused across it

    qk_index_map = lambda ti, bi: (bi, 0, ti, 0)
    qk_spec = pl.BlockSpec((1, h, block_q, j), qk_index_map)
    if use_buffered:
        try:
            qk_spec = pl.BlockSpec((1, h, block_q, j), qk_index_map,
                                   pipeline_mode=pl.Buffered(in_buffers))
        except TypeError:
            pass   # older BlockSpec signature: keep default double-buffering

    kernel = functools.partial(_rel_pos_bias_kernel, causal=causal,
                               num_buckets=num_buckets, max_distance=max_distance)

    return pl.pallas_call(
        kernel,
        out_shape=jax.ShapeDtypeStruct(qk_dots.shape, qk_dots.dtype),
        grid=grid,
        in_specs=[
            pl.BlockSpec(memory_space=pltpu.MemorySpace.SMEM),   # bias table
            qk_spec,
        ],
        out_specs=pl.BlockSpec((1, h, block_q, j), qk_index_map),
        scratch_shapes=[pltpu.VMEM((h, block_q, j), bias_dtype)],
        input_output_aliases={1: 0},      # in-place update of qk_dots
        compiler_params=pltpu.CompilerParams(
            # q-tile axis is independent (megacore-shardable); batch axis stays
            # sequential so the bias built at batch==0 is valid when reused.
            dimension_semantics=("parallel", "arbitrary"),
            vmem_limit_bytes=vmem_limit,
        ),
    )(table, qk_dots)


def _reference(qk_dots, emb_weight, *, scale, causal, num_buckets, max_distance):
    """Pure-JAX replica of the PyTorch forward (for validation)."""
    i, j = qk_dots.shape[-2:]
    q_pos = jnp.arange(i)
    k_pos = jnp.arange(j)
    rel = k_pos[None, :] - q_pos[:, None]
    n = -rel
    nb = num_buckets
    if not causal:
        nb //= 2
        ret = (n < 0).astype(jnp.int32) * nb
        n = jnp.abs(n)
    else:
        ret = jnp.zeros_like(n)
        n = jnp.maximum(n, 0)
    max_exact = nb // 2
    is_small = n < max_exact
    val_if_large = max_exact + (
        jnp.log(n.astype(jnp.float32) / max_exact)
        / math.log(max_distance / max_exact) * (nb - max_exact)
    ).astype(jnp.int32)
    val_if_large = jnp.minimum(val_if_large, nb - 1)
    bucket = ret + jnp.where(is_small, n, val_if_large)
    values = emb_weight[bucket]                               # (i, j, heads)
    bias = jnp.transpose(values, (2, 0, 1))[None]             # (1, h, i, j)
    return qk_dots + bias * scale


if __name__ == "__main__":
    # Donation is a perf win on TPU; on non-TPU interpreters it only warns.
    warnings.filterwarnings("ignore", message=".*donated buffer.*")
    warnings.filterwarnings("ignore", message=".*[Dd]onation.*")

    B, H = 2, 8
    I = J = 128                     # lane-dense last dim (multiple of 128)
    NUM_BUCKETS, MAX_DISTANCE = 32, 128
    CAUSAL = False
    SCALE = 64 ** -0.5              # typical scale = dim_head ** -0.5

    key = jax.random.PRNGKey(0)
    k_qk, k_emb = jax.random.split(key)
    qk_dots = jax.random.normal(k_qk, (B, H, I, J), dtype=jnp.float32)
    # nn.Embedding(num_buckets, heads) default init ~ N(0, 1)
    emb_weight = jax.random.normal(k_emb, (NUM_BUCKETS, H), dtype=jnp.float32)

    qk_shape, qk_dtype = qk_dots.shape, qk_dots.dtype

    # Reference first (qk_dots is donated to the kernel call below).
    ref = jax.block_until_ready(_reference(
        qk_dots, emb_weight, scale=SCALE, causal=CAUSAL,
        num_buckets=NUM_BUCKETS, max_distance=MAX_DISTANCE))

    out = relative_position_bias(
        qk_dots, emb_weight, SCALE, causal=CAUSAL,
        num_buckets=NUM_BUCKETS, max_distance=MAX_DISTANCE)
    out = jax.block_until_ready(out)

    assert out.shape == qk_shape and out.dtype == qk_dtype
    assert jnp.allclose(out, ref, atol=1e-5, rtol=1e-5), \
        float(jnp.max(jnp.abs(out - ref)))
    print("KERNEL_OK")
</pallas_src>

<mosaic_0001>
module attributes {stable_mosaic.version = 11 : i64} {
  func.func @_rel_pos_bias_kernel(%arg0: i32, %arg1: i32, %arg2: memref<8x32xf32, #tpu.memory_space<smem>>, %arg3: memref<1x8x64x128xf32, #tpu.memory_space<vmem>>, %arg4: memref<1x8x64x128xf32, #tpu.memory_space<vmem>>, %arg5: memref<8x64x128xf32, #tpu.memory_space<vmem>>) attributes {dimension_semantics = [#tpu.dimension_semantics<parallel>, #tpu.dimension_semantics<arbitrary>], iteration_bounds = array<i64: 2, 2>, scalar_prefetch = 0 : i64, scratch_operands = 1 : i64, tpu.core_type = #tpu.core_type<tc>, window_params = [{transform_indices = @transform_0, window_bounds = array<i64: 8, 32>}, {transform_indices = @transform_1, window_bounds = array<i64: 1, 8, 64, 128>}, {transform_indices = @transform_2, window_bounds = array<i64: 1, 8, 64, 128>}]} {
    %c0_i32 = arith.constant 0 : i32
    %0 = arith.cmpi eq, %arg1, %c0_i32 : i32
    %1 = arith.extui %0 : i1 to i32
    %c0_i32_0 = arith.constant 0 : i32
    %2 = arith.cmpi ne, %1, %c0_i32_0 : i32
    scf.if %2 {
      %c64_i32 = arith.constant 64 : i32
      %10 = arith.muli %arg0, %c64_i32 : i32
      %11 = tpu.iota {dimensions = array<i32: 0>} : vector<64x128xi32>
      %12 = vector.broadcast %10 : i32 to vector<64x128xi32>
      %13 = arith.addi %12, %11 : vector<64x128xi32>
      %14 = tpu.iota {dimensions = array<i32: 1>} : vector<64x128xi32>
      %15 = arith.subi %13, %14 : vector<64x128xi32>
      %c0_i32_11 = arith.constant 0 : i32
      %16 = vector.broadcast %c0_i32_11 : i32 to vector<64x128xi32>
      %17 = arith.cmpi slt, %15, %16 : vector<64x128xi32>
      %c16_i32 = arith.constant 16 : i32
      %c0_i32_12 = arith.constant 0 : i32
      %18 = vector.broadcast %c16_i32 : i32 to vector<64x128xi32>
      %19 = vector.broadcast %c0_i32_12 : i32 to vector<64x128xi32>
      %20 = arith.select %17, %18, %19 : vector<64x128xi1>, vector<64x128xi32>
      %21 = math.absi %15 : vector<64x128xi32>
      %c8_i32 = arith.constant 8 : i32
      %22 = vector.broadcast %c8_i32 : i32 to vector<64x128xi32>
      %23 = arith.cmpi slt, %21, %22 : vector<64x128xi32>
      %c1_i32 = arith.constant 1 : i32
      %24 = vector.broadcast %c1_i32 : i32 to vector<64x128xi32>
      %25 = arith.maxsi %21, %24 : vector<64x128xi32>
      %26 = arith.sitofp %25 : vector<64x128xi32> to vector<64x128xf32>
      %cst = arith.constant 8.000000e+00 : f32
      %27 = vector.broadcast %cst : f32 to vector<64x128xf32>
      %28 = arith.divf %26, %27 : vector<64x128xf32>
      %29 = math.log %28 : vector<64x128xf32>
      %cst_13 = arith.constant 2.77258873 : f32
      %30 = vector.broadcast %cst_13 : f32 to vector<64x128xf32>
      %31 = arith.divf %29, %30 : vector<64x128xf32>
      %cst_14 = arith.constant 8.000000e+00 : f32
      %32 = vector.broadcast %cst_14 : f32 to vector<64x128xf32>
      %33 = arith.mulf %31, %32 : vector<64x128xf32>
      %34 = arith.fptosi %33 : vector<64x128xf32> to vector<64x128xi32>
      %c8_i32_15 = arith.constant 8 : i32
      %35 = vector.broadcast %c8_i32_15 : i32 to vector<64x128xi32>
      %36 = arith.addi %35, %34 : vector<64x128xi32>
      %c15_i32 = arith.constant 15 : i32
      %37 = vector.broadcast %c15_i32 : i32 to vector<64x128xi32>
      %38 = arith.minsi %36, %37 : vector<64x128xi32>
      %39 = arith.select %23, %21, %38 : vector<64x128xi1>, vector<64x128xi32>
      %40 = arith.addi %20, %39 : vector<64x128xi32>
      %c1_i32_16 = arith.constant 1 : i32
      %41 = vector.broadcast %c1_i32_16 : i32 to vector<64x128xi32>
      %42 = arith.cmpi eq, %40, %41 : vector<64x128xi32>
      %c2_i32 = arith.constant 2 : i32
      %43 = vector.broadcast %c2_i32 : i32 to vector<64x128xi32>
      %44 = arith.cmpi eq, %40, %43 : vector<64x128xi32>
      %c3_i32 = arith.constant 3 : i32
      %45 = vector.broadcast %c3_i32 : i32 to vector<64x128xi32>
      %46 = arith.cmpi eq, %40, %45 : vector<64x128xi32>
      %c4_i32 = arith.constant 4 : i32
      %47 = vector.broadcast %c4_i32 : i32 to vector<64x128xi32>
      %48 = arith.cmpi eq, %40, %47 : vector<64x128xi32>
      %c5_i32 = arith.constant 5 : i32
      %49 = vector.broadcast %c5_i32 : i32 to vector<64x128xi32>
      %50 = arith.cmpi eq, %40, %49 : vector<64x128xi32>
      %c6_i32 = arith.constant 6 : i32
      %51 = vector.broadcast %c6_i32 : i32 to vector<64x128xi32>
      %52 = arith.cmpi eq, %40, %51 : vector<64x128xi32>
      %c7_i32 = arith.constant 7 : i32
      %53 = vector.broadcast %c7_i32 : i32 to vector<64x128xi32>
      %54 = arith.cmpi eq, %40, %53 : vector<64x128xi32>
      %c8_i32_17 = arith.constant 8 : i32
      %55 = vector.broadcast %c8_i32_17 : i32 to vector<64x128xi32>
      %56 = arith.cmpi eq, %40, %55 : vector<64x128xi32>
      %c9_i32 = arith.constant 9 : i32
      %57 = vector.broadcast %c9_i32 : i32 to vector<64x128xi32>
      %58 = arith.cmpi eq, %40, %57 : vector<64x128xi32>
      %c10_i32 = arith.constant 10 : i32
      %59 = vector.broadcast %c10_i32 : i32 to vector<64x128xi32>
      %60 = arith.cmpi eq, %40, %59 : vector<64x128xi32>
      %c11_i32 = arith.constant 11 : i32
      %61 = vector.broadcast %c11_i32 : i32 to vector<64x128xi32>
      %62 = arith.cmpi eq, %40, %61 : vector<64x128xi32>
      %c12_i32 = arith.constant 12 : i32
      %63 = vector.broadcast %c12_i32 : i32 to vector<64x128xi32>
      %64 = arith.cmpi eq, %40, %63 : vector<64x128xi32>
      %c13_i32 = arith.constant 13 : i32
      %65 = vector.broadcast %c13_i32 : i32 to vector<64x128xi32>
      %66 = arith.cmpi eq, %40, %65 : vector<64x128xi32>
      %c14_i32 = arith.constant 14 : i32
      %67 = vector.broadcast %c14_i32 : i32 to vector<64x128xi32>
      %68 = arith.cmpi eq, %40, %67 : vector<64x128xi32>
      %c15_i32_18 = arith.constant 15 : i32
      %69 = vector.broadcast %c15_i32_18 : i32 to vector<64x128xi32>
      %70 = arith.cmpi eq, %40, %69 : vector<64x128xi32>
      %c16_i32_19 = arith.constant 16 : i32
      %71 = vector.broadcast %c16_i32_19 : i32 to vector<64x128xi32>
      %72 = arith.cmpi eq, %40, %71 : vector<64x128xi32>
      %c17_i32 = arith.constant 17 : i32
      %73 = vector.broadcast %c17_i32 : i32 to vector<64x128xi32>
      %74 = arith.cmpi eq, %40, %73 : vector<64x128xi32>
      %c18_i32 = arith.constant 18 : i32
      %75 = vector.broadcast %c18_i32 : i32 to vector<64x128xi32>
      %76 = arith.cmpi eq, %40, %75 : vector<64x128xi32>
      %c19_i32 = arith.constant 19 : i32
      %77 = vector.broadcast %c19_i32 : i32 to vector<64x128xi32>
      %78 = arith.cmpi eq, %40, %77 : vector<64x128xi32>
      %c20_i32 = arith.constant 20 : i32
      %79 = vector.broadcast %c20_i32 : i32 to vector<64x128xi32>
      %80 = arith.cmpi eq, %40, %79 : vector<64x128xi32>
      %c21_i32 = arith.constant 21 : i32
      %81 = vector.broadcast %c21_i32 : i32 to vector<64x128xi32>
      %82 = arith.cmpi eq, %40, %81 : vector<64x128xi32>
      %c22_i32 = arith.constant 22 : i32
      %83 = vector.broadcast %c22_i32 : i32 to vector<64x128xi32>
      %84 = arith.cmpi eq, %40, %83 : vector<64x128xi32>
      %c23_i32 = arith.constant 23 : i32
      %85 = vector.broadcast %c23_i32 : i32 to vector<64x128xi32>
      %86 = arith.cmpi eq, %40, %85 : vector<64x128xi32>
      %c24_i32 = arith.constant 24 : i32
      %87 = vector.broadcast %c24_i32 : i32 to vector<64x128xi32>
      %88 = arith.cmpi eq, %40, %87 : vector<64x128xi32>
      %c25_i32 = arith.constant 25 : i32
      %89 = vector.broadcast %c25_i32 : i32 to vector<64x128xi32>
      %90 = arith.cmpi eq, %40, %89 : vector<64x128xi32>
      %c26_i32 = arith.constant 26 : i32
      %91 = vector.broadcast %c26_i32 : i32 to vector<64x128xi32>
      %92 = arith.cmpi eq, %40, %91 : vector<64x128xi32>
      %c27_i32 = arith.constant 27 : i32
      %93 = vector.broadcast %c27_i32 : i32 to vector<64x128xi32>
      %94 = arith.cmpi eq, %40, %93 : vector<64x128xi32>
      %c28_i32 = arith.constant 28 : i32
      %95 = vector.broadcast %c28_i32 : i32 to vector<64x128xi32>
      %96 = arith.cmpi eq, %40, %95 : vector<64x128xi32>
      %c29_i32 = arith.constant 29 : i32
      %97 = vector.broadcast %c29_i32 : i32 to vector<64x128xi32>
      %98 = arith.cmpi eq, %40, %97 : vector<64x128xi32>
      %c30_i32 = arith.constant 30 : i32
      %99 = vector.broadcast %c30_i32 : i32 to vector<64x128xi32>
      %100 = arith.cmpi eq, %40, %99 : vector<64x128xi32>
      %c31_i32 = arith.constant 31 : i32
      %101 = vector.broadcast %c31_i32 : i32 to vector<64x128xi32>
      %102 = arith.cmpi eq, %40, %101 : vector<64x128xi32>
      %c0_20 = arith.constant 0 : index
      %c0_21 = arith.constant 0 : index
      %103 = memref.load %arg2[%c0_20, %c0_21] : memref<8x32xf32, #tpu.memory_space<smem>>
      %104 = vector.broadcast %103 : f32 to vector<64x128xf32>
      %c0_22 = arith.constant 0 : index
      %c1 = arith.constant 1 : index
      %105 = memref.load %arg2[%c0_22, %c1] : memref<8x32xf32, #tpu.memory_space<smem>>
      %106 = vector.broadcast %105 : f32 to vector<64x128xf32>
      %107 = arith.select %42, %106, %104 : vector<64x128xi1>, vector<64x128xf32>
      %c0_23 = arith.constant 0 : index
      %c2 = arith.constant 2 : index
      %108 = memref.load %arg2[%c0_23, %c2] : memref<8x32xf32, #tpu.memory_space<smem>>
      %109 = vector.broadcast %108 : f32 to vector<64x128xf32>
      %110 = arith.select %44, %109, %107 : vector<64x128xi1>, vector<64x128xf32>
      %c0_24 = arith.constant 0 : index
      %c3 = arith.constant 3 : index
      %111 = memref.load %arg2[%c0_24, %c3] : memref<8x32xf32, #tpu.memory_space<smem>>
      %112 = vector.broadcast %111 : f32 to vector<64x128xf32>
      %113 = arith.select %46, %112, %110 : vector<64x128xi1>, vector<64x128xf32>
      %c0_25 = arith.constant 0 : index
      %c4 = arith.constant 4 : index
      %114 = memref.load %arg2[%c0_25, %c4] : memref<8x32xf32, #tpu.memory_space<smem>>
      %115 = vector.broadcast %114 : f32 to vector<64x128xf32>
      %116 = arith.select %48, %115, %113 : vector<64x128xi1>, vector<64x128xf32>
      %c0_26 = arith.constant 0 : index
      %c5 = arith.constant 5 : index
      %117 = memref.load %arg2[%c0_26, %c5] : memref<8x32xf32, #tpu.memory_space<smem>>
      %118 = vector.broadcast %117 : f32 to vector<64x128xf32>
      %119 = arith.select %50, %118, %116 : vector<64x128xi1>, vector<64x128xf32>
      %c0_27 = arith.constant 0 : index
      %c6 = arith.constant 6 : index
      %120 = memref.load %arg2[%c0_27, %c6] : memref<8x32xf32, #tpu.memory_space<smem>>
      %121 = vector.broadcast %120 : f32 to vector<64x128xf32>
      %122 = arith.select %52, %121, %119 : vector<64x128xi1>, vector<64x128xf32>
      %c0_28 = arith.constant 0 : index
      %c7 = arith.constant 7 : index
      %123 = memref.load %arg2[%c0_28, %c7] : memref<8x32xf32, #tpu.memory_space<smem>>
      %124 = vector.broadcast %123 : f32 to vector<64x128xf32>
      %125 = arith.select %54, %124, %122 : vector<64x128xi1>, vector<64x128xf32>
      %c0_29 = arith.constant 0 : index
      %c8 = arith.constant 8 : index
      %126 = memref.load %arg2[%c0_29, %c8] : memref<8x32xf32, #tpu.memory_space<smem>>
      %127 = vector.broadcast %126 : f32 to vector<64x128xf32>
      %128 = arith.select %56, %127, %125 : vector<64x128xi1>, vector<64x128xf32>
      %c0_30 = arith.constant 0 : index
      %c9 = arith.constant 9 : index
      %129 = memref.load %arg2[%c0_30, %c9] : memref<8x32xf32, #tpu.memory_space<smem>>
      %130 = vector.broadcast %129 : f32 to vector<64x128xf32>
      %131 = arith.select %58, %130, %128 : vector<64x128xi1>, vector<64x128xf32>
      %c0_31 = arith.constant 0 : index
      %c10 = arith.constant 10 : index
      %132 = memref.load %arg2[%c0_31, %c10] : memref<8x32xf32, #tpu.memory_space<smem>>
      %133 = vector.broadcast %132 : f32 to vector<64x128xf32>
      %134 = arith.select %60, %133, %131 : vector<64x128xi1>, vector<64x128xf32>
      %c0_32 = arith.constant 0 : index
      %c11 = arith.constant 11 : index
      %135 = memref.load %arg2[%c0_32, %c11] : memref<8x32xf32, #tpu.memory_space<smem>>
      %136 = vector.broadcast %135 : f32 to vector<64x128xf32>
      %137 = arith.select %62, %136, %134 : vector<64x128xi1>, vector<64x128xf32>
      %c0_33 = arith.constant 0 : index
      %c12 = arith.constant 12 : index
      %138 = memref.load %arg2[%c0_33, %c12] : memref<8x32xf32, #tpu.memory_space<smem>>
      %139 = vector.broadcast %138 : f32 to vector<64x128xf32>
      %140 = arith.select %64, %139, %137 : vector<64x128xi1>, vector<64x128xf32>
      %c0_34 = arith.constant 0 : index
      %c13 = arith.constant 13 : index
      %141 = memref.load %arg2[%c0_34, %c13] : memref<8x32xf32, #tpu.memory_space<smem>>
      %142 = vector.broadcast %141 : f32 to vector<64x128xf32>
      %143 = arith.select %66, %142, %140 : vector<64x128xi1>, vector<64x128xf32>
      %c0_35 = arith.constant 0 : index
      %c14 = arith.constant 14 : index
      %144 = memref.load %arg2[%c0_35, %c14] : memref<8x32xf32, #tpu.memory_space<smem>>
      %145 = vector.broadcast %144 : f32 to vector<64x128xf32>
      %146 = arith.select %68, %145, %143 : vector<64x128xi1>, vector<64x128xf32>
      %c0_36 = arith.constant 0 : index
      %c15 = arith.constant 15 : index
      %147 = memref.load %arg2[%c0_36, %c15] : memref<8x32xf32, #tpu.memory_space<smem>>
      %148 = vector.broadcast %147 : f32 to vector<64x128xf32>
      %149 = arith.select %70, %148, %146 : vector<64x128xi1>, vector<64x128xf32>
      %c0_37 = arith.constant 0 : index
      %c16 = arith.constant 16 : index
      %150 = memref.load %arg2[%c0_37, %c16] : memref<8x32xf32, #tpu.memory_space<smem>>
      %151 = vector.broadcast %150 : f32 to vector<64x128xf32>
      %152 = arith.select %72, %151, %149 : vector<64x128xi1>, vector<64x128xf32>
      %c0_38 = arith.constant 0 : index
      %c17 = arith.constant 17 : index
      %153 = memref.load %arg2[%c0_38, %c17] : memref<8x32xf32, #tpu.memory_space<smem>>
      %154 = vector.broadcast %153 : f32 to vector<64x128xf32>
      %155 = arith.select %74, %154, %152 : vector<64x128xi1>, vector<64x128xf32>
      %c0_39 = arith.constant 0 : index
      %c18 = arith.constant 18 : index
      %156 = memref.load %arg2[%c0_39, %c18] : memref<8x32xf32, #tpu.memory_space<smem>>
      %157 = vector.broadcast %156 : f32 to vector<64x128xf32>
      %158 = arith.select %76, %157, %155 : vector<64x128xi1>, vector<64x128xf32>
      %c0_40 = arith.constant 0 : index
      %c19 = arith.constant 19 : index
      %159 = memref.load %arg2[%c0_40, %c19] : memref<8x32xf32, #tpu.memory_space<smem>>
      %160 = vector.broadcast %159 : f32 to vector<64x128xf32>
      %161 = arith.select %78, %160, %158 : vector<64x128xi1>, vector<64x128xf32>
      %c0_41 = arith.constant 0 : index
      %c20 = arith.constant 20 : index
      %162 = memref.load %arg2[%c0_41, %c20] : memref<8x32xf32, #tpu.memory_space<smem>>
      %163 = vector.broadcast %162 : f32 to vector<64x128xf32>
      %164 = arith.select %80, %163, %161 : vector<64x128xi1>, vector<64x128xf32>
      %c0_42 = arith.constant 0 : index
      %c21 = arith.constant 21 : index
      %165 = memref.load %arg2[%c0_42, %c21] : memref<8x32xf32, #tpu.memory_space<smem>>
      %166 = vector.broadcast %165 : f32 to vector<64x128xf32>
      %167 = arith.select %82, %166, %164 : vector<64x128xi1>, vector<64x128xf32>
      %c0_43 = arith.constant 0 : index
      %c22 = arith.constant 22 : index
      %168 = memref.load %arg2[%c0_43, %c22] : memref<8x32xf32, #tpu.memory_space<smem>>
      %169 = vector.broadcast %168 : f32 to vector<64x128xf32>
      %170 = arith.select %84, %169, %167 : vector<64x128xi1>, vector<64x128xf32>
      %c0_44 = arith.constant 0 : index
      %c23 = arith.constant 23 : index
      %171 = memref.load %arg2[%c0_44, %c23] : memref<8x32xf32, #tpu.memory_space<smem>>
      %172 = vector.broadcast %171 : f32 to vector<64x128xf32>
      %173 = arith.select %86, %172, %170 : vector<64x128xi1>, vector<64x128xf32>
      %c0_45 = arith.constant 0 : index
      %c24 = arith.constant 24 : index
      %174 = memref.load %arg2[%c0_45, %c24] : memref<8x32xf32, #tpu.memory_space<smem>>
      %175 = vector.broadcast %174 : f32 to vector<64x128xf32>
      %176 = arith.select %88, %175, %173 : vector<64x128xi1>, vector<64x128xf32>
      %c0_46 = arith.constant 0 : index
      %c25 = arith.constant 25 : index
      %177 = memref.load %arg2[%c0_46, %c25] : memref<8x32xf32, #tpu.memory_space<smem>>
      %178 = vector.broadcast %177 : f32 to vector<64x128xf32>
      %179 = arith.select %90, %178, %176 : vector<64x128xi1>, vector<64x128xf32>
      %c0_47 = arith.constant 0 : index
      %c26 = arith.constant 26 : index
      %180 = memref.load %arg2[%c0_47, %c26] : memref<8x32xf32, #tpu.memory_space<smem>>
      %181 = vector.broadcast %180 : f32 to vector<64x128xf32>
      %182 = arith.select %92, %181, %179 : vector<64x128xi1>, vector<64x128xf32>
      %c0_48 = arith.constant 0 : index
      %c27 = arith.constant 27 : index
      %183 = memref.load %arg2[%c0_48, %c27] : memref<8x32xf32, #tpu.memory_space<smem>>
      %184 = vector.broadcast %183 : f32 to vector<64x128xf32>
      %185 = arith.select %94, %184, %182 : vector<64x128xi1>, vector<64x128xf32>
      %c0_49 = arith.constant 0 : index
      %c28 = arith.constant 28 : index
      %186 = memref.load %arg2[%c0_49, %c28] : memref<8x32xf32, #tpu.memory_space<smem>>
      %187 = vector.broadcast %186 : f32 to vector<64x128xf32>
      %188 = arith.select %96, %187, %185 : vector<64x128xi1>, vector<64x128xf32>
      %c0_50 = arith.constant 0 : index
      %c29 = arith.constant 29 : index
      %189 = memref.load %arg2[%c0_50, %c29] : memref<8x32xf32, #tpu.memory_space<smem>>
      %190 = vector.broadcast %189 : f32 to vector<64x128xf32>
      %191 = arith.select %98, %190, %188 : vector<64x128xi1>, vector<64x128xf32>
      %c0_51 = arith.constant 0 : index
      %c30 = arith.constant 30 : index
      %192 = memref.load %arg2[%c0_51, %c30] : memref<8x32xf32, #tpu.memory_space<smem>>
      %193 = vector.broadcast %192 : f32 to vector<64x128xf32>
      %194 = arith.select %100, %193, %191 : vector<64x128xi1>, vector<64x128xf32>
      %c0_52 = arith.constant 0 : index
      %c31 = arith.constant 31 : index
      %195 = memref.load %arg2[%c0_52, %c31] : memref<8x32xf32, #tpu.memory_space<smem>>
      %196 = vector.broadcast %195 : f32 to vector<64x128xf32>
      %197 = arith.select %102, %196, %194 : vector<64x128xi1>, vector<64x128xf32>
      %c0_53 = arith.constant 0 : index
      %c0_54 = arith.constant 0 : index
      %c0_55 = arith.constant 0 : index
      %198 = vector.load %arg5[%c0_53, %c0_54, %c0_55] : memref<8x64x128xf32, #tpu.memory_space<vmem>>, vector<1x64x128xf32>
      %199 = vector.shape_cast %198 : vector<1x64x128xf32> to vector<64x128xf32>
      %200 = vector.shape_cast %197 : vector<64x128xf32> to vector<1x64x128xf32>
      tpu.vector_store %arg5[%c0_53, %c0_54, %c0_55], %200 {strides = array<i32>} : memref<8x64x128xf32, #tpu.memory_space<vmem>>, vector<1x64x128xf32>,
      %c1_56 = arith.constant 1 : index
      %c0_57 = arith.constant 0 : index
      %201 = memref.load %arg2[%c1_56, %c0_57] : memref<8x32xf32, #tpu.memory_space<smem>>
      %202 = vector.broadcast %201 : f32 to vector<64x128xf32>
      %c1_58 = arith.constant 1 : index
      %c1_59 = arith.constant 1 : index
      %203 = memref.load %arg2[%c1_58, %c1_59] : memref<8x32xf32, #tpu.memory_space<smem>>
      %204 = vector.broadcast %203 : f32 to vector<64x128xf32>
      %205 = arith.select %42, %204, %202 : vector<64x128xi1>, vector<64x128xf32>
      %c1_60 = arith.constant 1 : index
      %c2_61 = arith.constant 2 : index
      %206 = memref.load %arg2[%c1_60, %c2_61] : memref<8x32xf32, #tpu.memory_space<smem>>
      %207 = vector.broadcast %206 : f32 to vector<64x128xf32>
      %208 = arith.select %44, %207, %205 : vector<64x128xi1>, vector<64x128xf32>
      %c1_62 = arith.constant 1 : index
      %c3_63 = arith.constant 3 : index
      %209 = memref.load %arg2[%c1_62, %c3_63] : memref<8x32xf32, #tpu.memory_space<smem>>
      %210 = vector.broadcast %209 : f32 to vector<64x128xf32>
      %211 = arith.select %46, %210, %208 : vector<64x128xi1>, vector<64x128xf32>
      %c1_64 = arith.constant 1 : index
      %c4_65 = arith.constant 4 : index
      %212 = memref.load %arg2[%c1_64, %c4_65] : memref<8x32xf32, #tpu.memory_space<smem>>
      %213 = vector.broadcast %212 : f32 to vector<64x128xf32>
      %214 = arith.select %48, %213, %211 : vector<64x128xi1>, vector<64x128xf32>
      %c1_66 = arith.constant 1 : index
      %c5_67 = arith.constant 5 : index
      %215 = memref.load %arg2[%c1_66, %c5_67] : memref<8x32xf32, #tpu.memory_space<smem>>
      %216 = vector.broadcast %215 : f32 to vector<64x128xf32>
      %217 = arith.select %50, %216, %214 : vector<64x128xi1>, vector<64x128xf32>
      %c1_68 = arith.constant 1 : index
      %c6_69 = arith.constant 6 : index
      %218 = memref.load %arg2[%c1_68, %c6_69] : memref<8x32xf32, #tpu.memory_space<smem>>
      %219 = vector.broadcast %218 : f32 to vector<64x128xf32>
      %220 = arith.select %52, %219, %217 : vector<64x128xi1>, vector<64x128xf32>
      %c1_70 = arith.constant 1 : index
      %c7_71 = arith.constant 7 : index
      %221 = memref.load %arg2[%c1_70, %c7_71] : memref<8x32xf32, #tpu.memory_space<smem>>
      %222 = vector.broadcast %221 : f32 to vector<64x128xf32>
      %223 = arith.select %54, %222, %220 : vector<64x128xi1>, vector<64x128xf32>
      %c1_72 = arith.constant 1 : index
      %c8_73 = arith.constant 8 : index
      %224 = memref.load %arg2[%c1_72, %c8_73] : memref<8x32xf32, #tpu.memory_space<smem>>
      %225 = vector.broadcast %224 : f32 to vector<64x128xf32>
      %226 = arith.select %56, %225, %223 : vector<64x128xi1>, vector<64x128xf32>
      %c1_74 = arith.constant 1 : index
      %c9_75 = arith.constant 9 : index
      %227 = memref.load %arg2[%c1_74, %c9_75] : memref<8x32xf32, #tpu.memory_space<smem>>
      %228 = vector.broadcast %227 : f32 to vector<64x128xf32>
      %229 = arith.select %58, %228, %226 : vector<64x128xi1>, vector<64x128xf32>
      %c1_76 = arith.constant 1 : index
      %c10_77 = arith.constant 10 : index
      %230 = memref.load %arg2[%c1_76, %c10_77] : memref<8x32xf32, #tpu.memory_space<smem>>
      %231 = vector.broadcast %230 : f32 to vector<64x128xf32>
      %232 = arith.select %60, %231, %229 : vector<64x128xi1>, vector<64x128xf32>
      %c1_78 = arith.constant 1 : index
      %c11_79 = arith.constant 11 : index
      %233 = memref.load %arg2[%c1_78, %c11_79] : memref<8x32xf32, #tpu.memory_space<smem>>
      %234 = vector.broadcast %233 : f32 to vector<64x128xf32>
      %235 = arith.select %62, %234, %232 : vector<64x128xi1>, vector<64x128xf32>
      %c1_80 = arith.constant 1 : index
      %c12_81 = arith.constant 12 : index
      %236 = memref.load %arg2[%c1_80, %c12_81] : memref<8x32xf32, #tpu.memory_space<smem>>
      %237 = vector.broadcast %236 : f32 to vector<64x128xf32>
      %238 = arith.select %64, %237, %235 : vector<64x128xi1>, vector<64x128xf32>
      %c1_82 = arith.constant 1 : index
      %c13_83 = arith.constant 13 : index
      %239 = memref.load %arg2[%c1_82, %c13_83] : memref<8x32xf32, #tpu.memory_space<smem>>
      %240 = vector.broadcast %239 : f32 to vector<64x128xf32>
      %241 = arith.select %66, %240, %238 : vector<64x128xi1>, vector<64x128xf32>
      %c1_84 = arith.constant 1 : index
      %c14_85 = arith.constant 14 : index
      %242 = memref.load %arg2[%c1_84, %c14_85] : memref<8x32xf32, #tpu.memory_space<smem>>
      %243 = vector.broadcast %242 : f32 to vector<64x128xf32>
      %244 = arith.select %68, %243, %241 : vector<64x128xi1>, vector<64x128xf32>
      %c1_86 = arith.constant 1 : index
      %c15_87 = arith.constant 15 : index
      %245 = memref.load %arg2[%c1_86, %c15_87] : memref<8x32xf32, #tpu.memory_space<smem>>
      %246 = vector.broadcast %245 : f32 to vector<64x128xf32>
      %247 = arith.select %70, %246, %244 : vector<64x128xi1>, vector<64x128xf32>
      %c1_88 = arith.constant 1 : index
      %c16_89 = arith.constant 16 : index
      %248 = memref.load %arg2[%c1_88, %c16_89] : memref<8x32xf32, #tpu.memory_space<smem>>
      %249 = vector.broadcast %248 : f32 to vector<64x128xf32>
      %250 = arith.select %72, %249, %247 : vector<64x128xi1>, vector<64x128xf32>
      %c1_90 = arith.constant 1 : index
      %c17_91 = arith.constant 17 : index
      %251 = memref.load %arg2[%c1_90, %c17_91] : memref<8x32xf32, #tpu.memory_space<smem>>
      %252 = vector.broadcast %251 : f32 to vector<64x128xf32>
      %253 = arith.select %74, %252, %250 : vector<64x128xi1>, vector<64x128xf32>
      %c1_92 = arith.constant 1 : index
      %c18_93 = arith.constant 18 : index
      %254 = memref.load %arg2[%c1_92, %c18_93] : memref<8x32xf32, #tpu.memory_space<smem>>
      %255 = vector.broadcast %254 : f32 to vector<64x128xf32>
      %256 = arith.select %76, %255, %253 : vector<64x128xi1>, vector<64x128xf32>
      %c1_94 = arith.constant 1 : index
      %c19_95 = arith.constant 19 : index
      %257 = memref.load %arg2[%c1_94, %c19_95] : memref<8x32xf32, #tpu.memory_space<smem>>
      %258 = vector.broadcast %257 : f32 to vector<64x128xf32>
      %259 = arith.select %78, %258, %256 : vector<64x128xi1>, vector<64x128xf32>
      %c1_96 = arith.constant 1 : index
      %c20_97 = arith.constant 20 : index
      %260 = memref.load %arg2[%c1_96, %c20_97] : memref<8x32xf32, #tpu.memory_space<smem>>
      %261 = vector.broadcast %260 : f32 to vector<64x128xf32>
      %262 = arith.select %80, %261, %259 : vector<64x128xi1>, vector<64x128xf32>
      %c1_98 = arith.constant 1 : index
      %c21_99 = arith.constant 21 : index
      %263 = memref.load %arg2[%c1_98, %c21_99] : memref<8x32xf32, #tpu.memory_space<smem>>
      %264 = vector.broadcast %263 : f32 to vector<64x128xf32>
      %265 = arith.select %82, %264, %262 : vector<64x128xi1>, vector<64x128xf32>
      %c1_100 = arith.constant 1 : index
      %c22_101 = arith.constant 22 : index
      %266 = memref.load %arg2[%c1_100, %c22_101] : memref<8x32xf32, #tpu.memory_space<smem>>
      %267 = vector.broadcast %266 : f32 to vector<64x128xf32>
      %268 = arith.select %84, %267, %265 : vector<64x128xi1>, vector<64x128xf32>
      %c1_102 = arith.constant 1 : index
      %c23_103 = arith.constant 23 : index
      %269 = memref.load %arg2[%c1_102, %c23_103] : memref<8x32xf32, #tpu.memory_space<smem>>
      %270 = vector.broadcast %269 : f32 to vector<64x128xf32>
      %271 = arith.select %86, %270, %268 : vector<64x128xi1>, vector<64x128xf32>
      %c1_104 = arith.constant 1 : index
      %c24_105 = arith.constant 24 : index
      %272 = memref.load %arg2[%c1_104, %c24_105] : memref<8x32xf32, #tpu.memory_space<smem>>
      %273 = vector.broadcast %272 : f32 to vector<64x128xf32>
      %274 = arith.select %88, %273, %271 : vector<64x128xi1>, vector<64x128xf32>
      %c1_106 = arith.constant 1 : index
      %c25_107 = arith.constant 25 : index
      %275 = memref.load %arg2[%c1_106, %c25_107] : memref<8x32xf32, #tpu.memory_space<smem>>
      %276 = vector.broadcast %275 : f32 to vector<64x128xf32>
      %277 = arith.select %90, %276, %274 : vector<64x128xi1>, vector<64x128xf32>
      %c1_108 = arith.constant 1 : index
      %c26_109 = arith.constant 26 : index
      %278 = memref.load %arg2[%c1_108, %c26_109] : memref<8x32xf32, #tpu.memory_space<smem>>
      %279 = vector.broadcast %278 : f32 to vector<64x128xf32>
      %280 = arith.select %92, %279, %277 : vector<64x128xi1>, vector<64x128xf32>
      %c1_110 = arith.constant 1 : index
      %c27_111 = arith.constant 27 : index
      %281 = memref.load %arg2[%c1_110, %c27_111] : memref<8x32xf32, #tpu.memory_space<smem>>
      %282 = vector.broadcast %281 : f32 to vector<64x128xf32>
      %283 = arith.select %94, %282, %280 : vector<64x128xi1>, vector<64x128xf32>
      %c1_112 = arith.constant 1 : index
      %c28_113 = arith.constant 28 : index
      %284 = memref.load %arg2[%c1_112, %c28_113] : memref<8x32xf32, #tpu.memory_space<smem>>
      %285 = vector.broadcast %284 : f32 to vector<64x128xf32>
      %286 = arith.select %96, %285, %283 : vector<64x128xi1>, vector<64x128xf32>
      %c1_114 = arith.constant 1 : index
      %c29_115 = arith.constant 29 : index
      %287 = memref.load %arg2[%c1_114, %c29_115] : memref<8x32xf32, #tpu.memory_space<smem>>
      %288 = vector.broadcast %287 : f32 to vector<64x128xf32>
      %289 = arith.select %98, %288, %286 : vector<64x128xi1>, vector<64x128xf32>
      %c1_116 = arith.constant 1 : index
      %c30_117 = arith.constant 30 : index
      %290 = memref.load %arg2[%c1_116, %c30_117] : memref<8x32xf32, #tpu.memory_space<smem>>
      %291 = vector.broadcast %290 : f32 to vector<64x128xf32>
      %292 = arith.select %100, %291, %289 : vector<64x128xi1>, vector<64x128xf32>
      %c1_118 = arith.constant 1 : index
      %c31_119 = arith.constant 31 : index
      %293 = memref.load %arg2[%c1_118, %c31_119] : memref<8x32xf32, #tpu.memory_space<smem>>
      %294 = vector.broadcast %293 : f32 to vector<64x128xf32>
      %295 = arith.select %102, %294, %292 : vector<64x128xi1>, vector<64x128xf32>
      %c1_120 = arith.constant 1 : index
      %c0_121 = arith.constant 0 : index
      %c0_122 = arith.constant 0 : index
      %296 = vector.load %arg5[%c1_120, %c0_121, %c0_122] : memref<8x64x128xf32, #tpu.memory_space<vmem>>, vector<1x64x128xf32>
      %297 = vector.shape_cast %296 : vector<1x64x128xf32> to vector<64x128xf32>
      %298 = vector.shape_cast %295 : vector<64x128xf32> to vector<1x64x128xf32>
      tpu.vector_store %arg5[%c1_120, %c0_121, %c0_122], %298 {strides = array<i32>} : memref<8x64x128xf32, #tpu.memory_space<vmem>>, vector<1x64x128xf32>,
      %c2_123 = arith.constant 2 : index
      %c0_124 = arith.constant 0 : index
      %299 = memref.load %arg2[%c2_123, %c0_124] : memref<8x32xf32, #tpu.memory_space<smem>>
      %300 = vector.broadcast %299 : f32 to vector<64x128xf32>
      %c2_125 = arith.constant 2 : index
      %c1_126 = arith.constant 1 : index
      %301 = memref.load %arg2[%c2_125, %c1_126] : memref<8x32xf32, #tpu.memory_space<smem>>
      %302 = vector.broadcast %301 : f32 to vector<64x128xf32>
      %303 = arith.select %42, %302, %300 : vector<64x128xi1>, vector<64x128xf32>
      %c2_127 = arith.constant 2 : index
      %c2_128 = arith.constant 2 : index
      %304 = memref.load %arg2[%c2_127, %c2_128] : memref<8x32xf32, #tpu.memory_space<smem>>
      %305 = vector.broadcast %304 : f32 to vector<64x128xf32>
      %306 = arith.select %44, %305, %303 : vector<64x128xi1>, vector<64x128xf32>
      %c2_129 = arith.constant 2 : index
      %c3_130 = arith.constant 3 : index
      %307 = memref.load %arg2[%c2_129, %c3_130] : memref<8x32xf32, #tpu.memory_space<smem>>
      %308 = vector.broadcast %307 : f32 to vector<64x128xf32>
      %309 = arith.select %46, %308, %306 : vector<64x128xi1>, vector<64x128xf32>
      %c2_131 = arith.constant 2 : index
      %c4_132 = arith.constant 4 : index
      %310 = memref.load %arg2[%c2_131, %c4_132] : memref<8x32xf32, #tpu.memory_space<smem>>
      %311 = vector.broadcast %310 : f32 to vector<64x128xf32>
      %312 = arith.select %48, %311, %309 : vector<64x128xi1>, vector<64x128xf32>
      %c2_133 = arith.constant 2 : index
      %c5_134 = arith.constant 5 : index
      %313 = memref.load %arg2[%c2_133, %c5_134] : memref<8x32xf32, #tpu.memory_space<smem>>
      %314 = vector.broadcast %313 : f32 to vector<64x128xf32>
      %315 = arith.select %50, %314, %312 : vector<64x128xi1>, vector<64x128xf32>
      %c2_135 = arith.constant 2 : index
      %c6_136 = arith.constant 6 : index
      %316 = memref.load %arg2[%c2_135, %c6_136] : memref<8x32xf32, #tpu.memory_space<smem>>
      %317 = vector.broadcast %316 : f32 to vector<64x128xf32>
      %318 = arith.select %52, %317, %315 : vector<64x128xi1>, vector<64x128xf32>
      %c2_137 = arith.constant 2 : index
      %c7_138 = arith.constant 7 : index
      %319 = memref.load %arg2[%c2_137, %c7_138] : memref<8x32xf32, #tpu.memory_space<smem>>
      %320 = vector.broadcast %319 : f32 to vector<64x128xf32>
      %321 = arith.select %54, %320, %318 : vector<64x128xi1>, vector<64x128xf32>
      %c2_139 = arith.constant 2 : index
      %c8_140 = arith.constant 8 : index
      %322 = memref.load %arg2[%c2_139, %c8_140] : memref<8x32xf32, #tpu.memory_space<smem>>
      %323 = vector.broadcast %322 : f32 to vector<64x128xf32>
      %324 = arith.select %56, %323, %321 : vector<64x128xi1>, vector<64x128xf32>
      %c2_141 = arith.constant 2 : index
      %c9_142 = arith.constant 9 : index
      %325 = memref.load %arg2[%c2_141, %c9_142] : memref<8x32xf32, #tpu.memory_space<smem>>
      %326 = vector.broadcast %325 : f32 to vector<64x128xf32>
      %327 = arith.select %58, %326, %324 : vector<64x128xi1>, vector<64x128xf32>
      %c2_143 = arith.constant 2 : index
      %c10_144 = arith.constant 10 : index
      %328 = memref.load %arg2[%c2_143, %c10_144] : memref<8x32xf32, #tpu.memory_space<smem>>
      %329 = vector.broadcast %328 : f32 to vector<64x128xf32>
      %330 = arith.select %60, %329, %327 : vector<64x128xi1>, vector<64x128xf32>
      %c2_145 = arith.constant 2 : index
      %c11_146 = arith.constant 11 : index
      %331 = memref.load %arg2[%c2_145, %c11_146] : memref<8x32xf32, #tpu.memory_space<smem>>
      %332 = vector.broadcast %331 : f32 to vector<64x128xf32>
      %333 = arith.select %62, %332, %330 : vector<64x128xi1>, vector<64x128xf32>
      %c2_147 = arith.constant 2 : index
      %c12_148 = arith.constant 12 : index
      %334 = memref.load %arg2[%c2_147, %c12_148] : memref<8x32xf32, #tpu.memory_space<smem>>
      %335 = vector.broadcast %334 : f32 to vector<64x128xf32>
      %336 = arith.select %64, %335, %333 : vector<64x128xi1>, vector<64x128xf32>
      %c2_149 = arith.constant 2 : index
      %c13_150 = arith.constant 13 : index
      %337 = memref.load %arg2[%c2_149, %c13_150] : memref<8x32xf32, #tpu.memory_space<smem>>
      %338 = vector.broadcast %337 : f32 to vector<64x128xf32>
      %339 = arith.select %66, %338, %336 : vector<64x128xi1>, vector<64x128xf32>
      %c2_151 = arith.constant 2 : index
      %c14_152 = arith.constant 14 : index
      %340 = memref.load %arg2[%c2_151, %c14_152] : memref<8x32xf32, #tpu.memory_space<smem>>
      %341 = vector.broadcast %340 : f32 to vector<64x128xf32>
      %342 = arith.select %68, %341, %339 : vector<64x128xi1>, vector<64x128xf32>
      %c2_153 = arith.constant 2 : index
      %c15_154 = arith.constant 15 : index
      %343 = memref.load %arg2[%c2_153, %c15_154] : memref<8x32xf32, #tpu.memory_space<smem>>
      %344 = vector.broadcast %343 : f32 to vector<64x128xf32>
      %345 = arith.select %70, %344, %342 : vector<64x128xi1>, vector<64x128xf32>
      %c2_155 = arith.constant 2 : index
      %c16_156 = arith.constant 16 : index
      %346 = memref.load %arg2[%c2_155, %c16_156] : memref<8x32xf32, #tpu.memory_space<smem>>
      %347 = vector.broadcast %346 : f32 to vector<64x128xf32>
      %348 = arith.select %72, %347, %345 : vector<64x128xi1>, vector<64x128xf32>
      %c2_157 = arith.constant 2 : index
      %c17_158 = arith.constant 17 : index
      %349 = memref.load %arg2[%c2_157, %c17_158] : memref<8x32xf32, #tpu.memory_space<smem>>
      %350 = vector.broadcast %349 : f32 to vector<64x128xf32>
      %351 = arith.select %74, %350, %348 : vector<64x128xi1>, vector<64x128xf32>
      %c2_159 = arith.constant 2 : index
      %c18_160 = arith.constant 18 : index
      %352 = memref.load %arg2[%c2_159, %c18_160] : memref<8x32xf32, #tpu.memory_space<smem>>
      %353 = vector.broadcast %352 : f32 to vector<64x128xf32>
      %354 = arith.select %76, %353, %351 : vector<64x128xi1>, vector<64x128xf32>
      %c2_161 = arith.constant 2 : index
      %c19_162 = arith.constant 19 : index
      %355 = memref.load %arg2[%c2_161, %c19_162] : memref<8x32xf32, #tpu.memory_space<smem>>
      %356 = vector.broadcast %355 : f32 to vector<64x128xf32>
      %357 = arith.select %78, %356, %354 : vector<64x128xi1>, vector<64x128xf32>
      %c2_163 = arith.constant 2 : index
      %c20_164 = arith.constant 20 : index
      %358 = memref.load %arg2[%c2_163, %c20_164] : memref<8x32xf32, #tpu.memory_space<smem>>
      %359 = vector.broadcast %358 : f32 to vector<64x128xf32>
      %360 = arith.select %80, %359, %357 : vector<64x128xi1>, vector<64x128xf32>
      %c2_165 = arith.constant 2 : index
      %c21_166 = arith.constant 21 : index
      %361 = memref.load %arg2[%c2_165, %c21_166] : memref<8x32xf32, #tpu.memory_space<smem>>
      %362 = vector.broadcast %361 : f32 to vector<64x128xf32>
      %363 = arith.select %82, %362, %360 : vector<64x128xi1>, vector<64x128xf32>
      %c2_167 = arith.constant 2 : index
      %c22_168 = arith.constant 22 : index
      %364 = memref.load %arg2[%c2_167, %c22_168] : memref<8x32xf32, #tpu.memory_space<smem>>
      %365 = vector.broadcast %364 : f32 to vector<64x128xf32>
      %366 = arith.select %84, %365, %363 : vector<64x128xi1>, vector<64x128xf32>
      %c2_169 = arith.constant 2 : index
      %c23_170 = arith.constant 23 : index
      %367 = memref.load %arg2[%c2_169, %c23_170] : memref<8x32xf32, #tpu.memory_space<smem>>
      %368 = vector.broadcast %367 : f32 to vector<64x128xf32>
      %369 = arith.select %86, %368, %366 : vector<64x128xi1>, vector<64x128xf32>
      %c2_171 = arith.constant 2 : index
      %c24_172 = arith.constant 24 : index
      %370 = memref.load %arg2[%c2_171, %c24_172] : memref<8x32xf32, #tpu.memory_space<smem>>
      %371 = vector.broadcast %370 : f32 to vector<64x128xf32>
      %372 = arith.select %88, %371, %369 : vector<64x128xi1>, vector<64x128xf32>
      %c2_173 = arith.constant 2 : index
      %c25_174 = arith.constant 25 : index
      %373 = memref.load %arg2[%c2_173, %c25_174] : memref<8x32xf32, #tpu.memory_space<smem>>
      %374 = vector.broadcast %373 : f32 to vector<64x128xf32>
      %375 = arith.select %90, %374, %372 : vector<64x128xi1>, vector<64x128xf32>
      %c2_175 = arith.constant 2 : index
      %c26_176 = arith.constant 26 : index
      %376 = memref.load %arg2[%c2_175, %c26_176] : memref<8x32xf32, #tpu.memory_space<smem>>
      %377 = vector.broadcast %376 : f32 to vector<64x128xf32>
      %378 = arith.select %92, %377, %375 : vector<64x128xi1>, vector<64x128xf32>
      %c2_177 = arith.constant 2 : index
      %c27_178 = arith.constant 27 : index
      %379 = memref.load %arg2[%c2_177, %c27_178] : memref<8x32xf32, #tpu.memory_space<smem>>
      %380 = vector.broadcast %379 : f32 to vector<64x128xf32>
      %381 = arith.select %94, %380, %378 : vector<64x128xi1>, vector<64x128xf32>
      %c2_179 = arith.constant 2 : index
      %c28_180 = arith.constant 28 : index
      %382 = memref.load %arg2[%c2_179, %c28_180] : memref<8x32xf32, #tpu.memory_space<smem>>
      %383 = vector.broadcast %382 : f32 to vector<64x128xf32>
      %384 = arith.select %96, %383, %381 : vector<64x128xi1>, vector<64x128xf32>
      %c2_181 = arith.constant 2 : index
      %c29_182 = arith.constant 29 : index
      %385 = memref.load %arg2[%c2_181, %c29_182] : memref<8x32xf32, #tpu.memory_space<smem>>
      %386 = vector.broadcast %385 : f32 to vector<64x128xf32>
      %387 = arith.select %98, %386, %384 : vector<64x128xi1>, vector<64x128xf32>
      %c2_183 = arith.constant 2 : index
      %c30_184 = arith.constant 30 : index
      %388 = memref.load %arg2[%c2_183, %c30_184] : memref<8x32xf32, #tpu.memory_space<smem>>
      %389 = vector.broadcast %388 : f32 to vector<64x128xf32>
      %390 = arith.select %100, %389, %387 : vector<64x128xi1>, vector<64x128xf32>
      %c2_185 = arith.constant 2 : index
      %c31_186 = arith.constant 31 : index
      %391 = memref.load %arg2[%c2_185, %c31_186] : memref<8x32xf32, #tpu.memory_space<smem>>
      %392 = vector.broadcast %391 : f32 to vector<64x128xf32>
      %393 = arith.select %102, %392, %390 : vector<64x128xi1>, vector<64x128xf32>
      %c2_187 = arith.constant 2 : index
      %c0_188 = arith.constant 0 : index
      %c0_189 = arith.constant 0 : index
      %394 = vector.load %arg5[%c2_187, %c0_188, %c0_189] : memref<8x64x128xf32, #tpu.memory_space<vmem>>, vector<1x64x128xf32>
      %395 = vector.shape_cast %394 : vector<1x64x128xf32> to vector<64x128xf32>
      %396 = vector.shape_cast %393 : vector<64x128xf32> to vector<1x64x128xf32>
      tpu.vector_store %arg5[%c2_187, %c0_188, %c0_189], %396 {strides = array<i32>} : memref<8x64x128xf32, #tpu.memory_space<vmem>>, vector<1x64x128xf32>,
      %c3_190 = arith.constant 3 : index
      %c0_191 = arith.constant 0 : index
      %397 = memref.load %arg2[%c3_190, %c0_191] : memref<8x32xf32, #tpu.memory_space<smem>>
      %398 = vector.broadcast %397 : f32 to vector<64x128xf32>
      %c3_192 = arith.constant 3 : index
      %c1_193 = arith.constant 1 : index
      %399 = memref.load %arg2[%c3_192, %c1_193] : memref<8x32xf32, #tpu.memory_space<smem>>
      %400 = vector.broadcast %399 : f32 to vector<64x128xf32>
      %401 = arith.select %42, %400, %398 : vector<64x128xi1>, vector<64x128xf32>
      %c3_194 = arith.constant 3 : index
      %c2_195 = arith.constant 2 : index
      %402 = memref.load %arg2[%c3_194, %c2_195] : memref<8x32xf32, #tpu.memory_space<smem>>
      %403 = vector.broadcast %402 : f32 to vector<64x128xf32>
      %404 = arith.select %44, %403, %401 : vector<64x128xi1>, vector<64x128xf32>
      %c3_196 = arith.constant 3 : index
      %c3_197 = arith.constant 3 : index
      %405 = memref.load %arg2[%c3_196, %c3_197] : memref<8x32xf32, #tpu.memory_space<smem>>
      %406 = vector.broadcast %405 : f32 to vector<64x128xf32>
      %407 = arith.select %46, %406, %404 : vector<64x128xi1>, vector<64x128xf32>
      %c3_198 = arith.constant 3 : index
      %c4_199 = arith.constant 4 : index
      %408 = memref.load %arg2[%c3_198, %c4_199] : memref<8x32xf32, #tpu.memory_space<smem>>
      %409 = vector.broadcast %408 : f32 to vector<64x128xf32>
      %410 = arith.select %48, %409, %407 : vector<64x128xi1>, vector<64x128xf32>
      %c3_200 = arith.constant 3 : index
      %c5_201 = arith.constant 5 : index
      %411 = memref.load %arg2[%c3_200, %c5_201] : memref<8x32xf32, #tpu.memory_space<smem>>
      %412 = vector.broadcast %411 : f32 to vector<64x128xf32>
      %413 = arith.select %50, %412, %410 : vector<64x128xi1>, vector<64x128xf32>
      %c3_202 = arith.constant 3 : index
      %c6_203 = arith.constant 6 : index
      %414 = memref.load %arg2[%c3_202, %c6_203] : memref<8x32xf32, #tpu.memory_space<smem>>
      %415 = vector.broadcast %414 : f32 to vector<64x128xf32>
      %416 = arith.select %52, %415, %413 : vector<64x128xi1>, vector<64x128xf32>
      %c3_204 = arith.constant 3 : index
      %c7_205 = arith.constant 7 : index
      %417 = memref.load %arg2[%c3_204, %c7_205] : memref<8x32xf32, #tpu.memory_space<smem>>
      %418 = vector.broadcast %417 : f32 to vector<64x128xf32>
      %419 = arith.select %54, %418, %416 : vector<64x128xi1>, vector<64x128xf32>
      %c3_206 = arith.constant 3 : index
      %c8_207 = arith.constant 8 : index
      %420 = memref.load %arg2[%c3_206, %c8_207] : memref<8x32xf32, #tpu.memory_space<smem>>
      %421 = vector.broadcast %420 : f32 to vector<64x128xf32>
      %422 = arith.select %56, %421, %419 : vector<64x128xi1>, vector<64x128xf32>
      %c3_208 = arith.constant 3 : index
      %c9_209 = arith.constant 9 : index
      %423 = memref.load %arg2[%c3_208, %c9_209] : memref<8x32xf32, #tpu.memory_space<smem>>
      %424 = vector.broadcast %423 : f32 to vector<64x128xf32>
      %425 = arith.select %58, %424, %422 : vector<64x128xi1>, vector<64x128xf32>
      %c3_210 = arith.constant 3 : index
      %c10_211 = arith.constant 10 : index
      %426 = memref.load %arg2[%c3_210, %c10_211] : memref<8x32xf32, #tpu.memory_space<smem>>
      %427 = vector.broadcast %426 : f32 to vector<64x128xf32>
      %428 = arith.select %60, %427, %425 : vector<64x128xi1>, vector<64x128xf32>
      %c3_212 = arith.constant 3 : index
      %c11_213 = arith.constant 11 : index
      %429 = memref.load %arg2[%c3_212, %c11_213] : memref<8x32xf32, #tpu.memory_space<smem>>
      %430 = vector.broadcast %429 : f32 to vector<64x128xf32>
      %431 = arith.select %62, %430, %428 : vector<64x128xi1>, vector<64x128xf32>
      %c3_214 = arith.constant 3 : index
      %c12_215 = arith.constant 12 : index
      %432 = memref.load %arg2[%c3_214, %c12_215] : memref<8x32xf32, #tpu.memory_space<smem>>
      %433 = vector.broadcast %432 : f32 to vector<64x128xf32>
      %434 = arith.select %64, %433, %431 : vector<64x128xi1>, vector<64x128xf32>
      %c3_216 = arith.constant 3 : index
      %c13_217 = arith.constant 13 : index
      %435 = memref.load %arg2[%c3_216, %c13_217] : memref<8x32xf32, #tpu.memory_space<smem>>
      %436 = vector.broadcast %435 : f32 to vector<64x128xf32>
      %437 = arith.select %66, %436, %434 : vector<64x128xi1>, vector<64x128xf32>
      %c3_218 = arith.constant 3 : index
      %c14_219 = arith.constant 14 : index
      %438 = memref.load %arg2[%c3_218, %c14_219] : memref<8x32xf32, #tpu.memory_space<smem>>
      %439 = vector.broadcast %438 : f32 to vector<64x128xf32>
      %440 = arith.select %68, %439, %437 : vector<64x128xi1>, vector<64x128xf32>
      %c3_220 = arith.constant 3 : index
      %c15_221 = arith.constant 15 : index
      %441 = memref.load %arg2[%c3_220, %c15_221] : memref<8x32xf32, #tpu.memory_space<smem>>
      %442 = vector.broadcast %441 : f32 to vector<64x128xf32>
      %443 = arith.select %70, %442, %440 : vector<64x128xi1>, vector<64x128xf32>
      %c3_222 = arith.constant 3 : index
      %c16_223 = arith.constant 16 : index
      %444 = memref.load %arg2[%c3_222, %c16_223] : memref<8x32xf32, #tpu.memory_space<smem>>
      %445 = vector.broadcast %444 : f32 to vector<64x128xf32>
      %446 = arith.select %72, %445, %443 : vector<64x128xi1>, vector<64x128xf32>
      %c3_224 = arith.constant 3 : index
      %c17_225 = arith.constant 17 : index
      %447 = memref.load %arg2[%c3_224, %c17_225] : memref<8x32xf32, #tpu.memory_space<smem>>
      %448 = vector.broadcast %447 : f32 to vector<64x128xf32>
      %449 = arith.select %74, %448, %446 : vector<64x128xi1>, vector<64x128xf32>
      %c3_226 = arith.constant 3 : index
      %c18_227 = arith.constant 18 : index
      %450 = memref.load %arg2[%c3_226, %c18_227] : memref<8x32xf32, #tpu.memory_space<smem>>
      %451 = vector.broadcast %450 : f32 to vector<64x128xf32>
      %452 = arith.select %76, %451, %449 : vector<64x128xi1>, vector<64x128xf32>
      %c3_228 = arith.constant 3 : index
      %c19_229 = arith.constant 19 : index
      %453 = memref.load %arg2[%c3_228, %c19_229] : memref<8x32xf32, #tpu.memory_space<smem>>
      %454 = vector.broadcast %453 : f32 to vector<64x128xf32>
      %455 = arith.select %78, %454, %452 : vector<64x128xi1>, vector<64x128xf32>
      %c3_230 = arith.constant 3 : index
      %c20_231 = arith.constant 20 : index
      %456 = memref.load %arg2[%c3_230, %c20_231] : memref<8x32xf32, #tpu.memory_space<smem>>
      %457 = vector.broadcast %456 : f32 to vector<64x128xf32>
      %458 = arith.select %80, %457, %455 : vector<64x128xi1>, vector<64x128xf32>
      %c3_232 = arith.constant 3 : index
      %c21_233 = arith.constant 21 : index
      %459 = memref.load %arg2[%c3_232, %c21_233] : memref<8x32xf32, #tpu.memory_space<smem>>
      %460 = vector.broadcast %459 : f32 to vector<64x128xf32>
      %461 = arith.select %82, %460, %458 : vector<64x128xi1>, vector<64x128xf32>
      %c3_234 = arith.constant 3 : index
      %c22_235 = arith.constant 22 : index
      %462 = memref.load %arg2[%c3_234, %c22_235] : memref<8x32xf32, #tpu.memory_space<smem>>
      %463 = vector.broadcast %462 : f32 to vector<64x128xf32>
      %464 = arith.select %84, %463, %461 : vector<64x128xi1>, vector<64x128xf32>
      %c3_236 = arith.constant 3 : index
      %c23_237 = arith.constant 23 : index
      %465 = memref.load %arg2[%c3_236, %c23_237] : memref<8x32xf32, #tpu.memory_space<smem>>
      %466 = vector.broadcast %465 : f32 to vector<64x128xf32>
      %467 = arith.select %86, %466, %464 : vector<64x128xi1>, vector<64x128xf32>
      %c3_238 = arith.constant 3 : index
      %c24_239 = arith.constant 24 : index
      %468 = memref.load %arg2[%c3_238, %c24_239] : memref<8x32xf32, #tpu.memory_space<smem>>
      %469 = vector.broadcast %468 : f32 to vector<64x128xf32>
      %470 = arith.select %88, %469, %467 : vector<64x128xi1>, vector<64x128xf32>
      %c3_240 = arith.constant 3 : index
      %c25_241 = arith.constant 25 : index
      %471 = memref.load %arg2[%c3_240, %c25_241] : memref<8x32xf32, #tpu.memory_space<smem>>
      %472 = vector.broadcast %471 : f32 to vector<64x128xf32>
      %473 = arith.select %90, %472, %470 : vector<64x128xi1>, vector<64x128xf32>
      %c3_242 = arith.constant 3 : index
      %c26_243 = arith.constant 26 : index
      %474 = memref.load %arg2[%c3_242, %c26_243] : memref<8x32xf32, #tpu.memory_space<smem>>
      %475 = vector.broadcast %474 : f32 to vector<64x128xf32>
      %476 = arith.select %92, %475, %473 : vector<64x128xi1>, vector<64x128xf32>
      %c3_244 = arith.constant 3 : index
      %c27_245 = arith.constant 27 : index
      %477 = memref.load %arg2[%c3_244, %c27_245] : memref<8x32xf32, #tpu.memory_space<smem>>
      %478 = vector.broadcast %477 : f32 to vector<64x128xf32>
      %479 = arith.select %94, %478, %476 : vector<64x128xi1>, vector<64x128xf32>
      %c3_246 = arith.constant 3 : index
      %c28_247 = arith.constant 28 : index
      %480 = memref.load %arg2[%c3_246, %c28_247] : memref<8x32xf32, #tpu.memory_space<smem>>
      %481 = vector.broadcast %480 : f32 to vector<64x128xf32>
      %482 = arith.select %96, %481, %479 : vector<64x128xi1>, vector<64x128xf32>
      %c3_248 = arith.constant 3 : index
      %c29_249 = arith.constant 29 : index
      %483 = memref.load %arg2[%c3_248, %c29_249] : memref<8x32xf32, #tpu.memory_space<smem>>
      %484 = vector.broadcast %483 : f32 to vector<64x128xf32>
      %485 = arith.select %98, %484, %482 : vector<64x128xi1>, vector<64x128xf32>
      %c3_250 = arith.constant 3 : index
      %c30_251 = arith.constant 30 : index
      %486 = memref.load %arg2[%c3_250, %c30_251] : memref<8x32xf32, #tpu.memory_space<smem>>
      %487 = vector.broadcast %486 : f32 to vector<64x128xf32>
      %488 = arith.select %100, %487, %485 : vector<64x128xi1>, vector<64x128xf32>
      %c3_252 = arith.constant 3 : index
      %c31_253 = arith.constant 31 : index
      %489 = memref.load %arg2[%c3_252, %c31_253] : memref<8x32xf32, #tpu.memory_space<smem>>
      %490 = vector.broadcast %489 : f32 to vector<64x128xf32>
      %491 = arith.select %102, %490, %488 : vector<64x128xi1>, vector<64x128xf32>
      %c3_254 = arith.constant 3 : index
      %c0_255 = arith.constant 0 : index
      %c0_256 = arith.constant 0 : index
      %492 = vector.load %arg5[%c3_254, %c0_255, %c0_256] : memref<8x64x128xf32, #tpu.memory_space<vmem>>, vector<1x64x128xf32>
      %493 = vector.shape_cast %492 : vector<1x64x128xf32> to vector<64x128xf32>
      %494 = vector.shape_cast %491 : vector<64x128xf32> to vector<1x64x128xf32>
      tpu.vector_store %arg5[%c3_254, %c0_255, %c0_256], %494 {strides = array<i32>} : memref<8x64x128xf32, #tpu.memory_space<vmem>>, vector<1x64x128xf32>,
      %c4_257 = arith.constant 4 : index
      %c0_258 = arith.constant 0 : index
      %495 = memref.load %arg2[%c4_257, %c0_258] : memref<8x32xf32, #tpu.memory_space<smem>>
      %496 = vector.broadcast %495 : f32 to vector<64x128xf32>
      %c4_259 = arith.constant 4 : index
      %c1_260 = arith.constant 1 : index
      %497 = memref.load %arg2[%c4_259, %c1_260] : memref<8x32xf32, #tpu.memory_space<smem>>
      %498 = vector.broadcast %497 : f32 to vector<64x128xf32>
      %499 = arith.select %42, %498, %496 : vector<64x128xi1>, vector<64x128xf32>
      %c4_261 = arith.constant 4 : index
      %c2_262 = arith.constant 2 : index
      %500 = memref.load %arg2[%c4_261, %c2_262] : memref<8x32xf32, #tpu.memory_space<smem>>
      %501 = vector.broadcast %500 : f32 to vector<64x128xf32>
      %502 = arith.select %44, %501, %499 : vector<64x128xi1>, vector<64x128xf32>
      %c4_263 = arith.constant 4 : index
      %c3_264 = arith.constant 3 : index
      %503 = memref.load %arg2[%c4_263, %c3_264] : memref<8x32xf32, #tpu.memory_space<smem>>
      %504 = vector.broadcast %503 : f32 to vector<64x128xf32>
      %505 = arith.select %46, %504, %502 : vector<64x128xi1>, vector<64x128xf32>
      %c4_265 = arith.constant 4 : index
      %c4_266 = arith.constant 4 : index
      %506 = memref.load %arg2[%c4_265, %c4_266] : memref<8x32xf32, #tpu.memory_space<smem>>
      %507 = vector.broadcast %506 : f32 to vector<64x128xf32>
      %508 = arith.select %48, %507, %505 : vector<64x128xi1>, vector<64x128xf32>
      %c4_267 = arith.constant 4 : index
      %c5_268 = arith.constant 5 : index
      %509 = memref.load %arg2[%c4_267, %c5_268] : memref<8x32xf32, #tpu.memory_space<smem>>
      %510 = vector.broadcast %509 : f32 to vector<64x128xf32>
      %511 = arith.select %50, %510, %508 : vector<64x128xi1>, vector<64x128xf32>
      %c4_269 = arith.constant 4 : index
      %c6_270 = arith.constant 6 : index
      %512 = memref.load %arg2[%c4_269, %c6_270] : memref<8x32xf32, #tpu.memory_space<smem>>
      %513 = vector.broadcast %512 : f32 to vector<64x128xf32>
      %514 = arith.select %52, %513, %511 : vector<64x128xi1>, vector<64x128xf32>
      %c4_271 = arith.constant 4 : index
      %c7_272 = arith.constant 7 : index
      %515 = memref.load %arg2[%c4_271, %c7_272] : memref<8x32xf32, #tpu.memory_space<smem>>
      %516 = vector.broadcast %515 : f32 to vector<64x128xf32>
      %517 = arith.select %54, %516, %514 : vector<64x128xi1>, vector<64x128xf32>
      %c4_273 = arith.constant 4 : index
      %c8_274 = arith.constant 8 : index
      %518 = memref.load %arg2[%c4_273, %c8_274] : memref<8x32xf32, #tpu.memory_space<smem>>
      %519 = vector.broadcast %518 : f32 to vector<64x128xf32>
      %520 = arith.select %56, %519, %517 : vector<64x128xi1>, vector<64x128xf32>
      %c4_275 = arith.constant 4 : index
      %c9_276 = arith.constant 9 : index
      %521 = memref.load %arg2[%c4_275, %c9_276] : memref<8x32xf32, #tpu.memory_space<smem>>
      %522 = vector.broadcast %521 : f32 to vector<64x128xf32>
      %523 = arith.select %58, %522, %520 : vector<64x128xi1>, vector<64x128xf32>
      %c4_277 = arith.constant 4 : index
      %c10_278 = arith.constant 10 : index
      %524 = memref.load %arg2[%c4_277, %c10_278] : memref<8x32xf32, #tpu.memory_space<smem>>
      %525 = vector.broadcast %524 : f32 to vector<64x128xf32>
      %526 = arith.select %60, %525, %523 : vector<64x128xi1>, vector<64x128xf32>
      %c4_279 = arith.constant 4 : index
      %c11_280 = arith.constant 11 : index
      %527 = memref.load %arg2[%c4_279, %c11_280] : memref<8x32xf32, #tpu.memory_space<smem>>
      %528 = vector.broadcast %527 : f32 to vector<64x128xf32>
      %529 = arith.select %62, %528, %526 : vector<64x128xi1>, vector<64x128xf32>
      %c4_281 = arith.constant 4 : index
      %c12_282 = arith.constant 12 : index
      %530 = memref.load %arg2[%c4_281, %c12_282] : memref<8x32xf32, #tpu.memory_space<smem>>
      %531 = vector.broadcast %530 : f32 to vector<64x128xf32>
      %532 = arith.select %64, %531, %529 : vector<64x128xi1>, vector<64x128xf32>
      %c4_283 = arith.constant 4 : index
      %c13_284 = arith.constant 13 : index
      %533 = memref.load %arg2[%c4_283, %c13_284] : memref<8x32xf32, #tpu.memory_space<smem>>
      %534 = vector.broadcast %533 : f32 to vector<64x128xf32>
      %535 = arith.select %66, %534, %532 : vector<64x128xi1>, vector<64x128xf32>
      %c4_285 = arith.constant 4 : index
      %c14_286 = arith.constant 14 : index
      %536 = memref.load %arg2[%c4_285, %c14_286] : memref<8x32xf32, #tpu.memory_space<smem>>
      %537 = vector.broadcast %536 : f32 to vector<64x128xf32>
      %538 = arith.select %68, %537, %535 : vector<64x128xi1>, vector<64x128xf32>
      %c4_287 = arith.constant 4 : index
      %c15_288 = arith.constant 15 : index
      %539 = memref.load %arg2[%c4_287, %c15_288] : memref<8x32xf32, #tpu.memory_space<smem>>
      %540 = vector.broadcast %539 : f32 to vector<64x128xf32>
      %541 = arith.select %70, %540, %538 : vector<64x128xi1>, vector<64x128xf32>
      %c4_289 = arith.constant 4 : index
      %c16_290 = arith.constant 16 : index
      %542 = memref.load %arg2[%c4_289, %c16_290] : memref<8x32xf32, #tpu.memory_space<smem>>
      %543 = vector.broadcast %542 : f32 to vector<64x128xf32>
      %544 = arith.select %72, %543, %541 : vector<64x128xi1>, vector<64x128xf32>
      %c4_291 = arith.constant 4 : index
      %c17_292 = arith.constant 17 : index
      %545 = memref.load %arg2[%c4_291, %c17_292] : memref<8x32xf32, #tpu.memory_space<smem>>
      %546 = vector.broadcast %545 : f32 to vector<64x128xf32>
      %547 = arith.select %74, %546, %544 : vector<64x128xi1>, vector<64x128xf32>
      %c4_293 = arith.constant 4 : index
      %c18_294 = arith.constant 18 : index
      %548 = memref.load %arg2[%c4_293, %c18_294] : memref<8x32xf32, #tpu.memory_space<smem>>
      %549 = vector.broadcast %548 : f32 to vector<64x128xf32>
      %550 = arith.select %76, %549, %547 : vector<64x128xi1>, vector<64x128xf32>
      %c4_295 = arith.constant 4 : index
      %c19_296 = arith.constant 19 : index
      %551 = memref.load %arg2[%c4_295, %c19_296] : memref<8x32xf32, #tpu.memory_space<smem>>
      %552 = vector.broadcast %551 : f32 to vector<64x128xf32>
      %553 = arith.select %78, %552, %550 : vector<64x128xi1>, vector<64x128xf32>
      %c4_297 = arith.constant 4 : index
      %c20_298 = arith.constant 20 : index
      %554 = memref.load %arg2[%c4_297, %c20_298] : memref<8x32xf32, #tpu.memory_space<smem>>
      %555 = vector.broadcast %554 : f32 to vector<64x128xf32>
      %556 = arith.select %80, %555, %553 : vector<64x128xi1>, vector<64x128xf32>
      %c4_299 = arith.constant 4 : index
      %c21_300 = arith.constant 21 : index
      %557 = memref.load %arg2[%c4_299, %c21_300] : memref<8x32xf32, #tpu.memory_space<smem>>
      %558 = vector.broadcast %557 : f32 to vector<64x128xf32>
      %559 = arith.select %82, %558, %556 : vector<64x128xi1>, vector<64x128xf32>
      %c4_301 = arith.constant 4 : index
      %c22_302 = arith.constant 22 : index
      %560 = memref.load %arg2[%c4_301, %c22_302] : memref<8x32xf32, #tpu.memory_space<smem>>
      %561 = vector.broadcast %560 : f32 to vector<64x128xf32>
      %562 = arith.select %84, %561, %559 : vector<64x128xi1>, vector<64x128xf32>
      %c4_303 = arith.constant 4 : index
      %c23_304 = arith.constant 23 : index
      %563 = memref.load %arg2[%c4_303, %c23_304] : memref<8x32xf32, #tpu.memory_space<smem>>
      %564 = vector.broadcast %563 : f32 to vector<64x128xf32>
      %565 = arith.select %86, %564, %562 : vector<64x128xi1>, vector<64x128xf32>
      %c4_305 = arith.constant 4 : index
      %c24_306 = arith.constant 24 : index
      %566 = memref.load %arg2[%c4_305, %c24_306] : memref<8x32xf32, #tpu.memory_space<smem>>
      %567 = vector.broadcast %566 : f32 to vector<64x128xf32>
      %568 = arith.select %88, %567, %565 : vector<64x128xi1>, vector<64x128xf32>
      %c4_307 = arith.constant 4 : index
      %c25_308 = arith.constant 25 : index
      %569 = memref.load %arg2[%c4_307, %c25_308] : memref<8x32xf32, #tpu.memory_space<smem>>
      %570 = vector.broadcast %569 : f32 to vector<64x128xf32>
      %571 = arith.select %90, %570, %568 : vector<64x128xi1>, vector<64x128xf32>
      %c4_309 = arith.constant 4 : index
      %c26_310 = arith.constant 26 : index
      %572 = memref.load %arg2[%c4_309, %c26_310] : memref<8x32xf32, #tpu.memory_space<smem>>
      %573 = vector.broadcast %572 : f32 to vector<64x128xf32>
      %574 = arith.select %92, %573, %571 : vector<64x128xi1>, vector<64x128xf32>
      %c4_311 = arith.constant 4 : index
      %c27_312 = arith.constant 27 : index
      %575 = memref.load %arg2[%c4_311, %c27_312] : memref<8x32xf32, #tpu.memory_space<smem>>
      %576 = vector.broadcast %575 : f32 to vector<64x128xf32>
      %577 = arith.select %94, %576, %574 : vector<64x128xi1>, vector<64x128xf32>
      %c4_313 = arith.constant 4 : index
      %c28_314 = arith.constant 28 : index
      %578 = memref.load %arg2[%c4_313, %c28_314] : memref<8x32xf32, #tpu.memory_space<smem>>
      %579 = vector.broadcast %578 : f32 to vector<64x128xf32>
      %580 = arith.select %96, %579, %577 : vector<64x128xi1>, vector<64x128xf32>
      %c4_315 = arith.constant 4 : index
      %c29_316 = arith.constant 29 : index
      %581 = memref.load %arg2[%c4_315, %c29_316] : memref<8x32xf32, #tpu.memory_space<smem>>
      %582 = vector.broadcast %581 : f32 to vector<64x128xf32>
      %583 = arith.select %98, %582, %580 : vector<64x128xi1>, vector<64x128xf32>
      %c4_317 = arith.constant 4 : index
      %c30_318 = arith.constant 30 : index
      %584 = memref.load %arg2[%c4_317, %c30_318] : memref<8x32xf32, #tpu.memory_space<smem>>
      %585 = vector.broadcast %584 : f32 to vector<64x128xf32>
      %586 = arith.select %100, %585, %583 : vector<64x128xi1>, vector<64x128xf32>
      %c4_319 = arith.constant 4 : index
      %c31_320 = arith.constant 31 : index
      %587 = memref.load %arg2[%c4_319, %c31_320] : memref<8x32xf32, #tpu.memory_space<smem>>
      %588 = vector.broadcast %587 : f32 to vector<64x128xf32>
      %589 = arith.select %102, %588, %586 : vector<64x128xi1>, vector<64x128xf32>
      %c4_321 = arith.constant 4 : index
      %c0_322 = arith.constant 0 : index
      %c0_323 = arith.constant 0 : index
      %590 = vector.load %arg5[%c4_321, %c0_322, %c0_323] : memref<8x64x128xf32, #tpu.memory_space<vmem>>, vector<1x64x128xf32>
      %591 = vector.shape_cast %590 : vector<1x64x128xf32> to vector<64x128xf32>
      %592 = vector.shape_cast %589 : vector<64x128xf32> to vector<1x64x128xf32>
      tpu.vector_store %arg5[%c4_321, %c0_322, %c0_323], %592 {strides = array<i32>} : memref<8x64x128xf32, #tpu.memory_space<vmem>>, vector<1x64x128xf32>,
      %c5_324 = arith.constant 5 : index
      %c0_325 = arith.constant 0 : index
      %593 = memref.load %arg2[%c5_324, %c0_325] : memref<8x32xf32, #tpu.memory_space<smem>>
      %594 = vector.broadcast %593 : f32 to vector<64x128xf32>
      %c5_326 = arith.constant 5 : index
      %c1_327 = arith.constant 1 : index
      %595 = memref.load %arg2[%c5_326, %c1_327] : memref<8x32xf32, #tpu.memory_space<smem>>
      %596 = vector.broadcast %595 : f32 to vector<64x128xf32>
      %597 = arith.select %42, %596, %594 : vector<64x128xi1>, vector<64x128xf32>
      %c5_328 = arith.constant 5 : index
      %c2_329 = arith.constant 2 : index
      %598 = memref.load %arg2[%c5_328, %c2_329] : memref<8x32xf32, #tpu.memory_space<smem>>
      %599 = vector.broadcast %598 : f32 to vector<64x128xf32>
      %600 = arith.select %44, %599, %597 : vector<64x128xi1>, vector<64x128xf32>
      %c5_330 = arith.constant 5 : index
      %c3_331 = arith.constant 3 : index
      %601 = memref.load %arg2[%c5_330, %c3_331] : memref<8x32xf32, #tpu.memory_space<smem>>
      %602 = vector.broadcast %601 : f32 to vector<64x128xf32>
      %603 = arith.select %46, %602, %600 : vector<64x128xi1>, vector<64x128xf32>
      %c5_332 = arith.constant 5 : index
      %c4_333 = arith.constant 4 : index
      %604 = memref.load %arg2[%c5_332, %c4_333] : memref<8x32xf32, #tpu.memory_space<smem>>
      %605 = vector.broadcast %604 : f32 to vector<64x128xf32>
      %606 = arith.select %48, %605, %603 : vector<64x128xi1>, vector<64x128xf32>
      %c5_334 = arith.constant 5 : index
      %c5_335 = arith.constant 5 : index
      %607 = memref.load %arg2[%c5_334, %c5_335] : memref<8x32xf32, #tpu.memory_space<smem>>
      %608 = vector.broadcast %607 : f32 to vector<64x128xf32>
      %609 = arith.select %50, %608, %606 : vector<64x128xi1>, vector<64x128xf32>
      %c5_336 = arith.constant 5 : index
      %c6_337 = arith.constant 6 : index
      %610 = memref.load %arg2[%c5_336, %c6_337] : memref<8x32xf32, #tpu.memory_space<smem>>
      %611 = vector.broadcast %610 : f32 to vector<64x128xf32>
      %612 = arith.select %52, %611, %609 : vector<64x128xi1>, vector<64x128xf32>
      %c5_338 = arith.constant 5 : index
      %c7_339 = arith.constant 7 : index
      %613 = memref.load %arg2[%c5_338, %c7_339] : memref<8x32xf32, #tpu.memory_space<smem>>
      %614 = vector.broadcast %613 : f32 to vector<64x128xf32>
      %615 = arith.select %54, %614, %612 : vector<64x128xi1>, vector<64x128xf32>
      %c5_340 = arith.constant 5 : index
      %c8_341 = arith.constant 8 : index
      %616 = memref.load %arg2[%c5_340, %c8_341] : memref<8x32xf32, #tpu.memory_space<smem>>
      %617 = vector.broadcast %616 : f32 to vector<64x128xf32>
      %618 = arith.select %56, %617, %615 : vector<64x128xi1>, vector<64x128xf32>
      %c5_342 = arith.constant 5 : index
      %c9_343 = arith.constant 9 : index
      %619 = memref.load %arg2[%c5_342, %c9_343] : memref<8x32xf32, #tpu.memory_space<smem>>
      %620 = vector.broadcast %619 : f32 to vector<64x128xf32>
      %621 = arith.select %58, %620, %618 : vector<64x128xi1>, vector<64x128xf32>
      %c5_344 = arith.constant 5 : index
      %c10_345 = arith.constant 10 : index
      %622 = memref.load %arg2[%c5_344, %c10_345] : memref<8x32xf32, #tpu.memory_space<smem>>
      %623 = vector.broadcast %622 : f32 to vector<64x128xf32>
      %624 = arith.select %60, %623, %621 : vector<64x128xi1>, vector<64x128xf32>
      %c5_346 = arith.constant 5 : index
      %c11_347 = arith.constant 11 : index
      %625 = memref.load %arg2[%c5_346, %c11_347] : memref<8x32xf32, #tpu.memory_space<smem>>
      %626 = vector.broadcast %625 : f32 to vector<64x128xf32>
      %627 = arith.select %62, %626, %624 : vector<64x128xi1>, vector<64x128xf32>
      %c5_348 = arith.constant 5 : index
      %c12_349 = arith.constant 12 : index
      %628 = memref.load %arg2[%c5_348, %c12_349] : memref<8x32xf32, #tpu.memory_space<smem>>
      %629 = vector.broadcast %628 : f32 to vector<64x128xf32>
      %630 = arith.select %64, %629, %627 : vector<64x128xi1>, vector<64x128xf32>
      %c5_350 = arith.constant 5 : index
      %c13_351 = arith.constant 13 : index
      %631 = memref.load %arg2[%c5_350, %c13_351] : memref<8x32xf32, #tpu.memory_space<smem>>
      %632 = vector.broadcast %631 : f32 to vector<64x128xf32>
      %633 = arith.select %66, %632, %630 : vector<64x128xi1>, vector<64x128xf32>
      %c5_352 = arith.constant 5 : index
      %c14_353 = arith.constant 14 : index
      %634 = memref.load %arg2[%c5_352, %c14_353] : memref<8x32xf32, #tpu.memory_space<smem>>
      %635 = vector.broadcast %634 : f32 to vector<64x128xf32>
      %636 = arith.select %68, %635, %633 : vector<64x128xi1>, vector<64x128xf32>
      %c5_354 = arith.constant 5 : index
      %c15_355 = arith.constant 15 : index
      %637 = memref.load %arg2[%c5_354, %c15_355] : memref<8x32xf32, #tpu.memory_space<smem>>
      %638 = vector.broadcast %637 : f32 to vector<64x128xf32>
      %639 = arith.select %70, %638, %636 : vector<64x128xi1>, vector<64x128xf32>
      %c5_356 = arith.constant 5 : index
      %c16_357 = arith.constant 16 : index
      %640 = memref.load %arg2[%c5_356, %c16_357] : memref<8x32xf32, #tpu.memory_space<smem>>
      %641 = vector.broadcast %640 : f32 to vector<64x128xf32>
      %642 = arith.select %72, %641, %639 : vector<64x128xi1>, vector<64x128xf32>
      %c5_358 = arith.constant 5 : index
      %c17_359 = arith.constant 17 : index
      %643 = memref.load %arg2[%c5_358, %c17_359] : memref<8x32xf32, #tpu.memory_space<smem>>
      %644 = vector.broadcast %643 : f32 to vector<64x128xf32>
      %645 = arith.select %74, %644, %642 : vector<64x128xi1>, vector<64x128xf32>
      %c5_360 = arith.constant 5 : index
      %c18_361 = arith.constant 18 : index
      %646 = memref.load %arg2[%c5_360, %c18_361] : memref<8x32xf32, #tpu.memory_space<smem>>
      %647 = vector.broadcast %646 : f32 to vector<64x128xf32>
      %648 = arith.select %76, %647, %645 : vector<64x128xi1>, vector<64x128xf32>
      %c5_362 = arith.constant 5 : index
      %c19_363 = arith.constant 19 : index
      %649 = memref.load %arg2[%c5_362, %c19_363] : memref<8x32xf32, #tpu.memory_space<smem>>
      %650 = vector.broadcast %649 : f32 to vector<64x128xf32>
      %651 = arith.select %78, %650, %648 : vector<64x128xi1>, vector<64x128xf32>
      %c5_364 = arith.constant 5 : index
      %c20_365 = arith.constant 20 : index
      %652 = memref.load %arg2[%c5_364, %c20_365] : memref<8x32xf32, #tpu.memory_space<smem>>
      %653 = vector.broadcast %652 : f32 to vector<64x128xf32>
      %654 = arith.select %80, %653, %651 : vector<64x128xi1>, vector<64x128xf32>
      %c5_366 = arith.constant 5 : index
      %c21_367 = arith.constant 21 : index
      %655 = memref.load %arg2[%c5_366, %c21_367] : memref<8x32xf32, #tpu.memory_space<smem>>
      %656 = vector.broadcast %655 : f32 to vector<64x128xf32>
      %657 = arith.select %82, %656, %654 : vector<64x128xi1>, vector<64x128xf32>
      %c5_368 = arith.constant 5 : index
      %c22_369 = arith.constant 22 : index
      %658 = memref.load %arg2[%c5_368, %c22_369] : memref<8x32xf32, #tpu.memory_space<smem>>
      %659 = vector.broadcast %658 : f32 to vector<64x128xf32>
      %660 = arith.select %84, %659, %657 : vector<64x128xi1>, vector<64x128xf32>
      %c5_370 = arith.constant 5 : index
      %c23_371 = arith.constant 23 : index
      %661 = memref.load %arg2[%c5_370, %c23_371] : memref<8x32xf32, #tpu.memory_space<smem>>
      %662 = vector.broadcast %661 : f32 to vector<64x128xf32>
      %663 = arith.select %86, %662, %660 : vector<64x128xi1>, vector<64x128xf32>
      %c5_372 = arith.constant 5 : index
      %c24_373 = arith.constant 24 : index
      %664 = memref.load %arg2[%c5_372, %c24_373] : memref<8x32xf32, #tpu.memory_space<smem>>
      %665 = vector.broadcast %664 : f32 to vector<64x128xf32>
      %666 = arith.select %88, %665, %663 : vector<64x128xi1>, vector<64x128xf32>
      %c5_374 = arith.constant 5 : index
      %c25_375 = arith.constant 25 : index
      %667 = memref.load %arg2[%c5_374, %c25_375] : memref<8x32xf32, #tpu.memory_space<smem>>
      %668 = vector.broadcast %667 : f32 to vector<64x128xf32>
      %669 = arith.select %90, %668, %666 : vector<64x128xi1>, vector<64x128xf32>
      %c5_376 = arith.constant 5 : index
      %c26_377 = arith.constant 26 : index
      %670 = memref.load %arg2[%c5_376, %c26_377] : memref<8x32xf32, #tpu.memory_space<smem>>
      %671 = vector.broadcast %670 : f32 to vector<64x128xf32>
      %672 = arith.select %92, %671, %669 : vector<64x128xi1>, vector<64x128xf32>
      %c5_378 = arith.constant 5 : index
      %c27_379 = arith.constant 27 : index
      %673 = memref.load %arg2[%c5_378, %c27_379] : memref<8x32xf32, #tpu.memory_space<smem>>
      %674 = vector.broadcast %673 : f32 to vector<64x128xf32>
      %675 = arith.select %94, %674, %672 : vector<64x128xi1>, vector<64x128xf32>
      %c5_380 = arith.constant 5 : index
      %c28_381 = arith.constant 28 : index
      %676 = memref.load %arg2[%c5_380, %c28_381] : memref<8x32xf32, #tpu.memory_space<smem>>
      %677 = vector.broadcast %676 : f32 to vector<64x128xf32>
      %678 = arith.select %96, %677, %675 : vector<64x128xi1>, vector<64x128xf32>
      %c5_382 = arith.constant 5 : index
      %c29_383 = arith.constant 29 : index
      %679 = memref.load %arg2[%c5_382, %c29_383] : memref<8x32xf32, #tpu.memory_space<smem>>
      %680 = vector.broadcast %679 : f32 to vector<64x128xf32>
      %681 = arith.select %98, %680, %678 : vector<64x128xi1>, vector<64x128xf32>
      %c5_384 = arith.constant 5 : index
      %c30_385 = arith.constant 30 : index
      %682 = memref.load %arg2[%c5_384, %c30_385] : memref<8x32xf32, #tpu.memory_space<smem>>
      %683 = vector.broadcast %682 : f32 to vector<64x128xf32>
      %684 = arith.select %100, %683, %681 : vector<64x128xi1>, vector<64x128xf32>
      %c5_386 = arith.constant 5 : index
      %c31_387 = arith.constant 31 : index
      %685 = memref.load %arg2[%c5_386, %c31_387] : memref<8x32xf32, #tpu.memory_space<smem>>
      %686 = vector.broadcast %685 : f32 to vector<64x128xf32>
      %687 = arith.select %102, %686, %684 : vector<64x128xi1>, vector<64x128xf32>
      %c5_388 = arith.constant 5 : index
      %c0_389 = arith.constant 0 : index
      %c0_390 = arith.constant 0 : index
      %688 = vector.load %arg5[%c5_388, %c0_389, %c0_390] : memref<8x64x128xf32, #tpu.memory_space<vmem>>, vector<1x64x128xf32>
      %689 = vector.shape_cast %688 : vector<1x64x128xf32> to vector<64x128xf32>
      %690 = vector.shape_cast %687 : vector<64x128xf32> to vector<1x64x128xf32>
      tpu.vector_store %arg5[%c5_388, %c0_389, %c0_390], %690 {strides = array<i32>} : memref<8x64x128xf32, #tpu.memory_space<vmem>>, vector<1x64x128xf32>,
      %c6_391 = arith.constant 6 : index
      %c0_392 = arith.constant 0 : index
      %691 = memref.load %arg2[%c6_391, %c0_392] : memref<8x32xf32, #tpu.memory_space<smem>>
      %692 = vector.broadcast %691 : f32 to vector<64x128xf32>
      %c6_393 = arith.constant 6 : index
      %c1_394 = arith.constant 1 : index
      %693 = memref.load %arg2[%c6_393, %c1_394] : memref<8x32xf32, #tpu.memory_space<smem>>
      %694 = vector.broadcast %693 : f32 to vector<64x128xf32>
      %695 = arith.select %42, %694, %692 : vector<64x128xi1>, vector<64x128xf32>
      %c6_395 = arith.constant 6 : index
      %c2_396 = arith.constant 2 : index
      %696 = memref.load %arg2[%c6_395, %c2_396] : memref<8x32xf32, #tpu.memory_space<smem>>
      %697 = vector.broadcast %696 : f32 to vector<64x128xf32>
      %698 = arith.select %44, %697, %695 : vector<64x128xi1>, vector<64x128xf32>
      %c6_397 = arith.constant 6 : index
      %c3_398 = arith.constant 3 : index
      %699 = memref.load %arg2[%c6_397, %c3_398] : memref<8x32xf32, #tpu.memory_space<smem>>
      %700 = vector.broadcast %699 : f32 to vector<64x128xf32>
      %701 = arith.select %46, %700, %698 : vector<64x128xi1>, vector<64x128xf32>
      %c6_399 = arith.constant 6 : index
      %c4_400 = arith.constant 4 : index
      %702 = memref.load %arg2[%c6_399, %c4_400] : memref<8x32xf32, #tpu.memory_space<smem>>
      %703 = vector.broadcast %702 : f32 to vector<64x128xf32>
      %704 = arith.select %48, %703, %701 : vector<64x128xi1>, vector<64x128xf32>
      %c6_401 = arith.constant 6 : index
      %c5_402 = arith.constant 5 : index
      %705 = memref.load %arg2[%c6_401, %c5_402] : memref<8x32xf32, #tpu.memory_space<smem>>
      %706 = vector.broadcast %705 : f32 to vector<64x128xf32>
      %707 = arith.select %50, %706, %704 : vector<64x128xi1>, vector<64x128xf32>
      %c6_403 = arith.constant 6 : index
      %c6_404 = arith.constant 6 : index
      %708 = memref.load %arg2[%c6_403, %c6_404] : memref<8x32xf32, #tpu.memory_space<smem>>
      %709 = vector.broadcast %708 : f32 to vector<64x128xf32>
      %710 = arith.select %52, %709, %707 : vector<64x128xi1>, vector<64x128xf32>
      %c6_405 = arith.constant 6 : index
      %c7_406 = arith.constant 7 : index
      %711 = memref.load %arg2[%c6_405, %c7_406] : memref<8x32xf32, #tpu.memory_space<smem>>
      %712 = vector.broadcast %711 : f32 to vector<64x128xf32>
      %713 = arith.select %54, %712, %710 : vector<64x128xi1>, vector<64x128xf32>
      %c6_407 = arith.constant 6 : index
      %c8_408 = arith.constant 8 : index
      %714 = memref.load %arg2[%c6_407, %c8_408] : memref<8x32xf32, #tpu.memory_space<smem>>
      %715 = vector.broadcast %714 : f32 to vector<64x128xf32>
      %716 = arith.select %56, %715, %713 : vector<64x128xi1>, vector<64x128xf32>
      %c6_409 = arith.constant 6 : index
      %c9_410 = arith.constant 9 : index
      %717 = memref.load %arg2[%c6_409, %c9_410] : memref<8x32xf32, #tpu.memory_space<smem>>
      %718 = vector.broadcast %717 : f32 to vector<64x128xf32>
      %719 = arith.select %58, %718, %716 : vector<64x128xi1>, vector<64x128xf32>
      %c6_411 = arith.constant 6 : index
      %c10_412 = arith.constant 10 : index
      %720 = memref.load %arg2[%c6_411, %c10_412] : memref<8x32xf32, #tpu.memory_space<smem>>
      %721 = vector.broadcast %720 : f32 to vector<64x128xf32>
      %722 = arith.select %60, %721, %719 : vector<64x128xi1>, vector<64x128xf32>
      %c6_413 = arith.constant 6 : index
      %c11_414 = arith.constant 11 : index
      %723 = memref.load %arg2[%c6_413, %c11_414] : memref<8x32xf32, #tpu.memory_space<smem>>
      %724 = vector.broadcast %723 : f32 to vector<64x128xf32>
      %725 = arith.select %62, %724, %722 : vector<64x128xi1>, vector<64x128xf32>
      %c6_415 = arith.constant 6 : index
      %c12_416 = arith.constant 12 : index
      %726 = memref.load %arg2[%c6_415, %c12_416] : memref<8x32xf32, #tpu.memory_space<smem>>
      %727 = vector.broadcast %726 : f32 to vector<64x128xf32>
      %728 = arith.select %64, %727, %725 : vector<64x128xi1>, vector<64x128xf32>
      %c6_417 = arith.constant 6 : index
      %c13_418 = arith.constant 13 : index
      %729 = memref.load %arg2[%c6_417, %c13_418] : memref<8x32xf32, #tpu.memory_space<smem>>
      %730 = vector.broadcast %729 : f32 to vector<64x128xf32>
      %731 = arith.select %66, %730, %728 : vector<64x128xi1>, vector<64x128xf32>
      %c6_419 = arith.constant 6 : index
      %c14_420 = arith.constant 14 : index
      %732 = memref.load %arg2[%c6_419, %c14_420] : memref<8x32xf32, #tpu.memory_space<smem>>
      %733 = vector.broadcast %732 : f32 to vector<64x128xf32>
      %734 = arith.select %68, %733, %731 : vector<64x128xi1>, vector<64x128xf32>
      %c6_421 = arith.constant 6 : index
      %c15_422 = arith.constant 15 : index
      %735 = memref.load %arg2[%c6_421, %c15_422] : memref<8x32xf32, #tpu.memory_space<smem>>
      %736 = vector.broadcast %735 : f32 to vector<64x128xf32>
      %737 = arith.select %70, %736, %734 : vector<64x128xi1>, vector<64x128xf32>
      %c6_423 = arith.constant 6 : index
      %c16_424 = arith.constant 16 : index
      %738 = memref.load %arg2[%c6_423, %c16_424] : memref<8x32xf32, #tpu.memory_space<smem>>
      %739 = vector.broadcast %738 : f32 to vector<64x128xf32>
      %740 = arith.select %72, %739, %737 : vector<64x128xi1>, vector<64x128xf32>
      %c6_425 = arith.constant 6 : index
      %c17_426 = arith.constant 17 : index
      %741 = memref.load %arg2[%c6_425, %c17_426] : memref<8x32xf32, #tpu.memory_space<smem>>
      %742 = vector.broadcast %741 : f32 to vector<64x128xf32>
      %743 = arith.select %74, %742, %740 : vector<64x128xi1>, vector<64x128xf32>
      %c6_427 = arith.constant 6 : index
      %c18_428 = arith.constant 18 : index
      %744 = memref.load %arg2[%c6_427, %c18_428] : memref<8x32xf32, #tpu.memory_space<smem>>
      %745 = vector.broadcast %744 : f32 to vector<64x128xf32>
      %746 = arith.select %76, %745, %743 : vector<64x128xi1>, vector<64x128xf32>
      %c6_429 = arith.constant 6 : index
      %c19_430 = arith.constant 19 : index
      %747 = memref.load %arg2[%c6_429, %c19_430] : memref<8x32xf32, #tpu.memory_space<smem>>
      %748 = vector.broadcast %747 : f32 to vector<64x128xf32>
      %749 = arith.select %78, %748, %746 : vector<64x128xi1>, vector<64x128xf32>
      %c6_431 = arith.constant 6 : index
      %c20_432 = arith.constant 20 : index
      %750 = memref.load %arg2[%c6_431, %c20_432] : memref<8x32xf32, #tpu.memory_space<smem>>
      %751 = vector.broadcast %750 : f32 to vector<64x128xf32>
      %752 = arith.select %80, %751, %749 : vector<64x128xi1>, vector<64x128xf32>
      %c6_433 = arith.constant 6 : index
      %c21_434 = arith.constant 21 : index
      %753 = memref.load %arg2[%c6_433, %c21_434] : memref<8x32xf32, #tpu.memory_space<smem>>
      %754 = vector.broadcast %753 : f32 to vector<64x128xf32>
      %755 = arith.select %82, %754, %752 : vector<64x128xi1>, vector<64x128xf32>
      %c6_435 = arith.constant 6 : index
      %c22_436 = arith.constant 22 : index
      %756 = memref.load %arg2[%c6_435, %c22_436] : memref<8x32xf32, #tpu.memory_space<smem>>
      %757 = vector.broadcast %756 : f32 to vector<64x128xf32>
      %758 = arith.select %84, %757, %755 : vector<64x128xi1>, vector<64x128xf32>
      %c6_437 = arith.constant 6 : index
      %c23_438 = arith.constant 23 : index
      %759 = memref.load %arg2[%c6_437, %c23_438] : memref<8x32xf32, #tpu.memory_space<smem>>
      %760 = vector.broadcast %759 : f32 to vector<64x128xf32>
      %761 = arith.select %86, %760, %758 : vector<64x128xi1>, vector<64x128xf32>
      %c6_439 = arith.constant 6 : index
      %c24_440 = arith.constant 24 : index
      %762 = memref.load %arg2[%c6_439, %c24_440] : memref<8x32xf32, #tpu.memory_space<smem>>
      %763 = vector.broadcast %762 : f32 to vector<64x128xf32>
      %764 = arith.select %88, %763, %761 : vector<64x128xi1>, vector<64x128xf32>
      %c6_441 = arith.constant 6 : index
      %c25_442 = arith.constant 25 : index
      %765 = memref.load %arg2[%c6_441, %c25_442] : memref<8x32xf32, #tpu.memory_space<smem>>
      %766 = vector.broadcast %765 : f32 to vector<64x128xf32>
      %767 = arith.select %90, %766, %764 : vector<64x128xi1>, vector<64x128xf32>
      %c6_443 = arith.constant 6 : index
      %c26_444 = arith.constant 26 : index
      %768 = memref.load %arg2[%c6_443, %c26_444] : memref<8x32xf32, #tpu.memory_space<smem>>
      %769 = vector.broadcast %768 : f32 to vector<64x128xf32>
      %770 = arith.select %92, %769, %767 : vector<64x128xi1>, vector<64x128xf32>
      %c6_445 = arith.constant 6 : index
      %c27_446 = arith.constant 27 : index
      %771 = memref.load %arg2[%c6_445, %c27_446] : memref<8x32xf32, #tpu.memory_space<smem>>
      %772 = vector.broadcast %771 : f32 to vector<64x128xf32>
      %773 = arith.select %94, %772, %770 : vector<64x128xi1>, vector<64x128xf32>
      %c6_447 = arith.constant 6 : index
      %c28_448 = arith.constant 28 : index
      %774 = memref.load %arg2[%c6_447, %c28_448] : memref<8x32xf32, #tpu.memory_space<smem>>
      %775 = vector.broadcast %774 : f32 to vector<64x128xf32>
      %776 = arith.select %96, %775, %773 : vector<64x128xi1>, vector<64x128xf32>
      %c6_449 = arith.constant 6 : index
      %c29_450 = arith.constant 29 : index
      %777 = memref.load %arg2[%c6_449, %c29_450] : memref<8x32xf32, #tpu.memory_space<smem>>
      %778 = vector.broadcast %777 : f32 to vector<64x128xf32>
      %779 = arith.select %98, %778, %776 : vector<64x128xi1>, vector<64x128xf32>
      %c6_451 = arith.constant 6 : index
      %c30_452 = arith.constant 30 : index
      %780 = memref.load %arg2[%c6_451, %c30_452] : memref<8x32xf32, #tpu.memory_space<smem>>
      %781 = vector.broadcast %780 : f32 to vector<64x128xf32>
      %782 = arith.select %100, %781, %779 : vector<64x128xi1>, vector<64x128xf32>
      %c6_453 = arith.constant 6 : index
      %c31_454 = arith.constant 31 : index
      %783 = memref.load %arg2[%c6_453, %c31_454] : memref<8x32xf32, #tpu.memory_space<smem>>
      %784 = vector.broadcast %783 : f32 to vector<64x128xf32>
      %785 = arith.select %102, %784, %782 : vector<64x128xi1>, vector<64x128xf32>
      %c6_455 = arith.constant 6 : index
      %c0_456 = arith.constant 0 : index
      %c0_457 = arith.constant 0 : index
      %786 = vector.load %arg5[%c6_455, %c0_456, %c0_457] : memref<8x64x128xf32, #tpu.memory_space<vmem>>, vector<1x64x128xf32>
      %787 = vector.shape_cast %786 : vector<1x64x128xf32> to vector<64x128xf32>
      %788 = vector.shape_cast %785 : vector<64x128xf32> to vector<1x64x128xf32>
      tpu.vector_store %arg5[%c6_455, %c0_456, %c0_457], %788 {strides = array<i32>} : memref<8x64x128xf32, #tpu.memory_space<vmem>>, vector<1x64x128xf32>,
      %c7_458 = arith.constant 7 : index
      %c0_459 = arith.constant 0 : index
      %789 = memref.load %arg2[%c7_458, %c0_459] : memref<8x32xf32, #tpu.memory_space<smem>>
      %790 = vector.broadcast %789 : f32 to vector<64x128xf32>
      %c7_460 = arith.constant 7 : index
      %c1_461 = arith.constant 1 : index
      %791 = memref.load %arg2[%c7_460, %c1_461] : memref<8x32xf32, #tpu.memory_space<smem>>
      %792 = vector.broadcast %791 : f32 to vector<64x128xf32>
      %793 = arith.select %42, %792, %790 : vector<64x128xi1>, vector<64x128xf32>
      %c7_462 = arith.constant 7 : index
      %c2_463 = arith.constant 2 : index
      %794 = memref.load %arg2[%c7_462, %c2_463] : memref<8x32xf32, #tpu.memory_space<smem>>
      %795 = vector.broadcast %794 : f32 to vector<64x128xf32>
      %796 = arith.select %44, %795, %793 : vector<64x128xi1>, vector<64x128xf32>
      %c7_464 = arith.constant 7 : index
      %c3_465 = arith.constant 3 : index
      %797 = memref.load %arg2[%c7_464, %c3_465] : memref<8x32xf32, #tpu.memory_space<smem>>
      %798 = vector.broadcast %797 : f32 to vector<64x128xf32>
      %799 = arith.select %46, %798, %796 : vector<64x128xi1>, vector<64x128xf32>
      %c7_466 = arith.constant 7 : index
      %c4_467 = arith.constant 4 : index
      %800 = memref.load %arg2[%c7_466, %c4_467] : memref<8x32xf32, #tpu.memory_space<smem>>
      %801 = vector.broadcast %800 : f32 to vector<64x128xf32>
      %802 = arith.select %48, %801, %799 : vector<64x128xi1>, vector<64x128xf32>
      %c7_468 = arith.constant 7 : index
      %c5_469 = arith.constant 5 : index
      %803 = memref.load %arg2[%c7_468, %c5_469] : memref<8x32xf32, #tpu.memory_space<smem>>
      %804 = vector.broadcast %803 : f32 to vector<64x128xf32>
      %805 = arith.select %50, %804, %802 : vector<64x128xi1>, vector<64x128xf32>
      %c7_470 = arith.constant 7 : index
      %c6_471 = arith.constant 6 : index
      %806 = memref.load %arg2[%c7_470, %c6_471] : memref<8x32xf32, #tpu.memory_space<smem>>
      %807 = vector.broadcast %806 : f32 to vector<64x128xf32>
      %808 = arith.select %52, %807, %805 : vector<64x128xi1>, vector<64x128xf32>
      %c7_472 = arith.constant 7 : index
      %c7_473 = arith.constant 7 : index
      %809 = memref.load %arg2[%c7_472, %c7_473] : memref<8x32xf32, #tpu.memory_space<smem>>
      %810 = vector.broadcast %809 : f32 to vector<64x128xf32>
      %811 = arith.select %54, %810, %808 : vector<64x128xi1>, vector<64x128xf32>
      %c7_474 = arith.constant 7 : index
      %c8_475 = arith.constant 8 : index
      %812 = memref.load %arg2[%c7_474, %c8_475] : memref<8x32xf32, #tpu.memory_space<smem>>
      %813 = vector.broadcast %812 : f32 to vector<64x128xf32>
      %814 = arith.select %56, %813, %811 : vector<64x128xi1>, vector<64x128xf32>
      %c7_476 = arith.constant 7 : index
      %c9_477 = arith.constant 9 : index
      %815 = memref.load %arg2[%c7_476, %c9_477] : memref<8x32xf32, #tpu.memory_space<smem>>
      %816 = vector.broadcast %815 : f32 to vector<64x128xf32>
      %817 = arith.select %58, %816, %814 : vector<64x128xi1>, vector<64x128xf32>
      %c7_478 = arith.constant 7 : index
      %c10_479 = arith.constant 10 : index
      %818 = memref.load %arg2[%c7_478, %c10_479] : memref<8x32xf32, #tpu.memory_space<smem>>
      %819 = vector.broadcast %818 : f32 to vector<64x128xf32>
      %820 = arith.select %60, %819, %817 : vector<64x128xi1>, vector<64x128xf32>
      %c7_480 = arith.constant 7 : index
      %c11_481 = arith.constant 11 : index
      %821 = memref.load %arg2[%c7_480, %c11_481] : memref<8x32xf32, #tpu.memory_space<smem>>
      %822 = vector.broadcast %821 : f32 to vector<64x128xf32>
      %823 = arith.select %62, %822, %820 : vector<64x128xi1>, vector<64x128xf32>
      %c7_482 = arith.constant 7 : index
      %c12_483 = arith.constant 12 : index
      %824 = memref.load %arg2[%c7_482, %c12_483] : memref<8x32xf32, #tpu.memory_space<smem>>
      %825 = vector.broadcast %824 : f32 to vector<64x128xf32>
      %826 = arith.select %64, %825, %823 : vector<64x128xi1>, vector<64x128xf32>
      %c7_484 = arith.constant 7 : index
      %c13_485 = arith.constant 13 : index
      %827 = memref.load %arg2[%c7_484, %c13_485] : memref<8x32xf32, #tpu.memory_space<smem>>
      %828 = vector.broadcast %827 : f32 to vector<64x128xf32>
      %829 = arith.select %66, %828, %826 : vector<64x128xi1>, vector<64x128xf32>
      %c7_486 = arith.constant 7 : index
      %c14_487 = arith.constant 14 : index
      %830 = memref.load %arg2[%c7_486, %c14_487] : memref<8x32xf32, #tpu.memory_space<smem>>
      %831 = vector.broadcast %830 : f32 to vector<64x128xf32>
      %832 = arith.select %68, %831, %829 : vector<64x128xi1>, vector<64x128xf32>
      %c7_488 = arith.constant 7 : index
      %c15_489 = arith.constant 15 : index
      %833 = memref.load %arg2[%c7_488, %c15_489] : memref<8x32xf32, #tpu.memory_space<smem>>
      %834 = vector.broadcast %833 : f32 to vector<64x128xf32>
      %835 = arith.select %70, %834, %832 : vector<64x128xi1>, vector<64x128xf32>
      %c7_490 = arith.constant 7 : index
      %c16_491 = arith.constant 16 : index
      %836 = memref.load %arg2[%c7_490, %c16_491] : memref<8x32xf32, #tpu.memory_space<smem>>
      %837 = vector.broadcast %836 : f32 to vector<64x128xf32>
      %838 = arith.select %72, %837, %835 : vector<64x128xi1>, vector<64x128xf32>
      %c7_492 = arith.constant 7 : index
      %c17_493 = arith.constant 17 : index
      %839 = memref.load %arg2[%c7_492, %c17_493] : memref<8x32xf32, #tpu.memory_space<smem>>
      %840 = vector.broadcast %839 : f32 to vector<64x128xf32>
      %841 = arith.select %74, %840, %838 : vector<64x128xi1>, vector<64x128xf32>
      %c7_494 = arith.constant 7 : index
      %c18_495 = arith.constant 18 : index
      %842 = memref.load %arg2[%c7_494, %c18_495] : memref<8x32xf32, #tpu.memory_space<smem>>
      %843 = vector.broadcast %842 : f32 to vector<64x128xf32>
      %844 = arith.select %76, %843, %841 : vector<64x128xi1>, vector<64x128xf32>
      %c7_496 = arith.constant 7 : index
      %c19_497 = arith.constant 19 : index
      %845 = memref.load %arg2[%c7_496, %c19_497] : memref<8x32xf32, #tpu.memory_space<smem>>
      %846 = vector.broadcast %845 : f32 to vector<64x128xf32>
      %847 = arith.select %78, %846, %844 : vector<64x128xi1>, vector<64x128xf32>
      %c7_498 = arith.constant 7 : index
      %c20_499 = arith.constant 20 : index
      %848 = memref.load %arg2[%c7_498, %c20_499] : memref<8x32xf32, #tpu.memory_space<smem>>
      %849 = vector.broadcast %848 : f32 to vector<64x128xf32>
      %850 = arith.select %80, %849, %847 : vector<64x128xi1>, vector<64x128xf32>
      %c7_500 = arith.constant 7 : index
      %c21_501 = arith.constant 21 : index
      %851 = memref.load %arg2[%c7_500, %c21_501] : memref<8x32xf32, #tpu.memory_space<smem>>
      %852 = vector.broadcast %851 : f32 to vector<64x128xf32>
      %853 = arith.select %82, %852, %850 : vector<64x128xi1>, vector<64x128xf32>
      %c7_502 = arith.constant 7 : index
      %c22_503 = arith.constant 22 : index
      %854 = memref.load %arg2[%c7_502, %c22_503] : memref<8x32xf32, #tpu.memory_space<smem>>
      %855 = vector.broadcast %854 : f32 to vector<64x128xf32>
      %856 = arith.select %84, %855, %853 : vector<64x128xi1>, vector<64x128xf32>
      %c7_504 = arith.constant 7 : index
      %c23_505 = arith.constant 23 : index
      %857 = memref.load %arg2[%c7_504, %c23_505] : memref<8x32xf32, #tpu.memory_space<smem>>
      %858 = vector.broadcast %857 : f32 to vector<64x128xf32>
      %859 = arith.select %86, %858, %856 : vector<64x128xi1>, vector<64x128xf32>
      %c7_506 = arith.constant 7 : index
      %c24_507 = arith.constant 24 : index
      %860 = memref.load %arg2[%c7_506, %c24_507] : memref<8x32xf32, #tpu.memory_space<smem>>
      %861 = vector.broadcast %860 : f32 to vector<64x128xf32>
      %862 = arith.select %88, %861, %859 : vector<64x128xi1>, vector<64x128xf32>
      %c7_508 = arith.constant 7 : index
      %c25_509 = arith.constant 25 : index
      %863 = memref.load %arg2[%c7_508, %c25_509] : memref<8x32xf32, #tpu.memory_space<smem>>
      %864 = vector.broadcast %863 : f32 to vector<64x128xf32>
      %865 = arith.select %90, %864, %862 : vector<64x128xi1>, vector<64x128xf32>
      %c7_510 = arith.constant 7 : index
      %c26_511 = arith.constant 26 : index
      %866 = memref.load %arg2[%c7_510, %c26_511] : memref<8x32xf32, #tpu.memory_space<smem>>
      %867 = vector.broadcast %866 : f32 to vector<64x128xf32>
      %868 = arith.select %92, %867, %865 : vector<64x128xi1>, vector<64x128xf32>
      %c7_512 = arith.constant 7 : index
      %c27_513 = arith.constant 27 : index
      %869 = memref.load %arg2[%c7_512, %c27_513] : memref<8x32xf32, #tpu.memory_space<smem>>
      %870 = vector.broadcast %869 : f32 to vector<64x128xf32>
      %871 = arith.select %94, %870, %868 : vector<64x128xi1>, vector<64x128xf32>
      %c7_514 = arith.constant 7 : index
      %c28_515 = arith.constant 28 : index
      %872 = memref.load %arg2[%c7_514, %c28_515] : memref<8x32xf32, #tpu.memory_space<smem>>
      %873 = vector.broadcast %872 : f32 to vector<64x128xf32>
      %874 = arith.select %96, %873, %871 : vector<64x128xi1>, vector<64x128xf32>
      %c7_516 = arith.constant 7 : index
      %c29_517 = arith.constant 29 : index
      %875 = memref.load %arg2[%c7_516, %c29_517] : memref<8x32xf32, #tpu.memory_space<smem>>
      %876 = vector.broadcast %875 : f32 to vector<64x128xf32>
      %877 = arith.select %98, %876, %874 : vector<64x128xi1>, vector<64x128xf32>
      %c7_518 = arith.constant 7 : index
      %c30_519 = arith.constant 30 : index
      %878 = memref.load %arg2[%c7_518, %c30_519] : memref<8x32xf32, #tpu.memory_space<smem>>
      %879 = vector.broadcast %878 : f32 to vector<64x128xf32>
      %880 = arith.select %100, %879, %877 : vector<64x128xi1>, vector<64x128xf32>
      %c7_520 = arith.constant 7 : index
      %c31_521 = arith.constant 31 : index
      %881 = memref.load %arg2[%c7_520, %c31_521] : memref<8x32xf32, #tpu.memory_space<smem>>
      %882 = vector.broadcast %881 : f32 to vector<64x128xf32>
      %883 = arith.select %102, %882, %880 : vector<64x128xi1>, vector<64x128xf32>
      %c7_522 = arith.constant 7 : index
      %c0_523 = arith.constant 0 : index
      %c0_524 = arith.constant 0 : index
      %884 = vector.load %arg5[%c7_522, %c0_523, %c0_524] : memref<8x64x128xf32, #tpu.memory_space<vmem>>, vector<1x64x128xf32>
      %885 = vector.shape_cast %884 : vector<1x64x128xf32> to vector<64x128xf32>
      %886 = vector.shape_cast %883 : vector<64x128xf32> to vector<1x64x128xf32>
      tpu.vector_store %arg5[%c7_522, %c0_523, %c0_524], %886 {strides = array<i32>} : memref<8x64x128xf32, #tpu.memory_space<vmem>>, vector<1x64x128xf32>,
    } else {
    }
    %c0 = arith.constant 0 : index
    %c0_1 = arith.constant 0 : index
    %c0_2 = arith.constant 0 : index
    %c0_3 = arith.constant 0 : index
    %3 = vector.load %arg3[%c0, %c0_1, %c0_2, %c0_3] : memref<1x8x64x128xf32, #tpu.memory_space<vmem>>, vector<1x8x64x128xf32>
    %4 = vector.shape_cast %3 : vector<1x8x64x128xf32> to vector<8x64x128xf32>
    %c0_4 = arith.constant 0 : index
    %c0_5 = arith.constant 0 : index
    %c0_6 = arith.constant 0 : index
    %5 = vector.load %arg5[%c0_4, %c0_5, %c0_6] : memref<8x64x128xf32, #tpu.memory_space<vmem>>, vector<8x64x128xf32>
    %6 = arith.addf %4, %5 : vector<8x64x128xf32>
    %c0_7 = arith.constant 0 : index
    %c0_8 = arith.constant 0 : index
    %c0_9 = arith.constant 0 : index
    %c0_10 = arith.constant 0 : index
    %7 = vector.load %arg4[%c0_7, %c0_8, %c0_9, %c0_10] : memref<1x8x64x128xf32, #tpu.memory_space<vmem>>, vector<1x8x64x128xf32>
    %8 = vector.shape_cast %7 : vector<1x8x64x128xf32> to vector<8x64x128xf32>
    %9 = vector.shape_cast %6 : vector<8x64x128xf32> to vector<1x8x64x128xf32>
    tpu.vector_store %arg4[%c0_7, %c0_8, %c0_9, %c0_10], %9 {strides = array<i32>} : memref<1x8x64x128xf32, #tpu.memory_space<vmem>>, vector<1x8x64x128xf32>,
    return
  }
  func.func @transform_0(%arg0: i32, %arg1: i32) -> (i32, i32) {
    %c0_i32 = arith.constant 0 : i32
    %c0_i32_0 = arith.constant 0 : i32
    %c0_i32_1 = arith.constant 0 : i32
    return %c0_i32, %c0_i32_0 : i32, i32
  }
  func.func @transform_1(%arg0: i32, %arg1: i32) -> (i32, i32, i32, i32) {
    %c0_i32 = arith.constant 0 : i32
    %c0_i32_0 = arith.constant 0 : i32
    %c0_i32_1 = arith.constant 0 : i32
    return %arg1, %c0_i32, %arg0, %c0_i32_0 : i32, i32, i32, i32
  }
  func.func @transform_2(%arg0: i32, %arg1: i32) -> (i32, i32, i32, i32) {
    %c0_i32 = arith.constant 0 : i32
    %c0_i32_0 = arith.constant 0 : i32
    %c0_i32_1 = arith.constant 0 : i32
    return %arg1, %c0_i32, %arg0, %c0_i32_0 : i32, i32, i32, i32
  }
}

</mosaic_0001>

<bundles_post_ra>
// kernel: relative_position_bias.1
= control target key start
LH: loop header
LB: loop body
LE: loop exit
PB: predicated region body
PF: predicated region fallthrough
CT: control target
= control target key end

     0   :  { %s12203_s0 = inlined_call_operand.vmem [shape: f32[8,32], index: 0, kind: input, shape index: {}]   ;;  %s12204_s1 = inlined_call_operand.hbm [shape: f32[2,8,128,128], index: 1, kind: input, shape index: {}, may-alias: {1,2}]   ;;  %s12205_s2 = inlined_call_operand.hbm [shape: f32[2,8,128,128], index: 2, kind: output, shape index: {}, may-alias: {1,2}]  }
   0x1   :  { %12427 = sst [smem:[#allocation27_spill]] %s12203_s0 }
   0x2   :  { %12428 = sst [smem:[#allocation28_spill]] %s12204_s1 }
   0x3   :  { %12429 = sst [smem:[#allocation29_spill]] %s12205_s2 }
   0x4   :  { %7 = vsyncpa [#allocation6], 0 }
   0x5   :  { %8 = vsyncpa [#allocation4], 0 }
   0x6   :  { %10 = vsyncpa [#allocation4 + $0x1], 0 }
   0x7   :  { %11 = vsyncpa [#allocation5], 0 }
   0x8   :  { %13 = vsyncpa [#allocation5 + $0x1], 0  ;;  %s4172_s9 = smov 0   ;;  %s4174_s10 = smov 0  }
   0x9   :  { %s4176_s11 = smov 0   ;;  %s4178_s12 = smov 0  }
   0xa   :  { %s4180_s13 = smov 0   ;;  %s4182_s14 = smov 0  }
   0xb   :  { %s4184_s15 = smov 0   ;;  %s4186_s16 = smov 0  }
   0xc LB: > { %12430 = sst [smem:[#allocation17_spill]] %s4114_s9  ;;  %s3626_s17 = sadd.s32 4294967295, %s4142_s16   ;;  %s4142_s16 = sphi %s4186_s16, %s19_s16   ;;  %s4138_s15 = sphi %s4184_s15, %s14159_s15   ;;  %s4134_s14 = sphi %s4182_s14, %s14158_s14   ;;  %s4130_s13 = sphi %s4180_s13, %s14157_s13   ;;  %s4126_s12 = sphi %s4178_s12, %s14156_s12   ;;  %s4122_s11 = sphi %s4176_s11, %s14155_s11   ;;  %s4118_s10 = sphi %s4174_s10, %s14154_s10   ;;  %s4114_s9 = sphi %s4172_s9, %s14153_s9  }
   0xd   : > { %12431 = sst [smem:[#allocation18_spill]] %s4118_s10  ;;  %s3627_s18 = sadd.s32 4294967294, %s4142_s16  }
   0xe   : > { %12432 = sst [smem:[#allocation19_spill]] %s4122_s11  ;;  %s28_s19 = sadd.s32 1, %s4134_s14 }
   0xf   : > { %12433 = sst [smem:[#allocation20_spill]] %s4134_s14  ;;  %s31_s20 = sadd.s32 1, %s4138_s15 }
  0x10   : > { %12434 = sst [smem:[#allocation21_spill]] %s4138_s15  ;;  %p29_p0 = scmp.ge.s32.totalorder %s28_s19, 2 }
  0x11   : > { %12435 = sst [smem:[#allocation22_spill]] %s4142_s16  ;;  %s61_s21 = sadd.s32 1, %s4122_s11 }
  0x12   : > { %p68_p1 = scmp.ne.s32.totalorder %s4122_s11, %s4118_s10  ;;  %p69_p2 = scmp.eq.s32.totalorder %s4142_s16, 0 }
  0x13   : > { %s14161_s19 = smov (%p29_p0, %s28_s19), 0  ;;  %s14163_s20 = smov (!%p29_p0, %s31_s20), %s4138_s15 }
  0x14   : > { %12436 = sst [smem:[#allocation23_spill]] %s14161_s19  ;;  %s56_s22 = ssub.s32 %s4134_s14, %s14161_s19 }
  0x15   : > { %p4225_p3 = por %p69_p2, %p68_p1  ;;  %p33_p4 = scmp.ge.s32.totalorder %s14163_s20, 2 }
  0x16   : > { %p74_p5 = scmp.ne.s32.totalorder %s4118_s10, %s4114_s9  ;;  %p4231_p6 = scmp.eq.s32.totalorder %s3626_s17, 0 }
  0x17   : > { %p100_p7 = scmp.eq.s32.totalorder %s3626_s17, 3  ;;  %s14165_s20 = smov (%p33_p4, %s14163_s20), 0 }
  0x18   : > { %12439 = sst [smem:[#allocation24_spill]] %s14165_s20  ;;  %p4239_p8 = por %p4231_p6, %p74_p5 }
  0x19   : > { %p4243_p9 = por %p100_p7, %p68_p1  ;;  %s57_s27 = ssub.s32 %s4138_s15, %s14165_s20 }
  0x1a   : > { %s12440_s25 = scalar_select %p4239_p8, 1, 0 }
  0x1b   : > { %s12441_s26 = scalar_select %p4243_p9, 1, 0 }
  0x1c   : > { %p106_p10 = scmp.eq.s32.totalorder %s3627_s18, 3  ;;  %s58_s28 = sor.u32 %s57_s27, %s56_s22 }
  0x1d   : > { %p3628_p11 = scmp.ge.s32.totalorder %s4142_s16, 1  ;;  %p59_p12 = scmp.eq.s32.totalorder %s58_s28, 0 }
  0x1e   : > { %p4250_p13 = por %p106_p10, %p74_p5  ;;  %p113_p0 = scmp.lt.s32.totalorder %s4142_s16, 5 }
  0x1f   : > { %s4256_s30 = scalar_select %p59_p12, %s4122_s11, %s61_s21  }
  0x20   : > { %s12442_s29 = scalar_select %p4250_p13, 1, 0 }
  0x21   : > { %12444 = sst [smem:[#allocation26_spill]] %s4256_s30  ;;  %p4258_p2 = pnand %p3628_p11, %p113_p0 }
  0x22   : > { %12443 = sst [smem:[#allocation25_spill]] %s12442_s29  ;;  %s12446_s0 = sld [smem:[#allocation27_spill]] }
  0x23   : > { %p3949_p1 = pneg %p4258_p2 }
  0x25   : > { %p3950_p4 = pnand %p3949_p1, %p4231_p6 }
  0x27   : > { %p4055_p7 = pneg %p3950_p4 }
  0x28   : > { %s126_s6 = sshll.u32 %s12446_s0, 4  ;;  %s127_s6 = int_to_ptr.vmem [resolvable:$true] %s126_s6 }
  0x29   : > { %s4053_s7 = scalar_lea.vmem %s127_s6, 128  ;;  %p4061_p13 = scmp.lt.s32.totalorder %s127_s6, %s127_s6 }
  0x2a   : > { %p4054_p5 = scmp.ne.s32.totalorder %s127_s6, %s4053_s7  ;;  %p4062_p11 = scmp.lt.s32.totalorder %s4053_s7, %s4053_s7 }
  0x2c   : > { %p4056_p10 = pnand %p4055_p7, %p4054_p5  ;;  %p4063_p0 = por %p4062_p11, %p4061_p13 }
  0x2e   : > { %p4057_p12 = pneg %p4056_p10 }
  0x30   : > { %p4064_p9 = pnand %p4063_p0, %p4057_p12 }
  0x32   : > { %4067 = shalt.err (!%p4064_p9)
}
  0x33   : > { %s4144_s8 = smov [#allocation3]   ;;  %p3630_p8 = scmp.ge.s32.totalorder %s4142_s16, 4 }
  0x34   : > { %3952 = dma.vmem_to_smem (!%p3950_p4), %s127_s6, 128, %s4144_s8, [#allocation6]  }
  0x35   : > { %133 = sbr.rel (%p3630_p8) target bundleno = 77 (0x4d), region = 20 }
  0x3c   : > { %s137_s17 = sand.u32 1, %s4122_s11   ;;  %s3632_s18 = sshll.u32 %s4138_s15, 3 }
  0x3d   : > { %s3631_s21 = sshll.u32 %s137_s17, 9  ;;  %s3633_s22 = sshll.u32 %s4134_s14, 7 }
  0x3e   : > { %s147_s27 = sadd.s32 %s3633_s22, %s3632_s18  ;;  %s141_s28 = scalar_lea.vmem [#allocation7], %s3631_s21 }
  0x3f   : > { %s162_s4 = sshll.u32 %s141_s28, 4  ;;  %s3634_s5 = sshll.u32 %s147_s27, 7  ;;  %s163_s4 = int_to_ptr.vmem [resolvable:$true] %s162_s4 }
  0x40   : > { %s3930_s6 = scalar_select %p4225_p3, [#allocation0], [#allocation13] }
  0x41   : > { %s4145_s7 = smov 2048   ;;  %s4146_s0 = smov 1024  }
  0x42   : > { %3931 = sst [smem:[#allocation10]] (%p4225_p3), %s4145_s7  ;;  %s4147_s20 = smov 8  }
  0x43   : > { %s154_s8 = sld [smem:[%s3930_s6]]   ;;  %s4148_s18 = smov 128  }
  0x44   : > { %3932 = sst [smem:[#allocation10 + $0x1]] (%p4225_p3), %s4146_s0  ;;  %s138_s7 = scalar_lea.sflag [#allocation4], %s137_s17 }
  0x45   : > { %3933 = sst [smem:[#allocation10 + $0x2]] (%p4225_p3), %s4147_s20  ;;  %s12447_s1 = sld [smem:[#allocation28_spill]] }
  0x46   : > { %3934 = sst [smem:[#allocation10 + $0x3]] (%p4225_p3), %s4148_s18  ;;  %s4149_s19 = smov [#allocation9]  }
  0x47   : > { %3935 = sst [smem:[#allocation10 + $0x4]] (%p4225_p3), %s4148_s18 }
  0x48   : > { %3936 = sst [smem:[#allocation10 + $0x5]] (%p4225_p3), %s4147_s20 }
  0x49   : > { %s3635_s28 = sshll.u32 %s154_s8, 26 }
  0x4a   : > { %s3636_s6 = sadd.s32 134217728, %s3635_s28 }
  0x4b   : > { %s149_s27 = scalar_lea.hbm %s12447_s1, %s3634_s5 }
  0x4c   : > { %3937 = dma.general (%p4225_p3), %s149_s27, 8192, %s163_s4, %s138_s7, %s4149_s19, [#allocation10], %s3636_s6, 0  }
  0x4d PF: > { %187 = sbr.rel (%p4258_p2) target bundleno = 1252 (0x4e4), region = 28 }
  0x54   : > { %4101 = dma.done.wait (%p4231_p6), [#allocation6], 128  }
  0x55   : > { %4103 = vsyncadd (%p4231_p6), [#allocation6], 4294967168  ;;  %s4299_s0 = sand.u32 1, %s4118_s10   ;;  %p12448_p3 = scmp.ne.s32.totalorder %s12440_s25, 0 }
  0x56   : > { %s3639_s20 = sshll.u32 %s4299_s0, 9  ;;  %s194_s17 = scalar_lea.sflag [#allocation4], %s4299_s0 }
  0x57   : > { %s4303_s23 = scalar_lea.vmem [#allocation7], %s3639_s20 }
  0x58   : > { %4105 = dma.done.wait (%p12448_p3), %s194_s17, 8192  }
  0x59   : > { %4107 = vsyncadd (%p12448_p3), %s194_s17, 4294959104 }
  0x5a   : > { %202 = sfence }
  0x5b   : > { %s4309_s19 = scalar_lea.vmem [#allocation8], %s3639_s20  ;;  %p3641_p6 = scmp.ne.s32.totalorder %s4126_s12, 0 }
  0x5c   : > { %s3642_s24 = sshll.u32 (!%p3641_p6), %s4130_s13, 6  ;;  %v226_v0 = vlaneseq (!%p3641_p6)  ;;  %s4344_s25 = sld [smem:[#allocation3]] (!%p3641_p6)  ;;  %v4150_v34 = vmov (!%p3641_p6), 0  }
  0x5d   : > { %224 = sbr.rel (%p3641_p6) target bundleno = 1187 (0x4a3), region = 40  ;;  %v235_v1 = vstv (!%p3641_p6), %s3642_s24  ;;  %s4346_s3 = sld [smem:[#allocation3 + $0x1]] (!%p3641_p6) }
  0x5e   : > { %v227_v2 = vshrl.u32 (!%p3641_p6), %v226_v0, 7  ;;  %v4313_v3 = vand.u32 (!%p3641_p6), 127, %v226_v0  ;;  %s4357_s4 = sld [smem:[#allocation3 + $0x2]] (!%p3641_p6)  ;;  %s4359_s5 = sld [smem:[#allocation3 + $0x3]] (!%p3641_p6) }
  0x5f   : > { %s4361_s8 = sld [smem:[#allocation3 + $0x4]] (!%p3641_p6)  ;;  %s4363_s18 = sld [smem:[#allocation3 + $0x5]] (!%p3641_p6) }
  0x60   : > { %v236_v4 = vadd.s32 (!%p3641_p6), %v235_v1, %v227_v2  ;;  %v228_v5 = vadd.s32 (!%p3641_p6), 8, %v227_v2  ;;  %v229_v6 = vadd.s32 (!%p3641_p6), 16, %v227_v2  ;;  %v231_v7 = vadd.s32 (!%p3641_p6), 32, %v227_v2  ;;  %s4365_s21 = sld [smem:[#allocation3 + $0x6]] (!%p3641_p6)  ;;  %s4367_s22 = sld [smem:[#allocation3 + $0x7]] (!%p3641_p6) }
  0x61   : > { %v230_v17 = vadd.s32 (!%p3641_p6), 24, %v227_v2  ;;  %v232_v37 = vadd.s32 (!%p3641_p6), 40, %v227_v2  ;;  %v233_v38 = vadd.s32 (!%p3641_p6), 48, %v227_v2  ;;  %v234_v39 = vadd.s32 (!%p3641_p6), 56, %v227_v2  ;;  %s4370_s27 = sld [smem:[#allocation3 + $0x8]] (!%p3641_p6)  ;;  %s4372_s28 = sld [smem:[#allocation3 + $0x9]] (!%p3641_p6) }
  0x62   : > { %v4316_v8 = vsub.s32 (!%p3641_p6), %v236_v4, %v4313_v3  ;;  %v237_v9 = vadd.s32 (!%p3641_p6), %v235_v1, %v228_v5  ;;  %v238_v10 = vadd.s32 (!%p3641_p6), %v235_v1, %v229_v6  ;;  %v240_v11 = vadd.s32 (!%p3641_p6), %v235_v1, %v231_v7  ;;  %s4384_s6 = sld [smem:[#allocation3 + $0xa]] (!%p3641_p6)  ;;  %s4386_s7 = sld [smem:[#allocation3 + $0xb]] (!%p3641_p6) }
  0x63   : > { %v239_v23 = vadd.s32 (!%p3641_p6), %v235_v1, %v230_v17  ;;  %v241_v40 = vadd.s32 (!%p3641_p6), %v235_v1, %v232_v37  ;;  %v242_v41 = vadd.s32 (!%p3641_p6), %v235_v1, %v233_v38  ;;  %v243_v42 = vadd.s32 (!%p3641_p6), %v235_v1, %v234_v39  ;;  %s4393_s20 = sld [smem:[#allocation3 + $0xc]] (!%p3641_p6)  ;;  %s4401_s17 = sld [smem:[#allocation3 + $0xd]] (!%p3641_p6) }
  0x64   : > { %v270_v12 = vsub.s32 0, %v4316_v8  ;;  %v4320_v13 = vsub.s32 %v237_v9, %v4313_v3  ;;  %v4327_v16 = vsub.s32 %v238_v10, %v4313_v3  ;;  %v250_v28 = vsub.s32 %v240_v11, %v4313_v3  ;;  %s4408_s24 = sld [smem:[#allocation3 + $0xe]]  ;;  %s4479_s1 = sld [smem:[#allocation3 + $0x19]] }
  0x65   : > { %v4341_v27 = vsub.s32 %v239_v23, %v4313_v3  ;;  %v251_v47 = vsub.s32 %v241_v40, %v4313_v3  ;;  %v252_v48 = vsub.s32 %v242_v41, %v4313_v3  ;;  %v4379_v49 = vstv %s4344_s25  ;;  %s4419_s25 = sld [smem:[#allocation3 + $0xf]]  ;;  %s4481_s15 = sld [smem:[#allocation3 + $0x1a]] }
  0x66   : > { %v4323_v14 = vmin.u32 %v270_v12, %v4316_v8  ;;  %v272_v15 = vsub.s32 0, %v4320_v13  ;;  %v274_v21 = vsub.s32 0, %v4327_v16  ;;  %vm258_vm3 = vcmp.lt.s32.totalorder %v250_v28, 0  ;;  %s6623_s14 = sld [smem:[#allocation3 + $0x119]]  ;;  %s6639_s30 = sld [smem:[#allocation3 + $0x11b]] }
  0x67   : > { %v276_v30 = vsub.s32 0, %v4341_v27  ;;  %v4355_v35 = vsel %vm258_vm3, 16, %v4150_v34  ;;  %v278_v36 = vsub.s32 0, %v250_v28  ;;  %v4382_v50 = vstv %s4346_s3  ;;  %s4421_s3 = sld [smem:[#allocation3 + $0x10]]  ;;  %s6653_s11 = sld [smem:[#allocation3 + $0x11c]] }
  0x68   : > { %vm294_vm0 = vcmp.gt.s32.totalorder %v4323_v14, 1  ;;  %v4332_v20 = vmin.u32 %v272_v15, %v4320_v13  ;;  %v4338_v26 = vmin.u32 %v274_v21, %v4327_v16  ;;  %v4389_v51 = vsub.s32 %v243_v42, %v4313_v3  ;;  %s6655_s10 = sld [smem:[#allocation3 + $0x11d]]  ;;  %s7569_s9 = sld [smem:[#allocation3 + $0x19e]] }
  0x69   : > { %v295_v18 = vsel %vm294_vm0, %v4323_v14, 1  ;;  %v4352_v33 = vmin.u32 %v276_v30, %v4341_v27  ;;  %v4374_v46 = vmin.u32 %v278_v36, %v250_v28  ;;  %vm259_vm5 = vcmp.lt.s32.totalorder %v251_v47, 0  ;;  %s7567_s29 = sld [smem:[#allocation3 + $0x19d]]  ;;  %s8483_s16 = sld [smem:[#allocation3 + $0x21f]] }
  0x6a   : > { %v310_v19 = vcvt.s32.f32 %v295_v18  ;;  %vm296_vm1 = vcmp.gt.s32.totalorder %v4332_v20, 1  ;;  %vm298_vm2 = vcmp.gt.s32.totalorder %v4338_v26, 1  ;;  %vm260_vm6 = vcmp.lt.s32.totalorder %v252_v48, 0  ;;  %s9395_s2 = sld [smem:[#allocation3 + $0x29f]] }
  0x6b   : > { %v297_v24 = vsel %vm296_vm1, %v4332_v20, 1  ;;  %v299_v31 = vsel %vm298_vm2, %v4338_v26, 1  ;;  %vm300_vm4 = vcmp.gt.s32.totalorder %v4352_v33, 1  ;;  %vm254_vm7 = vcmp.lt.s32.totalorder %v4316_v8, 0 }
  0x6c   : > { %v319_v22 = vmul.f32 0.125, %v310_v19  ;;  %v311_v25 = vcvt.s32.f32 %v297_v24  ;;  %v312_v32 = vcvt.s32.f32 %v299_v31  ;;  %v301_v53 = vsel %vm300_vm4, %v4352_v33, 1 }
  0x6d   : > { %v4396_v54 = vsel %vm259_vm5, 16, %v4150_v34  ;;  %v4399_v55 = vsel %vm260_vm6, 16, %v4150_v34  ;;  %vm302_vm8 = vcmp.gt.s32.totalorder %v4374_v46, 1  ;;  %v280_v58 = vsub.s32 0, %v251_v47 }
  0x6e   : > { %4037 = vlog2.f32 %v319_v22  ;;  %v320_v29 = vmul.f32 0.125, %v311_v25  ;;  %v321_v44 = vmul.f32 0.125, %v312_v32  ;;  %vm261_vm9 = vcmp.lt.s32.totalorder %v4389_v51, 0 }
  0x6f   : > { %v4406_v59 = vstv %s4357_s4  ;;  %v313_v61 = vcvt.s32.f32 %v301_v53  ;;  %v4411_v62 = vsel %vm261_vm9, 16, %v4150_v34  ;;  %v4414_v0 = vstv %s4359_s5  ;;  %s4429_s4 = sld [smem:[#allocation3 + $0x11]]  ;;  %s4440_s5 = sld [smem:[#allocation3 + $0x12]] }
  0x70   : > { %4039 = vlog2.f32 %v320_v29  ;;  %v4417_v1 = vstv %s4361_s8  ;;  %v282_v2 = vsub.s32 0, %v252_v48  ;;  %v262_v3 = vsel %vm254_vm7, 16, %v4150_v34  ;;  %s4442_s8 = sld [smem:[#allocation3 + $0x13]] }
  0x71   : > { %4041 = vlog2.f32 %v321_v44  ;;  %v4427_v4 = vstv %s4363_s18  ;;  %v303_v6 = vsel %vm302_vm8, %v4374_v46, 1  ;;  %v4435_v9 = vstv %s4365_s21  ;;  %s4452_s18 = sld [smem:[#allocation3 + $0x14]]  ;;  %s4454_s21 = sld [smem:[#allocation3 + $0x15]] }
  0x72   : > { %v4438_v10 = vstv %s4367_s22  ;;  %v4444_v8 = vmin.u32 %v280_v58, %v251_v47  ;;  %v4447_v11 = vstv %s4370_s27  ;;  %v4450_v12 = vstv %s4372_s28  ;;  %s4456_s22 = sld [smem:[#allocation3 + $0x16]]  ;;  %s4468_s27 = sld [smem:[#allocation3 + $0x17]] }
  0x73   : > { %v322_v17 = vmul.f32 0.125, %v313_v61  ;;  %v314_v19 = vcvt.s32.f32 %v303_v6  ;;  %v4458_v21 = vmin.u32 %v282_v2, %v252_v48  ;;  %v284_v22 = vsub.s32 0, %v4389_v51  ;;  %s4470_s28 = sld [smem:[#allocation3 + $0x18]] }
  0x74   : > { %vm286_vm10 = vcmp.lt.s32.totalorder %v4323_v14, 8  ;;  %v4463_v23 = vstv %s4384_s6  ;;  %v4466_v24 = vstv %s4386_s7  ;;  %vm255_vm11 = vcmp.lt.s32.totalorder %v4320_v13, 0  ;;  %s4490_s6 = sld [smem:[#allocation3 + $0x1b]]  ;;  %s4492_s7 = sld [smem:[#allocation3 + $0x1c]] }
  0x75   : > { %v4474_v25 = vstv %s4393_s20  ;;  %v4477_v28 = vstv %s4401_s17  ;;  %vm304_vm13 = vcmp.gt.s32.totalorder %v4444_v8, 1  ;;  %v4485_v31 = vstv %s4408_s24  ;;  %s4504_s20 = sld [smem:[#allocation3 + $0x1d]]  ;;  %s4506_s17 = sld [smem:[#allocation3 + $0x1e]] }
  0x76   : > { %4043 = vlog2.f32 %v322_v17  ;;  %v323_v37 = vmul.f32 0.125, %v314_v19  ;;  %vm306_vm14 = vcmp.gt.s32.totalorder %v4458_v21, 1  ;;  %v4496_v38 = vmin.u32 %v284_v22, %v4389_v51  ;;  %s4542_s24 = sld [smem:[#allocation3 + $0x1f]] }
  0x77   : > { %v4499_v39 = vstv %s4419_s25  ;;  %v4502_v40 = vstv %s4421_s3  ;;  %v305_v41 = vsel %vm304_vm13, %v4444_v8, 1  ;;  %v4517_v42 = vstv %s4429_s4  ;;  %s5276_s25 = sld [smem:[#allocation3 + $0x82]]  ;;  %s5309_s3 = sld [smem:[#allocation3 + $0x83]] }
  0x78   : > { %v4038_v43 = vpop.eup %4037  ;;  %v4523_v44 = vstv %s4442_s8  ;;  %vm256_vm15 = vcmp.lt.s32.totalorder %v4327_v16, 0  ;;  %v307_v48 = vsel %vm306_vm14, %v4458_v21, 1  ;;  %v4530_v51 = vstv %s4452_s18  ;;  %s5349_s4 = sld [smem:[#allocation3 + $0x84]]  ;;  %s5390_s8 = sld [smem:[#allocation3 + $0x86]] }
  0x79   : > { %v328_v45 = vmul.f32 0.6931472, %v4038_v43  ;;  %v4520_v43 = vstv %s4440_s5  ;;  %4045 = vlog2.f32 %v323_v37  ;;  %vm308_vm0 = vcmp.gt.s32.totalorder %v4496_v38, 1  ;;  %s5351_s5 = sld [smem:[#allocation3 + $0x85]]  ;;  %s5422_s18 = sld [smem:[#allocation3 + $0x87]] }
  0x7a   : > { %v4040_v56 = vpop.eup %4039  ;;  %v4534_v53 = vstv %s4454_s21  ;;  %v4540_v16 = vstv %s4468_s27  ;;  %vm287_vm1 = vcmp.lt.s32.totalorder %v4332_v20, 8  ;;  %v4549_v58 = vstv %s4470_s28  ;;  %s5448_s21 = sld [smem:[#allocation3 + $0x88]]  ;;  %s5525_s27 = sld [smem:[#allocation3 + $0x8a]] }
  0x7b   : > { %v344_v52 = vmul.f32 0.36067376, %v328_v45  ;;  %v330_v60 = vmul.f32 0.6931472, %v4040_v56  ;;  %v4042_v29 = vpop.eup %4041  ;;  %v4537_v56 = vstv %s4456_s22  ;;  %v4555_v61 = vstv %s4481_s15  ;;  %s5248_s15 = sld [smem:[#allocation3 + $0x81]]  ;;  %s5533_s28 = sld [smem:[#allocation3 + $0x8b]] }
  0x7c   : > { %v332_v47 = vmul.f32 0.6931472, %v4042_v29  ;;  %v4561_v6 = vstv %s4490_s6  ;;  %v4571_v19 = vstv %s4506_s17  ;;  %vm257_vm5 = vcmp.lt.s32.totalorder %v4341_v27, 0  ;;  %s5481_s22 = sld [smem:[#allocation3 + $0x89]]  ;;  %s5541_s6 = sld [smem:[#allocation3 + $0x8c]] }
  0x7d   : > { %v352_v57 = vmul.f32 8.0, %v344_v52  ;;  %v345_v5 = vmul.f32 0.36067376, %v330_v60  ;;  %v315_v52 = vcvt.s32.f32 %v305_v41  ;;  %v4552_v60 = vstv %s4479_s1  ;;  %s5151_s1 = sld [smem:[#allocation3 + $0x80]]  ;;  %s5572_s17 = sld [smem:[#allocation3 + $0x8f]] }
  0x7f   : > { %v3912_v63 = vtrunc.f32 %v352_v57  ;;  %v353_v15 = vmul.f32 8.0, %v345_v5  ;;  %v4546_v57 = vsel %vm256_vm15, 16, %v4150_v34  ;;  %v309_v5 = vsel %vm308_vm0, %v4496_v38, 1 }
  0x80   : > { %v4044_v17 = vpop.eup %4043 }
  0x81   : > { %v3913_v7 = vcvt.f32.s32 %v3912_v63  ;;  %v3914_v32 = vtrunc.f32 %v353_v15  ;;  %v316_v63 = vcvt.s32.f32 %v307_v48  ;;  %v324_v15 = vmul.f32 0.125, %v315_v52 }
  0x82   : > { %v334_v41 = vmul.f32 0.6931472, %v4044_v17 }
  0x83   : > { %v368_v18 = vadd.s32 8, %v3913_v7  ;;  %v3915_v13 = vcvt.f32.s32 %v3914_v32  ;;  %v4564_v7 = vstv %s4492_s7  ;;  %v325_v29 = vmul.f32 0.125, %v316_v63  ;;  %v4046_v52 = vpop.eup %4045  ;;  %s5554_s7 = sld [smem:[#allocation3 + $0x8d]] }
  0x84   : > { %4047 = vlog2.f32 %v324_v15 }
  0x85   : > { %vm376_vm12 = vcmp.lt.s32.totalorder %v368_v18, 15  ;;  %v369_v2 = vadd.s32 8, %v3915_v13  ;;  %4049 = vlog2.f32 %v325_v29  ;;  %v336_v29 = vmul.f32 0.6931472, %v4046_v52 }
  0x86   : > { %v377_v30 = vsel %vm376_vm12, %v368_v18, 15  ;;  %v4568_v18 = vstv %s4504_s20  ;;  %s5563_s20 = sld [smem:[#allocation3 + $0x8e]] }
  0x87   : > { %v392_v36 = vsel %vm286_vm10, %v4323_v14, %v377_v30  ;;  %v4511_v14 = vsel %vm255_vm11, 16, %v4150_v34  ;;  %v317_v30 = vcvt.s32.f32 %v309_v5  ;;  %vm378_vm8 = vcmp.lt.s32.totalorder %v369_v2, 15 }
  0x88   : > { %v4526_v45 = vadd.s32 %v392_v36, %v262_v3  ;;  %v346_v3 = vmul.f32 0.36067376, %v332_v47  ;;  %v4592_v47 = vstv %s4542_s24  ;;  %v379_v48 = vsel %vm378_vm8, %v369_v2, 15  ;;  %s5581_s24 = sld [smem:[#allocation3 + $0x90]] }
  0x89   : > { %v4607_v15 = vmul.f32 0.125, %v317_v30  ;;  %v393_v27 = vsel %vm287_vm1, %v4332_v20, %v379_v48 }
  0x8a   : > { %vm12222_vm2 = vcmp.eq.s32.totalorder %v4526_v45, 1  ;;  %vm12220_vm3 = vcmp.eq.s32.totalorder %v4526_v45, 2  ;;  %vm12218_vm4 = vcmp.eq.s32.totalorder %v4526_v45, 3  ;;  %vm12216_vm6 = vcmp.eq.s32.totalorder %v4526_v45, 4 }
  0x8b   : > { %v660_v22 = vsel %vm12222_vm2, %v4382_v50, %v4379_v49  ;;  %vm12215_vm7 = vcmp.eq.s32.totalorder %v4526_v45, 5  ;;  %v354_v36 = vmul.f32 8.0, %v346_v3  ;;  %vm12213_vm9 = vcmp.eq.s32.totalorder %v4526_v45, 6 }
  0x8c   : > { %v670_v32 = vsel %vm12220_vm3, %v4406_v59, %v660_v22  ;;  %vm12211_vm10 = vcmp.eq.s32.totalorder %v4526_v45, 7  ;;  %vm12212_vm11 = vcmp.eq.s32.totalorder %v4526_v45, 8  ;;  %v4601_v3 = vsel %vm257_vm5, 16, %v4150_v34 }
  0x8d   : > { %v680_v37 = vsel %vm12218_vm4, %v4414_v0, %v670_v32  ;;  %vm12214_vm12 = vcmp.eq.s32.totalorder %v4526_v45, 9  ;;  %v3916_v2 = vtrunc.f32 %v354_v36  ;;  %vm12217_vm13 = vcmp.eq.s32.totalorder %v4526_v45, 10 }
  0x8e   : > { %v690_v13 = vsel %vm12216_vm6, %v4417_v1, %v680_v37  ;;  %v347_v34 = vmul.f32 0.36067376, %v334_v41  ;;  %vm12219_vm14 = vcmp.eq.s32.totalorder %v4526_v45, 11  ;;  %vm12221_vm15 = vcmp.eq.s32.totalorder %v4526_v45, 12  ;;  %v4048_v41 = vpop.eup %4047 }
  0x8f   : > { %v700_v63 = vsel %vm12215_vm7, %v4427_v4, %v690_v13  ;;  %vm12223_vm0 = vcmp.eq.s32.totalorder %v4526_v45, 13  ;;  %vm12224_vm5 = vcmp.eq.s32.totalorder %v4526_v45, 14  ;;  %vm12225_vm8 = vcmp.eq.s32.totalorder %v4526_v45, 15 }
  0x90   : > { %v710_v5 = vsel %vm12213_vm9, %v4435_v9, %v700_v63  ;;  %vm12226_vm1 = vcmp.eq.s32.totalorder %v4526_v45, 16  ;;  %v4633_v32 = vadd.s32 %v393_v27, %v4511_v14  ;;  %vm12253_vm9 = vcmp.eq.s32.totalorder %v4526_v45, 19 }
  0x91   : > { %v720_v17 = vsel %vm12211_vm10, %v4438_v10, %v710_v5  ;;  %vm12227_vm10 = vcmp.eq.s32.totalorder %v4526_v45, 17  ;;  %v3917_v37 = vcvt.f32.s32 %v3916_v2  ;;  %vm12251_vm7 = vcmp.eq.s32.totalorder %v4526_v45, 21  ;;  %v4050_v5 = vpop.eup %4049 }
  0x92   : > { %v730_v22 = vsel %vm12212_vm11, %v4447_v11, %v720_v17  ;;  %vm12229_vm11 = vcmp.eq.s32.totalorder %v4526_v45, 18  ;;  %vm12248_vm6 = vcmp.eq.s32.totalorder %v4526_v45, 22  ;;  %vm12237_vm4 = vcmp.eq.s32.totalorder %v4526_v45, 24 }
  0x93   : > { %v740_v20 = vsel %vm12214_vm12, %v4450_v12, %v730_v22  ;;  %vm12232_vm12 = vcmp.eq.s32.totalorder %v4526_v45, 20  ;;  %v355_v48 = vmul.f32 8.0, %v347_v34  ;;  %vm12228_vm3 = vcmp.eq.s32.totalorder %v4633_v32, 1 }
  0x94   : > { %v750_v30 = vsel %vm12217_vm13, %v4463_v23, %v740_v20  ;;  %vm12239_vm13 = vcmp.eq.s32.totalorder %v4526_v45, 23  ;;  %v348_v63 = vmul.f32 0.36067376, %v336_v29  ;;  %vm12241_vm2 = vcmp.eq.s32.totalorder %v4526_v45, 26 }
  0x95   : > { %v760_v36 = vsel %vm12219_vm14, %v4466_v24, %v750_v30  ;;  %v370_v17 = vadd.s32 8, %v3917_v37  ;;  %v338_v34 = vmul.f32 0.6931472, %v4048_v41  ;;  %v661_v29 = vsel %vm12228_vm3, %v4382_v50, %v4379_v49 }
  0x96   : > { %v770_v14 = vsel %vm12221_vm15, %v4474_v25, %v760_v36  ;;  %vm12245_vm15 = vcmp.eq.s32.totalorder %v4526_v45, 28  ;;  %v3918_v20 = vtrunc.f32 %v355_v48  ;;  %v4684_v37 = vmul.f32 8.0, %v348_v63 }
  0x97   : > { %v780_v13 = vsel %vm12223_vm0, %v4477_v28, %v770_v14  ;;  %vm12230_vm0 = vcmp.eq.s32.totalorder %v4633_v32, 2  ;;  %vm12235_vm3 = vcmp.eq.s32.totalorder %v4633_v32, 6  ;;  %vm12250_vm14 = vcmp.eq.s32.totalorder %v4526_v45, 31 }
  0x98   : > { %v790_v52 = vsel %vm12224_vm5, %v4485_v31, %v780_v13  ;;  %vm12231_vm5 = vcmp.eq.s32.totalorder %v4633_v32, 3  ;;  %v671_v36 = vsel %vm12230_vm0, %v4406_v59, %v661_v29  ;;  %vm12236_vm0 = vcmp.eq.s32.totalorder %v4633_v32, 7 }
  0x99   : > { %v800_v2 = vsel %vm12225_vm8, %v4499_v39, %v790_v52  ;;  %vm12233_vm8 = vcmp.eq.s32.totalorder %v4633_v32, 4  ;;  %v681_v41 = vsel %vm12231_vm5, %v4414_v0, %v671_v36  ;;  %v4702_v52 = vmul.f32 0.36067376, %v338_v34 }
  0x9a   : > { %v810_v27 = vsel %vm12226_vm1, %v4502_v40, %v800_v2  ;;  %vm12234_vm1 = vcmp.eq.s32.totalorder %v4633_v32, 5  ;;  %v691_v48 = vsel %vm12233_vm8, %v4417_v1, %v681_v41  ;;  %vm12238_vm5 = vcmp.eq.s32.totalorder %v4633_v32, 8 }
  0x9b   : > { %v820_v22 = vsel %vm12227_vm10, %v4517_v42, %v810_v27  ;;  %vm12247_vm10 = vcmp.eq.s32.totalorder %v4526_v45, 30  ;;  %v701_v2 = vsel %vm12234_vm1, %v4427_v4, %v691_v48  ;;  %v3919_v27 = vcvt.f32.s32 %v3918_v20 }
  0x9c   : > { %v830_v30 = vsel %vm12229_vm11, %v4520_v43, %v820_v22  ;;  %vm380_vm11 = vcmp.lt.s32.totalorder %v370_v17, 15  ;;  %v711_v34 = vsel %vm12235_vm3, %v4435_v9, %v701_v2  ;;  %vm12242_vm8 = vcmp.eq.s32.totalorder %v4633_v32, 10 }
  0x9d   : > { %v840_v14 = vsel %vm12253_vm9, %v4523_v44, %v830_v30  ;;  %v381_v29 = vsel %vm380_vm11, %v370_v17, 15  ;;  %v721_v20 = vsel %vm12236_vm0, %v4438_v10, %v711_v34  ;;  %v4725_v36 = vmul.f32 0.6931472, %v4050_v5 }
  0x9e   : > { %v850_v13 = vsel %vm12232_vm12, %v4530_v51, %v840_v14  ;;  %vm12240_vm12 = vcmp.eq.s32.totalorder %v4633_v32, 9  ;;  %vm12243_vm1 = vcmp.eq.s32.totalorder %v4633_v32, 11  ;;  %vm12244_vm11 = vcmp.eq.s32.totalorder %v4633_v32, 12 }
  0x9f   : > { %v860_v63 = vsel %vm12251_vm7, %v4534_v53, %v850_v13  ;;  %v731_v17 = vsel %vm12238_vm5, %v4447_v11, %v721_v20  ;;  %vm12449_vm3 = vcmp.eq.s32.totalorder %v4526_v45, 25  ;;  %vm12246_vm0 = vcmp.eq.s32.totalorder %v4633_v32, 13 }
  0xa0   : > { %v870_v22 = vsel %vm12248_vm6, %v4537_v56, %v860_v63  ;;  %v741_v5 = vsel %vm12240_vm12, %v4450_v12, %v731_v17  ;;  %vm12249_vm5 = vcmp.eq.s32.totalorder %v4633_v32, 14  ;;  %vm12254_vm12 = vcmp.eq.s32.totalorder %v4633_v32, 16 }
  0xa1   : > { %v880_v30 = vsel %vm12239_vm13, %v4540_v16, %v870_v22  ;;  %vm12252_vm13 = vcmp.eq.s32.totalorder %v4633_v32, 15  ;;  %v751_v63 = vsel %vm12242_vm8, %v4463_v23, %v741_v5  ;;  %vm12257_vm8 = vcmp.eq.s32.totalorder %v4633_v32, 19 }
  0xa2   : > { %v890_v14 = vsel %vm12237_vm4, %v4549_v58, %v880_v30  ;;  %vm12450_vm4 = vcmp.lt.s32.totalorder %v4338_v26, 8  ;;  %vm12265_vm6 = vcmp.eq.s32.totalorder %v4633_v32, 25  ;;  %vm12268_vm7 = vcmp.eq.s32.totalorder %v4633_v32, 27 }
  0xa3   : > { %v900_v41 = vsel %vm12449_vm3, %v4552_v60, %v890_v14  ;;  %v394_v13 = vsel %vm12450_vm4, %v4338_v26, %v381_v29  ;;  %vm12451_vm3 = vcmp.eq.s32.totalorder %v4526_v45, 27  ;;  %vm12255_vm4 = vcmp.eq.s32.totalorder %v4633_v32, 17 }
  0xa4   : > { %v910_v48 = vsel %vm12241_vm2, %v4555_v61, %v900_v41  ;;  %v761_v26 = vsel %vm12243_vm1, %v4466_v24, %v751_v63  ;;  %vm12256_vm2 = vcmp.eq.s32.totalorder %v4633_v32, 18  ;;  %v4769_v29 = vadd.s32 %v394_v13, %v4546_v57 }
  0xa5   : > { %v920_v2 = vsel %vm12451_vm3, %v4561_v6, %v910_v48  ;;  %v771_v34 = vsel %vm12244_vm11, %v4474_v25, %v761_v26  ;;  %vm12452_vm3 = vcmp.eq.s32.totalorder %v4526_v45, 29  ;;  %vm12258_vm1 = vcmp.eq.s32.totalorder %v4633_v32, 20 }
  0xa6   : > { %v930_v22 = vsel %vm12245_vm15, %v4564_v7, %v920_v2  ;;  %v781_v20 = vsel %vm12246_vm0, %v4477_v28, %v771_v34  ;;  %vm12259_vm11 = vcmp.eq.s32.totalorder %v4633_v32, 21  ;;  %vm12260_vm15 = vcmp.eq.s32.totalorder %v4633_v32, 22 }
  0xa7   : > { %v940_v30 = vsel %vm12452_vm3, %v4568_v18, %v930_v22  ;;  %v791_v57 = vsel %vm12249_vm5, %v4485_v31, %v781_v20  ;;  %vm12262_vm3 = vcmp.eq.s32.totalorder %v4633_v32, 23  ;;  %vm12263_vm0 = vcmp.eq.s32.totalorder %v4633_v32, 24 }
  0xa8   : > { %v950_v14 = vsel %vm12247_vm10, %v4571_v19, %v940_v30  ;;  %v801_v41 = vsel %vm12252_vm13, %v4499_v39, %v791_v57  ;;  %vm12279_vm5 = vcmp.eq.s32.totalorder %v4769_v29, 1  ;;  %v371_v13 = vadd.s32 8, %v3919_v27 }
  0xa9   : > { %v960_v17 = vsel %vm12250_vm14, %v4592_v47, %v950_v14  ;;  %v811_v5 = vsel %vm12254_vm12, %v4502_v40, %v801_v41  ;;  %vm12278_vm13 = vcmp.eq.s32.totalorder %v4769_v29, 2  ;;  %vm12270_vm9 = vcmp.eq.s32.totalorder %v4633_v32, 28 }
  0xaa   : > { %968 = vst [vmem:[#allocation2] sm:$0xff] %v960_v17  ;;  %v821_v48 = vsel %vm12255_vm4, %v4517_v42, %v811_v5  ;;  %vm12274_vm12 = vcmp.eq.s32.totalorder %v4769_v29, 3  ;;  %vm12261_vm4 = vcmp.eq.s32.totalorder %v4769_v29, 4  ;;  %v662_v2 = vsel %vm12279_vm5, %v4382_v50, %v4379_v49 }
  0xab   : > { %v831_v63 = vsel %vm12256_vm2, %v4520_v43, %v821_v48  ;;  %vm12275_vm10 = vcmp.eq.s32.totalorder %v4633_v32, 31  ;;  %vm12264_vm2 = vcmp.eq.s32.totalorder %v4769_v29, 5  ;;  %v672_v22 = vsel %vm12278_vm13, %v4406_v59, %v662_v2 }
  0xac   : > { %v841_v27 = vsel %vm12257_vm8, %v4523_v44, %v831_v63  ;;  %vm382_vm8 = vcmp.lt.s32.totalorder %v371_v13, 15  ;;  %vm12267_vm14 = vcmp.eq.s32.totalorder %v4769_v29, 6  ;;  %v682_v30 = vsel %vm12274_vm12, %v4414_v0, %v672_v22 }
  0xad   : > { %v851_v26 = vsel %vm12258_vm1, %v4530_v51, %v841_v27  ;;  %v3920_v20 = vtrunc.f32 %v4684_v37  ;;  %vm12266_vm1 = vcmp.eq.s32.totalorder %v4769_v29, 7  ;;  %v692_v57 = vsel %vm12261_vm4, %v4417_v1, %v682_v30 }
  0xae   : > { %v861_v34 = vsel %vm12259_vm11, %v4534_v53, %v851_v26  ;;  %v4846_v17 = vmul.f32 8.0, %v4702_v52  ;;  %vm12269_vm11 = vcmp.eq.s32.totalorder %v4769_v29, 8  ;;  %v702_v37 = vsel %vm12264_vm2, %v4427_v4, %v692_v57 }
  0xaf   : > { %v871_v14 = vsel %vm12260_vm15, %v4537_v56, %v861_v34  ;;  %v383_v5 = vsel %vm382_vm8, %v371_v13, 15  ;;  %vm12272_vm15 = vcmp.eq.s32.totalorder %v4769_v29, 9  ;;  %vm12271_vm4 = vcmp.eq.s32.totalorder %v4769_v29, 10 }
  0xb0   : > { %v881_v41 = vsel %vm12262_vm3, %v4540_v16, %v871_v14  ;;  %v712_v52 = vsel %vm12267_vm14, %v4435_v9, %v702_v37  ;;  %vm12273_vm3 = vcmp.eq.s32.totalorder %v4769_v29, 11  ;;  %vm12276_vm8 = vcmp.eq.s32.totalorder %v4769_v29, 12 }
  0xb1   : > { %v891_v48 = vsel %vm12263_vm0, %v4549_v58, %v881_v41  ;;  %v722_v13 = vsel %vm12266_vm1, %v4438_v10, %v712_v52  ;;  %vm12453_vm0 = vcmp.eq.s32.totalorder %v4633_v32, 26  ;;  %vm12277_vm2 = vcmp.eq.s32.totalorder %v4769_v29, 13 }
  0xb2   : > { %v901_v63 = vsel %vm12265_vm6, %v4552_v60, %v891_v48  ;;  %v732_v2 = vsel %vm12269_vm11, %v4447_v11, %v722_v13  ;;  %vm12454_vm6 = vcmp.lt.s32.totalorder %v4352_v33, 8  ;;  %vm12280_vm1 = vcmp.eq.s32.totalorder %v4769_v29, 14 }
  0xb3   : > { %v911_v27 = vsel %vm12453_vm0, %v4555_v61, %v901_v63  ;;  %v395_v26 = vsel %vm12454_vm6, %v4352_v33, %v383_v5  ;;  %vm12281_vm14 = vcmp.eq.s32.totalorder %v4769_v29, 15  ;;  %v742_v34 = vsel %vm12272_vm15, %v4450_v12, %v732_v2 }
  0xb4   : > { %v921_v22 = vsel %vm12268_vm7, %v4561_v6, %v911_v27  ;;  %vm290_vm0 = vcmp.lt.s32.totalorder %v4374_v46, 8  ;;  %vm12282_vm6 = vcmp.eq.s32.totalorder %v4769_v29, 16  ;;  %v752_v33 = vsel %vm12271_vm4, %v4463_v23, %v742_v34 }
  0xb5   : > { %v931_v30 = vsel %vm12270_vm9, %v4564_v7, %v921_v22  ;;  %v3921_v14 = vcvt.f32.s32 %v3920_v20  ;;  %vm12455_vm7 = vcmp.eq.s32.totalorder %v4633_v32, 29  ;;  %vm12283_vm11 = vcmp.eq.s32.totalorder %v4769_v29, 17 }
  0xb6   : > { %v941_v57 = vsel %vm12455_vm7, %v4568_v18, %v931_v30  ;;  %v762_v41 = vsel %vm12273_vm3, %v4466_v24, %v752_v33  ;;  %v4905_v37 = vadd.s32 %v395_v26, %v4601_v3  ;;  %vm12456_vm9 = vcmp.eq.s32.totalorder %v4633_v32, 30 }
  0xb7   : > { %v951_v5 = vsel %vm12456_vm9, %v4571_v19, %v941_v57  ;;  %vm12284_vm4 = vcmp.eq.s32.totalorder %v4769_v29, 18  ;;  %vm12288_vm15 = vcmp.eq.s32.totalorder %v4769_v29, 19  ;;  %v772_v20 = vsel %vm12276_vm8, %v4474_v25, %v762_v41 }
  0xb8   : > { %v961_v48 = vsel %vm12275_vm10, %v4592_v47, %v951_v5  ;;  %vm12285_vm7 = vcmp.eq.s32.totalorder %v4769_v29, 20  ;;  %vm12286_vm3 = vcmp.eq.s32.totalorder %v4769_v29, 21  ;;  %v782_v3 = vsel %vm12277_vm2, %v4477_v28, %v772_v20 }
  0xb9   : > { %969 = vst [vmem:[#allocation2 + $0x8] sm:$0xff] %v961_v48  ;;  %vm12287_vm9 = vcmp.eq.s32.totalorder %v4769_v29, 22  ;;  %vm12289_vm12 = vcmp.eq.s32.totalorder %v4769_v29, 23  ;;  %v792_v52 = vsel %vm12280_vm1, %v4485_v31, %v782_v3  ;;  %v372_v63 = vadd.s32 8, %v3921_v14 }
  0xba   : > { %vm12293_vm8 = vcmp.eq.s32.totalorder %v4769_v29, 25  ;;  %v802_v13 = vsel %vm12281_vm14, %v4499_v39, %v792_v52  ;;  %vm12306_vm2 = vcmp.eq.s32.totalorder %v4905_v37, 1  ;;  %vm12297_vm5 = vcmp.eq.s32.totalorder %v4769_v29, 27 }
  0xbb   : > { %v812_v27 = vsel %vm12282_vm6, %v4502_v40, %v802_v13  ;;  %vm12301_vm1 = vcmp.eq.s32.totalorder %v4905_v37, 2  ;;  %vm12298_vm14 = vcmp.eq.s32.totalorder %v4905_v37, 3  ;;  %v3922_v26 = vtrunc.f32 %v4846_v17 }
  0xbc   : > { %v822_v2 = vsel %vm12283_vm11, %v4517_v42, %v812_v27  ;;  %vm12295_vm6 = vcmp.eq.s32.totalorder %v4905_v37, 4  ;;  %v663_v34 = vsel %vm12306_vm2, %v4382_v50, %v4379_v49  ;;  %vm384_vm10 = vcmp.lt.s32.totalorder %v372_v63, 15 }
  0xbd   : > { %v832_v22 = vsel %vm12284_vm4, %v4520_v43, %v822_v2  ;;  %vm12302_vm11 = vcmp.eq.s32.totalorder %v4769_v29, 30  ;;  %vm12291_vm13 = vcmp.eq.s32.totalorder %v4905_v37, 5  ;;  %v673_v30 = vsel %vm12301_vm1, %v4406_v59, %v663_v34 }
  0xbe   : > { %v842_v17 = vsel %vm12288_vm15, %v4523_v44, %v832_v22  ;;  %v385_v33 = vsel %vm384_vm10, %v372_v63, 15  ;;  %vm12290_vm4 = vcmp.eq.s32.totalorder %v4905_v37, 6  ;;  %v683_v57 = vsel %vm12298_vm14, %v4414_v0, %v673_v30 }
  0xbf   : > { %v852_v14 = vsel %vm12285_vm7, %v4530_v51, %v842_v17  ;;  %v396_v41 = vsel %vm290_vm0, %v4374_v46, %v385_v33  ;;  %vm12292_vm10 = vcmp.eq.s32.totalorder %v4905_v37, 7  ;;  %v693_v20 = vsel %vm12295_vm6, %v4417_v1, %v683_v57 }
  0xc0   : > { %v862_v5 = vsel %vm12286_vm3, %v4534_v53, %v852_v14  ;;  %v4981_v48 = vadd.s32 %v396_v41, %v4355_v35  ;;  %vm12294_vm7 = vcmp.eq.s32.totalorder %v4905_v37, 8  ;;  %v703_v46 = vsel %vm12291_vm13, %v4427_v4, %v693_v20 }
  0xc1   : > { %v872_v3 = vsel %vm12287_vm9, %v4537_v56, %v862_v5  ;;  %v3923_v52 = vcvt.f32.s32 %v3922_v26  ;;  %vm12305_vm0 = vcmp.eq.s32.totalorder %v4769_v29, 31  ;;  %vm12296_vm3 = vcmp.eq.s32.totalorder %v4905_v37, 9 }
  0xc2   : > { %v882_v63 = vsel %vm12289_vm12, %v4540_v16, %v872_v3  ;;  %v713_v35 = vsel %vm12290_vm4, %v4435_v9, %v703_v46  ;;  %vm12457_vm9 = vcmp.eq.s32.totalorder %v4769_v29, 24  ;;  %vm12299_vm15 = vcmp.eq.s32.totalorder %v4905_v37, 10 }
  0xc3   : > { %v892_v13 = vsel %vm12457_vm9, %v4549_v58, %v882_v63  ;;  %v723_v27 = vsel %vm12292_vm10, %v4438_v10, %v713_v35  ;;  %v350_v2 = vmul.f32 0.36067376, %v4725_v36  ;;  %vm12300_vm12 = vcmp.eq.s32.totalorder %v4905_v37, 11 }
  0xc4   : > { %v902_v26 = vsel %vm12293_vm8, %v4552_v60, %v892_v13  ;;  %vm12303_vm4 = vcmp.eq.s32.totalorder %v4905_v37, 12  ;;  %v733_v22 = vsel %vm12294_vm7, %v4447_v11, %v723_v27  ;;  %vm291_vm9 = vcmp.lt.s32.totalorder %v4444_v8, 8 }
  0xc5   : > { %vm12458_vm13 = vcmp.eq.s32.totalorder %v4769_v29, 26  ;;  %vm12304_vm10 = vcmp.eq.s32.totalorder %v4905_v37, 13  ;;  %v743_v36 = vsel %vm12296_vm3, %v4450_v12, %v733_v22  ;;  %v373_v17 = vadd.s32 8, %v3923_v52 }
  0xc6   : > { %v912_v34 = vsel %vm12458_vm13, %v4555_v61, %v902_v26  ;;  %vm12307_vm8 = vcmp.eq.s32.totalorder %v4905_v37, 14  ;;  %vm12308_vm7 = vcmp.eq.s32.totalorder %v4905_v37, 15  ;;  %v753_v33 = vsel %vm12299_vm15, %v4463_v23, %v743_v36 }
  0xc7   : > { %v922_v30 = vsel %vm12297_vm5, %v4561_v6, %v912_v34  ;;  %vm12459_vm13 = vcmp.eq.s32.totalorder %v4769_v29, 28  ;;  %vm12309_vm6 = vcmp.eq.s32.totalorder %v4905_v37, 16  ;;  %vm12313_vm3 = vcmp.eq.s32.totalorder %v4905_v37, 17 }
  0xc8   : > { %v932_v14 = vsel %vm12459_vm13, %v4564_v7, %v922_v30  ;;  %v763_v57 = vsel %vm12300_vm12, %v4466_v24, %v753_v33  ;;  %vm12460_vm5 = vcmp.eq.s32.totalorder %v4769_v29, 29  ;;  %vm12310_vm14 = vcmp.eq.s32.totalorder %v4905_v37, 18 }
  0xc9   : > { %v942_v41 = vsel %vm12460_vm5, %v4568_v18, %v932_v14  ;;  %vm12311_vm15 = vcmp.eq.s32.totalorder %v4905_v37, 19  ;;  %v773_v5 = vsel %vm12303_vm4, %v4474_v25, %v763_v57  ;;  %vm12312_vm13 = vcmp.eq.s32.totalorder %v4905_v37, 20 }
  0xca   : > { %v952_v20 = vsel %vm12302_vm11, %v4571_v19, %v942_v41  ;;  %v783_v3 = vsel %vm12304_vm10, %v4477_v28, %v773_v5  ;;  %vm386_vm12 = vcmp.lt.s32.totalorder %v373_v17, 15  ;;  %vm12314_vm5 = vcmp.eq.s32.totalorder %v4905_v37, 21 }
  0xcb   : > { %v962_v46 = vsel %vm12305_vm0, %v4592_v47, %v952_v20  ;;  %vm12316_vm1 = vcmp.eq.s32.totalorder %v4905_v37, 22  ;;  %v793_v52 = vsel %vm12307_vm8, %v4485_v31, %v783_v3  ;;  %vm12320_vm4 = vcmp.eq.s32.totalorder %v4905_v37, 24 }
  0xcc   : > { %970 = vst [vmem:[#allocation2 + $0x10] sm:$0xff] %v962_v46  ;;  %v803_v63 = vsel %vm12308_vm7, %v4499_v39, %v793_v52  ;;  %vm12322_vm0 = vcmp.eq.s32.totalorder %v4905_v37, 26  ;;  %vm12334_vm2 = vcmp.eq.s32.totalorder %v4981_v48, 1  ;;  %v387_v13 = vsel %vm386_vm12, %v373_v17, 15 }
  0xcd   : > { %v813_v35 = vsel %vm12309_vm6, %v4502_v40, %v803_v63  ;;  %vm12324_vm8 = vcmp.eq.s32.totalorder %v4905_v37, 27  ;;  %vm12326_vm11 = vcmp.eq.s32.totalorder %v4905_v37, 28  ;;  %vm12315_vm10 = vcmp.eq.s32.totalorder %v4981_v48, 2 }
  0xce   : > { %v823_v27 = vsel %vm12313_vm3, %v4517_v42, %v813_v35  ;;  %vm12329_vm7 = vcmp.eq.s32.totalorder %v4905_v37, 29  ;;  %vm12317_vm6 = vcmp.eq.s32.totalorder %v4981_v48, 3  ;;  %v358_v22 = vmul.f32 8.0, %v350_v2 }
  0xcf   : > { %v833_v26 = vsel %vm12310_vm14, %v4520_v43, %v823_v27  ;;  %vm12318_vm12 = vcmp.eq.s32.totalorder %v4981_v48, 4  ;;  %v664_v36 = vsel %vm12334_vm2, %v4382_v50, %v4379_v49  ;;  %v397_v17 = vsel %vm291_vm9, %v4444_v8, %v387_v13 }
  0xd0   : > { %v843_v34 = vsel %vm12311_vm15, %v4523_v44, %v833_v26  ;;  %vm12319_vm14 = vcmp.eq.s32.totalorder %v4981_v48, 5  ;;  %v674_v2 = vsel %vm12315_vm10, %v4406_v59, %v664_v36  ;;  %v5102_v33 = vadd.s32 %v397_v17, %v4396_v54 }
  0xd1   : > { %v853_v30 = vsel %vm12312_vm13, %v4530_v51, %v843_v34  ;;  %vm12331_vm15 = vcmp.eq.s32.totalorder %v4905_v37, 30  ;;  %vm12321_vm9 = vcmp.eq.s32.totalorder %v4981_v48, 6  ;;  %v684_v8 = vsel %vm12317_vm6, %v4414_v0, %v674_v2 }
  0xd2   : > { %v863_v14 = vsel %vm12314_vm5, %v4534_v53, %v853_v30  ;;  %vm12333_vm13 = vcmp.eq.s32.totalorder %v4905_v37, 31  ;;  %vm12328_vm3 = vcmp.eq.s32.totalorder %v4981_v48, 7  ;;  %v694_v54 = vsel %vm12318_vm12, %v4417_v1, %v684_v8 }
  0xd3   : > { %v873_v57 = vsel %vm12316_vm1, %v4537_v56, %v863_v14  ;;  %vm12461_vm5 = vcmp.eq.s32.totalorder %v4905_v37, 23  ;;  %vm12323_vm10 = vcmp.eq.s32.totalorder %v4981_v48, 8  ;;  %v704_v5 = vsel %vm12319_vm14, %v4427_v4, %v694_v54 }
  0xd4   : > { %v883_v41 = vsel %vm12461_vm5, %v4540_v16, %v873_v57  ;;  %v3924_v20 = vtrunc.f32 %v358_v22  ;;  %vm12325_vm1 = vcmp.eq.s32.totalorder %v4981_v48, 9  ;;  %vm12327_vm6 = vcmp.eq.s32.totalorder %v4981_v48, 10 }
  0xd5   : > { %v893_v3 = vsel %vm12320_vm4, %v4549_v58, %v883_v41  ;;  %v714_v46 = vsel %vm12321_vm9, %v4435_v9, %v704_v5  ;;  %vm12462_vm5 = vcmp.eq.s32.totalorder %v4905_v37, 25  ;;  %vm12330_vm12 = vcmp.eq.s32.totalorder %v4981_v48, 11 }
  0xd6   : > { %v903_v52 = vsel %vm12462_vm5, %v4552_v60, %v893_v3  ;;  %vm12332_vm14 = vcmp.eq.s32.totalorder %v4981_v48, 12  ;;  %v724_v63 = vsel %vm12328_vm3, %v4438_v10, %v714_v46  ;;  %vm12335_vm4 = vcmp.eq.s32.totalorder %v4981_v48, 13 }
  0xd7   : > { %v913_v35 = vsel %vm12322_vm0, %v4555_v61, %v903_v52  ;;  %vm12336_vm9 = vcmp.eq.s32.totalorder %v4981_v48, 14  ;;  %v734_v13 = vsel %vm12323_vm10, %v4447_v11, %v724_v63  ;;  %vm12337_vm5 = vcmp.eq.s32.totalorder %v4981_v48, 15 }
  0xd8   : > { %v923_v27 = vsel %vm12324_vm8, %v4561_v6, %v913_v35  ;;  %v744_v26 = vsel %vm12325_vm1, %v4450_v12, %v734_v13  ;;  %4051 = vlog2.f32 %v4607_v15  ;;  %vm12338_vm0 = vcmp.eq.s32.totalorder %v4981_v48, 16 }
  0xd9   : > { %v933_v22 = vsel %vm12326_vm11, %v4564_v7, %v923_v27  ;;  %vm12339_vm10 = vcmp.eq.s32.totalorder %v4981_v48, 17  ;;  %v754_v34 = vsel %vm12327_vm6, %v4463_v23, %v744_v26  ;;  %vm12341_vm8 = vcmp.eq.s32.totalorder %v4981_v48, 18 }
  0xda   : > { %v943_v36 = vsel %vm12329_vm7, %v4568_v18, %v933_v22  ;;  %vm12343_vm1 = vcmp.eq.s32.totalorder %v4981_v48, 19  ;;  %v764_v15 = vsel %vm12330_vm12, %v4466_v24, %v754_v34  ;;  %vm292_vm11 = vcmp.lt.s32.totalorder %v4458_v21, 8 }
  0xdb   : > { %v953_v17 = vsel %vm12331_vm15, %v4571_v19, %v943_v36  ;;  %vm12364_vm6 = vcmp.eq.s32.totalorder %v4981_v48, 20  ;;  %vm12362_vm3 = vcmp.eq.s32.totalorder %v4981_v48, 21  ;;  %v774_v30 = vsel %vm12332_vm14, %v4474_v25, %v764_v15 }
  0xdc   : > { %v963_v2 = vsel %vm12333_vm13, %v4592_v47, %v953_v17  ;;  %vm12350_vm7 = vcmp.eq.s32.totalorder %v4981_v48, 22  ;;  %v784_v14 = vsel %vm12335_vm4, %v4477_v28, %v774_v30  ;;  %vm12349_vm15 = vcmp.eq.s32.totalorder %v4981_v48, 24 }
  0xdd   : > { %971 = vst [vmem:[#allocation2 + $0x18] sm:$0xff] %v963_v2  ;;  %v794_v8 = vsel %vm12336_vm9, %v4485_v31, %v784_v14  ;;  %vm12340_vm14 = vcmp.eq.s32.totalorder %v5102_v33, 1  ;;  %v3925_v57 = vcvt.f32.s32 %v3924_v20  ;;  %vm12342_vm4 = vcmp.eq.s32.totalorder %v5102_v33, 2 }
  0xde   : > { %v804_v54 = vsel %vm12337_vm5, %v4499_v39, %v794_v8  ;;  %vm12353_vm12 = vcmp.eq.s32.totalorder %v4981_v48, 27  ;;  %vm12344_vm9 = vcmp.eq.s32.totalorder %v5102_v33, 3  ;;  %v5211_v5 = vstv %s5151_s1  ;;  %s5592_s1 = sld [smem:[#allocation3 + $0x91]] }
  0xdf   : > { %v814_v41 = vsel %vm12338_vm0, %v4502_v40, %v804_v54  ;;  %vm12345_vm5 = vcmp.eq.s32.totalorder %v5102_v33, 4  ;;  %vm12346_vm2 = vcmp.eq.s32.totalorder %v5102_v33, 5  ;;  %v665_v3 = vsel %vm12340_vm14, %v4382_v50, %v4379_v49 }
  0xe0   : > { %v824_v20 = vsel %vm12339_vm10, %v4517_v42, %v814_v41  ;;  %vm12348_vm13 = vcmp.eq.s32.totalorder %v5102_v33, 6  ;;  %v675_v52 = vsel %vm12342_vm4, %v4406_v59, %v665_v3  ;;  %v374_v63 = vadd.s32 8, %v3925_v57 }
  0xe1   : > { %v834_v46 = vsel %vm12341_vm8, %v4520_v43, %v824_v20  ;;  %vm12360_vm10 = vcmp.eq.s32.totalorder %v4981_v48, 30  ;;  %vm12347_vm14 = vcmp.eq.s32.totalorder %v5102_v33, 7  ;;  %vm12351_vm0 = vcmp.eq.s32.totalorder %v5102_v33, 8 }
  0xe2   : > { %v4052_v35 = vpop.eup %4051  ;;  %v844_v13 = vsel %vm12343_vm1, %v4523_v44, %v834_v46  ;;  %v685_v27 = vsel %vm12344_vm9, %v4414_v0, %v675_v52  ;;  %vm12357_vm8 = vcmp.eq.s32.totalorder %v4981_v48, 31  ;;  %vm12355_vm4 = vcmp.eq.s32.totalorder %v5102_v33, 9 }
  0xe3   : > { %v854_v26 = vsel %vm12364_vm6, %v4530_v51, %v844_v13  ;;  %v695_v22 = vsel %vm12345_vm5, %v4417_v1, %v685_v27  ;;  %vm388_vm1 = vcmp.lt.s32.totalorder %v374_v63, 15  ;;  %vm12352_vm9 = vcmp.eq.s32.totalorder %v5102_v33, 10 }
  0xe4   : > { %v864_v34 = vsel %vm12362_vm3, %v4534_v53, %v854_v26  ;;  %v705_v36 = vsel %vm12346_vm2, %v4427_v4, %v695_v22  ;;  %v389_v15 = vsel %vm388_vm1, %v374_v63, 15  ;;  %v342_v14 = vmul.f32 0.6931472, %v4052_v35 }
  0xe5   : > { %v874_v17 = vsel %vm12350_vm7, %v4537_v56, %v864_v34  ;;  %v715_v30 = vsel %vm12348_vm13, %v4435_v9, %v705_v36  ;;  %v398_v2 = vsel %vm292_vm11, %v4458_v21, %v389_v15  ;;  %vm12463_vm5 = vcmp.eq.s32.totalorder %v4981_v48, 23 }
  0xe6   : > { %v884_v8 = vsel %vm12463_vm5, %v4540_v16, %v874_v17  ;;  %vm12354_vm2 = vcmp.eq.s32.totalorder %v5102_v33, 11  ;;  %v725_v57 = vsel %vm12347_vm14, %v4438_v10, %v715_v30  ;;  %v5274_v54 = vadd.s32 %v398_v2, %v4399_v55 }
  0xe7   : > { %v894_v21 = vsel %vm12349_vm15, %v4549_v58, %v884_v8  ;;  %vm12361_vm1 = vcmp.eq.s32.totalorder %v5102_v33, 12  ;;  %vm12358_vm11 = vcmp.eq.s32.totalorder %v5102_v33, 13  ;;  %v735_v41 = vsel %vm12351_vm0, %v4447_v11, %v725_v57 }
  0xe8   : > { %vm12464_vm5 = vcmp.eq.s32.totalorder %v4981_v48, 25  ;;  %vm12356_vm14 = vcmp.eq.s32.totalorder %v5102_v33, 14  ;;  %vm12359_vm13 = vcmp.eq.s32.totalorder %v5102_v33, 15  ;;  %v745_v55 = vsel %vm12355_vm4, %v4450_v12, %v735_v41 }
  0xe9   : > { %v904_v20 = vsel %vm12464_vm5, %v4552_v60, %v894_v21  ;;  %vm12465_vm15 = vcmp.eq.s32.totalorder %v4981_v48, 26  ;;  %vm12363_vm7 = vcmp.eq.s32.totalorder %v5102_v33, 16  ;;  %v755_v46 = vsel %vm12352_vm9, %v4463_v23, %v745_v55 }
  0xea   : > { %v914_v3 = vsel %vm12465_vm15, %v4555_v61, %v904_v20  ;;  %v351_v52 = vmul.f32 0.36067376, %v342_v14  ;;  %vm12365_vm5 = vcmp.eq.s32.totalorder %v5102_v33, 17  ;;  %vm12366_vm0 = vcmp.eq.s32.totalorder %v5102_v33, 18 }
  0xeb   : > { %v924_v63 = vsel %vm12353_vm12, %v4561_v6, %v914_v3  ;;  %v765_v35 = vsel %vm12354_vm2, %v4466_v24, %v755_v46  ;;  %vm12466_vm15 = vcmp.eq.s32.totalorder %v4981_v48, 28  ;;  %vm12367_vm9 = vcmp.eq.s32.totalorder %v5102_v33, 19 }
  0xec   : > { %v934_v13 = vsel %vm12466_vm15, %v4564_v7, %v924_v63  ;;  %v775_v27 = vsel %vm12361_vm1, %v4474_v25, %v765_v35  ;;  %v5319_v26 = vstv %s5248_s15  ;;  %vm12467_vm12 = vcmp.eq.s32.totalorder %v4981_v48, 29  ;;  %s5607_s15 = sld [smem:[#allocation3 + $0x92]] }
  0xed   : > { %v944_v22 = vsel %vm12467_vm12, %v4568_v18, %v934_v13  ;;  %vm12375_vm2 = vcmp.eq.s32.totalorder %v5102_v33, 20  ;;  %vm12368_vm4 = vcmp.eq.s32.totalorder %v5102_v33, 21  ;;  %v785_v34 = vsel %vm12358_vm11, %v4477_v28, %v775_v27 }
  0xee   : > { %v954_v36 = vsel %vm12360_vm10, %v4571_v19, %v944_v22  ;;  %vm12370_vm15 = vcmp.eq.s32.totalorder %v5102_v33, 22  ;;  %v795_v15 = vsel %vm12356_vm14, %v4485_v31, %v785_v34  ;;  %v359_v17 = vmul.f32 8.0, %v351_v52 }
  0xef   : > { %v964_v30 = vsel %vm12357_vm8, %v4592_v47, %v954_v36  ;;  %v805_v2 = vsel %vm12359_vm13, %v4499_v39, %v795_v15  ;;  %vm12468_vm12 = vcmp.eq.s32.totalorder %v4526_v45, 1  ;;  %v5347_v8 = vstv %s5276_s25  ;;  %s5622_s25 = sld [smem:[#allocation3 + $0x93]] }
  0xf0   : > { %v980_v14 = vsel %vm12468_vm12, %v5319_v26, %v5211_v5  ;;  %972 = vst [vmem:[#allocation2 + $0x20] sm:$0xff] %v964_v30  ;;  %vm12369_vm14 = vcmp.eq.s32.totalorder %v5102_v33, 23  ;;  %vm12371_vm8 = vcmp.eq.s32.totalorder %v5102_v33, 24  ;;  %vm12373_vm11 = vcmp.eq.s32.totalorder %v5102_v33, 25 }
  0xf1   : > { %v815_v57 = vsel %vm12363_vm7, %v4502_v40, %v805_v2  ;;  %vm12372_vm12 = vcmp.eq.s32.totalorder %v5102_v33, 26  ;;  %vm12374_vm13 = vcmp.eq.s32.totalorder %v5102_v33, 27  ;;  %vm12391_vm7 = vcmp.eq.s32.totalorder %v5274_v54, 1 }
  0xf2   : > { %v825_v21 = vsel %vm12365_vm5, %v4517_v42, %v815_v57  ;;  %v3926_v20 = vtrunc.f32 %v359_v17  ;;  %vm12469_vm6 = vcmp.eq.s32.totalorder %v4526_v45, 2  ;;  %vm12389_vm5 = vcmp.eq.s32.totalorder %v5274_v54, 2 }
  0xf3   : > { %v835_v41 = vsel %vm12366_vm0, %v4520_v43, %v825_v21  ;;  %v990_v55 = vsel %vm12469_vm6, %v5347_v8, %v980_v14  ;;  %vm12387_vm3 = vcmp.eq.s32.totalorder %v5274_v54, 3  ;;  %v5381_v46 = vstv %s5309_s3  ;;  %s5637_s3 = sld [smem:[#allocation3 + $0x94]] }
  0xf4   : > { %v845_v3 = vsel %vm12367_vm9, %v4523_v44, %v835_v41  ;;  %vm12386_vm6 = vcmp.eq.s32.totalorder %v5274_v54, 4  ;;  %vm12383_vm10 = vcmp.eq.s32.totalorder %v5274_v54, 5  ;;  %vm12381_vm9 = vcmp.eq.s32.totalorder %v5274_v54, 6 }
  0xf5   : > { %v855_v52 = vsel %vm12375_vm2, %v4530_v51, %v845_v3  ;;  %vm12380_vm0 = vcmp.eq.s32.totalorder %v5274_v54, 7  ;;  %vm12378_vm1 = vcmp.eq.s32.totalorder %v5274_v54, 8  ;;  %v666_v35 = vsel %vm12391_vm7, %v4382_v50, %v4379_v49 }
  0xf6   : > { %v865_v63 = vsel %vm12368_vm4, %v4534_v53, %v855_v52  ;;  %v676_v27 = vsel %vm12389_vm5, %v4406_v59, %v666_v35  ;;  %v3927_v22 = vcvt.f32.s32 %v3926_v20  ;;  %vm12470_vm4 = vcmp.eq.s32.totalorder %v4526_v45, 3 }
  0xf7   : > { %v875_v13 = vsel %vm12370_vm15, %v4537_v56, %v865_v63  ;;  %v1000_v34 = vsel %vm12470_vm4, %v5381_v46, %v990_v55  ;;  %v686_v15 = vsel %vm12387_vm3, %v4414_v0, %v676_v27  ;;  %v5417_v17 = vstv %s5349_s4  ;;  %s5639_s4 = sld [smem:[#allocation3 + $0x95]] }
  0xf8   : > { %v885_v36 = vsel %vm12369_vm14, %v4540_v16, %v875_v13  ;;  %v5420_v30 = vstv %s5351_s5  ;;  %v696_v14 = vsel %vm12386_vm6, %v4417_v1, %v686_v15  ;;  %v375_v57 = vadd.s32 8, %v3927_v22  ;;  %s5654_s5 = sld [smem:[#allocation3 + $0x96]] }
  0xf9   : > { %v895_v2 = vsel %vm12371_vm8, %v4549_v58, %v885_v36  ;;  %vm12471_vm4 = vcmp.eq.s32.totalorder %v4526_v45, 4  ;;  %vm12376_vm14 = vcmp.eq.s32.totalorder %v5274_v54, 9  ;;  %vm12377_vm15 = vcmp.eq.s32.totalorder %v5274_v54, 10 }
  0xfa   : > { %v1010_v21 = vsel %vm12471_vm4, %v5417_v17, %v1000_v34  ;;  %v905_v41 = vsel %vm12373_vm11, %v4552_v60, %v895_v2  ;;  %v706_v20 = vsel %vm12383_vm10, %v4427_v4, %v696_v14  ;;  %vm12379_vm8 = vcmp.eq.s32.totalorder %v5274_v54, 11 }
  0xfb   : > { %v915_v55 = vsel %vm12372_vm12, %v4555_v61, %v905_v41  ;;  %v716_v3 = vsel %vm12381_vm9, %v4435_v9, %v706_v20  ;;  %vm390_vm4 = vcmp.lt.s32.totalorder %v375_v57, 15  ;;  %vm12472_vm12 = vcmp.eq.s32.totalorder %v4526_v45, 5 }
  0xfc   : > { %v925_v52 = vsel %vm12374_vm13, %v4561_v6, %v915_v55  ;;  %v726_v63 = vsel %vm12380_vm0, %v4438_v10, %v716_v3  ;;  %v391_v35 = vsel %vm390_vm4, %v375_v57, 15  ;;  %v1020_v13 = vsel %vm12472_vm12, %v5420_v30, %v1010_v21 }
  0xfd   : > { %vm12473_vm11 = vcmp.eq.s32.totalorder %v5102_v33, 28  ;;  %v736_v22 = vsel %vm12378_vm1, %v4447_v11, %v726_v63  ;;  %vm12474_vm13 = vcmp.lt.s32.totalorder %v4496_v38, 8  ;;  %v5469_v36 = vstv %s5390_s8  ;;  %s5656_s8 = sld [smem:[#allocation3 + $0x97]] }
  0xfe   : > { %v935_v27 = vsel %vm12473_vm11, %v4564_v7, %v925_v52  ;;  %v399_v34 = vsel %vm12474_vm13, %v4496_v38, %v391_v35  ;;  %vm12475_vm4 = vcmp.eq.s32.totalorder %v5102_v33, 29  ;;  %vm12382_vm12 = vcmp.eq.s32.totalorder %v5274_v54, 12 }
  0xff   : > { %v945_v15 = vsel %vm12475_vm4, %v4568_v18, %v935_v27  ;;  %v746_v2 = vsel %vm12376_vm14, %v4450_v12, %v736_v22  ;;  %v5479_v14 = vadd.s32 %v399_v34, %v4411_v62  ;;  %vm12476_vm13 = vcmp.eq.s32.totalorder %v5102_v33, 30 }
 0x100   : > { %v955_v38 = vsel %vm12476_vm13, %v4571_v19, %v945_v15  ;;  %vm12384_vm11 = vcmp.eq.s32.totalorder %v5274_v54, 13  ;;  %vm12385_vm2 = vcmp.eq.s32.totalorder %v5274_v54, 14  ;;  %v756_v57 = vsel %vm12377_vm15, %v4463_v23, %v746_v2 }
 0x101   : > { %vm12477_vm4 = vcmp.eq.s32.totalorder %v5102_v33, 31  ;;  %v766_v62 = vsel %vm12379_vm8, %v4466_v24, %v756_v57  ;;  %vm12478_vm13 = vcmp.eq.s32.totalorder %v4526_v45, 6  ;;  %v5501_v20 = vstv %s5422_s18  ;;  %s5671_s18 = sld [smem:[#allocation3 + $0x98]] }
 0x102   : > { %v965_v21 = vsel %vm12477_vm4, %v4592_v47, %v955_v38  ;;  %v1030_v41 = vsel %vm12478_vm13, %v5469_v36, %v1020_v13  ;;  %vm12388_vm14 = vcmp.eq.s32.totalorder %v5274_v54, 15  ;;  %vm12390_vm15 = vcmp.eq.s32.totalorder %v5274_v54, 16 }
 0x103   : > { %973 = vst [vmem:[#allocation2 + $0x28] sm:$0xff] %v965_v21  ;;  %vm12392_vm1 = vcmp.eq.s32.totalorder %v5274_v54, 17  ;;  %v776_v55 = vsel %vm12382_vm12, %v4474_v25, %v766_v62  ;;  %vm12393_vm4 = vcmp.eq.s32.totalorder %v5274_v54, 18  ;;  %vm12394_vm8 = vcmp.eq.s32.totalorder %v5274_v54, 19 }
 0x104   : > { %vm12395_vm0 = vcmp.eq.s32.totalorder %v5274_v54, 20  ;;  %v786_v3 = vsel %vm12384_vm11, %v4477_v28, %v776_v55  ;;  %vm12396_vm13 = vcmp.eq.s32.totalorder %v5274_v54, 21  ;;  %vm12479_vm9 = vcmp.eq.s32.totalorder %v4526_v45, 7 }
 0x105   : > { %v796_v52 = vsel %vm12385_vm2, %v4485_v31, %v786_v3  ;;  %v1040_v63 = vsel %vm12479_vm9, %v5501_v20, %v1030_v41  ;;  %v5523_v35 = vstv %s5448_s21  ;;  %vm12397_vm12 = vcmp.eq.s32.totalorder %v5274_v54, 22  ;;  %s5673_s21 = sld [smem:[#allocation3 + $0x99]] }
 0x106   : > { %vm12399_vm10 = vcmp.eq.s32.totalorder %v5274_v54, 23  ;;  %vm12400_vm11 = vcmp.eq.s32.totalorder %v5274_v54, 24  ;;  %v806_v13 = vsel %vm12388_vm14, %v4499_v39, %v796_v52  ;;  %vm12415_vm14 = vcmp.eq.s32.totalorder %v5479_v14, 1 }
 0x107   : > { %v816_v27 = vsel %vm12390_vm15, %v4502_v40, %v806_v13  ;;  %vm12480_vm5 = vcmp.eq.s32.totalorder %v4526_v45, 8  ;;  %v5552_v15 = vstv %s5481_s22  ;;  %vm12398_vm7 = vcmp.eq.s32.totalorder %v5479_v14, 2  ;;  %s5688_s22 = sld [smem:[#allocation3 + $0x9a]] }
 0x108   : > { %v826_v22 = vsel %vm12392_vm1, %v4517_v42, %v816_v27  ;;  %v1050_v34 = vsel %vm12480_vm5, %v5523_v35, %v1040_v63  ;;  %vm12404_vm1 = vcmp.eq.s32.totalorder %v5479_v14, 3  ;;  %vm12401_vm3 = vcmp.eq.s32.totalorder %v5479_v14, 4 }
 0x109   : > { %v836_v2 = vsel %vm12393_vm4, %v4520_v43, %v826_v22  ;;  %vm12402_vm15 = vcmp.eq.s32.totalorder %v5479_v14, 5  ;;  %vm12403_vm6 = vcmp.eq.s32.totalorder %v5479_v14, 6  ;;  %vm12405_vm5 = vcmp.eq.s32.totalorder %v5479_v14, 8 }
 0x10a   : > { %v846_v38 = vsel %vm12394_vm8, %v4523_v44, %v836_v2  ;;  %vm12406_vm2 = vcmp.eq.s32.totalorder %v5479_v14, 9  ;;  %vm12407_vm8 = vcmp.eq.s32.totalorder %v5479_v14, 10  ;;  %vm12408_vm4 = vcmp.eq.s32.totalorder %v5479_v14, 11 }
 0x10b   : > { %v856_v57 = vsel %vm12395_vm0, %v4530_v51, %v846_v38  ;;  %vm12409_vm9 = vcmp.eq.s32.totalorder %v5479_v14, 12  ;;  %v667_v62 = vsel %vm12415_vm14, %v4382_v50, %v4379_v49  ;;  %vm12410_vm0 = vcmp.eq.s32.totalorder %v5479_v14, 13 }
 0x10c   : > { %v866_v21 = vsel %vm12396_vm13, %v4534_v53, %v856_v57  ;;  %v677_v55 = vsel %vm12398_vm7, %v4406_v59, %v667_v62  ;;  %vm12481_vm13 = vcmp.eq.s32.totalorder %v4526_v45, 9  ;;  %v5605_v52 = vstv %s5525_s27  ;;  %s5690_s27 = sld [smem:[#allocation3 + $0x9b]] }
 0x10d   : > { %v876_v41 = vsel %vm12397_vm12, %v4537_v56, %v866_v21  ;;  %v1060_v3 = vsel %vm12481_vm13, %v5552_v15, %v1050_v34  ;;  %vm12411_vm12 = vcmp.eq.s32.totalorder %v5479_v14, 14  ;;  %v687_v50 = vsel %vm12404_vm1, %v4414_v0, %v677_v55 }
 0x10e   : > { %v886_v49 = vsel %vm12399_vm10, %v4540_v16, %v876_v41  ;;  %vm12482_vm7 = vcmp.eq.s32.totalorder %v4526_v45, 10  ;;  %v5620_v63 = vstv %s5533_s28  ;;  %vm12412_vm13 = vcmp.eq.s32.totalorder %v5479_v14, 15  ;;  %s5705_s28 = sld [smem:[#allocation3 + $0x9c]] }
 0x10f   : > { %v1070_v59 = vsel %vm12482_vm7, %v5605_v52, %v1060_v3  ;;  %v896_v13 = vsel %vm12400_vm11, %v4549_v58, %v886_v49  ;;  %v697_v27 = vsel %vm12401_vm3, %v4417_v1, %v687_v50  ;;  %vm12483_vm10 = vcmp.eq.s32.totalorder %v4526_v45, 11 }
 0x110   : > { %v1080_v0 = vsel %vm12483_vm10, %v5620_v63, %v1070_v59  ;;  %v5635_v22 = vstv %s5541_s6  ;;  %vm12484_vm7 = vcmp.eq.s32.totalorder %v5274_v54, 25  ;;  %vm12413_vm11 = vcmp.eq.s32.totalorder %v5479_v14, 16  ;;  %s5707_s6 = sld [smem:[#allocation3 + $0x9d]] }
 0x111   : > { %v906_v34 = vsel %vm12484_vm7, %v4552_v60, %v896_v13  ;;  %v707_v1 = vsel %vm12402_vm15, %v4427_v4, %v697_v27  ;;  %vm12485_vm3 = vcmp.eq.s32.totalorder %v4526_v45, 12  ;;  %v5652_v38 = vstv %s5554_s7  ;;  %s5722_s7 = sld [smem:[#allocation3 + $0x9e]] }
 0x112   : > { %v1090_v2 = vsel %vm12485_vm3, %v5635_v22, %v1080_v0  ;;  %vm12486_vm10 = vcmp.eq.s32.totalorder %v5274_v54, 26  ;;  %vm12414_vm7 = vcmp.eq.s32.totalorder %v5479_v14, 17  ;;  %v717_v4 = vsel %vm12403_vm6, %v4435_v9, %v707_v1 }
 0x113   : > { %v916_v57 = vsel %vm12486_vm10, %v4555_v61, %v906_v34  ;;  %vm12487_vm15 = vcmp.eq.s32.totalorder %v4526_v45, 13  ;;  %v5669_v62 = vstv %s5563_s20  ;;  %vm12488_vm3 = vcmp.eq.s32.totalorder %v5274_v54, 27  ;;  %s5724_s20 = sld [smem:[#allocation3 + $0x9f]] }
 0x114   : > { %v1100_v21 = vsel %vm12487_vm15, %v5652_v38, %v1090_v2  ;;  %v926_v41 = vsel %vm12488_vm3, %v4561_v6, %v916_v57  ;;  %vm12416_vm10 = vcmp.eq.s32.totalorder %v5479_v14, 18  ;;  %vm12489_vm6 = vcmp.eq.s32.totalorder %v5479_v14, 7 }
 0x115   : > { %v727_v9 = vsel %vm12489_vm6, %v4438_v10, %v717_v4  ;;  %vm12490_vm1 = vcmp.eq.s32.totalorder %v4526_v45, 14  ;;  %v5686_v3 = vstv %s5572_s17  ;;  %vm12491_vm15 = vcmp.eq.s32.totalorder %v5274_v54, 28  ;;  %s6295_s17 = sld [smem:[#allocation3 + $0x100]] }
 0x116   : > { %v1110_v55 = vsel %vm12490_vm1, %v5669_v62, %v1100_v21  ;;  %v936_v49 = vsel %vm12491_vm15, %v4564_v7, %v926_v41  ;;  %vm12417_vm3 = vcmp.eq.s32.totalorder %v5479_v14, 19  ;;  %v737_v10 = vsel %vm12405_vm5, %v4447_v11, %v727_v9 }
 0x117   : > { %vm12492_vm6 = vcmp.eq.s32.totalorder %v4526_v45, 15  ;;  %v5703_v59 = vstv %s5581_s24  ;;  %vm12493_vm1 = vcmp.eq.s32.totalorder %v5274_v54, 29  ;;  %vm12418_vm15 = vcmp.eq.s32.totalorder %v5479_v14, 20  ;;  %s6310_s24 = sld [smem:[#allocation3 + $0x101]] }
 0x118   : > { %v1120_v50 = vsel %vm12492_vm6, %v5686_v3, %v1110_v55  ;;  %v946_v13 = vsel %vm12493_vm1, %v4568_v18, %v936_v49  ;;  %v747_v11 = vsel %vm12406_vm2, %v4450_v12, %v737_v10  ;;  %vm12494_vm6 = vcmp.eq.s32.totalorder %v4526_v45, 16 }
 0x119   : > { %v1130_v27 = vsel %vm12494_vm6, %v5703_v59, %v1120_v50  ;;  %v5720_v0 = vstv %s5592_s1  ;;  %vm12495_vm1 = vcmp.eq.s32.totalorder %v5274_v54, 30  ;;  %vm575_vm5 = vcmp.eq.s32.totalorder %v5479_v14, 21  ;;  %s6336_s1 = sld [smem:[#allocation3 + $0x102]] }
 0x11a   : > { %v956_v34 = vsel %vm12495_vm1, %v4571_v19, %v946_v13  ;;  %v757_v12 = vsel %vm12407_vm8, %v4463_v23, %v747_v11  ;;  %vm12496_vm6 = vcmp.eq.s32.totalorder %v4526_v45, 17  ;;  %v5737_v2 = vstv %s5607_s15  ;;  %s6362_s15 = sld [smem:[#allocation3 + $0x103]] }
 0x11b   : > { %v1140_v1 = vsel %vm12496_vm6, %v5720_v0, %v1130_v27  ;;  %vm12497_vm2 = vcmp.eq.s32.totalorder %v5274_v54, 31  ;;  %vm583_vm1 = vcmp.eq.s32.totalorder %v5479_v14, 22  ;;  %v767_v4 = vsel %vm12408_vm4, %v4466_v24, %v757_v12 }
 0x11c   : > { %v966_v57 = vsel %vm12497_vm2, %v4592_v47, %v956_v34  ;;  %vm12498_vm8 = vcmp.eq.s32.totalorder %v4526_v45, 18  ;;  %v5750_v21 = vstv %s5622_s25  ;;  %vm591_vm6 = vcmp.eq.s32.totalorder %v5479_v14, 23  ;;  %s6388_s25 = sld [smem:[#allocation3 + $0x104]] }
 0x11d   : > { %v1150_v23 = vsel %vm12498_vm8, %v5737_v2, %v1140_v1  ;;  %974 = vst [vmem:[#allocation2 + $0x30] sm:$0xff] %v966_v57  ;;  %v777_v41 = vsel %vm12409_vm9, %v4474_v25, %v767_v4  ;;  %vm12499_vm2 = vcmp.eq.s32.totalorder %v4526_v45, 19  ;;  %v5760_v24 = vstv %s5637_s3  ;;  %s6414_s3 = sld [smem:[#allocation3 + $0x105]] }
 0x11e   : > { %v1160_v9 = vsel %vm12499_vm2, %v5750_v21, %v1150_v23  ;;  %v5763_v55 = vstv %s5639_s4  ;;  %vm599_vm8 = vcmp.eq.s32.totalorder %v5479_v14, 24  ;;  %v787_v49 = vsel %vm12410_vm0, %v4477_v28, %v777_v41  ;;  %s6441_s4 = sld [smem:[#allocation3 + $0x106]] }
 0x11f   : > { %vm12500_vm4 = vcmp.eq.s32.totalorder %v4526_v45, 20  ;;  %v5773_v10 = vstv %s5654_s5  ;;  %v5776_v50 = vstv %s5656_s8  ;;  %vm607_vm2 = vcmp.eq.s32.totalorder %v5479_v14, 25  ;;  %s6467_s5 = sld [smem:[#allocation3 + $0x107]]  ;;  %s6493_s8 = sld [smem:[#allocation3 + $0x108]] }
 0x120   : > { %v1170_v25 = vsel %vm12500_vm4, %v5760_v24, %v1160_v9  ;;  %v797_v13 = vsel %vm12411_vm12, %v4485_v31, %v787_v49  ;;  %vm12501_vm9 = vcmp.eq.s32.totalorder %v4526_v45, 21  ;;  %v5786_v11 = vstv %s5671_s18  ;;  %s6495_s18 = sld [smem:[#allocation3 + $0x109]] }
 0x121   : > { %v1180_v28 = vsel %vm12501_vm9, %v5763_v55, %v1170_v25  ;;  %v5789_v27 = vstv %s5673_s21  ;;  %vm615_vm4 = vcmp.eq.s32.totalorder %v5479_v14, 26  ;;  %v807_v34 = vsel %vm12412_vm13, %v4499_v39, %v797_v13  ;;  %s6509_s21 = sld [smem:[#allocation3 + $0x10a]] }
 0x122   : > { %vm12502_vm0 = vcmp.eq.s32.totalorder %v4526_v45, 22  ;;  %v5799_v12 = vstv %s5688_s22  ;;  %v5802_v1 = vstv %s5690_s27  ;;  %vm623_vm9 = vcmp.eq.s32.totalorder %v5479_v14, 27  ;;  %s6511_s22 = sld [smem:[#allocation3 + $0x10b]]  ;;  %s6525_s27 = sld [smem:[#allocation3 + $0x10c]] }
 0x123   : > { %v1190_v31 = vsel %vm12502_vm0, %v5773_v10, %v1180_v28  ;;  %v817_v57 = vsel %vm12413_vm11, %v4502_v40, %v807_v34  ;;  %vm12503_vm12 = vcmp.eq.s32.totalorder %v4526_v45, 23  ;;  %v5812_v23 = vstv %s5705_s28  ;;  %s6527_s28 = sld [smem:[#allocation3 + $0x10d]] }
 0x124   : > { %v1200_v4 = vsel %vm12503_vm12, %v5776_v50, %v1190_v31  ;;  %v5815_v39 = vstv %s5707_s6  ;;  %vm631_vm0 = vcmp.eq.s32.totalorder %v5479_v14, 28  ;;  %v827_v41 = vsel %vm12414_vm7, %v4517_v42, %v817_v57  ;;  %s6541_s6 = sld [smem:[#allocation3 + $0x10e]] }
 0x125   : > { %vm12504_vm13 = vcmp.eq.s32.totalorder %v4526_v45, 24  ;;  %v5825_v49 = vstv %s5722_s7  ;;  %v5828_v40 = vstv %s5724_s20  ;;  %vm639_vm12 = vcmp.eq.s32.totalorder %v5479_v14, 29  ;;  %s6543_s7 = sld [smem:[#allocation3 + $0x10f]]  ;;  %s6557_s20 = sld [smem:[#allocation3 + $0x110]] }
 0x126   : > { %v1210_v9 = vsel %vm12504_vm13, %v5786_v11, %v1200_v4  ;;  %v837_v25 = vsel %vm12416_vm10, %v4520_v43, %v827_v41  ;;  %vm12505_vm11 = vcmp.eq.s32.totalorder %v4526_v45, 25  ;;  %vm12506_vm7 = vcmp.eq.s32.totalorder %v4633_v32, 1 }
 0x127   : > { %v1220_v13 = vsel %vm12505_vm11, %v5789_v27, %v1210_v9  ;;  %v981_v42 = vsel %vm12506_vm7, %v5319_v26, %v5211_v5  ;;  %vm12507_vm13 = vcmp.eq.s32.totalorder %v4769_v29, 1  ;;  %vm647_vm14 = vcmp.eq.s32.totalorder %v5479_v14, 30 }
 0x128   : > { %v982_v28 = vsel %vm12507_vm13, %v5319_v26, %v5211_v5  ;;  %v847_v43 = vsel %vm12417_vm3, %v4523_v44, %v837_v25  ;;  %vm12508_vm10 = vcmp.eq.s32.totalorder %v4526_v45, 26  ;;  %vm12509_vm11 = vcmp.eq.s32.totalorder %v4633_v32, 2 }
 0x129   : > { %v1230_v34 = vsel %vm12508_vm10, %v5799_v12, %v1220_v13  ;;  %v991_v31 = vsel %vm12509_vm11, %v5347_v8, %v981_v42  ;;  %vm12510_vm7 = vcmp.eq.s32.totalorder %v4769_v29, 2  ;;  %vm12419_vm13 = vcmp.eq.s32.totalorder %v5479_v14, 31 }
 0x12a   : > { %v992_v57 = vsel %vm12510_vm7, %v5347_v8, %v982_v28  ;;  %v857_v4 = vsel %vm12418_vm15, %v4530_v51, %v847_v43  ;;  %vm12511_vm3 = vcmp.eq.s32.totalorder %v4526_v45, 27  ;;  %vm12512_vm10 = vcmp.eq.s32.totalorder %v4633_v32, 3 }
 0x12b   : > { %v1240_v44 = vsel %vm12511_vm3, %v5802_v1, %v1230_v34  ;;  %v1001_v41 = vsel %vm12512_vm10, %v5381_v46, %v991_v31  ;;  %vm12513_vm11 = vcmp.eq.s32.totalorder %v4769_v29, 3  ;;  %v867_v25 = vsel %vm575_vm5, %v4534_v53, %v857_v4 }
 0x12c   : > { %v1002_v9 = vsel %vm12513_vm11, %v5381_v46, %v992_v57  ;;  %vm12514_vm7 = vcmp.eq.s32.totalorder %v4526_v45, 28  ;;  %vm12515_vm15 = vcmp.eq.s32.totalorder %v4633_v32, 4  ;;  %vm12516_vm3 = vcmp.eq.s32.totalorder %v4769_v29, 4 }
 0x12d   : > { %v1250_v51 = vsel %vm12514_vm7, %v5812_v23, %v1240_v44  ;;  %v1011_v13 = vsel %vm12515_vm15, %v5417_v17, %v1001_v41  ;;  %v1012_v42 = vsel %vm12516_vm3, %v5417_v17, %v1002_v9  ;;  %v877_v28 = vsel %vm583_vm1, %v4537_v56, %v867_v25 }
 0x12e   : > { %vm12517_vm10 = vcmp.eq.s32.totalorder %v4526_v45, 29  ;;  %vm12518_vm11 = vcmp.eq.s32.totalorder %v4633_v32, 5  ;;  %vm12519_vm7 = vcmp.eq.s32.totalorder %v4769_v29, 5  ;;  %v887_v31 = vsel %vm591_vm6, %v4540_v16, %v877_v28 }
 0x12f   : > { %v1260_v53 = vsel %vm12517_vm10, %v5815_v39, %v1250_v51  ;;  %v1021_v43 = vsel %vm12518_vm11, %v5420_v30, %v1011_v13  ;;  %v1022_v34 = vsel %vm12519_vm7, %v5420_v30, %v1012_v42  ;;  %vm12520_vm15 = vcmp.eq.s32.totalorder %v4526_v45, 30 }
 0x130   : > { %v1270_v56 = vsel %vm12520_vm15, %v5825_v49, %v1260_v53  ;;  %vm12521_vm3 = vcmp.eq.s32.totalorder %v4633_v32, 6  ;;  %vm12522_vm10 = vcmp.eq.s32.totalorder %v4769_v29, 6  ;;  %v897_v44 = vsel %vm599_vm8, %v4549_v58, %v887_v31 }
 0x131   : > { %v1031_v57 = vsel %vm12521_vm3, %v5469_v36, %v1021_v43  ;;  %v1032_v4 = vsel %vm12522_vm10, %v5469_v36, %v1022_v34  ;;  %vm12523_vm11 = vcmp.eq.s32.totalorder %v4526_v45, 31  ;;  %vm12524_vm7 = vcmp.eq.s32.totalorder %v4633_v32, 7 }
 0x132   : > { %v1280_v16 = vsel %vm12523_vm11, %v5828_v40, %v1270_v56  ;;  %v1041_v41 = vsel %vm12524_vm7, %v5501_v20, %v1031_v57  ;;  %vm12525_vm15 = vcmp.eq.s32.totalorder %v4769_v29, 7  ;;  %v907_v25 = vsel %vm607_vm2, %v4552_v60, %v897_v44 }
 0x133   : > { %v1042_v9 = vsel %vm12525_vm15, %v5501_v20, %v1032_v4  ;;  %1289 = vst [vmem:[#allocation2 + $0x40] sm:$0xff] %v1280_v16  ;;  %vm12526_vm3 = vcmp.eq.s32.totalorder %v4633_v32, 8  ;;  %vm12527_vm10 = vcmp.eq.s32.totalorder %v4769_v29, 8  ;;  %vm12528_vm11 = vcmp.eq.s32.totalorder %v4905_v37, 1 }
 0x134   : > { %v1051_v58 = vsel %vm12526_vm3, %v5523_v35, %v1041_v41  ;;  %v1052_v51 = vsel %vm12527_vm10, %v5523_v35, %v1042_v9  ;;  %v983_v13 = vsel %vm12528_vm11, %v5319_v26, %v5211_v5  ;;  %v917_v42 = vsel %vm615_vm4, %v4555_v61, %v907_v25 }
 0x135   : > { %vm12529_vm7 = vcmp.eq.s32.totalorder %v4633_v32, 9  ;;  %vm12530_vm15 = vcmp.eq.s32.totalorder %v4769_v29, 9  ;;  %vm12531_vm3 = vcmp.eq.s32.totalorder %v4905_v37, 2  ;;  %v927_v43 = vsel %vm623_vm9, %v4561_v6, %v917_v42 }
 0x136   : > { %v1061_v60 = vsel %vm12529_vm7, %v5552_v15, %v1051_v58  ;;  %v1062_v28 = vsel %vm12530_vm15, %v5552_v15, %v1052_v51  ;;  %v993_v53 = vsel %vm12531_vm3, %v5347_v8, %v983_v13  ;;  %vm12532_vm10 = vcmp.eq.s32.totalorder %v4633_v32, 10 }
 0x137   : > { %v1071_v61 = vsel %vm12532_vm10, %v5605_v52, %v1061_v60  ;;  %vm12533_vm11 = vcmp.eq.s32.totalorder %v4769_v29, 10  ;;  %vm12534_vm7 = vcmp.eq.s32.totalorder %v4905_v37, 3  ;;  %v937_v56 = vsel %vm631_vm0, %v4564_v7, %v927_v43 }
 0x138   : > { %v1072_v34 = vsel %vm12533_vm11, %v5605_v52, %v1062_v28  ;;  %v1003_v31 = vsel %vm12534_vm7, %v5381_v46, %v993_v53  ;;  %vm12535_vm15 = vcmp.eq.s32.totalorder %v4633_v32, 11  ;;  %vm12536_vm3 = vcmp.eq.s32.totalorder %v4769_v29, 11 }
 0x139   : > { %v1081_v6 = vsel %vm12535_vm15, %v5620_v63, %v1071_v61  ;;  %v1082_v57 = vsel %vm12536_vm3, %v5620_v63, %v1072_v34  ;;  %vm12537_vm10 = vcmp.eq.s32.totalorder %v4905_v37, 4  ;;  %v947_v44 = vsel %vm639_vm12, %v4568_v18, %v937_v56 }
 0x13a   : > { %v1013_v4 = vsel %vm12537_vm10, %v5417_v17, %v1003_v31  ;;  %vm12538_vm11 = vcmp.eq.s32.totalorder %v4633_v32, 12  ;;  %vm12539_vm7 = vcmp.eq.s32.totalorder %v4769_v29, 12  ;;  %vm12540_vm15 = vcmp.eq.s32.totalorder %v4905_v37, 5 }
 0x13b   : > { %v1091_v7 = vsel %vm12538_vm11, %v5635_v22, %v1081_v6  ;;  %v1092_v16 = vsel %vm12539_vm7, %v5635_v22, %v1082_v57  ;;  %v1023_v41 = vsel %vm12540_vm15, %v5420_v30, %v1013_v4  ;;  %v957_v9 = vsel %vm647_vm14, %v4571_v19, %v947_v44 }
 0x13c   : > { %vm12541_vm3 = vcmp.eq.s32.totalorder %v4633_v32, 13  ;;  %vm12542_vm10 = vcmp.eq.s32.totalorder %v4769_v29, 13  ;;  %vm12543_vm11 = vcmp.eq.s32.totalorder %v4905_v37, 6  ;;  %v967_v51 = vsel %vm12419_vm13, %v4592_v47, %v957_v9 }
 0x13d   : > { %v1101_v18 = vsel %vm12541_vm3, %v5652_v38, %v1091_v7  ;;  %v1102_v25 = vsel %vm12542_vm10, %v5652_v38, %v1092_v16  ;;  %v1033_v58 = vsel %vm12543_vm11, %v5469_v36, %v1023_v41  ;;  %vm12544_vm7 = vcmp.eq.s32.totalorder %v4633_v32, 14  ;;  %975 = vst [vmem:[#allocation2 + $0x38] sm:$0xff] %v967_v51 }
 0x13e   : > { %v1111_v19 = vsel %vm12544_vm7, %v5669_v62, %v1101_v18  ;;  %vm12545_vm15 = vcmp.eq.s32.totalorder %v4769_v29, 14  ;;  %vm12546_vm3 = vcmp.eq.s32.totalorder %v4905_v37, 7  ;;  %vm12547_vm10 = vcmp.eq.s32.totalorder %v4633_v32, 15 }
 0x13f   : > { %v1112_v13 = vsel %vm12545_vm15, %v5669_v62, %v1102_v25  ;;  %v1043_v42 = vsel %vm12546_vm3, %v5501_v20, %v1033_v58  ;;  %v1121_v60 = vsel %vm12547_vm10, %v5686_v3, %v1111_v19  ;;  %vm12548_vm11 = vcmp.eq.s32.totalorder %v4769_v29, 15 }
 0x140   : > { %v1122_v47 = vsel %vm12548_vm11, %v5686_v3, %v1112_v13  ;;  %vm12549_vm7 = vcmp.eq.s32.totalorder %v4905_v37, 8  ;;  %vm12550_vm15 = vcmp.eq.s32.totalorder %v4981_v48, 1  ;;  %vm12551_vm3 = vcmp.eq.s32.totalorder %v4633_v32, 16 }
 0x141   : > { %v1053_v28 = vsel %vm12549_vm7, %v5523_v35, %v1043_v42  ;;  %v984_v53 = vsel %vm12550_vm15, %v5319_v26, %v5211_v5  ;;  %v1131_v43 = vsel %vm12551_vm3, %v5703_v59, %v1121_v60  ;;  %vm12552_vm10 = vcmp.eq.s32.totalorder %v4769_v29, 16 }
 0x142   : > { %v1132_v61 = vsel %vm12552_vm10, %v5703_v59, %v1122_v47  ;;  %vm12553_vm11 = vcmp.eq.s32.totalorder %v4905_v37, 9  ;;  %vm12554_vm7 = vcmp.eq.s32.totalorder %v4981_v48, 2  ;;  %vm12555_vm13 = vcmp.eq.s32.totalorder %v4633_v32, 17 }
 0x143   : > { %v1063_v34 = vsel %vm12553_vm11, %v5552_v15, %v1053_v28  ;;  %v994_v31 = vsel %vm12554_vm7, %v5347_v8, %v984_v53  ;;  %v1141_v56 = vsel %vm12555_vm13, %v5720_v0, %v1131_v43  ;;  %vm12556_vm15 = vcmp.eq.s32.totalorder %v4769_v29, 17 }
 0x144   : > { %v1142_v6 = vsel %vm12556_vm15, %v5720_v0, %v1132_v61  ;;  %vm12557_vm3 = vcmp.eq.s32.totalorder %v4905_v37, 10  ;;  %vm12558_vm10 = vcmp.eq.s32.totalorder %v4981_v48, 3  ;;  %vm12559_vm11 = vcmp.eq.s32.totalorder %v4633_v32, 18 }
 0x145   : > { %v1073_v57 = vsel %vm12557_vm3, %v5605_v52, %v1063_v34  ;;  %v1004_v4 = vsel %vm12558_vm10, %v5381_v46, %v994_v31  ;;  %v1151_v44 = vsel %vm12559_vm11, %v5737_v2, %v1141_v56  ;;  %vm12560_vm7 = vcmp.eq.s32.totalorder %v4769_v29, 18 }
 0x146   : > { %v1152_v7 = vsel %vm12560_vm7, %v5737_v2, %v1142_v6  ;;  %vm12561_vm13 = vcmp.eq.s32.totalorder %v4905_v37, 11  ;;  %vm12562_vm15 = vcmp.eq.s32.totalorder %v4981_v48, 4  ;;  %vm12563_vm3 = vcmp.eq.s32.totalorder %v4633_v32, 19 }
 0x147   : > { %v1083_v16 = vsel %vm12561_vm13, %v5620_v63, %v1073_v57  ;;  %v1014_v41 = vsel %vm12562_vm15, %v5417_v17, %v1004_v4  ;;  %v1161_v9 = vsel %vm12563_vm3, %v5750_v21, %v1151_v44  ;;  %vm12564_vm10 = vcmp.eq.s32.totalorder %v4769_v29, 19 }
 0x148   : > { %v1162_v18 = vsel %vm12564_vm10, %v5750_v21, %v1152_v7  ;;  %vm12565_vm11 = vcmp.eq.s32.totalorder %v4905_v37, 12  ;;  %vm12566_vm7 = vcmp.eq.s32.totalorder %v4981_v48, 5  ;;  %vm12567_vm13 = vcmp.eq.s32.totalorder %v4633_v32, 20 }
 0x149   : > { %v1093_v25 = vsel %vm12565_vm11, %v5635_v22, %v1083_v16  ;;  %v1024_v58 = vsel %vm12566_vm7, %v5420_v30, %v1014_v41  ;;  %v1171_v51 = vsel %vm12567_vm13, %v5760_v24, %v1161_v9  ;;  %vm12568_vm15 = vcmp.eq.s32.totalorder %v4769_v29, 20 }
 0x14a   : > { %v1172_v19 = vsel %vm12568_vm15, %v5760_v24, %v1162_v18  ;;  %vm12569_vm3 = vcmp.eq.s32.totalorder %v4905_v37, 13  ;;  %vm12570_vm10 = vcmp.eq.s32.totalorder %v4981_v48, 6  ;;  %vm12571_vm11 = vcmp.eq.s32.totalorder %v4633_v32, 21 }
 0x14b   : > { %v1103_v13 = vsel %vm12569_vm3, %v5652_v38, %v1093_v25  ;;  %v1034_v42 = vsel %vm12570_vm10, %v5469_v36, %v1024_v58  ;;  %v1181_v60 = vsel %vm12571_vm11, %v5763_v55, %v1171_v51  ;;  %vm12572_vm7 = vcmp.eq.s32.totalorder %v4769_v29, 21 }
 0x14c   : > { %v1182_v47 = vsel %vm12572_vm7, %v5763_v55, %v1172_v19  ;;  %vm12573_vm13 = vcmp.eq.s32.totalorder %v4905_v37, 14  ;;  %vm12574_vm15 = vcmp.eq.s32.totalorder %v4981_v48, 7  ;;  %vm12575_vm3 = vcmp.eq.s32.totalorder %v4633_v32, 22 }
 0x14d   : > { %v1113_v28 = vsel %vm12573_vm13, %v5669_v62, %v1103_v13  ;;  %v1044_v53 = vsel %vm12574_vm15, %v5501_v20, %v1034_v42  ;;  %v1191_v43 = vsel %vm12575_vm3, %v5773_v10, %v1181_v60  ;;  %vm12576_vm10 = vcmp.eq.s32.totalorder %v4769_v29, 22 }
 0x14e   : > { %v1192_v61 = vsel %vm12576_vm10, %v5773_v10, %v1182_v47  ;;  %vm12577_vm11 = vcmp.eq.s32.totalorder %v4905_v37, 15  ;;  %vm12578_vm7 = vcmp.eq.s32.totalorder %v4981_v48, 8  ;;  %vm12579_vm13 = vcmp.eq.s32.totalorder %v4633_v32, 23 }
 0x14f   : > { %v1123_v34 = vsel %vm12577_vm11, %v5686_v3, %v1113_v28  ;;  %v1054_v31 = vsel %vm12578_vm7, %v5523_v35, %v1044_v53  ;;  %v1201_v56 = vsel %vm12579_vm13, %v5776_v50, %v1191_v43  ;;  %vm12580_vm15 = vcmp.eq.s32.totalorder %v4769_v29, 23 }
 0x150   : > { %v1202_v6 = vsel %vm12580_vm15, %v5776_v50, %v1192_v61  ;;  %vm12581_vm3 = vcmp.eq.s32.totalorder %v4905_v37, 16  ;;  %vm12582_vm10 = vcmp.eq.s32.totalorder %v4981_v48, 9  ;;  %vm12583_vm11 = vcmp.eq.s32.totalorder %v4633_v32, 24 }
 0x151   : > { %v1133_v57 = vsel %vm12581_vm3, %v5703_v59, %v1123_v34  ;;  %v1064_v4 = vsel %vm12582_vm10, %v5552_v15, %v1054_v31  ;;  %v1211_v44 = vsel %vm12583_vm11, %v5786_v11, %v1201_v56  ;;  %vm12584_vm7 = vcmp.eq.s32.totalorder %v4769_v29, 24 }
 0x152   : > { %v1212_v7 = vsel %vm12584_vm7, %v5786_v11, %v1202_v6  ;;  %vm12585_vm13 = vcmp.eq.s32.totalorder %v4905_v37, 17  ;;  %vm12586_vm15 = vcmp.eq.s32.totalorder %v4981_v48, 10  ;;  %vm12587_vm3 = vcmp.eq.s32.totalorder %v4633_v32, 25 }
 0x153   : > { %v1143_v16 = vsel %vm12585_vm13, %v5720_v0, %v1133_v57  ;;  %v1074_v41 = vsel %vm12586_vm15, %v5605_v52, %v1064_v4  ;;  %v1221_v9 = vsel %vm12587_vm3, %v5789_v27, %v1211_v44  ;;  %vm12588_vm10 = vcmp.eq.s32.totalorder %v4769_v29, 25 }
 0x154   : > { %v1222_v18 = vsel %vm12588_vm10, %v5789_v27, %v1212_v7  ;;  %vm12589_vm11 = vcmp.eq.s32.totalorder %v4905_v37, 18  ;;  %vm12590_vm7 = vcmp.eq.s32.totalorder %v4981_v48, 11  ;;  %vm12591_vm13 = vcmp.eq.s32.totalorder %v4633_v32, 26 }
 0x155   : > { %v1153_v25 = vsel %vm12589_vm11, %v5737_v2, %v1143_v16  ;;  %v1084_v58 = vsel %vm12590_vm7, %v5620_v63, %v1074_v41  ;;  %v1231_v51 = vsel %vm12591_vm13, %v5799_v12, %v1221_v9  ;;  %vm12592_vm15 = vcmp.eq.s32.totalorder %v4769_v29, 26 }
 0x156   : > { %v1232_v19 = vsel %vm12592_vm15, %v5799_v12, %v1222_v18  ;;  %vm12593_vm3 = vcmp.eq.s32.totalorder %v4905_v37, 19  ;;  %vm12594_vm10 = vcmp.eq.s32.totalorder %v4981_v48, 12  ;;  %vm12595_vm11 = vcmp.eq.s32.totalorder %v4633_v32, 27 }
 0x157   : > { %v1163_v13 = vsel %vm12593_vm3, %v5750_v21, %v1153_v25  ;;  %v1094_v42 = vsel %vm12594_vm10, %v5635_v22, %v1084_v58  ;;  %v1241_v60 = vsel %vm12595_vm11, %v5802_v1, %v1231_v51  ;;  %vm12596_vm7 = vcmp.eq.s32.totalorder %v4769_v29, 27 }
 0x158   : > { %v1242_v47 = vsel %vm12596_vm7, %v5802_v1, %v1232_v19  ;;  %vm12597_vm13 = vcmp.eq.s32.totalorder %v4905_v37, 20  ;;  %vm12598_vm15 = vcmp.eq.s32.totalorder %v4981_v48, 13  ;;  %vm12599_vm3 = vcmp.eq.s32.totalorder %v4633_v32, 28 }
 0x159   : > { %v1173_v28 = vsel %vm12597_vm13, %v5760_v24, %v1163_v13  ;;  %v1104_v53 = vsel %vm12598_vm15, %v5652_v38, %v1094_v42  ;;  %v1251_v43 = vsel %vm12599_vm3, %v5812_v23, %v1241_v60  ;;  %vm12600_vm10 = vcmp.eq.s32.totalorder %v4769_v29, 28 }
 0x15a   : > { %v1252_v61 = vsel %vm12600_vm10, %v5812_v23, %v1242_v47  ;;  %vm12601_vm11 = vcmp.eq.s32.totalorder %v4905_v37, 21  ;;  %vm12602_vm7 = vcmp.eq.s32.totalorder %v4981_v48, 14  ;;  %vm12603_vm13 = vcmp.eq.s32.totalorder %v4633_v32, 29 }
 0x15b   : > { %v1183_v34 = vsel %vm12601_vm11, %v5763_v55, %v1173_v28  ;;  %v1114_v31 = vsel %vm12602_vm7, %v5669_v62, %v1104_v53  ;;  %v1261_v56 = vsel %vm12603_vm13, %v5815_v39, %v1251_v43  ;;  %vm12604_vm15 = vcmp.eq.s32.totalorder %v4769_v29, 29 }
 0x15c   : > { %v1262_v6 = vsel %vm12604_vm15, %v5815_v39, %v1252_v61  ;;  %vm12605_vm3 = vcmp.eq.s32.totalorder %v4905_v37, 22  ;;  %vm12606_vm10 = vcmp.eq.s32.totalorder %v4981_v48, 15  ;;  %vm12607_vm11 = vcmp.eq.s32.totalorder %v4633_v32, 30 }
 0x15d   : > { %v1193_v57 = vsel %vm12605_vm3, %v5773_v10, %v1183_v34  ;;  %v1124_v4 = vsel %vm12606_vm10, %v5686_v3, %v1114_v31  ;;  %v1271_v44 = vsel %vm12607_vm11, %v5825_v49, %v1261_v56  ;;  %vm12608_vm7 = vcmp.eq.s32.totalorder %v4769_v29, 30 }
 0x15e   : > { %v1272_v7 = vsel %vm12608_vm7, %v5825_v49, %v1262_v6  ;;  %vm12609_vm13 = vcmp.eq.s32.totalorder %v4905_v37, 23  ;;  %vm12610_vm15 = vcmp.eq.s32.totalorder %v4981_v48, 16  ;;  %vm12611_vm3 = vcmp.eq.s32.totalorder %v4633_v32, 31 }
 0x15f   : > { %v1203_v16 = vsel %vm12609_vm13, %v5776_v50, %v1193_v57  ;;  %v1134_v41 = vsel %vm12610_vm15, %v5703_v59, %v1124_v4  ;;  %v1281_v9 = vsel %vm12611_vm3, %v5828_v40, %v1271_v44  ;;  %vm12612_vm10 = vcmp.eq.s32.totalorder %v4769_v29, 31 }
 0x160   : > { %v1282_v18 = vsel %vm12612_vm10, %v5828_v40, %v1272_v7  ;;  %vm12613_vm11 = vcmp.eq.s32.totalorder %v4905_v37, 24  ;;  %vm12614_vm7 = vcmp.eq.s32.totalorder %v4981_v48, 17  ;;  %1290 = vst [vmem:[#allocation2 + $0x48] sm:$0xff] %v1281_v9  ;;  %vm12615_vm13 = vcmp.eq.s32.totalorder %v4905_v37, 25 }
 0x161   : > { %v1213_v25 = vsel %vm12613_vm11, %v5786_v11, %v1203_v16  ;;  %v1144_v58 = vsel %vm12614_vm7, %v5720_v0, %v1134_v41  ;;  %1291 = vst [vmem:[#allocation2 + $0x50] sm:$0xff] %v1282_v18  ;;  %vm12616_vm15 = vcmp.eq.s32.totalorder %v4981_v48, 18  ;;  %vm12617_vm3 = vcmp.eq.s32.totalorder %v5102_v33, 1 }
 0x162   : > { %v1223_v51 = vsel %vm12615_vm13, %v5789_v27, %v1213_v25  ;;  %v1154_v19 = vsel %vm12616_vm15, %v5737_v2, %v1144_v58  ;;  %v985_v13 = vsel %vm12617_vm3, %v5319_v26, %v5211_v5  ;;  %vm12618_vm10 = vcmp.eq.s32.totalorder %v5274_v54, 1 }
 0x163   : > { %v986_v42 = vsel %vm12618_vm10, %v5319_v26, %v5211_v5  ;;  %vm12619_vm11 = vcmp.eq.s32.totalorder %v4905_v37, 26  ;;  %vm12620_vm7 = vcmp.eq.s32.totalorder %v4981_v48, 19  ;;  %vm12621_vm13 = vcmp.eq.s32.totalorder %v5102_v33, 2 }
 0x164   : > { %v1233_v60 = vsel %vm12619_vm11, %v5799_v12, %v1223_v51  ;;  %v1164_v47 = vsel %vm12620_vm7, %v5750_v21, %v1154_v19  ;;  %v995_v28 = vsel %vm12621_vm13, %v5347_v8, %v985_v13  ;;  %vm12622_vm15 = vcmp.eq.s32.totalorder %v5274_v54, 2 }
 0x165   : > { %v996_v53 = vsel %vm12622_vm15, %v5347_v8, %v986_v42  ;;  %vm12623_vm3 = vcmp.eq.s32.totalorder %v4905_v37, 27  ;;  %vm12624_vm10 = vcmp.eq.s32.totalorder %v4981_v48, 20  ;;  %vm12625_vm11 = vcmp.eq.s32.totalorder %v5102_v33, 3 }
 0x166   : > { %v1243_v43 = vsel %vm12623_vm3, %v5802_v1, %v1233_v60  ;;  %v1174_v61 = vsel %vm12624_vm10, %v5760_v24, %v1164_v47  ;;  %v1005_v34 = vsel %vm12625_vm11, %v5381_v46, %v995_v28  ;;  %vm12626_vm7 = vcmp.eq.s32.totalorder %v5274_v54, 3 }
 0x167   : > { %v1006_v31 = vsel %vm12626_vm7, %v5381_v46, %v996_v53  ;;  %vm12627_vm13 = vcmp.eq.s32.totalorder %v4905_v37, 28  ;;  %vm12628_vm15 = vcmp.eq.s32.totalorder %v4981_v48, 21  ;;  %vm12629_vm3 = vcmp.eq.s32.totalorder %v5102_v33, 4 }
 0x168   : > { %v1253_v56 = vsel %vm12627_vm13, %v5812_v23, %v1243_v43  ;;  %v1184_v6 = vsel %vm12628_vm15, %v5763_v55, %v1174_v61  ;;  %v1015_v57 = vsel %vm12629_vm3, %v5417_v17, %v1005_v34  ;;  %vm12630_vm10 = vcmp.eq.s32.totalorder %v5274_v54, 4 }
 0x169   : > { %v1016_v4 = vsel %vm12630_vm10, %v5417_v17, %v1006_v31  ;;  %vm12631_vm11 = vcmp.eq.s32.totalorder %v4905_v37, 29  ;;  %vm12632_vm7 = vcmp.eq.s32.totalorder %v4981_v48, 22  ;;  %vm12633_vm13 = vcmp.eq.s32.totalorder %v5102_v33, 5 }
 0x16a   : > { %v1263_v44 = vsel %vm12631_vm11, %v5815_v39, %v1253_v56  ;;  %v1194_v7 = vsel %vm12632_vm7, %v5773_v10, %v1184_v6  ;;  %v1025_v16 = vsel %vm12633_vm13, %v5420_v30, %v1015_v57  ;;  %vm12634_vm15 = vcmp.eq.s32.totalorder %v5274_v54, 5 }
 0x16b   : > { %v1026_v41 = vsel %vm12634_vm15, %v5420_v30, %v1016_v4  ;;  %vm12635_vm3 = vcmp.eq.s32.totalorder %v4905_v37, 30  ;;  %vm12636_vm10 = vcmp.eq.s32.totalorder %v4981_v48, 23  ;;  %vm12637_vm11 = vcmp.eq.s32.totalorder %v5102_v33, 6 }
 0x16c   : > { %v1273_v9 = vsel %vm12635_vm3, %v5825_v49, %v1263_v44  ;;  %v1204_v18 = vsel %vm12636_vm10, %v5776_v50, %v1194_v7  ;;  %v1035_v25 = vsel %vm12637_vm11, %v5469_v36, %v1025_v16  ;;  %vm12638_vm7 = vcmp.eq.s32.totalorder %v5274_v54, 6 }
 0x16d   : > { %v1036_v58 = vsel %vm12638_vm7, %v5469_v36, %v1026_v41  ;;  %vm12639_vm13 = vcmp.eq.s32.totalorder %v4905_v37, 31  ;;  %vm12640_vm15 = vcmp.eq.s32.totalorder %v4981_v48, 24  ;;  %vm12641_vm3 = vcmp.eq.s32.totalorder %v5102_v33, 7 }
 0x16e   : > { %v1283_v51 = vsel %vm12639_vm13, %v5828_v40, %v1273_v9  ;;  %v1214_v19 = vsel %vm12640_vm15, %v5786_v11, %v1204_v18  ;;  %v1045_v13 = vsel %vm12641_vm3, %v5501_v20, %v1035_v25  ;;  %vm12642_vm10 = vcmp.eq.s32.totalorder %v5274_v54, 7 }
 0x16f   : > { %v1046_v42 = vsel %vm12642_vm10, %v5501_v20, %v1036_v58  ;;  %1292 = vst [vmem:[#allocation2 + $0x58] sm:$0xff] %v1283_v51  ;;  %vm12643_vm11 = vcmp.eq.s32.totalorder %v4981_v48, 25  ;;  %vm12644_vm7 = vcmp.eq.s32.totalorder %v5102_v33, 8  ;;  %vm12645_vm13 = vcmp.eq.s32.totalorder %v5274_v54, 8 }
 0x170   : > { %v1224_v60 = vsel %vm12643_vm11, %v5789_v27, %v1214_v19  ;;  %v1055_v47 = vsel %vm12644_vm7, %v5523_v35, %v1045_v13  ;;  %v1056_v28 = vsel %vm12645_vm13, %v5523_v35, %v1046_v42  ;;  %vm12646_vm15 = vcmp.eq.s32.totalorder %v5479_v14, 1 }
 0x171   : > { %v987_v53 = vsel %vm12646_vm15, %v5319_v26, %v5211_v5  ;;  %vm12647_vm3 = vcmp.eq.s32.totalorder %v4981_v48, 26  ;;  %vm12648_vm10 = vcmp.eq.s32.totalorder %v5102_v33, 9  ;;  %vm12649_vm11 = vcmp.eq.s32.totalorder %v5274_v54, 9 }
 0x172   : > { %v1234_v43 = vsel %vm12647_vm3, %v5799_v12, %v1224_v60  ;;  %v1065_v61 = vsel %vm12648_vm10, %v5552_v15, %v1055_v47  ;;  %v1066_v34 = vsel %vm12649_vm11, %v5552_v15, %v1056_v28  ;;  %vm12650_vm7 = vcmp.eq.s32.totalorder %v5479_v14, 2 }
 0x173   : > { %v997_v31 = vsel %vm12650_vm7, %v5347_v8, %v987_v53  ;;  %vm12651_vm13 = vcmp.eq.s32.totalorder %v4981_v48, 27  ;;  %vm12652_vm15 = vcmp.eq.s32.totalorder %v5102_v33, 10  ;;  %vm12653_vm3 = vcmp.eq.s32.totalorder %v5274_v54, 10 }
 0x174   : > { %v1244_v5 = vsel %vm12651_vm13, %v5802_v1, %v1234_v43  ;;  %v1075_v26 = vsel %vm12652_vm15, %v5605_v52, %v1065_v61  ;;  %v1076_v56 = vsel %vm12653_vm3, %v5605_v52, %v1066_v34  ;;  %vm12654_vm10 = vcmp.eq.s32.totalorder %v5479_v14, 3 }
 0x175   : > { %v1007_v6 = vsel %vm12654_vm10, %v5381_v46, %v997_v31  ;;  %vm12655_vm11 = vcmp.eq.s32.totalorder %v4981_v48, 28  ;;  %vm12656_vm7 = vcmp.eq.s32.totalorder %v5102_v33, 11  ;;  %vm12657_vm13 = vcmp.eq.s32.totalorder %v5274_v54, 11 }
 0x176   : > { %v1254_v8 = vsel %vm12655_vm11, %v5812_v23, %v1244_v5  ;;  %v1085_v57 = vsel %vm12656_vm7, %v5620_v63, %v1075_v26  ;;  %v1086_v4 = vsel %vm12657_vm13, %v5620_v63, %v1076_v56  ;;  %vm12658_vm15 = vcmp.eq.s32.totalorder %v5479_v14, 4 }
 0x177   : > { %v1017_v44 = vsel %vm12658_vm15, %v5417_v17, %v1007_v6  ;;  %vm12659_vm3 = vcmp.eq.s32.totalorder %v4981_v48, 29  ;;  %vm12660_vm10 = vcmp.eq.s32.totalorder %v5102_v33, 12  ;;  %vm12661_vm11 = vcmp.eq.s32.totalorder %v5274_v54, 12 }
 0x178   : > { %v1264_v46 = vsel %vm12659_vm3, %v5815_v39, %v1254_v8  ;;  %v1095_v7 = vsel %vm12660_vm10, %v5635_v22, %v1085_v57  ;;  %v1096_v16 = vsel %vm12661_vm11, %v5635_v22, %v1086_v4  ;;  %vm12662_vm7 = vcmp.eq.s32.totalorder %v5479_v14, 5 }
 0x179   : > { %v1027_v41 = vsel %vm12662_vm7, %v5420_v30, %v1017_v44  ;;  %vm12663_vm13 = vcmp.eq.s32.totalorder %v4981_v48, 30  ;;  %vm12664_vm15 = vcmp.eq.s32.totalorder %v5102_v33, 13  ;;  %vm12665_vm3 = vcmp.eq.s32.totalorder %v5274_v54, 13 }
 0x17a   : > { %v1274_v17 = vsel %vm12663_vm13, %v5825_v49, %v1264_v46  ;;  %v1105_v9 = vsel %vm12664_vm15, %v5652_v38, %v1095_v7  ;;  %v1106_v18 = vsel %vm12665_vm3, %v5652_v38, %v1096_v16  ;;  %vm12666_vm10 = vcmp.eq.s32.totalorder %v5479_v14, 6 }
 0x17b   : > { %v1037_v25 = vsel %vm12666_vm10, %v5469_v36, %v1027_v41  ;;  %vm12667_vm11 = vcmp.eq.s32.totalorder %v4981_v48, 31  ;;  %vm12668_vm7 = vcmp.eq.s32.totalorder %v5102_v33, 14  ;;  %vm12669_vm13 = vcmp.eq.s32.totalorder %v5274_v54, 14 }
 0x17c   : > { %v1284_v30 = vsel %vm12667_vm11, %v5828_v40, %v1274_v17  ;;  %v1115_v58 = vsel %vm12668_vm7, %v5669_v62, %v1105_v9  ;;  %v1116_v51 = vsel %vm12669_vm13, %v5669_v62, %v1106_v18  ;;  %vm12670_vm15 = vcmp.eq.s32.totalorder %v5479_v14, 7 }
 0x17d   : > { %v1047_v19 = vsel %vm12670_vm15, %v5501_v20, %v1037_v25  ;;  %1293 = vst [vmem:[#allocation2 + $0x60] sm:$0xff] %v1284_v30  ;;  %vm12671_vm3 = vcmp.eq.s32.totalorder %v5102_v33, 15  ;;  %vm12672_vm10 = vcmp.eq.s32.totalorder %v5274_v54, 15  ;;  %vm12673_vm11 = vcmp.eq.s32.totalorder %v5479_v14, 8 }
 0x17e   : > { %v1125_v36 = vsel %vm12671_vm3, %v5686_v3, %v1115_v58  ;;  %v1126_v13 = vsel %vm12672_vm10, %v5686_v3, %v1116_v51  ;;  %v1057_v42 = vsel %vm12673_vm11, %v5523_v35, %v1047_v19  ;;  %v6400_v60 = vstv %s6295_s17  ;;  %s6559_s17 = sld [smem:[#allocation3 + $0x111]] }
 0x17f   : > { %vm12674_vm7 = vcmp.eq.s32.totalorder %v5102_v33, 16  ;;  %vm12675_vm13 = vcmp.eq.s32.totalorder %v5274_v54, 16  ;;  %vm12676_vm15 = vcmp.eq.s32.totalorder %v5479_v14, 9  ;;  %v6412_v53 = vstv %s6310_s24  ;;  %s6573_s24 = sld [smem:[#allocation3 + $0x112]] }
 0x180   : > { %v1135_v20 = vsel %vm12674_vm7, %v5703_v59, %v1125_v36  ;;  %v1136_v47 = vsel %vm12675_vm13, %v5703_v59, %v1126_v13  ;;  %v1067_v28 = vsel %vm12676_vm15, %v5552_v15, %v1057_v42  ;;  %vm12677_vm3 = vcmp.eq.s32.totalorder %v5102_v33, 17 }
 0x181   : > { %v1145_v35 = vsel %vm12677_vm3, %v5720_v0, %v1135_v20  ;;  %vm12678_vm10 = vcmp.eq.s32.totalorder %v5274_v54, 17  ;;  %vm12679_vm11 = vcmp.eq.s32.totalorder %v5479_v14, 10  ;;  %vm12680_vm7 = vcmp.eq.s32.totalorder %v4526_v45, 1 }
 0x182   : > { %v1146_v43 = vsel %vm12678_vm10, %v5720_v0, %v1136_v47  ;;  %v1077_v61 = vsel %vm12679_vm11, %v5605_v52, %v1067_v28  ;;  %v1301_v15 = vsel %vm12680_vm7, %v6412_v53, %v6400_v60  ;;  %vm12681_vm13 = vcmp.eq.s32.totalorder %v5102_v33, 18 }
 0x183   : > { %v1155_v34 = vsel %vm12681_vm13, %v5737_v2, %v1145_v35  ;;  %vm12682_vm15 = vcmp.eq.s32.totalorder %v5274_v54, 18  ;;  %vm12683_vm3 = vcmp.eq.s32.totalorder %v5479_v14, 11  ;;  %v6439_v26 = vstv %s6336_s1  ;;  %s6575_s1 = sld [smem:[#allocation3 + $0x113]] }
 0x184   : > { %v1156_v31 = vsel %vm12682_vm15, %v5737_v2, %v1146_v43  ;;  %v1087_v5 = vsel %vm12683_vm3, %v5620_v63, %v1077_v61  ;;  %vm12684_vm10 = vcmp.eq.s32.totalorder %v5102_v33, 19  ;;  %vm12685_vm11 = vcmp.eq.s32.totalorder %v5274_v54, 19 }
 0x185   : > { %v1165_v52 = vsel %vm12684_vm10, %v5750_v21, %v1155_v34  ;;  %v1166_v56 = vsel %vm12685_vm11, %v5750_v21, %v1156_v31  ;;  %vm12686_vm7 = vcmp.eq.s32.totalorder %v5479_v14, 12  ;;  %vm12687_vm13 = vcmp.eq.s32.totalorder %v4526_v45, 2 }
 0x186   : > { %v1097_v6 = vsel %vm12686_vm7, %v5635_v22, %v1087_v5  ;;  %v1311_v63 = vsel %vm12687_vm13, %v6439_v26, %v1301_v15  ;;  %vm12688_vm15 = vcmp.eq.s32.totalorder %v5102_v33, 20  ;;  %vm12689_vm3 = vcmp.eq.s32.totalorder %v5274_v54, 20 }
 0x187   : > { %v1175_v8 = vsel %vm12688_vm15, %v5760_v24, %v1165_v52  ;;  %v1176_v57 = vsel %vm12689_vm3, %v5760_v24, %v1166_v56  ;;  %vm12690_vm10 = vcmp.eq.s32.totalorder %v5479_v14, 13  ;;  %v6465_v44 = vstv %s6362_s15  ;;  %s6589_s15 = sld [smem:[#allocation3 + $0x114]] }
 0x188   : > { %v1107_v4 = vsel %vm12690_vm10, %v5652_v38, %v1097_v6  ;;  %vm12691_vm11 = vcmp.eq.s32.totalorder %v5102_v33, 21  ;;  %vm12692_vm7 = vcmp.eq.s32.totalorder %v5274_v54, 21  ;;  %vm12693_vm13 = vcmp.eq.s32.totalorder %v5479_v14, 14 }
 0x189   : > { %v1185_v22 = vsel %vm12691_vm11, %v5763_v55, %v1175_v8  ;;  %v1186_v46 = vsel %vm12692_vm7, %v5763_v55, %v1176_v57  ;;  %v1117_v7 = vsel %vm12693_vm13, %v5669_v62, %v1107_v4  ;;  %vm12694_vm15 = vcmp.eq.s32.totalorder %v4526_v45, 3 }
 0x18a   : > { %v1321_v38 = vsel %vm12694_vm15, %v6465_v44, %v1311_v63  ;;  %vm12695_vm3 = vcmp.eq.s32.totalorder %v5102_v33, 22  ;;  %vm12696_vm10 = vcmp.eq.s32.totalorder %v5274_v54, 22  ;;  %vm12697_vm11 = vcmp.eq.s32.totalorder %v5479_v14, 15 }
 0x18b   : > { %v1195_v16 = vsel %vm12695_vm3, %v5773_v10, %v1185_v22  ;;  %v1196_v41 = vsel %vm12696_vm10, %v5773_v10, %v1186_v46  ;;  %v1127_v17 = vsel %vm12697_vm11, %v5686_v3, %v1117_v7  ;;  %v6491_v9 = vstv %s6388_s25  ;;  %s6591_s25 = sld [smem:[#allocation3 + $0x115]] }
 0x18c   : > { %vm12698_vm7 = vcmp.eq.s32.totalorder %v5102_v33, 23  ;;  %vm12699_vm13 = vcmp.eq.s32.totalorder %v5274_v54, 23  ;;  %vm12700_vm15 = vcmp.eq.s32.totalorder %v5479_v14, 16  ;;  %vm12701_vm3 = vcmp.eq.s32.totalorder %v4526_v45, 4 }
 0x18d   : > { %v1205_v62 = vsel %vm12698_vm7, %v5776_v50, %v1195_v16  ;;  %v1206_v18 = vsel %vm12699_vm13, %v5776_v50, %v1196_v41  ;;  %v1137_v25 = vsel %vm12700_vm15, %v5703_v59, %v1127_v17  ;;  %v1331_v3 = vsel %vm12701_vm3, %v6491_v9, %v1321_v38 }
 0x18e   : > { %vm12702_vm10 = vcmp.eq.s32.totalorder %v5102_v33, 24  ;;  %vm12703_vm11 = vcmp.eq.s32.totalorder %v5274_v54, 24  ;;  %vm12704_vm7 = vcmp.eq.s32.totalorder %v5479_v14, 17  ;;  %v6523_v51 = vstv %s6414_s3  ;;  %s6605_s3 = sld [smem:[#allocation3 + $0x116]] }
 0x18f   : > { %v1215_v30 = vsel %vm12702_vm10, %v5786_v11, %v1205_v62  ;;  %v1216_v58 = vsel %vm12703_vm11, %v5786_v11, %v1206_v18  ;;  %v1147_v59 = vsel %vm12704_vm7, %v5720_v0, %v1137_v25  ;;  %vm12705_vm13 = vcmp.eq.s32.totalorder %v5102_v33, 25 }
 0x190   : > { %v1225_v19 = vsel %vm12705_vm13, %v5789_v27, %v1215_v30  ;;  %vm12706_vm15 = vcmp.eq.s32.totalorder %v5274_v54, 25  ;;  %vm12707_vm3 = vcmp.eq.s32.totalorder %v5479_v14, 18  ;;  %vm12708_vm10 = vcmp.eq.s32.totalorder %v4526_v45, 5 }
 0x191   : > { %v1226_v36 = vsel %vm12706_vm15, %v5789_v27, %v1216_v58  ;;  %v1157_v13 = vsel %vm12707_vm3, %v5737_v2, %v1147_v59  ;;  %v1341_v0 = vsel %vm12708_vm10, %v6523_v51, %v1331_v3  ;;  %vm12709_vm11 = vcmp.eq.s32.totalorder %v5102_v33, 26 }
 0x192   : > { %v1235_v42 = vsel %vm12709_vm11, %v5799_v12, %v1225_v19  ;;  %vm12710_vm7 = vcmp.eq.s32.totalorder %v5274_v54, 26  ;;  %vm12711_vm13 = vcmp.eq.s32.totalorder %v5479_v14, 19  ;;  %v6555_v47 = vstv %s6441_s4  ;;  %s6607_s4 = sld [smem:[#allocation3 + $0x117]] }
 0x193   : > { %v1236_v20 = vsel %vm12710_vm7, %v5799_v12, %v1226_v36  ;;  %v1167_v2 = vsel %vm12711_vm13, %v5750_v21, %v1157_v13  ;;  %vm12712_vm15 = vcmp.eq.s32.totalorder %v5102_v33, 27  ;;  %vm12713_vm3 = vcmp.eq.s32.totalorder %v5274_v54, 27 }
 0x194   : > { %v1245_v28 = vsel %vm12712_vm15, %v5802_v1, %v1235_v42  ;;  %v1246_v35 = vsel %vm12713_vm3, %v5802_v1, %v1236_v20  ;;  %vm12714_vm10 = vcmp.eq.s32.totalorder %v5479_v14, 20  ;;  %vm12715_vm11 = vcmp.eq.s32.totalorder %v4526_v45, 6 }
 0x195   : > { %v1177_v43 = vsel %vm12714_vm10, %v5760_v24, %v1167_v2  ;;  %v1351_v21 = vsel %vm12715_vm11, %v6555_v47, %v1341_v0  ;;  %vm12716_vm7 = vcmp.eq.s32.totalorder %v5102_v33, 28  ;;  %vm12717_vm13 = vcmp.eq.s32.totalorder %v5274_v54, 28 }
 0x196   : > { %v1255_v61 = vsel %vm12716_vm7, %v5812_v23, %v1245_v28  ;;  %v1256_v15 = vsel %vm12717_vm13, %v5812_v23, %v1246_v35  ;;  %v1187_v24 = vsel %vm575_vm5, %v5763_v55, %v1177_v43  ;;  %v6587_v34 = vstv %s6467_s5  ;;  %s6621_s5 = sld [smem:[#allocation3 + $0x118]] }
 0x197   : > { %vm12718_vm15 = vcmp.eq.s32.totalorder %v5102_v33, 29  ;;  %vm12719_vm3 = vcmp.eq.s32.totalorder %v5274_v54, 29  ;;  %v1197_v52 = vsel %vm583_vm1, %v5773_v10, %v1187_v24  ;;  %vm12720_vm10 = vcmp.eq.s32.totalorder %v4526_v45, 7 }
 0x198   : > { %v1265_v31 = vsel %vm12718_vm15, %v5815_v39, %v1255_v61  ;;  %v1266_v5 = vsel %vm12719_vm3, %v5815_v39, %v1256_v15  ;;  %v1361_v55 = vsel %vm12720_vm10, %v6587_v34, %v1351_v21  ;;  %vm12721_vm11 = vcmp.eq.s32.totalorder %v5102_v33, 30 }
 0x199   : > { %v1275_v56 = vsel %vm12721_vm11, %v5825_v49, %v1265_v31  ;;  %vm12722_vm7 = vcmp.eq.s32.totalorder %v5274_v54, 30  ;;  %v1207_v10 = vsel %vm591_vm6, %v5776_v50, %v1197_v52  ;;  %v6619_v63 = vstv %s6493_s8  ;;  %s6637_s8 = sld [smem:[#allocation3 + $0x11a]] }
 0x19a   : > { %v1276_v6 = vsel %vm12722_vm7, %v5825_v49, %v1266_v5  ;;  %vm12723_vm13 = vcmp.eq.s32.totalorder %v5102_v33, 31  ;;  %vm12724_vm15 = vcmp.eq.s32.totalorder %v5274_v54, 31  ;;  %v1217_v50 = vsel %vm599_vm8, %v5786_v11, %v1207_v10 }
 0x19b   : > { %v1285_v8 = vsel %vm12723_vm13, %v5828_v40, %v1275_v56  ;;  %v1286_v57 = vsel %vm12724_vm15, %v5828_v40, %v1276_v6  ;;  %vm12725_vm3 = vcmp.eq.s32.totalorder %v4526_v45, 8  ;;  %v1227_v22 = vsel %vm607_vm2, %v5789_v27, %v1217_v50 }
 0x19c   : > { %v1371_v4 = vsel %vm12725_vm3, %v6619_v63, %v1361_v55  ;;  %1294 = vst [vmem:[#allocation2 + $0x68] sm:$0xff] %v1285_v8  ;;  %1295 = vst [vmem:[#allocation2 + $0x70] sm:$0xff] %v1286_v57  ;;  %v6645_v46 = vstv %s6495_s18  ;;  %v6648_v7 = vstv %s6509_s21  ;;  %v6651_v11 = vstv %s6511_s22  ;;  %s6669_s18 = sld [smem:[#allocation3 + $0x11e]]  ;;  %s6671_s21 = sld [smem:[#allocation3 + $0x11f]] }
 0x19d   : > { %v1237_v38 = vsel %vm615_vm4, %v5799_v12, %v1227_v22  ;;  %vm12726_vm10 = vcmp.eq.s32.totalorder %v4526_v45, 9  ;;  %v6664_v16 = vstv %s6525_s27  ;;  %v6667_v41 = vstv %s6527_s28  ;;  %s7324_s22 = sld [smem:[#allocation3 + $0x184]]  ;;  %s7350_s27 = sld [smem:[#allocation3 + $0x185]] }
 0x19e   : > { %v1381_v27 = vsel %vm12726_vm10, %v6645_v46, %v1371_v4  ;;  %v1247_v12 = vsel %vm623_vm9, %v5802_v1, %v1237_v38  ;;  %vm12727_vm11 = vcmp.eq.s32.totalorder %v4526_v45, 10  ;;  %v6680_v62 = vstv %s6541_s6  ;;  %s7377_s28 = sld [smem:[#allocation3 + $0x186]]  ;;  %s7391_s6 = sld [smem:[#allocation3 + $0x187]] }
 0x19f   : > { %v1391_v17 = vsel %vm12727_vm11, %v6648_v7, %v1381_v27  ;;  %v6683_v18 = vstv %s6543_s7  ;;  %v1257_v25 = vsel %vm631_vm0, %v5812_v23, %v1247_v12  ;;  %vm12728_vm7 = vcmp.eq.s32.totalorder %v4526_v45, 11  ;;  %s7393_s7 = sld [smem:[#allocation3 + $0x188]] }
 0x1a0   : > { %v1401_v3 = vsel %vm12728_vm7, %v6651_v11, %v1391_v17  ;;  %v6692_v30 = vstv %s6557_s20  ;;  %v6695_v1 = vstv %s6559_s17  ;;  %v1267_v58 = vsel %vm639_vm12, %v5815_v39, %v1257_v25  ;;  %s7407_s20 = sld [smem:[#allocation3 + $0x189]]  ;;  %s7409_s17 = sld [smem:[#allocation3 + $0x18a]] }
 0x1a1   : > { %vm12729_vm13 = vcmp.eq.s32.totalorder %v4526_v45, 12  ;;  %v6704_v23 = vstv %s6573_s24  ;;  %v6707_v19 = vstv %s6575_s1  ;;  %v1277_v36 = vsel %vm647_vm14, %v5825_v49, %v1267_v58  ;;  %s7423_s24 = sld [smem:[#allocation3 + $0x18b]]  ;;  %s7425_s1 = sld [smem:[#allocation3 + $0x18c]] }
 0x1a2   : > { %v1411_v59 = vsel %vm12729_vm13, %v6664_v16, %v1401_v3  ;;  %vm12730_vm15 = vcmp.eq.s32.totalorder %v4526_v45, 13  ;;  %v6716_v13 = vstv %s6589_s15  ;;  %v6719_v0 = vstv %s6591_s25  ;;  %s7439_s15 = sld [smem:[#allocation3 + $0x18d]]  ;;  %s7441_s25 = sld [smem:[#allocation3 + $0x18e]] }
 0x1a3   : > { %v1421_v39 = vsel %vm12730_vm15, %v6667_v41, %v1411_v59  ;;  %vm12731_vm3 = vcmp.eq.s32.totalorder %v5479_v14, 31  ;;  %vm12732_vm10 = vcmp.eq.s32.totalorder %v4526_v45, 14  ;;  %v6728_v49 = vstv %s6605_s3  ;;  %s7455_s3 = sld [smem:[#allocation3 + $0x18f]] }
 0x1a4   : > { %v1287_v42 = vsel %vm12731_vm3, %v5828_v40, %v1277_v36  ;;  %v1431_v20 = vsel %vm12732_vm10, %v6680_v62, %v1421_v39  ;;  %v6731_v2 = vstv %s6607_s4  ;;  %vm12733_vm11 = vcmp.eq.s32.totalorder %v4526_v45, 15  ;;  %s7457_s4 = sld [smem:[#allocation3 + $0x190]] }
 0x1a5   : > { %1296 = vst [vmem:[#allocation2 + $0x78] sm:$0xff] %v1287_v42  ;;  %v1441_v28 = vsel %vm12733_vm11, %v6683_v18, %v1431_v20  ;;  %v6737_v35 = vstv %s6621_s5  ;;  %v6740_v43 = vstv %s6623_s14  ;;  %v6743_v21 = vstv %s6637_s8  ;;  %s7272_s14 = sld [smem:[#allocation3 + $0x182]]  ;;  %s7471_s5 = sld [smem:[#allocation3 + $0x191]] }
 0x1a6   : > { %vm12734_vm7 = vcmp.eq.s32.totalorder %v4526_v45, 16  ;;  %v6749_v61 = vstv %s6639_s30  ;;  %v6752_v15 = vstv %s6653_s11  ;;  %v6755_v24 = vstv %s6655_s10  ;;  %s7232_s10 = sld [smem:[#allocation3 + $0x180]]  ;;  %s7246_s11 = sld [smem:[#allocation3 + $0x181]] }
 0x1a7   : > { %v1451_v40 = vsel %vm12734_vm7, %v6692_v30, %v1441_v28  ;;  %vm12735_vm13 = vcmp.eq.s32.totalorder %v4526_v45, 17  ;;  %v6761_v5 = vstv %s6669_s18  ;;  %v6764_v52 = vstv %s6671_s21  ;;  %s7298_s30 = sld [smem:[#allocation3 + $0x183]]  ;;  %s7473_s8 = sld [smem:[#allocation3 + $0x192]] }
 0x1a8   : > { %v1461_v31 = vsel %vm12735_vm13, %v6695_v1, %v1451_v40  ;;  %vm12736_vm15 = vcmp.eq.s32.totalorder %v4633_v32, 1  ;;  %vm12737_vm3 = vcmp.eq.s32.totalorder %v4526_v45, 18  ;;  %vm12738_vm10 = vcmp.eq.s32.totalorder %v4633_v32, 2  ;;  %s7487_s18 = sld [smem:[#allocation3 + $0x193]]  ;;  %s7489_s21 = sld [smem:[#allocation3 + $0x194]] }
 0x1a9   : > { %v1302_v55 = vsel %vm12736_vm15, %v6412_v53, %v6400_v60  ;;  %v1471_v56 = vsel %vm12737_vm3, %v6704_v23, %v1461_v31  ;;  %vm12739_vm11 = vcmp.eq.s32.totalorder %v4769_v29, 1  ;;  %vm12740_vm7 = vcmp.eq.s32.totalorder %v4905_v37, 1 }
 0x1aa   : > { %v1312_v6 = vsel %vm12738_vm10, %v6439_v26, %v1302_v55  ;;  %v1303_v10 = vsel %vm12739_vm11, %v6412_v53, %v6400_v60  ;;  %v1304_v8 = vsel %vm12740_vm7, %v6412_v53, %v6400_v60  ;;  %vm12741_vm13 = vcmp.eq.s32.totalorder %v4526_v45, 19 }
 0x1ab   : > { %v1481_v57 = vsel %vm12741_vm13, %v6707_v19, %v1471_v56  ;;  %vm12742_vm15 = vcmp.eq.s32.totalorder %v4633_v32, 3  ;;  %vm12743_vm3 = vcmp.eq.s32.totalorder %v4769_v29, 2  ;;  %vm12744_vm10 = vcmp.eq.s32.totalorder %v4905_v37, 2 }
 0x1ac   : > { %v1322_v50 = vsel %vm12742_vm15, %v6465_v44, %v1312_v6  ;;  %v1313_v4 = vsel %vm12743_vm3, %v6439_v26, %v1303_v10  ;;  %v1314_v22 = vsel %vm12744_vm10, %v6439_v26, %v1304_v8  ;;  %vm12745_vm11 = vcmp.eq.s32.totalorder %v4526_v45, 20 }
 0x1ad   : > { %v1491_v38 = vsel %vm12745_vm11, %v6716_v13, %v1481_v57  ;;  %vm12746_vm7 = vcmp.eq.s32.totalorder %v4633_v32, 4  ;;  %vm12747_vm13 = vcmp.eq.s32.totalorder %v4769_v29, 3  ;;  %vm12748_vm15 = vcmp.eq.s32.totalorder %v4905_v37, 3 }
 0x1ae   : > { %v1332_v27 = vsel %vm12746_vm7, %v6491_v9, %v1322_v50  ;;  %v1323_v12 = vsel %vm12747_vm13, %v6465_v44, %v1313_v4  ;;  %v1324_v17 = vsel %vm12748_vm15, %v6465_v44, %v1314_v22  ;;  %vm12749_vm3 = vcmp.eq.s32.totalorder %v4526_v45, 21 }
 0x1af   : > { %v1501_v25 = vsel %vm12749_vm3, %v6719_v0, %v1491_v38  ;;  %vm12750_vm10 = vcmp.eq.s32.totalorder %v4633_v32, 5  ;;  %vm12751_vm11 = vcmp.eq.s32.totalorder %v4769_v29, 4  ;;  %vm12752_vm7 = vcmp.eq.s32.totalorder %v4905_v37, 4 }
 0x1b0   : > { %v1342_v3 = vsel %vm12750_vm10, %v6523_v51, %v1332_v27  ;;  %v1333_v58 = vsel %vm12751_vm11, %v6491_v9, %v1323_v12  ;;  %v1334_v59 = vsel %vm12752_vm7, %v6491_v9, %v1324_v17  ;;  %vm12753_vm13 = vcmp.eq.s32.totalorder %v4526_v45, 22 }
 0x1b1   : > { %v1511_v36 = vsel %vm12753_vm13, %v6728_v49, %v1501_v25  ;;  %vm12754_vm15 = vcmp.eq.s32.totalorder %v4633_v32, 6  ;;  %vm12755_vm3 = vcmp.eq.s32.totalorder %v4769_v29, 5  ;;  %vm12756_vm10 = vcmp.eq.s32.totalorder %v4905_v37, 5 }
 0x1b2   : > { %v1352_v39 = vsel %vm12754_vm15, %v6555_v47, %v1342_v3  ;;  %v1343_v42 = vsel %vm12755_vm3, %v6523_v51, %v1333_v58  ;;  %v1344_v20 = vsel %vm12756_vm10, %v6523_v51, %v1334_v59  ;;  %vm12757_vm11 = vcmp.eq.s32.totalorder %v4526_v45, 23 }
 0x1b3   : > { %v1521_v28 = vsel %vm12757_vm11, %v6731_v2, %v1511_v36  ;;  %vm12758_vm7 = vcmp.eq.s32.totalorder %v4633_v32, 7  ;;  %vm12759_vm13 = vcmp.eq.s32.totalorder %v4769_v29, 6  ;;  %vm12760_vm15 = vcmp.eq.s32.totalorder %v4905_v37, 6 }
 0x1b4   : > { %v1362_v40 = vsel %vm12758_vm7, %v6587_v34, %v1352_v39  ;;  %v1353_v31 = vsel %vm12759_vm13, %v6555_v47, %v1343_v42  ;;  %v1354_v55 = vsel %vm12760_vm15, %v6555_v47, %v1344_v20  ;;  %vm12761_vm3 = vcmp.eq.s32.totalorder %v4526_v45, 24 }
 0x1b5   : > { %v1531_v56 = vsel %vm12761_vm3, %v6737_v35, %v1521_v28  ;;  %vm12762_vm10 = vcmp.eq.s32.totalorder %v4633_v32, 8  ;;  %vm12763_vm11 = vcmp.eq.s32.totalorder %v4769_v29, 7  ;;  %vm12764_vm7 = vcmp.eq.s32.totalorder %v4905_v37, 7 }
 0x1b6   : > { %v1372_v6 = vsel %vm12762_vm10, %v6619_v63, %v1362_v40  ;;  %v1363_v10 = vsel %vm12763_vm11, %v6587_v34, %v1353_v31  ;;  %v1364_v8 = vsel %vm12764_vm7, %v6587_v34, %v1354_v55  ;;  %vm12765_vm13 = vcmp.eq.s32.totalorder %v4526_v45, 25 }
 0x1b7   : > { %v1541_v57 = vsel %vm12765_vm13, %v6740_v43, %v1531_v56  ;;  %vm12766_vm15 = vcmp.eq.s32.totalorder %v4633_v32, 9  ;;  %vm12767_vm3 = vcmp.eq.s32.totalorder %v4769_v29, 8  ;;  %vm12768_vm10 = vcmp.eq.s32.totalorder %v4905_v37, 8 }
 0x1b8   : > { %v1382_v50 = vsel %vm12766_vm15, %v6645_v46, %v1372_v6  ;;  %v1373_v4 = vsel %vm12767_vm3, %v6619_v63, %v1363_v10  ;;  %v1374_v22 = vsel %vm12768_vm10, %v6619_v63, %v1364_v8  ;;  %vm12769_vm11 = vcmp.eq.s32.totalorder %v4526_v45, 26 }
 0x1b9   : > { %v1551_v38 = vsel %vm12769_vm11, %v6743_v21, %v1541_v57  ;;  %vm12770_vm7 = vcmp.eq.s32.totalorder %v4633_v32, 10  ;;  %vm12771_vm13 = vcmp.eq.s32.totalorder %v4769_v29, 9  ;;  %vm12772_vm15 = vcmp.eq.s32.totalorder %v4905_v37, 9 }
 0x1ba   : > { %v1392_v27 = vsel %vm12770_vm7, %v6648_v7, %v1382_v50  ;;  %v1383_v12 = vsel %vm12771_vm13, %v6645_v46, %v1373_v4  ;;  %v1384_v17 = vsel %vm12772_vm15, %v6645_v46, %v1374_v22  ;;  %vm12773_vm3 = vcmp.eq.s32.totalorder %v4526_v45, 27 }
 0x1bb   : > { %v1561_v25 = vsel %vm12773_vm3, %v6749_v61, %v1551_v38  ;;  %vm12774_vm10 = vcmp.eq.s32.totalorder %v4633_v32, 11  ;;  %vm12775_vm11 = vcmp.eq.s32.totalorder %v4769_v29, 10  ;;  %vm12776_vm7 = vcmp.eq.s32.totalorder %v4905_v37, 10 }
 0x1bc   : > { %v1402_v3 = vsel %vm12774_vm10, %v6651_v11, %v1392_v27  ;;  %v1393_v58 = vsel %vm12775_vm11, %v6648_v7, %v1383_v12  ;;  %v1394_v59 = vsel %vm12776_vm7, %v6648_v7, %v1384_v17  ;;  %vm12777_vm13 = vcmp.eq.s32.totalorder %v4526_v45, 28 }
 0x1bd   : > { %v1571_v36 = vsel %vm12777_vm13, %v6752_v15, %v1561_v25  ;;  %vm12778_vm15 = vcmp.eq.s32.totalorder %v4633_v32, 12  ;;  %vm12779_vm3 = vcmp.eq.s32.totalorder %v4769_v29, 11  ;;  %vm12780_vm10 = vcmp.eq.s32.totalorder %v4905_v37, 11 }
 0x1be   : > { %v1412_v39 = vsel %vm12778_vm15, %v6664_v16, %v1402_v3  ;;  %v1403_v42 = vsel %vm12779_vm3, %v6651_v11, %v1393_v58  ;;  %v1404_v20 = vsel %vm12780_vm10, %v6651_v11, %v1394_v59  ;;  %vm12781_vm11 = vcmp.eq.s32.totalorder %v4526_v45, 29 }
 0x1bf   : > { %v1581_v28 = vsel %vm12781_vm11, %v6755_v24, %v1571_v36  ;;  %vm12782_vm7 = vcmp.eq.s32.totalorder %v4633_v32, 13  ;;  %vm12783_vm13 = vcmp.eq.s32.totalorder %v4769_v29, 12  ;;  %vm12784_vm15 = vcmp.eq.s32.totalorder %v4905_v37, 12 }
 0x1c0   : > { %v1422_v40 = vsel %vm12782_vm7, %v6667_v41, %v1412_v39  ;;  %v1413_v31 = vsel %vm12783_vm13, %v6664_v16, %v1403_v42  ;;  %v1414_v55 = vsel %vm12784_vm15, %v6664_v16, %v1404_v20  ;;  %vm12785_vm3 = vcmp.eq.s32.totalorder %v4526_v45, 30 }
 0x1c1   : > { %v1591_v56 = vsel %vm12785_vm3, %v6761_v5, %v1581_v28  ;;  %vm12786_vm10 = vcmp.eq.s32.totalorder %v4633_v32, 14  ;;  %vm12787_vm11 = vcmp.eq.s32.totalorder %v4769_v29, 13  ;;  %vm12788_vm7 = vcmp.eq.s32.totalorder %v4905_v37, 13 }
 0x1c2   : > { %v1432_v6 = vsel %vm12786_vm10, %v6680_v62, %v1422_v40  ;;  %v1423_v10 = vsel %vm12787_vm11, %v6667_v41, %v1413_v31  ;;  %v1424_v8 = vsel %vm12788_vm7, %v6667_v41, %v1414_v55  ;;  %vm12789_vm13 = vcmp.eq.s32.totalorder %v4526_v45, 31 }
 0x1c3   : > { %v1601_v57 = vsel %vm12789_vm13, %v6764_v52, %v1591_v56  ;;  %vm12790_vm15 = vcmp.eq.s32.totalorder %v4633_v32, 15  ;;  %vm12791_vm3 = vcmp.eq.s32.totalorder %v4769_v29, 14  ;;  %vm12792_vm10 = vcmp.eq.s32.totalorder %v4905_v37, 14 }
 0x1c4   : > { %v1442_v50 = vsel %vm12790_vm15, %v6683_v18, %v1432_v6  ;;  %v1433_v4 = vsel %vm12791_vm3, %v6680_v62, %v1423_v10  ;;  %v1434_v22 = vsel %vm12792_vm10, %v6680_v62, %v1424_v8  ;;  %1610 = vst [vmem:[#allocation2 + $0x80] sm:$0xff] %v1601_v57  ;;  %vm12793_vm11 = vcmp.eq.s32.totalorder %v4633_v32, 16 }
 0x1c5   : > { %v1452_v38 = vsel %vm12793_vm11, %v6692_v30, %v1442_v50  ;;  %vm12794_vm7 = vcmp.eq.s32.totalorder %v4769_v29, 15  ;;  %vm12795_vm13 = vcmp.eq.s32.totalorder %v4905_v37, 15  ;;  %vm12796_vm15 = vcmp.eq.s32.totalorder %v4981_v48, 1 }
 0x1c6   : > { %v1443_v27 = vsel %vm12794_vm7, %v6683_v18, %v1433_v4  ;;  %v1444_v12 = vsel %vm12795_vm13, %v6683_v18, %v1434_v22  ;;  %v1305_v17 = vsel %vm12796_vm15, %v6412_v53, %v6400_v60  ;;  %vm12797_vm3 = vcmp.eq.s32.totalorder %v4633_v32, 17 }
 0x1c7   : > { %v1462_v25 = vsel %vm12797_vm3, %v6695_v1, %v1452_v38  ;;  %vm12798_vm10 = vcmp.eq.s32.totalorder %v4769_v29, 16  ;;  %vm12799_vm11 = vcmp.eq.s32.totalorder %v4905_v37, 16  ;;  %vm12800_vm7 = vcmp.eq.s32.totalorder %v4981_v48, 2 }
 0x1c8   : > { %v1453_v3 = vsel %vm12798_vm10, %v6692_v30, %v1443_v27  ;;  %v1454_v58 = vsel %vm12799_vm11, %v6692_v30, %v1444_v12  ;;  %v1315_v59 = vsel %vm12800_vm7, %v6439_v26, %v1305_v17  ;;  %vm12801_vm13 = vcmp.eq.s32.totalorder %v4633_v32, 18 }
 0x1c9   : > { %v1472_v36 = vsel %vm12801_vm13, %v6704_v23, %v1462_v25  ;;  %vm12802_vm15 = vcmp.eq.s32.totalorder %v4769_v29, 17  ;;  %vm12803_vm3 = vcmp.eq.s32.totalorder %v4905_v37, 17  ;;  %vm12804_vm10 = vcmp.eq.s32.totalorder %v4981_v48, 3 }
 0x1ca   : > { %v1463_v39 = vsel %vm12802_vm15, %v6695_v1, %v1453_v3  ;;  %v1464_v42 = vsel %vm12803_vm3, %v6695_v1, %v1454_v58  ;;  %v1325_v20 = vsel %vm12804_vm10, %v6465_v44, %v1315_v59  ;;  %vm12805_vm11 = vcmp.eq.s32.totalorder %v4633_v32, 19 }
 0x1cb   : > { %v1482_v28 = vsel %vm12805_vm11, %v6707_v19, %v1472_v36  ;;  %vm12806_vm7 = vcmp.eq.s32.totalorder %v4769_v29, 18  ;;  %vm12807_vm13 = vcmp.eq.s32.totalorder %v4905_v37, 18  ;;  %vm12808_vm15 = vcmp.eq.s32.totalorder %v4981_v48, 4 }
 0x1cc   : > { %v1473_v40 = vsel %vm12806_vm7, %v6704_v23, %v1463_v39  ;;  %v1474_v31 = vsel %vm12807_vm13, %v6704_v23, %v1464_v42  ;;  %v1335_v55 = vsel %vm12808_vm15, %v6491_v9, %v1325_v20  ;;  %vm12809_vm3 = vcmp.eq.s32.totalorder %v4633_v32, 20 }
 0x1cd   : > { %v1492_v56 = vsel %vm12809_vm3, %v6716_v13, %v1482_v28  ;;  %vm12810_vm10 = vcmp.eq.s32.totalorder %v4769_v29, 19  ;;  %vm12811_vm11 = vcmp.eq.s32.totalorder %v4905_v37, 19  ;;  %vm12812_vm7 = vcmp.eq.s32.totalorder %v4981_v48, 5 }
 0x1ce   : > { %v1483_v6 = vsel %vm12810_vm10, %v6707_v19, %v1473_v40  ;;  %v1484_v10 = vsel %vm12811_vm11, %v6707_v19, %v1474_v31  ;;  %v1345_v8 = vsel %vm12812_vm7, %v6523_v51, %v1335_v55  ;;  %vm12813_vm13 = vcmp.eq.s32.totalorder %v4633_v32, 21 }
 0x1cf   : > { %v1502_v57 = vsel %vm12813_vm13, %v6719_v0, %v1492_v56  ;;  %vm12814_vm15 = vcmp.eq.s32.totalorder %v4769_v29, 20  ;;  %vm12815_vm3 = vcmp.eq.s32.totalorder %v4905_v37, 20  ;;  %vm12816_vm10 = vcmp.eq.s32.totalorder %v4981_v48, 6 }
 0x1d0   : > { %v1493_v50 = vsel %vm12814_vm15, %v6716_v13, %v1483_v6  ;;  %v1494_v4 = vsel %vm12815_vm3, %v6716_v13, %v1484_v10  ;;  %v1355_v22 = vsel %vm12816_vm10, %v6555_v47, %v1345_v8  ;;  %vm12817_vm11 = vcmp.eq.s32.totalorder %v4633_v32, 22 }
 0x1d1   : > { %v1512_v38 = vsel %vm12817_vm11, %v6728_v49, %v1502_v57  ;;  %vm12818_vm7 = vcmp.eq.s32.totalorder %v4769_v29, 21  ;;  %vm12819_vm13 = vcmp.eq.s32.totalorder %v4905_v37, 21  ;;  %vm12820_vm15 = vcmp.eq.s32.totalorder %v4981_v48, 7 }
 0x1d2   : > { %v1503_v27 = vsel %vm12818_vm7, %v6719_v0, %v1493_v50  ;;  %v1504_v12 = vsel %vm12819_vm13, %v6719_v0, %v1494_v4  ;;  %v1365_v17 = vsel %vm12820_vm15, %v6587_v34, %v1355_v22  ;;  %vm12821_vm3 = vcmp.eq.s32.totalorder %v4633_v32, 23 }
 0x1d3   : > { %v1522_v25 = vsel %vm12821_vm3, %v6731_v2, %v1512_v38  ;;  %vm12822_vm10 = vcmp.eq.s32.totalorder %v4769_v29, 22  ;;  %vm12823_vm11 = vcmp.eq.s32.totalorder %v4905_v37, 22  ;;  %vm12824_vm7 = vcmp.eq.s32.totalorder %v4981_v48, 8 }
 0x1d4   : > { %v1513_v3 = vsel %vm12822_vm10, %v6728_v49, %v1503_v27  ;;  %v1514_v58 = vsel %vm12823_vm11, %v6728_v49, %v1504_v12  ;;  %v1375_v59 = vsel %vm12824_vm7, %v6619_v63, %v1365_v17  ;;  %vm12825_vm13 = vcmp.eq.s32.totalorder %v4633_v32, 24 }
 0x1d5   : > { %v1532_v36 = vsel %vm12825_vm13, %v6737_v35, %v1522_v25  ;;  %vm12826_vm15 = vcmp.eq.s32.totalorder %v4769_v29, 23  ;;  %vm12827_vm3 = vcmp.eq.s32.totalorder %v4905_v37, 23  ;;  %vm12828_vm10 = vcmp.eq.s32.totalorder %v4981_v48, 9 }
 0x1d6   : > { %v1523_v39 = vsel %vm12826_vm15, %v6731_v2, %v1513_v3  ;;  %v1524_v42 = vsel %vm12827_vm3, %v6731_v2, %v1514_v58  ;;  %v1385_v20 = vsel %vm12828_vm10, %v6645_v46, %v1375_v59  ;;  %vm12829_vm11 = vcmp.eq.s32.totalorder %v4633_v32, 25 }
 0x1d7   : > { %v1542_v28 = vsel %vm12829_vm11, %v6740_v43, %v1532_v36  ;;  %vm12830_vm7 = vcmp.eq.s32.totalorder %v4769_v29, 24  ;;  %vm12831_vm13 = vcmp.eq.s32.totalorder %v4905_v37, 24  ;;  %vm12832_vm15 = vcmp.eq.s32.totalorder %v4981_v48, 10 }
 0x1d8   : > { %v1533_v40 = vsel %vm12830_vm7, %v6737_v35, %v1523_v39  ;;  %v1534_v31 = vsel %vm12831_vm13, %v6737_v35, %v1524_v42  ;;  %v1395_v55 = vsel %vm12832_vm15, %v6648_v7, %v1385_v20  ;;  %vm12833_vm3 = vcmp.eq.s32.totalorder %v4633_v32, 26 }
 0x1d9   : > { %v1552_v56 = vsel %vm12833_vm3, %v6743_v21, %v1542_v28  ;;  %vm12834_vm10 = vcmp.eq.s32.totalorder %v4769_v29, 25  ;;  %vm12835_vm11 = vcmp.eq.s32.totalorder %v4905_v37, 25  ;;  %vm12836_vm7 = vcmp.eq.s32.totalorder %v4981_v48, 11 }
 0x1da   : > { %v1543_v6 = vsel %vm12834_vm10, %v6740_v43, %v1533_v40  ;;  %v1544_v10 = vsel %vm12835_vm11, %v6740_v43, %v1534_v31  ;;  %v1405_v8 = vsel %vm12836_vm7, %v6651_v11, %v1395_v55  ;;  %vm12837_vm13 = vcmp.eq.s32.totalorder %v4633_v32, 27 }
 0x1db   : > { %v1562_v57 = vsel %vm12837_vm13, %v6749_v61, %v1552_v56  ;;  %vm12838_vm15 = vcmp.eq.s32.totalorder %v4769_v29, 26  ;;  %vm12839_vm3 = vcmp.eq.s32.totalorder %v4905_v37, 26  ;;  %vm12840_vm10 = vcmp.eq.s32.totalorder %v4981_v48, 12 }
 0x1dc   : > { %v1553_v50 = vsel %vm12838_vm15, %v6743_v21, %v1543_v6  ;;  %v1554_v4 = vsel %vm12839_vm3, %v6743_v21, %v1544_v10  ;;  %v1415_v22 = vsel %vm12840_vm10, %v6664_v16, %v1405_v8  ;;  %vm12841_vm11 = vcmp.eq.s32.totalorder %v4633_v32, 28 }
 0x1dd   : > { %v1572_v38 = vsel %vm12841_vm11, %v6752_v15, %v1562_v57  ;;  %vm12842_vm7 = vcmp.eq.s32.totalorder %v4769_v29, 27  ;;  %vm12843_vm13 = vcmp.eq.s32.totalorder %v4905_v37, 27  ;;  %vm12844_vm15 = vcmp.eq.s32.totalorder %v4981_v48, 13 }
 0x1de   : > { %v1563_v27 = vsel %vm12842_vm7, %v6749_v61, %v1553_v50  ;;  %v1564_v12 = vsel %vm12843_vm13, %v6749_v61, %v1554_v4  ;;  %v1425_v17 = vsel %vm12844_vm15, %v6667_v41, %v1415_v22  ;;  %vm12845_vm3 = vcmp.eq.s32.totalorder %v4633_v32, 29 }
 0x1df   : > { %v1582_v25 = vsel %vm12845_vm3, %v6755_v24, %v1572_v38  ;;  %vm12846_vm10 = vcmp.eq.s32.totalorder %v4769_v29, 28  ;;  %vm12847_vm11 = vcmp.eq.s32.totalorder %v4905_v37, 28  ;;  %vm12848_vm7 = vcmp.eq.s32.totalorder %v4981_v48, 14 }
 0x1e0   : > { %v1573_v3 = vsel %vm12846_vm10, %v6752_v15, %v1563_v27  ;;  %v1574_v58 = vsel %vm12847_vm11, %v6752_v15, %v1564_v12  ;;  %v1435_v59 = vsel %vm12848_vm7, %v6680_v62, %v1425_v17  ;;  %vm12849_vm13 = vcmp.eq.s32.totalorder %v4633_v32, 30 }
 0x1e1   : > { %v1592_v36 = vsel %vm12849_vm13, %v6761_v5, %v1582_v25  ;;  %vm12850_vm15 = vcmp.eq.s32.totalorder %v4769_v29, 29  ;;  %vm12851_vm3 = vcmp.eq.s32.totalorder %v4905_v37, 29  ;;  %vm12852_vm10 = vcmp.eq.s32.totalorder %v4981_v48, 15 }
 0x1e2   : > { %v1583_v39 = vsel %vm12850_vm15, %v6755_v24, %v1573_v3  ;;  %v1584_v42 = vsel %vm12851_vm3, %v6755_v24, %v1574_v58  ;;  %v1445_v20 = vsel %vm12852_vm10, %v6683_v18, %v1435_v59  ;;  %vm12853_vm11 = vcmp.eq.s32.totalorder %v4633_v32, 31 }
 0x1e3   : > { %v1602_v28 = vsel %vm12853_vm11, %v6764_v52, %v1592_v36  ;;  %vm12854_vm7 = vcmp.eq.s32.totalorder %v4769_v29, 30  ;;  %vm12855_vm13 = vcmp.eq.s32.totalorder %v4905_v37, 30  ;;  %vm12856_vm15 = vcmp.eq.s32.totalorder %v4981_v48, 16 }
 0x1e4   : > { %v1593_v40 = vsel %vm12854_vm7, %v6761_v5, %v1583_v39  ;;  %v1594_v31 = vsel %vm12855_vm13, %v6761_v5, %v1584_v42  ;;  %v1455_v55 = vsel %vm12856_vm15, %v6692_v30, %v1445_v20  ;;  %1611 = vst [vmem:[#allocation2 + $0x88] sm:$0xff] %v1602_v28  ;;  %vm12857_vm3 = vcmp.eq.s32.totalorder %v4769_v29, 31 }
 0x1e5   : > { %v1603_v56 = vsel %vm12857_vm3, %v6764_v52, %v1593_v40  ;;  %vm12858_vm10 = vcmp.eq.s32.totalorder %v4905_v37, 31  ;;  %vm12859_vm11 = vcmp.eq.s32.totalorder %v4981_v48, 17  ;;  %vm12860_vm7 = vcmp.eq.s32.totalorder %v5102_v33, 1 }
 0x1e6   : > { %v1604_v6 = vsel %vm12858_vm10, %v6764_v52, %v1594_v31  ;;  %v1465_v10 = vsel %vm12859_vm11, %v6695_v1, %v1455_v55  ;;  %v1306_v8 = vsel %vm12860_vm7, %v6412_v53, %v6400_v60  ;;  %1612 = vst [vmem:[#allocation2 + $0x90] sm:$0xff] %v1603_v56  ;;  %vm12861_vm13 = vcmp.eq.s32.totalorder %v4981_v48, 18 }
 0x1e7   : > { %1613 = vst [vmem:[#allocation2 + $0x98] sm:$0xff] %v1604_v6  ;;  %v1475_v57 = vsel %vm12861_vm13, %v6704_v23, %v1465_v10  ;;  %vm12862_vm15 = vcmp.eq.s32.totalorder %v5102_v33, 2  ;;  %vm12863_vm3 = vcmp.eq.s32.totalorder %v5274_v54, 1  ;;  %vm12864_vm10 = vcmp.eq.s32.totalorder %v5479_v14, 1 }
 0x1e8   : > { %v1316_v50 = vsel %vm12862_vm15, %v6439_v26, %v1306_v8  ;;  %v1307_v4 = vsel %vm12863_vm3, %v6412_v53, %v6400_v60  ;;  %v1308_v22 = vsel %vm12864_vm10, %v6412_v53, %v6400_v60  ;;  %vm12865_vm11 = vcmp.eq.s32.totalorder %v4981_v48, 19 }
 0x1e9   : > { %v1485_v38 = vsel %vm12865_vm11, %v6707_v19, %v1475_v57  ;;  %vm12866_vm7 = vcmp.eq.s32.totalorder %v5102_v33, 3  ;;  %vm12867_vm13 = vcmp.eq.s32.totalorder %v5274_v54, 2  ;;  %vm12868_vm15 = vcmp.eq.s32.totalorder %v5479_v14, 2 }
 0x1ea   : > { %v1326_v27 = vsel %vm12866_vm7, %v6465_v44, %v1316_v50  ;;  %v1317_v12 = vsel %vm12867_vm13, %v6439_v26, %v1307_v4  ;;  %v1318_v17 = vsel %vm12868_vm15, %v6439_v26, %v1308_v22  ;;  %vm12869_vm3 = vcmp.eq.s32.totalorder %v4981_v48, 20 }
 0x1eb   : > { %v1495_v60 = vsel %vm12869_vm3, %v6716_v13, %v1485_v38  ;;  %vm12870_vm10 = vcmp.eq.s32.totalorder %v5102_v33, 4  ;;  %vm12871_vm11 = vcmp.eq.s32.totalorder %v5274_v54, 3  ;;  %vm12872_vm7 = vcmp.eq.s32.totalorder %v5479_v14, 3 }
 0x1ec   : > { %v1336_v53 = vsel %vm12870_vm10, %v6491_v9, %v1326_v27  ;;  %v1327_v25 = vsel %vm12871_vm11, %v6465_v44, %v1317_v12  ;;  %v1328_v3 = vsel %vm12872_vm7, %v6465_v44, %v1318_v17  ;;  %vm12873_vm13 = vcmp.eq.s32.totalorder %v4981_v48, 21 }
 0x1ed   : > { %v1505_v26 = vsel %vm12873_vm13, %v6719_v0, %v1495_v60  ;;  %vm12874_vm15 = vcmp.eq.s32.totalorder %v5102_v33, 5  ;;  %vm12875_vm3 = vcmp.eq.s32.totalorder %v5274_v54, 4  ;;  %vm12876_vm10 = vcmp.eq.s32.totalorder %v5479_v14, 4 }
 0x1ee   : > { %v1346_v58 = vsel %vm12874_vm15, %v6523_v51, %v1336_v53  ;;  %v1337_v59 = vsel %vm12875_vm3, %v6491_v9, %v1327_v25  ;;  %v1338_v36 = vsel %vm12876_vm10, %v6491_v9, %v1328_v3  ;;  %vm12877_vm11 = vcmp.eq.s32.totalorder %v4981_v48, 22 }
 0x1ef   : > { %v1515_v44 = vsel %vm12877_vm11, %v6728_v49, %v1505_v26  ;;  %vm12878_vm7 = vcmp.eq.s32.totalorder %v5102_v33, 6  ;;  %vm12879_vm13 = vcmp.eq.s32.totalorder %v5274_v54, 5  ;;  %vm12880_vm15 = vcmp.eq.s32.totalorder %v5479_v14, 5 }
 0x1f0   : > { %v1356_v39 = vsel %vm12878_vm7, %v6555_v47, %v1346_v58  ;;  %v1347_v42 = vsel %vm12879_vm13, %v6523_v51, %v1337_v59  ;;  %v1348_v20 = vsel %vm12880_vm15, %v6523_v51, %v1338_v36  ;;  %vm12881_vm3 = vcmp.eq.s32.totalorder %v4981_v48, 23 }
 0x1f1   : > { %v1525_v9 = vsel %vm12881_vm3, %v6731_v2, %v1515_v44  ;;  %vm12882_vm10 = vcmp.eq.s32.totalorder %v5102_v33, 7  ;;  %vm12883_vm11 = vcmp.eq.s32.totalorder %v5274_v54, 6  ;;  %vm12884_vm7 = vcmp.eq.s32.totalorder %v5479_v14, 6 }
 0x1f2   : > { %v1366_v28 = vsel %vm12882_vm10, %v6587_v34, %v1356_v39  ;;  %v1357_v40 = vsel %vm12883_vm11, %v6555_v47, %v1347_v42  ;;  %v1358_v31 = vsel %vm12884_vm7, %v6555_v47, %v1348_v20  ;;  %vm12885_vm13 = vcmp.eq.s32.totalorder %v4981_v48, 24 }
 0x1f3   : > { %v1535_v51 = vsel %vm12885_vm13, %v6737_v35, %v1525_v9  ;;  %vm12886_vm15 = vcmp.eq.s32.totalorder %v5102_v33, 8  ;;  %vm12887_vm3 = vcmp.eq.s32.totalorder %v5274_v54, 7  ;;  %vm12888_vm10 = vcmp.eq.s32.totalorder %v5479_v14, 7 }
 0x1f4   : > { %v1376_v55 = vsel %vm12886_vm15, %v6619_v63, %v1366_v28  ;;  %v1367_v56 = vsel %vm12887_vm3, %v6587_v34, %v1357_v40  ;;  %v1368_v6 = vsel %vm12888_vm10, %v6587_v34, %v1358_v31  ;;  %vm12889_vm11 = vcmp.eq.s32.totalorder %v4981_v48, 25 }
 0x1f5   : > { %v1545_v47 = vsel %vm12889_vm11, %v6740_v43, %v1535_v51  ;;  %vm12890_vm7 = vcmp.eq.s32.totalorder %v5102_v33, 9  ;;  %vm12891_vm13 = vcmp.eq.s32.totalorder %v5274_v54, 8  ;;  %vm12892_vm15 = vcmp.eq.s32.totalorder %v5479_v14, 8 }
 0x1f6   : > { %v1386_v10 = vsel %vm12890_vm7, %v6645_v46, %v1376_v55  ;;  %v1377_v8 = vsel %vm12891_vm13, %v6619_v63, %v1367_v56  ;;  %v1378_v57 = vsel %vm12892_vm15, %v6619_v63, %v1368_v6  ;;  %vm12893_vm3 = vcmp.eq.s32.totalorder %v4981_v48, 26 }
 0x1f7   : > { %v1555_v34 = vsel %vm12893_vm3, %v6743_v21, %v1545_v47  ;;  %vm12894_vm10 = vcmp.eq.s32.totalorder %v5102_v33, 10  ;;  %vm12895_vm11 = vcmp.eq.s32.totalorder %v5274_v54, 9  ;;  %vm12896_vm7 = vcmp.eq.s32.totalorder %v5479_v14, 9 }
 0x1f8   : > { %v1396_v50 = vsel %vm12894_vm10, %v6648_v7, %v1386_v10  ;;  %v1387_v4 = vsel %vm12895_vm11, %v6645_v46, %v1377_v8  ;;  %v1388_v22 = vsel %vm12896_vm7, %v6645_v46, %v1378_v57  ;;  %vm12897_vm13 = vcmp.eq.s32.totalorder %v4981_v48, 27 }
 0x1f9   : > { %v1565_v63 = vsel %vm12897_vm13, %v6749_v61, %v1555_v34  ;;  %vm12898_vm15 = vcmp.eq.s32.totalorder %v5102_v33, 11  ;;  %vm12899_vm3 = vcmp.eq.s32.totalorder %v5274_v54, 10  ;;  %vm12900_vm10 = vcmp.eq.s32.totalorder %v5479_v14, 10 }
 0x1fa   : > { %v1406_v38 = vsel %vm12898_vm15, %v6651_v11, %v1396_v50  ;;  %v1397_v27 = vsel %vm12899_vm3, %v6648_v7, %v1387_v4  ;;  %v1398_v12 = vsel %vm12900_vm10, %v6648_v7, %v1388_v22  ;;  %vm12901_vm11 = vcmp.eq.s32.totalorder %v4981_v48, 28 }
 0x1fb   : > { %v1575_v46 = vsel %vm12901_vm11, %v6752_v15, %v1565_v63  ;;  %vm12902_vm7 = vcmp.eq.s32.totalorder %v5102_v33, 12  ;;  %vm12903_vm13 = vcmp.eq.s32.totalorder %v5274_v54, 11  ;;  %vm12904_vm15 = vcmp.eq.s32.totalorder %v5479_v14, 11 }
 0x1fc   : > { %v1416_v17 = vsel %vm12902_vm7, %v6664_v16, %v1406_v38  ;;  %v1407_v60 = vsel %vm12903_vm13, %v6651_v11, %v1397_v27  ;;  %v1408_v53 = vsel %vm12904_vm15, %v6651_v11, %v1398_v12  ;;  %vm12905_vm3 = vcmp.eq.s32.totalorder %v4981_v48, 29 }
 0x1fd   : > { %v1585_v7 = vsel %vm12905_vm3, %v6755_v24, %v1575_v46  ;;  %vm12906_vm10 = vcmp.eq.s32.totalorder %v5102_v33, 13  ;;  %vm12907_vm11 = vcmp.eq.s32.totalorder %v5274_v54, 12  ;;  %vm12908_vm7 = vcmp.eq.s32.totalorder %v5479_v14, 12 }
 0x1fe   : > { %v1426_v25 = vsel %vm12906_vm10, %v6667_v41, %v1416_v17  ;;  %v1417_v3 = vsel %vm12907_vm11, %v6664_v16, %v1407_v60  ;;  %v1418_v26 = vsel %vm12908_vm7, %v6664_v16, %v1408_v53  ;;  %vm12909_vm13 = vcmp.eq.s32.totalorder %v4981_v48, 30 }
 0x1ff   : > { %v1595_v11 = vsel %vm12909_vm13, %v6761_v5, %v1585_v7  ;;  %vm12910_vm15 = vcmp.eq.s32.totalorder %v5102_v33, 14  ;;  %vm12911_vm3 = vcmp.eq.s32.totalorder %v5274_v54, 13  ;;  %vm12912_vm10 = vcmp.eq.s32.totalorder %v5479_v14, 13 }
 0x200   : > { %v1436_v58 = vsel %vm12910_vm15, %v6680_v62, %v1426_v25  ;;  %v1427_v59 = vsel %vm12911_vm3, %v6667_v41, %v1417_v3  ;;  %v1428_v36 = vsel %vm12912_vm10, %v6667_v41, %v1418_v26  ;;  %vm12913_vm11 = vcmp.eq.s32.totalorder %v4981_v48, 31 }
 0x201   : > { %v1605_v16 = vsel %vm12913_vm11, %v6764_v52, %v1595_v11  ;;  %vm12914_vm7 = vcmp.eq.s32.totalorder %v5102_v33, 15  ;;  %vm12915_vm13 = vcmp.eq.s32.totalorder %v5274_v54, 14  ;;  %vm12916_vm15 = vcmp.eq.s32.totalorder %v5479_v14, 14 }
 0x202   : > { %v1446_v44 = vsel %vm12914_vm7, %v6683_v18, %v1436_v58  ;;  %v1437_v39 = vsel %vm12915_vm13, %v6680_v62, %v1427_v59  ;;  %v1438_v42 = vsel %vm12916_vm15, %v6680_v62, %v1428_v36  ;;  %1614 = vst [vmem:[#allocation2 + $0xa0] sm:$0xff] %v1605_v16  ;;  %vm12917_vm3 = vcmp.eq.s32.totalorder %v5102_v33, 16 }
 0x203   : > { %v1456_v41 = vsel %vm12917_vm3, %v6692_v30, %v1446_v44  ;;  %vm12918_vm10 = vcmp.eq.s32.totalorder %v5274_v54, 15  ;;  %vm12919_vm11 = vcmp.eq.s32.totalorder %v5479_v14, 15  ;;  %v7336_v28 = vstv %s7232_s10  ;;  %s7503_s10 = sld [smem:[#allocation3 + $0x195]] }
 0x204   : > { %v1447_v20 = vsel %vm12918_vm10, %v6683_v18, %v1437_v39  ;;  %v1448_v9 = vsel %vm12919_vm11, %v6683_v18, %v1438_v42  ;;  %vm12920_vm7 = vcmp.eq.s32.totalorder %v5102_v33, 17  ;;  %vm12921_vm13 = vcmp.eq.s32.totalorder %v5274_v54, 16 }
 0x205   : > { %v1466_v62 = vsel %vm12920_vm7, %v6695_v1, %v1456_v41  ;;  %v1457_v40 = vsel %vm12921_vm13, %v6692_v30, %v1447_v20  ;;  %vm12922_vm15 = vcmp.eq.s32.totalorder %v5479_v14, 16  ;;  %v7348_v51 = vstv %s7246_s11  ;;  %s7505_s11 = sld [smem:[#allocation3 + $0x196]] }
 0x206   : > { %v1458_v31 = vsel %vm12922_vm15, %v6692_v30, %v1448_v9  ;;  %vm12923_vm3 = vcmp.eq.s32.totalorder %v5102_v33, 18  ;;  %vm12924_vm10 = vcmp.eq.s32.totalorder %v5274_v54, 17  ;;  %vm12925_vm11 = vcmp.eq.s32.totalorder %v5479_v14, 17 }
 0x207   : > { %v1476_v18 = vsel %vm12923_vm3, %v6704_v23, %v1466_v62  ;;  %v1467_v55 = vsel %vm12924_vm10, %v6695_v1, %v1457_v40  ;;  %v1468_v56 = vsel %vm12925_vm11, %v6695_v1, %v1458_v31  ;;  %vm12926_vm7 = vcmp.eq.s32.totalorder %v4526_v45, 1 }
 0x208   : > { %v1622_v30 = vsel %vm12926_vm7, %v7348_v51, %v7336_v28  ;;  %vm12927_vm13 = vcmp.eq.s32.totalorder %v5102_v33, 19  ;;  %vm12928_vm15 = vcmp.eq.s32.totalorder %v5274_v54, 18  ;;  %vm12929_vm3 = vcmp.eq.s32.totalorder %v5479_v14, 18 }
 0x209   : > { %v1486_v6 = vsel %vm12927_vm13, %v6707_v19, %v1476_v18  ;;  %v1477_v47 = vsel %vm12928_vm15, %v6704_v23, %v1467_v55  ;;  %v1478_v10 = vsel %vm12929_vm3, %v6704_v23, %v1468_v56  ;;  %v7375_v8 = vstv %s7272_s14  ;;  %s7519_s14 = sld [smem:[#allocation3 + $0x197]] }
 0x20a   : > { %vm12930_vm10 = vcmp.eq.s32.totalorder %v5102_v33, 20  ;;  %vm12931_vm11 = vcmp.eq.s32.totalorder %v5274_v54, 19  ;;  %vm12932_vm7 = vcmp.eq.s32.totalorder %v5479_v14, 19  ;;  %vm12933_vm13 = vcmp.eq.s32.totalorder %v4526_v45, 2 }
 0x20b   : > { %v1496_v1 = vsel %vm12930_vm10, %v6716_v13, %v1486_v6  ;;  %v1487_v57 = vsel %vm12931_vm11, %v6707_v19, %v1477_v47  ;;  %v1488_v34 = vsel %vm12932_vm7, %v6707_v19, %v1478_v10  ;;  %v1632_v23 = vsel %vm12933_vm13, %v7375_v8, %v1622_v30 }
 0x20c   : > { %vm12934_vm15 = vcmp.eq.s32.totalorder %v5102_v33, 21  ;;  %vm12935_vm3 = vcmp.eq.s32.totalorder %v5274_v54, 20  ;;  %vm12936_vm10 = vcmp.eq.s32.totalorder %v5479_v14, 20  ;;  %v7405_v22 = vstv %s7298_s30  ;;  %s7521_s30 = sld [smem:[#allocation3 + $0x198]] }
 0x20d   : > { %v1506_v50 = vsel %vm12934_vm15, %v6719_v0, %v1496_v1  ;;  %v1497_v4 = vsel %vm12935_vm3, %v6716_v13, %v1487_v57  ;;  %v1498_v19 = vsel %vm12936_vm10, %v6716_v13, %v1488_v34  ;;  %vm12937_vm11 = vcmp.eq.s32.totalorder %v5102_v33, 22 }
 0x20e   : > { %v1516_v63 = vsel %vm12937_vm11, %v6728_v49, %v1506_v50  ;;  %vm12938_vm7 = vcmp.eq.s32.totalorder %v5274_v54, 21  ;;  %v1508_v27 = vsel %vm575_vm5, %v6719_v0, %v1498_v19  ;;  %vm12939_vm13 = vcmp.eq.s32.totalorder %v4526_v45, 3 }
 0x20f   : > { %v1507_v38 = vsel %vm12938_vm7, %v6719_v0, %v1497_v4  ;;  %v1642_v13 = vsel %vm12939_vm13, %v7405_v22, %v1632_v23  ;;  %vm12940_vm15 = vcmp.eq.s32.totalorder %v5102_v33, 23  ;;  %vm12941_vm3 = vcmp.eq.s32.totalorder %v5274_v54, 22 }
 0x210   : > { %v1526_v12 = vsel %vm12940_vm15, %v6731_v2, %v1516_v63  ;;  %v1517_v46 = vsel %vm12941_vm3, %v6728_v49, %v1507_v38  ;;  %v1518_v0 = vsel %vm583_vm1, %v6728_v49, %v1508_v27  ;;  %v7437_v17 = vstv %s7324_s22  ;;  %s7535_s22 = sld [smem:[#allocation3 + $0x199]] }
 0x211   : > { %vm12942_vm10 = vcmp.eq.s32.totalorder %v5102_v33, 24  ;;  %vm12943_vm11 = vcmp.eq.s32.totalorder %v5274_v54, 23  ;;  %v1528_v7 = vsel %vm591_vm6, %v6731_v2, %v1518_v0  ;;  %vm12944_vm7 = vcmp.eq.s32.totalorder %v4526_v45, 4 }
 0x212   : > { %v1536_v60 = vsel %vm12942_vm10, %v6737_v35, %v1526_v12  ;;  %v1527_v53 = vsel %vm12943_vm11, %v6731_v2, %v1517_v46  ;;  %v1652_v49 = vsel %vm12944_vm7, %v7437_v17, %v1642_v13  ;;  %vm12945_vm13 = vcmp.eq.s32.totalorder %v5102_v33, 25 }
 0x213   : > { %v1546_v25 = vsel %vm12945_vm13, %v6740_v43, %v1536_v60  ;;  %vm12946_vm15 = vcmp.eq.s32.totalorder %v5274_v54, 24  ;;  %v1538_v2 = vsel %vm599_vm8, %v6737_v35, %v1528_v7  ;;  %v7469_v26 = vstv %s7350_s27  ;;  %s7537_s27 = sld [smem:[#allocation3 + $0x19a]] }
 0x214   : > { %v1537_v3 = vsel %vm12946_vm15, %v6737_v35, %v1527_v53  ;;  %vm12947_vm3 = vcmp.eq.s32.totalorder %v5102_v33, 26  ;;  %vm12948_vm10 = vcmp.eq.s32.totalorder %v5274_v54, 25  ;;  %v1548_v59 = vsel %vm607_vm2, %v6740_v43, %v1538_v2 }
 0x215   : > { %v1556_v11 = vsel %vm12947_vm3, %v6743_v21, %v1546_v25  ;;  %v1547_v58 = vsel %vm12948_vm10, %v6740_v43, %v1537_v3  ;;  %vm12949_vm11 = vcmp.eq.s32.totalorder %v4526_v45, 5  ;;  %vm12950_vm7 = vcmp.eq.s32.totalorder %v5102_v33, 27 }
 0x216   : > { %v1662_v35 = vsel %vm12949_vm11, %v7469_v26, %v1652_v49  ;;  %v1566_v36 = vsel %vm12950_vm7, %v6749_v61, %v1556_v11  ;;  %vm12951_vm13 = vcmp.eq.s32.totalorder %v5274_v54, 26  ;;  %v1558_v43 = vsel %vm615_vm4, %v6743_v21, %v1548_v59 }
 0x217   : > { %v1557_v16 = vsel %vm12951_vm13, %v6743_v21, %v1547_v58  ;;  %v7501_v44 = vstv %s7377_s28  ;;  %vm12952_vm15 = vcmp.eq.s32.totalorder %v5102_v33, 28  ;;  %vm12953_vm3 = vcmp.eq.s32.totalorder %v5274_v54, 27  ;;  %s7551_s28 = sld [smem:[#allocation3 + $0x19b]] }
 0x218   : > { %v1576_v39 = vsel %vm12952_vm15, %v6752_v15, %v1566_v36  ;;  %v1567_v42 = vsel %vm12953_vm3, %v6749_v61, %v1557_v16  ;;  %v1568_v41 = vsel %vm623_vm9, %v6749_v61, %v1558_v43  ;;  %vm12954_vm10 = vcmp.eq.s32.totalorder %v4526_v45, 6 }
 0x219   : > { %v1672_v21 = vsel %vm12954_vm10, %v7501_v44, %v1662_v35  ;;  %vm12955_vm11 = vcmp.eq.s32.totalorder %v5102_v33, 29  ;;  %vm12956_vm7 = vcmp.eq.s32.totalorder %v5274_v54, 28  ;;  %v1578_v61 = vsel %vm631_vm0, %v6752_v15, %v1568_v41 }
 0x21a   : > { %v1586_v20 = vsel %vm12955_vm11, %v6755_v24, %v1576_v39  ;;  %v1577_v9 = vsel %vm12956_vm7, %v6752_v15, %v1567_v42  ;;  %v7533_v62 = vstv %s7391_s6  ;;  %vm12957_vm13 = vcmp.eq.s32.totalorder %v5102_v33, 30  ;;  %s7553_s6 = sld [smem:[#allocation3 + $0x19c]] }
 0x21b   : > { %v1596_v40 = vsel %vm12957_vm13, %v6761_v5, %v1586_v20  ;;  %vm12958_vm15 = vcmp.eq.s32.totalorder %v5274_v54, 29  ;;  %v1588_v18 = vsel %vm639_vm12, %v6755_v24, %v1578_v61  ;;  %vm12959_vm3 = vcmp.eq.s32.totalorder %v4526_v45, 7 }
 0x21c   : > { %v1587_v31 = vsel %vm12958_vm15, %v6755_v24, %v1577_v9  ;;  %v1682_v15 = vsel %vm12959_vm3, %v7533_v62, %v1672_v21  ;;  %vm12960_vm10 = vcmp.eq.s32.totalorder %v5102_v33, 31  ;;  %vm12961_vm11 = vcmp.eq.s32.totalorder %v5274_v54, 30 }
 0x21d   : > { %v1606_v55 = vsel %vm12960_vm10, %v6764_v52, %v1596_v40  ;;  %v1597_v56 = vsel %vm12961_vm11, %v6761_v5, %v1587_v31  ;;  %v1598_v24 = vsel %vm647_vm14, %v6761_v5, %v1588_v18  ;;  %v7565_v30 = vstv %s7393_s7  ;;  %s7583_s7 = sld [smem:[#allocation3 + $0x19f]] }
 0x21e   : > { %1615 = vst [vmem:[#allocation2 + $0xa8] sm:$0xff] %v1606_v55  ;;  %vm12962_vm7 = vcmp.eq.s32.totalorder %v5274_v54, 31  ;;  %vm12963_vm13 = vcmp.eq.s32.totalorder %v5479_v14, 31  ;;  %vm12964_vm15 = vcmp.eq.s32.totalorder %v4526_v45, 8  ;;  %v7581_v10 = vstv %s7407_s20  ;;  %s8196_s20 = sld [smem:[#allocation3 + $0x202]] }
 0x21f   : > { %v1607_v6 = vsel %vm12962_vm7, %v6764_v52, %v1597_v56  ;;  %v1608_v47 = vsel %vm12963_vm13, %v6764_v52, %v1598_v24  ;;  %v1692_v5 = vsel %vm12964_vm15, %v7565_v30, %v1682_v15  ;;  %vm12965_vm3 = vcmp.eq.s32.totalorder %v4526_v45, 9 }
 0x220   : > { %1616 = vst [vmem:[#allocation2 + $0xb0] sm:$0xff] %v1607_v6  ;;  %1617 = vst [vmem:[#allocation2 + $0xb8] sm:$0xff] %v1608_v47  ;;  %v1702_v1 = vsel %vm12965_vm3, %v7581_v10, %v1692_v5  ;;  %v7589_v52 = vstv %s7409_s17  ;;  %v7592_v57 = vstv %s7423_s24  ;;  %v7595_v34 = vstv %s7425_s1  ;;  %s8222_s17 = sld [smem:[#allocation3 + $0x203]]  ;;  %s8248_s24 = sld [smem:[#allocation3 + $0x204]] }
 0x221   : > { %vm12966_vm10 = vcmp.eq.s32.totalorder %v4526_v45, 10  ;;  %v7601_v50 = vstv %s7439_s15  ;;  %v7604_v4 = vstv %s7441_s25  ;;  %v7607_v19 = vstv %s7455_s3  ;;  %s8274_s1 = sld [smem:[#allocation3 + $0x205]]  ;;  %s8289_s15 = sld [smem:[#allocation3 + $0x206]] }
 0x222   : > { %v1712_v23 = vsel %vm12966_vm10, %v7589_v52, %v1702_v1  ;;  %vm12967_vm11 = vcmp.eq.s32.totalorder %v4526_v45, 11  ;;  %v7613_v38 = vstv %s7457_s4  ;;  %v7616_v27 = vstv %s7471_s5  ;;  %s8291_s25 = sld [smem:[#allocation3 + $0x207]]  ;;  %s8305_s3 = sld [smem:[#allocation3 + $0x208]] }
 0x223   : > { %v1722_v63 = vsel %vm12967_vm11, %v7592_v57, %v1712_v23  ;;  %v7619_v13 = vstv %s7473_s8  ;;  %vm12968_vm7 = vcmp.eq.s32.totalorder %v4526_v45, 12  ;;  %v7625_v46 = vstv %s7487_s18  ;;  %s8307_s4 = sld [smem:[#allocation3 + $0x209]]  ;;  %s8321_s5 = sld [smem:[#allocation3 + $0x20a]] }
 0x224   : > { %v1732_v12 = vsel %vm12968_vm7, %v7595_v34, %v1722_v63  ;;  %v7628_v0 = vstv %s7489_s21  ;;  %v7631_v60 = vstv %s7503_s10  ;;  %vm12969_vm13 = vcmp.eq.s32.totalorder %v4526_v45, 13  ;;  %s8323_s8 = sld [smem:[#allocation3 + $0x20b]]  ;;  %s8337_s18 = sld [smem:[#allocation3 + $0x20c]] }
 0x225   : > { %v1742_v53 = vsel %vm12969_vm13, %v7601_v50, %v1732_v12  ;;  %v7637_v7 = vstv %s7505_s11  ;;  %v7640_v49 = vstv %s7519_s14  ;;  %v7643_v25 = vstv %s7521_s30  ;;  %s8339_s21 = sld [smem:[#allocation3 + $0x20d]]  ;;  %s8353_s10 = sld [smem:[#allocation3 + $0x20e]] }
 0x226   : > { %vm12970_vm15 = vcmp.eq.s32.totalorder %v4526_v45, 14  ;;  %v7649_v2 = vstv %s7535_s22  ;;  %v7652_v11 = vstv %s7537_s27  ;;  %v7655_v58 = vstv %s7551_s28  ;;  %s8355_s11 = sld [smem:[#allocation3 + $0x20f]]  ;;  %s8369_s14 = sld [smem:[#allocation3 + $0x210]] }
 0x227   : > { %v1752_v3 = vsel %vm12970_vm15, %v7604_v4, %v1742_v53  ;;  %vm12971_vm3 = vcmp.eq.s32.totalorder %v4526_v45, 15  ;;  %v7661_v35 = vstv %s7553_s6  ;;  %v7664_v36 = vstv %s7567_s29  ;;  %s8170_s29 = sld [smem:[#allocation3 + $0x201]]  ;;  %s8385_s22 = sld [smem:[#allocation3 + $0x212]] }
 0x228   : > { %v1762_v59 = vsel %vm12971_vm3, %v7607_v19, %v1752_v3  ;;  %v7667_v16 = vstv %s7569_s9  ;;  %vm12972_vm10 = vcmp.eq.s32.totalorder %v4526_v45, 16  ;;  %v7673_v39 = vstv %s7583_s7  ;;  %s8156_s9 = sld [smem:[#allocation3 + $0x200]]  ;;  %s8371_s30 = sld [smem:[#allocation3 + $0x211]] }
 0x229   : > { %v1772_v43 = vsel %vm12972_vm10, %v7613_v38, %v1762_v59  ;;  %vm12973_vm11 = vcmp.eq.s32.totalorder %v4633_v32, 1  ;;  %vm12974_vm7 = vcmp.eq.s32.totalorder %v4769_v29, 1  ;;  %vm12975_vm13 = vcmp.eq.s32.totalorder %v4526_v45, 17  ;;  %s8387_s27 = sld [smem:[#allocation3 + $0x213]]  ;;  %s8401_s28 = sld [smem:[#allocation3 + $0x214]] }
 0x22a   : > { %v1623_v42 = vsel %vm12973_vm11, %v7348_v51, %v7336_v28  ;;  %v1624_v41 = vsel %vm12974_vm7, %v7348_v51, %v7336_v28  ;;  %v1782_v21 = vsel %vm12975_vm13, %v7616_v27, %v1772_v43  ;;  %vm12976_vm15 = vcmp.eq.s32.totalorder %v4633_v32, 2  ;;  %s8403_s6 = sld [smem:[#allocation3 + $0x215]]  ;;  %s8417_s7 = sld [smem:[#allocation3 + $0x216]] }
 0x22b   : > { %v1633_v20 = vsel %vm12976_vm15, %v7375_v8, %v1623_v42  ;;  %vm12977_vm3 = vcmp.eq.s32.totalorder %v4769_v29, 2  ;;  %vm12978_vm10 = vcmp.eq.s32.totalorder %v4905_v37, 1  ;;  %vm12979_vm11 = vcmp.eq.s32.totalorder %v4526_v45, 18 }
 0x22c   : > { %v1634_v9 = vsel %vm12977_vm3, %v7375_v8, %v1624_v41  ;;  %v1625_v61 = vsel %vm12978_vm10, %v7348_v51, %v7336_v28  ;;  %v1792_v40 = vsel %vm12979_vm11, %v7619_v13, %v1782_v21  ;;  %vm12980_vm7 = vcmp.eq.s32.totalorder %v4633_v32, 3 }
 0x22d   : > { %v1643_v31 = vsel %vm12980_vm7, %v7405_v22, %v1633_v20  ;;  %vm12981_vm13 = vcmp.eq.s32.totalorder %v4769_v29, 3  ;;  %vm12982_vm15 = vcmp.eq.s32.totalorder %v4905_v37, 2  ;;  %vm12983_vm3 = vcmp.eq.s32.totalorder %v4526_v45, 19 }
 0x22e   : > { %v1644_v18 = vsel %vm12981_vm13, %v7405_v22, %v1634_v9  ;;  %v1635_v15 = vsel %vm12982_vm15, %v7375_v8, %v1625_v61  ;;  %v1802_v55 = vsel %vm12983_vm3, %v7625_v46, %v1792_v40  ;;  %vm12984_vm10 = vcmp.eq.s32.totalorder %v4633_v32, 4 }
 0x22f   : > { %v1653_v56 = vsel %vm12984_vm10, %v7437_v17, %v1643_v31  ;;  %vm12985_vm11 = vcmp.eq.s32.totalorder %v4769_v29, 4  ;;  %vm12986_vm7 = vcmp.eq.s32.totalorder %v4905_v37, 3  ;;  %vm12987_vm13 = vcmp.eq.s32.totalorder %v4526_v45, 20 }
 0x230   : > { %v1654_v24 = vsel %vm12985_vm11, %v7437_v17, %v1644_v18  ;;  %v1645_v6 = vsel %vm12986_vm7, %v7405_v22, %v1635_v15  ;;  %v1812_v47 = vsel %vm12987_vm13, %v7628_v0, %v1802_v55  ;;  %vm12988_vm15 = vcmp.eq.s32.totalorder %v4633_v32, 5 }
 0x231   : > { %v1663_v5 = vsel %vm12988_vm15, %v7469_v26, %v1653_v56  ;;  %vm12989_vm3 = vcmp.eq.s32.totalorder %v4769_v29, 5  ;;  %vm12990_vm10 = vcmp.eq.s32.totalorder %v4905_v37, 4  ;;  %vm12991_vm11 = vcmp.eq.s32.totalorder %v4526_v45, 21 }
 0x232   : > { %v1664_v1 = vsel %vm12989_vm3, %v7469_v26, %v1654_v24  ;;  %v1655_v23 = vsel %vm12990_vm10, %v7437_v17, %v1645_v6  ;;  %v1822_v63 = vsel %vm12991_vm11, %v7631_v60, %v1812_v47  ;;  %vm12992_vm7 = vcmp.eq.s32.totalorder %v4633_v32, 6 }
 0x233   : > { %v1673_v12 = vsel %vm12992_vm7, %v7501_v44, %v1663_v5  ;;  %vm12993_vm13 = vcmp.eq.s32.totalorder %v4769_v29, 6  ;;  %vm12994_vm15 = vcmp.eq.s32.totalorder %v4905_v37, 5  ;;  %vm12995_vm3 = vcmp.eq.s32.totalorder %v4526_v45, 22 }
 0x234   : > { %v1674_v53 = vsel %vm12993_vm13, %v7501_v44, %v1664_v1  ;;  %v1665_v3 = vsel %vm12994_vm15, %v7469_v26, %v1655_v23  ;;  %v1832_v59 = vsel %vm12995_vm3, %v7637_v7, %v1822_v63  ;;  %vm12996_vm10 = vcmp.eq.s32.totalorder %v4633_v32, 7 }
 0x235   : > { %v1683_v43 = vsel %vm12996_vm10, %v7533_v62, %v1673_v12  ;;  %vm12997_vm11 = vcmp.eq.s32.totalorder %v4769_v29, 7  ;;  %vm12998_vm7 = vcmp.eq.s32.totalorder %v4905_v37, 6  ;;  %vm12999_vm13 = vcmp.eq.s32.totalorder %v4526_v45, 23 }
 0x236   : > { %v1684_v42 = vsel %vm12997_vm11, %v7533_v62, %v1674_v53  ;;  %v1675_v41 = vsel %vm12998_vm7, %v7501_v44, %v1665_v3  ;;  %v1842_v21 = vsel %vm12999_vm13, %v7640_v49, %v1832_v59  ;;  %vm13000_vm15 = vcmp.eq.s32.totalorder %v4633_v32, 8 }
 0x237   : > { %v1693_v20 = vsel %vm13000_vm15, %v7565_v30, %v1683_v43  ;;  %vm13001_vm3 = vcmp.eq.s32.totalorder %v4769_v29, 8  ;;  %vm13002_vm10 = vcmp.eq.s32.totalorder %v4905_v37, 7  ;;  %vm13003_vm11 = vcmp.eq.s32.totalorder %v4526_v45, 24 }
 0x238   : > { %v1694_v9 = vsel %vm13001_vm3, %v7565_v30, %v1684_v42  ;;  %v1685_v61 = vsel %vm13002_vm10, %v7533_v62, %v1675_v41  ;;  %v1852_v40 = vsel %vm13003_vm11, %v7643_v25, %v1842_v21  ;;  %vm13004_vm7 = vcmp.eq.s32.totalorder %v4633_v32, 9 }
 0x239   : > { %v1703_v31 = vsel %vm13004_vm7, %v7581_v10, %v1693_v20  ;;  %vm13005_vm13 = vcmp.eq.s32.totalorder %v4769_v29, 9  ;;  %vm13006_vm15 = vcmp.eq.s32.totalorder %v4905_v37, 8  ;;  %vm13007_vm3 = vcmp.eq.s32.totalorder %v4526_v45, 25 }
 0x23a   : > { %v1704_v18 = vsel %vm13005_vm13, %v7581_v10, %v1694_v9  ;;  %v1695_v15 = vsel %vm13006_vm15, %v7565_v30, %v1685_v61  ;;  %v1862_v55 = vsel %vm13007_vm3, %v7649_v2, %v1852_v40  ;;  %vm13008_vm10 = vcmp.eq.s32.totalorder %v4633_v32, 10 }
 0x23b   : > { %v1713_v56 = vsel %vm13008_vm10, %v7589_v52, %v1703_v31  ;;  %vm13009_vm11 = vcmp.eq.s32.totalorder %v4769_v29, 10  ;;  %vm13010_vm7 = vcmp.eq.s32.totalorder %v4905_v37, 9  ;;  %vm13011_vm13 = vcmp.eq.s32.totalorder %v4526_v45, 26 }
 0x23c   : > { %v1714_v24 = vsel %vm13009_vm11, %v7589_v52, %v1704_v18  ;;  %v1705_v6 = vsel %vm13010_vm7, %v7581_v10, %v1695_v15  ;;  %v1872_v47 = vsel %vm13011_vm13, %v7652_v11, %v1862_v55  ;;  %vm13012_vm15 = vcmp.eq.s32.totalorder %v4633_v32, 11 }
 0x23d   : > { %v1723_v5 = vsel %vm13012_vm15, %v7592_v57, %v1713_v56  ;;  %vm13013_vm3 = vcmp.eq.s32.totalorder %v4769_v29, 11  ;;  %vm13014_vm10 = vcmp.eq.s32.totalorder %v4905_v37, 10  ;;  %vm13015_vm11 = vcmp.eq.s32.totalorder %v4526_v45, 27 }
 0x23e   : > { %v1724_v1 = vsel %vm13013_vm3, %v7592_v57, %v1714_v24  ;;  %v1715_v23 = vsel %vm13014_vm10, %v7589_v52, %v1705_v6  ;;  %v1882_v63 = vsel %vm13015_vm11, %v7655_v58, %v1872_v47  ;;  %vm13016_vm7 = vcmp.eq.s32.totalorder %v4633_v32, 12 }
 0x23f   : > { %v1733_v12 = vsel %vm13016_vm7, %v7595_v34, %v1723_v5  ;;  %vm13017_vm13 = vcmp.eq.s32.totalorder %v4769_v29, 12  ;;  %vm13018_vm15 = vcmp.eq.s32.totalorder %v4905_v37, 11  ;;  %vm13019_vm3 = vcmp.eq.s32.totalorder %v4526_v45, 28 }
 0x240   : > { %v1734_v53 = vsel %vm13017_vm13, %v7595_v34, %v1724_v1  ;;  %v1725_v3 = vsel %vm13018_vm15, %v7592_v57, %v1715_v23  ;;  %v1892_v59 = vsel %vm13019_vm3, %v7661_v35, %v1882_v63  ;;  %vm13020_vm10 = vcmp.eq.s32.totalorder %v4633_v32, 13 }
 0x241   : > { %v1743_v43 = vsel %vm13020_vm10, %v7601_v50, %v1733_v12  ;;  %vm13021_vm11 = vcmp.eq.s32.totalorder %v4769_v29, 13  ;;  %vm13022_vm7 = vcmp.eq.s32.totalorder %v4905_v37, 12  ;;  %vm13023_vm13 = vcmp.eq.s32.totalorder %v4526_v45, 29 }
 0x242   : > { %v1744_v42 = vsel %vm13021_vm11, %v7601_v50, %v1734_v53  ;;  %v1735_v41 = vsel %vm13022_vm7, %v7595_v34, %v1725_v3  ;;  %v1902_v21 = vsel %vm13023_vm13, %v7664_v36, %v1892_v59  ;;  %vm13024_vm15 = vcmp.eq.s32.totalorder %v4633_v32, 14 }
 0x243   : > { %v1753_v20 = vsel %vm13024_vm15, %v7604_v4, %v1743_v43  ;;  %vm13025_vm3 = vcmp.eq.s32.totalorder %v4769_v29, 14  ;;  %vm13026_vm10 = vcmp.eq.s32.totalorder %v4905_v37, 13  ;;  %vm13027_vm11 = vcmp.eq.s32.totalorder %v4526_v45, 30 }
 0x244   : > { %v1754_v9 = vsel %vm13025_vm3, %v7604_v4, %v1744_v42  ;;  %v1745_v61 = vsel %vm13026_vm10, %v7601_v50, %v1735_v41  ;;  %v1912_v40 = vsel %vm13027_vm11, %v7667_v16, %v1902_v21  ;;  %vm13028_vm7 = vcmp.eq.s32.totalorder %v4633_v32, 15 }
 0x245   : > { %v1763_v31 = vsel %vm13028_vm7, %v7607_v19, %v1753_v20  ;;  %vm13029_vm13 = vcmp.eq.s32.totalorder %v4769_v29, 15  ;;  %vm13030_vm15 = vcmp.eq.s32.totalorder %v4905_v37, 14  ;;  %vm13031_vm3 = vcmp.eq.s32.totalorder %v4526_v45, 31 }
 0x246   : > { %v1764_v18 = vsel %vm13029_vm13, %v7607_v19, %v1754_v9  ;;  %v1755_v15 = vsel %vm13030_vm15, %v7604_v4, %v1745_v61  ;;  %v1922_v55 = vsel %vm13031_vm3, %v7673_v39, %v1912_v40  ;;  %vm13032_vm10 = vcmp.eq.s32.totalorder %v4633_v32, 16 }
 0x247   : > { %v1773_v56 = vsel %vm13032_vm10, %v7613_v38, %v1763_v31  ;;  %vm13033_vm11 = vcmp.eq.s32.totalorder %v4769_v29, 16  ;;  %vm13034_vm7 = vcmp.eq.s32.totalorder %v4905_v37, 15  ;;  %1931 = vst [vmem:[#allocation2 + $0xc0] sm:$0xff] %v1922_v55  ;;  %vm13035_vm13 = vcmp.eq.s32.totalorder %v4633_v32, 17 }
 0x248   : > { %v1774_v24 = vsel %vm13033_vm11, %v7613_v38, %v1764_v18  ;;  %v1765_v6 = vsel %vm13034_vm7, %v7607_v19, %v1755_v15  ;;  %v1783_v47 = vsel %vm13035_vm13, %v7616_v27, %v1773_v56  ;;  %vm13036_vm15 = vcmp.eq.s32.totalorder %v4769_v29, 17 }
 0x249   : > { %v1784_v5 = vsel %vm13036_vm15, %v7616_v27, %v1774_v24  ;;  %vm13037_vm3 = vcmp.eq.s32.totalorder %v4905_v37, 16  ;;  %vm13038_vm10 = vcmp.eq.s32.totalorder %v4981_v48, 1  ;;  %vm13039_vm11 = vcmp.eq.s32.totalorder %v4633_v32, 18 }
 0x24a   : > { %v1775_v1 = vsel %vm13037_vm3, %v7613_v38, %v1765_v6  ;;  %v1626_v23 = vsel %vm13038_vm10, %v7348_v51, %v7336_v28  ;;  %v1793_v63 = vsel %vm13039_vm11, %v7619_v13, %v1783_v47  ;;  %vm13040_vm7 = vcmp.eq.s32.totalorder %v4769_v29, 18 }
 0x24b   : > { %v1794_v12 = vsel %vm13040_vm7, %v7619_v13, %v1784_v5  ;;  %vm13041_vm13 = vcmp.eq.s32.totalorder %v4905_v37, 17  ;;  %vm13042_vm15 = vcmp.eq.s32.totalorder %v4981_v48, 2  ;;  %vm13043_vm3 = vcmp.eq.s32.totalorder %v4633_v32, 19 }
 0x24c   : > { %v1785_v53 = vsel %vm13041_vm13, %v7616_v27, %v1775_v1  ;;  %v1636_v3 = vsel %vm13042_vm15, %v7375_v8, %v1626_v23  ;;  %v1803_v59 = vsel %vm13043_vm3, %v7625_v46, %v1793_v63  ;;  %vm13044_vm10 = vcmp.eq.s32.totalorder %v4769_v29, 19 }
 0x24d   : > { %v1804_v43 = vsel %vm13044_vm10, %v7625_v46, %v1794_v12  ;;  %vm13045_vm11 = vcmp.eq.s32.totalorder %v4905_v37, 18  ;;  %vm13046_vm7 = vcmp.eq.s32.totalorder %v4981_v48, 3  ;;  %vm13047_vm13 = vcmp.eq.s32.totalorder %v4633_v32, 20 }
 0x24e   : > { %v1795_v42 = vsel %vm13045_vm11, %v7619_v13, %v1785_v53  ;;  %v1646_v41 = vsel %vm13046_vm7, %v7405_v22, %v1636_v3  ;;  %v1813_v21 = vsel %vm13047_vm13, %v7628_v0, %v1803_v59  ;;  %vm13048_vm15 = vcmp.eq.s32.totalorder %v4769_v29, 20 }
 0x24f   : > { %v1814_v20 = vsel %vm13048_vm15, %v7628_v0, %v1804_v43  ;;  %vm13049_vm3 = vcmp.eq.s32.totalorder %v4905_v37, 19  ;;  %vm13050_vm10 = vcmp.eq.s32.totalorder %v4981_v48, 4  ;;  %vm13051_vm11 = vcmp.eq.s32.totalorder %v4633_v32, 21 }
 0x250   : > { %v1805_v9 = vsel %vm13049_vm3, %v7625_v46, %v1795_v42  ;;  %v1656_v61 = vsel %vm13050_vm10, %v7437_v17, %v1646_v41  ;;  %v1823_v40 = vsel %vm13051_vm11, %v7631_v60, %v1813_v21  ;;  %vm13052_vm7 = vcmp.eq.s32.totalorder %v4769_v29, 21 }
 0x251   : > { %v1824_v31 = vsel %vm13052_vm7, %v7631_v60, %v1814_v20  ;;  %vm13053_vm13 = vcmp.eq.s32.totalorder %v4905_v37, 20  ;;  %vm13054_vm15 = vcmp.eq.s32.totalorder %v4981_v48, 5  ;;  %vm13055_vm3 = vcmp.eq.s32.totalorder %v4633_v32, 22 }
 0x252   : > { %v1815_v18 = vsel %vm13053_vm13, %v7628_v0, %v1805_v9  ;;  %v1666_v15 = vsel %vm13054_vm15, %v7469_v26, %v1656_v61  ;;  %v1833_v55 = vsel %vm13055_vm3, %v7637_v7, %v1823_v40  ;;  %vm13056_vm10 = vcmp.eq.s32.totalorder %v4769_v29, 22 }
 0x253   : > { %v1834_v56 = vsel %vm13056_vm10, %v7637_v7, %v1824_v31  ;;  %vm13057_vm11 = vcmp.eq.s32.totalorder %v4905_v37, 21  ;;  %vm13058_vm7 = vcmp.eq.s32.totalorder %v4981_v48, 6  ;;  %vm13059_vm13 = vcmp.eq.s32.totalorder %v4633_v32, 23 }
 0x254   : > { %v1825_v24 = vsel %vm13057_vm11, %v7631_v60, %v1815_v18  ;;  %v1676_v6 = vsel %vm13058_vm7, %v7501_v44, %v1666_v15  ;;  %v1843_v47 = vsel %vm13059_vm13, %v7640_v49, %v1833_v55  ;;  %vm13060_vm15 = vcmp.eq.s32.totalorder %v4769_v29, 23 }
 0x255   : > { %v1844_v5 = vsel %vm13060_vm15, %v7640_v49, %v1834_v56  ;;  %vm13061_vm3 = vcmp.eq.s32.totalorder %v4905_v37, 22  ;;  %vm13062_vm10 = vcmp.eq.s32.totalorder %v4981_v48, 7  ;;  %vm13063_vm11 = vcmp.eq.s32.totalorder %v4633_v32, 24 }
 0x256   : > { %v1835_v1 = vsel %vm13061_vm3, %v7637_v7, %v1825_v24  ;;  %v1686_v23 = vsel %vm13062_vm10, %v7533_v62, %v1676_v6  ;;  %v1853_v63 = vsel %vm13063_vm11, %v7643_v25, %v1843_v47  ;;  %vm13064_vm7 = vcmp.eq.s32.totalorder %v4769_v29, 24 }
 0x257   : > { %v1854_v12 = vsel %vm13064_vm7, %v7643_v25, %v1844_v5  ;;  %vm13065_vm13 = vcmp.eq.s32.totalorder %v4905_v37, 23  ;;  %vm13066_vm15 = vcmp.eq.s32.totalorder %v4981_v48, 8  ;;  %vm13067_vm3 = vcmp.eq.s32.totalorder %v4633_v32, 25 }
 0x258   : > { %v1845_v53 = vsel %vm13065_vm13, %v7640_v49, %v1835_v1  ;;  %v1696_v3 = vsel %vm13066_vm15, %v7565_v30, %v1686_v23  ;;  %v1863_v59 = vsel %vm13067_vm3, %v7649_v2, %v1853_v63  ;;  %vm13068_vm10 = vcmp.eq.s32.totalorder %v4769_v29, 25 }
 0x259   : > { %v1864_v43 = vsel %vm13068_vm10, %v7649_v2, %v1854_v12  ;;  %vm13069_vm11 = vcmp.eq.s32.totalorder %v4905_v37, 24  ;;  %vm13070_vm7 = vcmp.eq.s32.totalorder %v4981_v48, 9  ;;  %vm13071_vm13 = vcmp.eq.s32.totalorder %v4633_v32, 26 }
 0x25a   : > { %v1855_v42 = vsel %vm13069_vm11, %v7643_v25, %v1845_v53  ;;  %v1706_v41 = vsel %vm13070_vm7, %v7581_v10, %v1696_v3  ;;  %v1873_v21 = vsel %vm13071_vm13, %v7652_v11, %v1863_v59  ;;  %vm13072_vm15 = vcmp.eq.s32.totalorder %v4769_v29, 26 }
 0x25b   : > { %v1874_v20 = vsel %vm13072_vm15, %v7652_v11, %v1864_v43  ;;  %vm13073_vm3 = vcmp.eq.s32.totalorder %v4905_v37, 25  ;;  %vm13074_vm10 = vcmp.eq.s32.totalorder %v4981_v48, 10  ;;  %vm13075_vm11 = vcmp.eq.s32.totalorder %v4633_v32, 27 }
 0x25c   : > { %v1865_v9 = vsel %vm13073_vm3, %v7649_v2, %v1855_v42  ;;  %v1716_v61 = vsel %vm13074_vm10, %v7589_v52, %v1706_v41  ;;  %v1883_v40 = vsel %vm13075_vm11, %v7655_v58, %v1873_v21  ;;  %vm13076_vm7 = vcmp.eq.s32.totalorder %v4769_v29, 27 }
 0x25d   : > { %v1884_v31 = vsel %vm13076_vm7, %v7655_v58, %v1874_v20  ;;  %vm13077_vm13 = vcmp.eq.s32.totalorder %v4905_v37, 26  ;;  %vm13078_vm15 = vcmp.eq.s32.totalorder %v4981_v48, 11  ;;  %vm13079_vm3 = vcmp.eq.s32.totalorder %v4633_v32, 28 }
 0x25e   : > { %v1875_v18 = vsel %vm13077_vm13, %v7652_v11, %v1865_v9  ;;  %v1726_v15 = vsel %vm13078_vm15, %v7592_v57, %v1716_v61  ;;  %v1893_v55 = vsel %vm13079_vm3, %v7661_v35, %v1883_v40  ;;  %vm13080_vm10 = vcmp.eq.s32.totalorder %v4769_v29, 28 }
 0x25f   : > { %v1894_v56 = vsel %vm13080_vm10, %v7661_v35, %v1884_v31  ;;  %vm13081_vm11 = vcmp.eq.s32.totalorder %v4905_v37, 27  ;;  %vm13082_vm7 = vcmp.eq.s32.totalorder %v4981_v48, 12  ;;  %vm13083_vm13 = vcmp.eq.s32.totalorder %v4633_v32, 29 }
 0x260   : > { %v1885_v24 = vsel %vm13081_vm11, %v7655_v58, %v1875_v18  ;;  %v1736_v6 = vsel %vm13082_vm7, %v7595_v34, %v1726_v15  ;;  %v1903_v47 = vsel %vm13083_vm13, %v7664_v36, %v1893_v55  ;;  %vm13084_vm15 = vcmp.eq.s32.totalorder %v4769_v29, 29 }
 0x261   : > { %v1904_v5 = vsel %vm13084_vm15, %v7664_v36, %v1894_v56  ;;  %vm13085_vm3 = vcmp.eq.s32.totalorder %v4905_v37, 28  ;;  %vm13086_vm10 = vcmp.eq.s32.totalorder %v4981_v48, 13  ;;  %vm13087_vm11 = vcmp.eq.s32.totalorder %v4633_v32, 30 }
 0x262   : > { %v1895_v1 = vsel %vm13085_vm3, %v7661_v35, %v1885_v24  ;;  %v1746_v23 = vsel %vm13086_vm10, %v7601_v50, %v1736_v6  ;;  %v1913_v63 = vsel %vm13087_vm11, %v7667_v16, %v1903_v47  ;;  %vm13088_vm7 = vcmp.eq.s32.totalorder %v4769_v29, 30 }
 0x263   : > { %v1914_v12 = vsel %vm13088_vm7, %v7667_v16, %v1904_v5  ;;  %vm13089_vm13 = vcmp.eq.s32.totalorder %v4905_v37, 29  ;;  %vm13090_vm15 = vcmp.eq.s32.totalorder %v4981_v48, 14  ;;  %vm13091_vm3 = vcmp.eq.s32.totalorder %v4633_v32, 31 }
 0x264   : > { %v1905_v53 = vsel %vm13089_vm13, %v7664_v36, %v1895_v1  ;;  %v1756_v3 = vsel %vm13090_vm15, %v7604_v4, %v1746_v23  ;;  %v1923_v59 = vsel %vm13091_vm3, %v7673_v39, %v1913_v63  ;;  %vm13092_vm10 = vcmp.eq.s32.totalorder %v4769_v29, 31 }
 0x265   : > { %v1924_v43 = vsel %vm13092_vm10, %v7673_v39, %v1914_v12  ;;  %vm13093_vm11 = vcmp.eq.s32.totalorder %v4905_v37, 30  ;;  %vm13094_vm7 = vcmp.eq.s32.totalorder %v4981_v48, 15  ;;  %1932 = vst [vmem:[#allocation2 + $0xc8] sm:$0xff] %v1923_v59  ;;  %vm13095_vm13 = vcmp.eq.s32.totalorder %v4905_v37, 31 }
 0x266   : > { %v1915_v42 = vsel %vm13093_vm11, %v7667_v16, %v1905_v53  ;;  %v1766_v41 = vsel %vm13094_vm7, %v7607_v19, %v1756_v3  ;;  %1933 = vst [vmem:[#allocation2 + $0xd0] sm:$0xff] %v1924_v43  ;;  %vm13096_vm15 = vcmp.eq.s32.totalorder %v4981_v48, 16  ;;  %vm13097_vm3 = vcmp.eq.s32.totalorder %v5102_v33, 1 }
 0x267   : > { %v1925_v21 = vsel %vm13095_vm13, %v7673_v39, %v1915_v42  ;;  %v1776_v20 = vsel %vm13096_vm15, %v7613_v38, %v1766_v41  ;;  %v1627_v9 = vsel %vm13097_vm3, %v7348_v51, %v7336_v28  ;;  %vm13098_vm10 = vcmp.eq.s32.totalorder %v5274_v54, 1 }
 0x268   : > { %v1628_v61 = vsel %vm13098_vm10, %v7348_v51, %v7336_v28  ;;  %1934 = vst [vmem:[#allocation2 + $0xd8] sm:$0xff] %v1925_v21  ;;  %vm13099_vm11 = vcmp.eq.s32.totalorder %v4981_v48, 17  ;;  %vm13100_vm7 = vcmp.eq.s32.totalorder %v5102_v33, 2  ;;  %vm13101_vm13 = vcmp.eq.s32.totalorder %v5274_v54, 2 }
 0x269   : > { %v1786_v40 = vsel %vm13099_vm11, %v7616_v27, %v1776_v20  ;;  %v1637_v31 = vsel %vm13100_vm7, %v7375_v8, %v1627_v9  ;;  %v1638_v18 = vsel %vm13101_vm13, %v7375_v8, %v1628_v61  ;;  %vm13102_vm15 = vcmp.eq.s32.totalorder %v5479_v14, 1 }
 0x26a   : > { %v1629_v15 = vsel %vm13102_vm15, %v7348_v51, %v7336_v28  ;;  %vm13103_vm3 = vcmp.eq.s32.totalorder %v4981_v48, 18  ;;  %vm13104_vm10 = vcmp.eq.s32.totalorder %v5102_v33, 3  ;;  %vm13105_vm11 = vcmp.eq.s32.totalorder %v5274_v54, 3 }
 0x26b   : > { %v1796_v55 = vsel %vm13103_vm3, %v7619_v13, %v1786_v40  ;;  %v1647_v56 = vsel %vm13104_vm10, %v7405_v22, %v1637_v31  ;;  %v1648_v24 = vsel %vm13105_vm11, %v7405_v22, %v1638_v18  ;;  %vm13106_vm7 = vcmp.eq.s32.totalorder %v5479_v14, 2 }
 0x26c   : > { %v1639_v6 = vsel %vm13106_vm7, %v7375_v8, %v1629_v15  ;;  %vm13107_vm13 = vcmp.eq.s32.totalorder %v4981_v48, 19  ;;  %vm13108_vm15 = vcmp.eq.s32.totalorder %v5102_v33, 4  ;;  %vm13109_vm3 = vcmp.eq.s32.totalorder %v5274_v54, 4 }
 0x26d   : > { %v1806_v28 = vsel %vm13107_vm13, %v7625_v46, %v1796_v55  ;;  %v1657_v51 = vsel %vm13108_vm15, %v7437_v17, %v1647_v56  ;;  %v1658_v47 = vsel %vm13109_vm3, %v7437_v17, %v1648_v24  ;;  %vm13110_vm10 = vcmp.eq.s32.totalorder %v5479_v14, 3 }
 0x26e   : > { %v1649_v5 = vsel %vm13110_vm10, %v7405_v22, %v1639_v6  ;;  %vm13111_vm11 = vcmp.eq.s32.totalorder %v4981_v48, 20  ;;  %vm13112_vm7 = vcmp.eq.s32.totalorder %v5102_v33, 5  ;;  %vm13113_vm13 = vcmp.eq.s32.totalorder %v5274_v54, 5 }
 0x26f   : > { %v1816_v8 = vsel %vm13111_vm11, %v7628_v0, %v1806_v28  ;;  %v1667_v1 = vsel %vm13112_vm7, %v7469_v26, %v1657_v51  ;;  %v1668_v23 = vsel %vm13113_vm13, %v7469_v26, %v1658_v47  ;;  %vm13114_vm15 = vcmp.eq.s32.totalorder %v5479_v14, 4 }
 0x270   : > { %v1659_v63 = vsel %vm13114_vm15, %v7437_v17, %v1649_v5  ;;  %vm13115_vm3 = vcmp.eq.s32.totalorder %v4981_v48, 21  ;;  %vm13116_vm10 = vcmp.eq.s32.totalorder %v5102_v33, 6  ;;  %vm13117_vm11 = vcmp.eq.s32.totalorder %v5274_v54, 6 }
 0x271   : > { %v1826_v22 = vsel %vm13115_vm3, %v7631_v60, %v1816_v8  ;;  %v1677_v12 = vsel %vm13116_vm10, %v7501_v44, %v1667_v1  ;;  %v1678_v53 = vsel %vm13117_vm11, %v7501_v44, %v1668_v23  ;;  %vm13118_vm7 = vcmp.eq.s32.totalorder %v5479_v14, 5 }
 0x272   : > { %v1669_v3 = vsel %vm13118_vm7, %v7469_v26, %v1659_v63  ;;  %vm13119_vm13 = vcmp.eq.s32.totalorder %v4981_v48, 22  ;;  %vm13120_vm15 = vcmp.eq.s32.totalorder %v5102_v33, 7  ;;  %vm13121_vm3 = vcmp.eq.s32.totalorder %v5274_v54, 7 }
 0x273   : > { %v1836_v17 = vsel %vm13119_vm13, %v7637_v7, %v1826_v22  ;;  %v1687_v59 = vsel %vm13120_vm15, %v7533_v62, %v1677_v12  ;;  %v1688_v43 = vsel %vm13121_vm3, %v7533_v62, %v1678_v53  ;;  %vm13122_vm10 = vcmp.eq.s32.totalorder %v5479_v14, 6 }
 0x274   : > { %v1679_v42 = vsel %vm13122_vm10, %v7501_v44, %v1669_v3  ;;  %vm13123_vm11 = vcmp.eq.s32.totalorder %v4981_v48, 23  ;;  %vm13124_vm7 = vcmp.eq.s32.totalorder %v5102_v33, 8  ;;  %vm13125_vm13 = vcmp.eq.s32.totalorder %v5274_v54, 8 }
 0x275   : > { %v1846_v26 = vsel %vm13123_vm11, %v7640_v49, %v1836_v17  ;;  %v1697_v41 = vsel %vm13124_vm7, %v7565_v30, %v1687_v59  ;;  %v1698_v21 = vsel %vm13125_vm13, %v7565_v30, %v1688_v43  ;;  %vm13126_vm15 = vcmp.eq.s32.totalorder %v5479_v14, 7 }
 0x276   : > { %v1689_v20 = vsel %vm13126_vm15, %v7533_v62, %v1679_v42  ;;  %vm13127_vm3 = vcmp.eq.s32.totalorder %v4981_v48, 24  ;;  %vm13128_vm10 = vcmp.eq.s32.totalorder %v5102_v33, 9  ;;  %vm13129_vm11 = vcmp.eq.s32.totalorder %v5274_v54, 9 }
 0x277   : > { %v1856_v44 = vsel %vm13127_vm3, %v7643_v25, %v1846_v26  ;;  %v1707_v9 = vsel %vm13128_vm10, %v7581_v10, %v1697_v41  ;;  %v1708_v61 = vsel %vm13129_vm11, %v7581_v10, %v1698_v21  ;;  %vm13130_vm7 = vcmp.eq.s32.totalorder %v5479_v14, 8 }
 0x278   : > { %v1699_v40 = vsel %vm13130_vm7, %v7565_v30, %v1689_v20  ;;  %vm13131_vm13 = vcmp.eq.s32.totalorder %v4981_v48, 25  ;;  %vm13132_vm15 = vcmp.eq.s32.totalorder %v5102_v33, 10  ;;  %vm13133_vm3 = vcmp.eq.s32.totalorder %v5274_v54, 10 }
 0x279   : > { %v1866_v62 = vsel %vm13131_vm13, %v7649_v2, %v1856_v44  ;;  %v1717_v31 = vsel %vm13132_vm15, %v7589_v52, %v1707_v9  ;;  %v1718_v18 = vsel %vm13133_vm3, %v7589_v52, %v1708_v61  ;;  %vm13134_vm10 = vcmp.eq.s32.totalorder %v5479_v14, 9 }
 0x27a   : > { %v1709_v15 = vsel %vm13134_vm10, %v7581_v10, %v1699_v40  ;;  %vm13135_vm11 = vcmp.eq.s32.totalorder %v4981_v48, 26  ;;  %vm13136_vm7 = vcmp.eq.s32.totalorder %v5102_v33, 11  ;;  %vm13137_vm13 = vcmp.eq.s32.totalorder %v5274_v54, 11 }
 0x27b   : > { %v1876_v30 = vsel %vm13135_vm11, %v7652_v11, %v1866_v62  ;;  %v1727_v55 = vsel %vm13136_vm7, %v7592_v57, %v1717_v31  ;;  %v1728_v56 = vsel %vm13137_vm13, %v7592_v57, %v1718_v18  ;;  %vm13138_vm15 = vcmp.eq.s32.totalorder %v5479_v14, 10 }
 0x27c   : > { %v1719_v24 = vsel %vm13138_vm15, %v7589_v52, %v1709_v15  ;;  %vm13139_vm3 = vcmp.eq.s32.totalorder %v4981_v48, 27  ;;  %vm13140_vm10 = vcmp.eq.s32.totalorder %v5102_v33, 12  ;;  %vm13141_vm11 = vcmp.eq.s32.totalorder %v5274_v54, 12 }
 0x27d   : > { %v1886_v10 = vsel %vm13139_vm3, %v7655_v58, %v1876_v30  ;;  %v1737_v6 = vsel %vm13140_vm10, %v7595_v34, %v1727_v55  ;;  %v1738_v28 = vsel %vm13141_vm11, %v7595_v34, %v1728_v56  ;;  %vm13142_vm7 = vcmp.eq.s32.totalorder %v5479_v14, 11 }
 0x27e   : > { %v1729_v51 = vsel %vm13142_vm7, %v7592_v57, %v1719_v24  ;;  %vm13143_vm13 = vcmp.eq.s32.totalorder %v4981_v48, 28  ;;  %vm13144_vm15 = vcmp.eq.s32.totalorder %v5102_v33, 13  ;;  %vm13145_vm3 = vcmp.eq.s32.totalorder %v5274_v54, 13 }
 0x27f   : > { %v1896_v52 = vsel %vm13143_vm13, %v7661_v35, %v1886_v10  ;;  %v1747_v47 = vsel %vm13144_vm15, %v7601_v50, %v1737_v6  ;;  %v1748_v5 = vsel %vm13145_vm3, %v7601_v50, %v1738_v28  ;;  %vm13146_vm10 = vcmp.eq.s32.totalorder %v5479_v14, 12 }
 0x280   : > { %v1739_v8 = vsel %vm13146_vm10, %v7595_v34, %v1729_v51  ;;  %vm13147_vm11 = vcmp.eq.s32.totalorder %v4981_v48, 29  ;;  %vm13148_vm7 = vcmp.eq.s32.totalorder %v5102_v33, 14  ;;  %vm13149_vm13 = vcmp.eq.s32.totalorder %v5274_v54, 14 }
 0x281   : > { %v1906_v57 = vsel %vm13147_vm11, %v7664_v36, %v1896_v52  ;;  %v1757_v1 = vsel %vm13148_vm7, %v7604_v4, %v1747_v47  ;;  %v1758_v23 = vsel %vm13149_vm13, %v7604_v4, %v1748_v5  ;;  %vm13150_vm15 = vcmp.eq.s32.totalorder %v5479_v14, 13 }
 0x282   : > { %v1749_v63 = vsel %vm13150_vm15, %v7601_v50, %v1739_v8  ;;  %vm13151_vm3 = vcmp.eq.s32.totalorder %v4981_v48, 30  ;;  %vm13152_vm10 = vcmp.eq.s32.totalorder %v5102_v33, 15  ;;  %vm13153_vm11 = vcmp.eq.s32.totalorder %v5274_v54, 15 }
 0x283   : > { %v1916_v34 = vsel %vm13151_vm3, %v7667_v16, %v1906_v57  ;;  %v1767_v22 = vsel %vm13152_vm10, %v7607_v19, %v1757_v1  ;;  %v1768_v12 = vsel %vm13153_vm11, %v7607_v19, %v1758_v23  ;;  %vm13154_vm7 = vcmp.eq.s32.totalorder %v5479_v14, 14 }
 0x284   : > { %v1759_v53 = vsel %vm13154_vm7, %v7604_v4, %v1749_v63  ;;  %vm13155_vm13 = vcmp.eq.s32.totalorder %v4981_v48, 31  ;;  %vm13156_vm15 = vcmp.eq.s32.totalorder %v5102_v33, 16  ;;  %vm13157_vm3 = vcmp.eq.s32.totalorder %v5274_v54, 16 }
 0x285   : > { %v1926_v50 = vsel %vm13155_vm13, %v7673_v39, %v1916_v34  ;;  %v1777_v3 = vsel %vm13156_vm15, %v7613_v38, %v1767_v22  ;;  %v1778_v17 = vsel %vm13157_vm3, %v7613_v38, %v1768_v12  ;;  %vm13158_vm10 = vcmp.eq.s32.totalorder %v5479_v14, 15 }
 0x286   : > { %v1769_v59 = vsel %vm13158_vm10, %v7607_v19, %v1759_v53  ;;  %1935 = vst [vmem:[#allocation2 + $0xe0] sm:$0xff] %v1926_v50  ;;  %vm13159_vm11 = vcmp.eq.s32.totalorder %v5102_v33, 17  ;;  %vm13160_vm7 = vcmp.eq.s32.totalorder %v5274_v54, 17  ;;  %vm13161_vm13 = vcmp.eq.s32.totalorder %v5479_v14, 16 }
 0x287   : > { %v1787_v4 = vsel %vm13159_vm11, %v7616_v27, %v1777_v3  ;;  %v1788_v43 = vsel %vm13160_vm7, %v7616_v27, %v1778_v17  ;;  %v1779_v42 = vsel %vm13161_vm13, %v7613_v38, %v1769_v59  ;;  %v8260_v26 = vstv %s8156_s9  ;;  %s8419_s9 = sld [smem:[#allocation3 + $0x217]] }
 0x288   : > { %vm13162_vm15 = vcmp.eq.s32.totalorder %v5102_v33, 18  ;;  %vm13163_vm3 = vcmp.eq.s32.totalorder %v5274_v54, 18  ;;  %vm13164_vm10 = vcmp.eq.s32.totalorder %v5479_v14, 17  ;;  %v8272_v20 = vstv %s8170_s29  ;;  %s8433_s29 = sld [smem:[#allocation3 + $0x218]] }
 0x289   : > { %v1797_v19 = vsel %vm13162_vm15, %v7619_v13, %v1787_v4  ;;  %v1798_v41 = vsel %vm13163_vm3, %v7619_v13, %v1788_v43  ;;  %v1789_v21 = vsel %vm13164_vm10, %v7616_v27, %v1779_v42  ;;  %vm13165_vm11 = vcmp.eq.s32.totalorder %v5102_v33, 19 }
 0x28a   : > { %v1807_v38 = vsel %vm13165_vm11, %v7625_v46, %v1797_v19  ;;  %vm13166_vm7 = vcmp.eq.s32.totalorder %v5274_v54, 19  ;;  %vm13167_vm13 = vcmp.eq.s32.totalorder %v5479_v14, 18  ;;  %vm13168_vm15 = vcmp.eq.s32.totalorder %v4526_v45, 1 }
 0x28b   : > { %v1808_v44 = vsel %vm13166_vm7, %v7625_v46, %v1798_v41  ;;  %v1799_v9 = vsel %vm13167_vm13, %v7619_v13, %v1789_v21  ;;  %v1943_v27 = vsel %vm13168_vm15, %v8272_v20, %v8260_v26  ;;  %vm13169_vm3 = vcmp.eq.s32.totalorder %v5102_v33, 20 }
 0x28c   : > { %v1817_v61 = vsel %vm13169_vm3, %v7628_v0, %v1807_v38  ;;  %vm13170_vm10 = vcmp.eq.s32.totalorder %v5274_v54, 20  ;;  %vm13171_vm11 = vcmp.eq.s32.totalorder %v5479_v14, 19  ;;  %v8303_v62 = vstv %s8196_s20  ;;  %s8435_s20 = sld [smem:[#allocation3 + $0x219]] }
 0x28d   : > { %v1818_v40 = vsel %vm13170_vm10, %v7628_v0, %v1808_v44  ;;  %v1809_v13 = vsel %vm13171_vm11, %v7625_v46, %v1799_v9  ;;  %vm13172_vm7 = vcmp.eq.s32.totalorder %v5102_v33, 21  ;;  %vm13173_vm13 = vcmp.eq.s32.totalorder %v5274_v54, 21 }
 0x28e   : > { %v1827_v31 = vsel %vm13172_vm7, %v7631_v60, %v1817_v61  ;;  %v1828_v18 = vsel %vm13173_vm13, %v7631_v60, %v1818_v40  ;;  %vm13174_vm15 = vcmp.eq.s32.totalorder %v5479_v14, 20  ;;  %vm13175_vm3 = vcmp.eq.s32.totalorder %v4526_v45, 2 }
 0x28f   : > { %v1819_v15 = vsel %vm13174_vm15, %v7628_v0, %v1809_v13  ;;  %v1953_v46 = vsel %vm13175_vm3, %v8303_v62, %v1943_v27  ;;  %vm13176_vm10 = vcmp.eq.s32.totalorder %v5102_v33, 22  ;;  %vm13177_vm11 = vcmp.eq.s32.totalorder %v5274_v54, 22 }
 0x290   : > { %v1837_v30 = vsel %vm13176_vm10, %v7637_v7, %v1827_v31  ;;  %v1838_v55 = vsel %vm13177_vm11, %v7637_v7, %v1828_v18  ;;  %v1829_v0 = vsel %vm575_vm5, %v7631_v60, %v1819_v15  ;;  %v8335_v56 = vstv %s8222_s17  ;;  %s8449_s17 = sld [smem:[#allocation3 + $0x21a]] }
 0x291   : > { %vm13178_vm7 = vcmp.eq.s32.totalorder %v5102_v33, 23  ;;  %vm13179_vm13 = vcmp.eq.s32.totalorder %v5274_v54, 23  ;;  %v1839_v6 = vsel %vm583_vm1, %v7637_v7, %v1829_v0  ;;  %vm13180_vm15 = vcmp.eq.s32.totalorder %v4526_v45, 3 }
 0x292   : > { %v1847_v24 = vsel %vm13178_vm7, %v7640_v49, %v1837_v30  ;;  %v1848_v10 = vsel %vm13179_vm13, %v7640_v49, %v1838_v55  ;;  %v1963_v60 = vsel %vm13180_vm15, %v8335_v56, %v1953_v46  ;;  %vm13181_vm3 = vcmp.eq.s32.totalorder %v5102_v33, 24 }
 0x293   : > { %v1857_v28 = vsel %vm13181_vm3, %v7643_v25, %v1847_v24  ;;  %vm13182_vm10 = vcmp.eq.s32.totalorder %v5274_v54, 24  ;;  %v1849_v7 = vsel %vm591_vm6, %v7640_v49, %v1839_v6  ;;  %v8367_v52 = vstv %s8248_s24  ;;  %s8451_s24 = sld [smem:[#allocation3 + $0x21b]] }
 0x294   : > { %v1858_v51 = vsel %vm13182_vm10, %v7643_v25, %v1848_v10  ;;  %vm13183_vm11 = vcmp.eq.s32.totalorder %v5102_v33, 25  ;;  %vm13184_vm7 = vcmp.eq.s32.totalorder %v5274_v54, 25  ;;  %v1859_v8 = vsel %vm599_vm8, %v7643_v25, %v1849_v7 }
 0x295   : > { %v1867_v47 = vsel %vm13183_vm11, %v7649_v2, %v1857_v28  ;;  %v1868_v5 = vsel %vm13184_vm7, %v7649_v2, %v1858_v51  ;;  %vm13185_vm13 = vcmp.eq.s32.totalorder %v4526_v45, 4  ;;  %vm13186_vm15 = vcmp.eq.s32.totalorder %v5102_v33, 26 }
 0x296   : > { %v1973_v49 = vsel %vm13185_vm13, %v8367_v52, %v1963_v60  ;;  %v1877_v57 = vsel %vm13186_vm15, %v7652_v11, %v1867_v47  ;;  %vm13187_vm3 = vcmp.eq.s32.totalorder %v5274_v54, 26  ;;  %v1869_v25 = vsel %vm607_vm2, %v7649_v2, %v1859_v8 }
 0x297   : > { %v1878_v1 = vsel %vm13187_vm3, %v7652_v11, %v1868_v5  ;;  %v8399_v23 = vstv %s8274_s1  ;;  %vm13188_vm10 = vcmp.eq.s32.totalorder %v5102_v33, 27  ;;  %vm13189_vm11 = vcmp.eq.s32.totalorder %v5274_v54, 27  ;;  %s8465_s1 = sld [smem:[#allocation3 + $0x21c]] }
 0x298   : > { %v1887_v63 = vsel %vm13188_vm10, %v7655_v58, %v1877_v57  ;;  %v1888_v34 = vsel %vm13189_vm11, %v7655_v58, %v1878_v1  ;;  %v1879_v22 = vsel %vm615_vm4, %v7652_v11, %v1869_v25  ;;  %vm13190_vm7 = vcmp.eq.s32.totalorder %v4526_v45, 5 }
 0x299   : > { %v1983_v2 = vsel %vm13190_vm7, %v8399_v23, %v1973_v49  ;;  %vm13191_vm13 = vcmp.eq.s32.totalorder %v5102_v33, 28  ;;  %vm13192_vm15 = vcmp.eq.s32.totalorder %v5274_v54, 28  ;;  %v1889_v11 = vsel %vm623_vm9, %v7655_v58, %v1879_v22 }
 0x29a   : > { %v1897_v12 = vsel %vm13191_vm13, %v7661_v35, %v1887_v63  ;;  %v1898_v53 = vsel %vm13192_vm15, %v7661_v35, %v1888_v34  ;;  %v8431_v50 = vstv %s8289_s15  ;;  %vm13193_vm3 = vcmp.eq.s32.totalorder %v5102_v33, 29  ;;  %s8467_s15 = sld [smem:[#allocation3 + $0x21d]] }
 0x29b   : > { %v1907_v3 = vsel %vm13193_vm3, %v7664_v36, %v1897_v12  ;;  %vm13194_vm10 = vcmp.eq.s32.totalorder %v5274_v54, 29  ;;  %v1899_v59 = vsel %vm631_vm0, %v7661_v35, %v1889_v11  ;;  %vm13195_vm11 = vcmp.eq.s32.totalorder %v4526_v45, 6 }
 0x29c   : > { %v1908_v17 = vsel %vm13194_vm10, %v7664_v36, %v1898_v53  ;;  %v1993_v58 = vsel %vm13195_vm11, %v8431_v50, %v1983_v2  ;;  %vm13196_vm7 = vcmp.eq.s32.totalorder %v5102_v33, 30  ;;  %vm13197_vm13 = vcmp.eq.s32.totalorder %v5274_v54, 30 }
 0x29d   : > { %v1917_v4 = vsel %vm13196_vm7, %v7667_v16, %v1907_v3  ;;  %v1918_v43 = vsel %vm13197_vm13, %v7667_v16, %v1908_v17  ;;  %v1909_v35 = vsel %vm639_vm12, %v7664_v36, %v1899_v59  ;;  %v8463_v42 = vstv %s8291_s25  ;;  %s8481_s25 = sld [smem:[#allocation3 + $0x21e]] }
 0x29e   : > { %vm13198_vm15 = vcmp.eq.s32.totalorder %v5102_v33, 31  ;;  %vm13199_vm3 = vcmp.eq.s32.totalorder %v5274_v54, 31  ;;  %v1919_v36 = vsel %vm647_vm14, %v7667_v16, %v1909_v35  ;;  %vm13200_vm10 = vcmp.eq.s32.totalorder %v4526_v45, 7 }
 0x29f   : > { %v1927_v19 = vsel %vm13198_vm15, %v7673_v39, %v1917_v4  ;;  %v1928_v41 = vsel %vm13199_vm3, %v7673_v39, %v1918_v43  ;;  %v2003_v21 = vsel %vm13200_vm10, %v8463_v42, %v1993_v58  ;;  %vm13201_vm11 = vcmp.eq.s32.totalorder %v5479_v14, 31 }
 0x2a0   : > { %1936 = vst [vmem:[#allocation2 + $0xe8] sm:$0xff] %v1927_v19  ;;  %1937 = vst [vmem:[#allocation2 + $0xf0] sm:$0xff] %v1928_v41  ;;  %v1929_v38 = vsel %vm13201_vm11, %v7673_v39, %v1919_v36  ;;  %v8489_v16 = vstv %s8305_s3  ;;  %v8492_v44 = vstv %s8307_s4  ;;  %v8495_v9 = vstv %s8321_s5  ;;  %s9094_s3 = sld [smem:[#allocation3 + $0x281]]  ;;  %s9120_s4 = sld [smem:[#allocation3 + $0x282]] }
 0x2a1   : > { %1938 = vst [vmem:[#allocation2 + $0xf8] sm:$0xff] %v1929_v38  ;;  %vm13202_vm7 = vcmp.eq.s32.totalorder %v4526_v45, 8  ;;  %v8501_v61 = vstv %s8323_s8  ;;  %v8504_v40 = vstv %s8337_s18  ;;  %v8507_v39 = vstv %s8339_s21  ;;  %s9146_s5 = sld [smem:[#allocation3 + $0x283]]  ;;  %s9172_s8 = sld [smem:[#allocation3 + $0x284]] }
 0x2a2   : > { %v2013_v27 = vsel %vm13202_vm7, %v8489_v16, %v2003_v21  ;;  %vm13203_vm13 = vcmp.eq.s32.totalorder %v4526_v45, 9  ;;  %v8513_v31 = vstv %s8353_s10  ;;  %v8516_v18 = vstv %s8355_s11  ;;  %s9186_s18 = sld [smem:[#allocation3 + $0x285]]  ;;  %s9200_s21 = sld [smem:[#allocation3 + $0x286]] }
 0x2a3   : > { %v2023_v13 = vsel %vm13203_vm13, %v8492_v44, %v2013_v27  ;;  %v8519_v15 = vstv %s8369_s14  ;;  %vm13204_vm15 = vcmp.eq.s32.totalorder %v4526_v45, 10  ;;  %v8525_v30 = vstv %s8371_s30  ;;  %s9202_s10 = sld [smem:[#allocation3 + $0x287]]  ;;  %s9217_s11 = sld [smem:[#allocation3 + $0x288]] }
 0x2a4   : > { %v2033_v46 = vsel %vm13204_vm15, %v8495_v9, %v2023_v13  ;;  %v8528_v55 = vstv %s8385_s22  ;;  %v8531_v0 = vstv %s8387_s27  ;;  %vm13205_vm3 = vcmp.eq.s32.totalorder %v4526_v45, 11  ;;  %s9219_s14 = sld [smem:[#allocation3 + $0x289]]  ;;  %s9233_s30 = sld [smem:[#allocation3 + $0x28a]] }
 0x2a5   : > { %v2043_v24 = vsel %vm13205_vm3, %v8501_v61, %v2033_v46  ;;  %v8537_v10 = vstv %s8401_s28  ;;  %v8540_v6 = vstv %s8403_s6  ;;  %v8543_v60 = vstv %s8417_s7  ;;  %s9235_s22 = sld [smem:[#allocation3 + $0x28b]]  ;;  %s9249_s27 = sld [smem:[#allocation3 + $0x28c]] }
 0x2a6   : > { %vm13206_vm10 = vcmp.eq.s32.totalorder %v4526_v45, 12  ;;  %v8549_v51 = vstv %s8419_s9  ;;  %v8552_v7 = vstv %s8433_s29  ;;  %v8555_v47 = vstv %s8435_s20  ;;  %s9251_s28 = sld [smem:[#allocation3 + $0x28d]]  ;;  %s9265_s6 = sld [smem:[#allocation3 + $0x28e]] }
 0x2a7   : > { %v2053_v28 = vsel %vm13206_vm10, %v8504_v40, %v2043_v24  ;;  %vm13207_vm11 = vcmp.eq.s32.totalorder %v4526_v45, 13  ;;  %v8561_v8 = vstv %s8449_s17  ;;  %v8564_v49 = vstv %s8451_s24  ;;  %s9267_s7 = sld [smem:[#allocation3 + $0x28f]]  ;;  %s9281_s9 = sld [smem:[#allocation3 + $0x290]] }
 0x2a8   : > { %v2063_v5 = vsel %vm13207_vm11, %v8507_v39, %v2053_v28  ;;  %v8567_v57 = vstv %s8465_s1  ;;  %vm13208_vm7 = vcmp.eq.s32.totalorder %v4526_v45, 14  ;;  %v8573_v25 = vstv %s8467_s15  ;;  %s9283_s29 = sld [smem:[#allocation3 + $0x291]]  ;;  %s9297_s20 = sld [smem:[#allocation3 + $0x292]] }
 0x2a9   : > { %v2073_v1 = vsel %vm13208_vm7, %v8513_v31, %v2063_v5  ;;  %v8576_v63 = vstv %s8481_s25  ;;  %v8579_v34 = vstv %s8483_s16  ;;  %vm13209_vm13 = vcmp.eq.s32.totalorder %v4526_v45, 15  ;;  %s9080_s16 = sld [smem:[#allocation3 + $0x280]]  ;;  %s9299_s17 = sld [smem:[#allocation3 + $0x293]] }
 0x2aa   : > { %v2083_v22 = vsel %vm13209_vm13, %v8516_v18, %v2073_v1  ;;  %vm13210_vm15 = vcmp.eq.s32.totalorder %v4633_v32, 1  ;;  %vm13211_vm3 = vcmp.eq.s32.totalorder %v4769_v29, 1  ;;  %vm13212_vm10 = vcmp.eq.s32.totalorder %v4905_v37, 1  ;;  %s9313_s24 = sld [smem:[#allocation3 + $0x294]]  ;;  %s9315_s1 = sld [smem:[#allocation3 + $0x295]] }
 0x2ab   : > { %v1944_v2 = vsel %vm13210_vm15, %v8272_v20, %v8260_v26  ;;  %v1945_v12 = vsel %vm13211_vm3, %v8272_v20, %v8260_v26  ;;  %v1946_v53 = vsel %vm13212_vm10, %v8272_v20, %v8260_v26  ;;  %vm13213_vm11 = vcmp.eq.s32.totalorder %v4526_v45, 16  ;;  %s9329_s15 = sld [smem:[#allocation3 + $0x296]]  ;;  %s9331_s25 = sld [smem:[#allocation3 + $0x297]] }
 0x2ac   : > { %v2093_v11 = vsel %vm13213_vm11, %v8519_v15, %v2083_v22  ;;  %vm13214_vm7 = vcmp.eq.s32.totalorder %v4633_v32, 2  ;;  %vm13215_vm13 = vcmp.eq.s32.totalorder %v4769_v29, 2  ;;  %vm13216_vm15 = vcmp.eq.s32.totalorder %v4905_v37, 2 }
 0x2ad   : > { %v1954_v3 = vsel %vm13214_vm7, %v8303_v62, %v1944_v2  ;;  %v1955_v17 = vsel %vm13215_vm13, %v8303_v62, %v1945_v12  ;;  %v1956_v59 = vsel %vm13216_vm15, %v8303_v62, %v1946_v53  ;;  %vm13217_vm3 = vcmp.eq.s32.totalorder %v4526_v45, 17 }
 0x2ae   : > { %v2103_v58 = vsel %vm13217_vm3, %v8525_v30, %v2093_v11  ;;  %vm13218_vm10 = vcmp.eq.s32.totalorder %v4633_v32, 3  ;;  %vm13219_vm11 = vcmp.eq.s32.totalorder %v4769_v29, 3  ;;  %vm13220_vm7 = vcmp.eq.s32.totalorder %v4905_v37, 3 }
 0x2af   : > { %v1964_v4 = vsel %vm13218_vm10, %v8335_v56, %v1954_v3  ;;  %v1965_v43 = vsel %vm13219_vm11, %v8335_v56, %v1955_v17  ;;  %v1966_v35 = vsel %vm13220_vm7, %v8335_v56, %v1956_v59  ;;  %vm13221_vm13 = vcmp.eq.s32.totalorder %v4526_v45, 18 }
 0x2b0   : > { %v2113_v19 = vsel %vm13221_vm13, %v8528_v55, %v2103_v58  ;;  %vm13222_vm15 = vcmp.eq.s32.totalorder %v4633_v32, 4  ;;  %vm13223_vm3 = vcmp.eq.s32.totalorder %v4769_v29, 4  ;;  %vm13224_vm10 = vcmp.eq.s32.totalorder %v4905_v37, 4 }
 0x2b1   : > { %v1974_v41 = vsel %vm13222_vm15, %v8367_v52, %v1964_v4  ;;  %v1975_v36 = vsel %vm13223_vm3, %v8367_v52, %v1965_v43  ;;  %v1976_v21 = vsel %vm13224_vm10, %v8367_v52, %v1966_v35  ;;  %vm13225_vm11 = vcmp.eq.s32.totalorder %v4526_v45, 19 }
 0x2b2   : > { %v2123_v38 = vsel %vm13225_vm11, %v8531_v0, %v2113_v19  ;;  %vm13226_vm7 = vcmp.eq.s32.totalorder %v4633_v32, 5  ;;  %vm13227_vm13 = vcmp.eq.s32.totalorder %v4769_v29, 5  ;;  %vm13228_vm15 = vcmp.eq.s32.totalorder %v4905_v37, 5 }
 0x2b3   : > { %v1984_v27 = vsel %vm13226_vm7, %v8399_v23, %v1974_v41  ;;  %v1985_v13 = vsel %vm13227_vm13, %v8399_v23, %v1975_v36  ;;  %v1986_v46 = vsel %vm13228_vm15, %v8399_v23, %v1976_v21  ;;  %vm13229_vm3 = vcmp.eq.s32.totalorder %v4526_v45, 20 }
 0x2b4   : > { %v2133_v24 = vsel %vm13229_vm3, %v8537_v10, %v2123_v38  ;;  %vm13230_vm10 = vcmp.eq.s32.totalorder %v4633_v32, 6  ;;  %vm13231_vm11 = vcmp.eq.s32.totalorder %v4769_v29, 6  ;;  %vm13232_vm7 = vcmp.eq.s32.totalorder %v4905_v37, 6 }
 0x2b5   : > { %v1994_v28 = vsel %vm13230_vm10, %v8431_v50, %v1984_v27  ;;  %v1995_v5 = vsel %vm13231_vm11, %v8431_v50, %v1985_v13  ;;  %v1996_v1 = vsel %vm13232_vm7, %v8431_v50, %v1986_v46  ;;  %vm13233_vm13 = vcmp.eq.s32.totalorder %v4526_v45, 21 }
 0x2b6   : > { %v2143_v22 = vsel %vm13233_vm13, %v8540_v6, %v2133_v24  ;;  %vm13234_vm15 = vcmp.eq.s32.totalorder %v4633_v32, 7  ;;  %vm13235_vm3 = vcmp.eq.s32.totalorder %v4769_v29, 7  ;;  %vm13236_vm10 = vcmp.eq.s32.totalorder %v4905_v37, 7 }
 0x2b7   : > { %v2004_v2 = vsel %vm13234_vm15, %v8463_v42, %v1994_v28  ;;  %v2005_v12 = vsel %vm13235_vm3, %v8463_v42, %v1995_v5  ;;  %v2006_v53 = vsel %vm13236_vm10, %v8463_v42, %v1996_v1  ;;  %vm13237_vm11 = vcmp.eq.s32.totalorder %v4526_v45, 22 }
 0x2b8   : > { %v2153_v11 = vsel %vm13237_vm11, %v8543_v60, %v2143_v22  ;;  %vm13238_vm7 = vcmp.eq.s32.totalorder %v4633_v32, 8  ;;  %vm13239_vm13 = vcmp.eq.s32.totalorder %v4769_v29, 8  ;;  %vm13240_vm15 = vcmp.eq.s32.totalorder %v4905_v37, 8 }
 0x2b9   : > { %v2014_v3 = vsel %vm13238_vm7, %v8489_v16, %v2004_v2  ;;  %v2015_v17 = vsel %vm13239_vm13, %v8489_v16, %v2005_v12  ;;  %v2016_v59 = vsel %vm13240_vm15, %v8489_v16, %v2006_v53  ;;  %vm13241_vm3 = vcmp.eq.s32.totalorder %v4526_v45, 23 }
 0x2ba   : > { %v2163_v58 = vsel %vm13241_vm3, %v8549_v51, %v2153_v11  ;;  %vm13242_vm10 = vcmp.eq.s32.totalorder %v4633_v32, 9  ;;  %vm13243_vm11 = vcmp.eq.s32.totalorder %v4769_v29, 9  ;;  %vm13244_vm7 = vcmp.eq.s32.totalorder %v4905_v37, 9 }
 0x2bb   : > { %v2024_v4 = vsel %vm13242_vm10, %v8492_v44, %v2014_v3  ;;  %v2025_v43 = vsel %vm13243_vm11, %v8492_v44, %v2015_v17  ;;  %v2026_v35 = vsel %vm13244_vm7, %v8492_v44, %v2016_v59  ;;  %vm13245_vm13 = vcmp.eq.s32.totalorder %v4526_v45, 24 }
 0x2bc   : > { %v2173_v19 = vsel %vm13245_vm13, %v8552_v7, %v2163_v58  ;;  %vm13246_vm15 = vcmp.eq.s32.totalorder %v4633_v32, 10  ;;  %vm13247_vm3 = vcmp.eq.s32.totalorder %v4769_v29, 10  ;;  %vm13248_vm10 = vcmp.eq.s32.totalorder %v4905_v37, 10 }
 0x2bd   : > { %v2034_v41 = vsel %vm13246_vm15, %v8495_v9, %v2024_v4  ;;  %v2035_v36 = vsel %vm13247_vm3, %v8495_v9, %v2025_v43  ;;  %v2036_v21 = vsel %vm13248_vm10, %v8495_v9, %v2026_v35  ;;  %vm13249_vm11 = vcmp.eq.s32.totalorder %v4526_v45, 25 }
 0x2be   : > { %v2183_v38 = vsel %vm13249_vm11, %v8555_v47, %v2173_v19  ;;  %vm13250_vm7 = vcmp.eq.s32.totalorder %v4633_v32, 11  ;;  %vm13251_vm13 = vcmp.eq.s32.totalorder %v4769_v29, 11  ;;  %vm13252_vm15 = vcmp.eq.s32.totalorder %v4905_v37, 11 }
 0x2bf   : > { %v2044_v27 = vsel %vm13250_vm7, %v8501_v61, %v2034_v41  ;;  %v2045_v13 = vsel %vm13251_vm13, %v8501_v61, %v2035_v36  ;;  %v2046_v46 = vsel %vm13252_vm15, %v8501_v61, %v2036_v21  ;;  %vm13253_vm3 = vcmp.eq.s32.totalorder %v4526_v45, 26 }
 0x2c0   : > { %v2193_v24 = vsel %vm13253_vm3, %v8561_v8, %v2183_v38  ;;  %vm13254_vm10 = vcmp.eq.s32.totalorder %v4633_v32, 12  ;;  %vm13255_vm11 = vcmp.eq.s32.totalorder %v4769_v29, 12  ;;  %vm13256_vm7 = vcmp.eq.s32.totalorder %v4905_v37, 12 }
 0x2c1   : > { %v2054_v28 = vsel %vm13254_vm10, %v8504_v40, %v2044_v27  ;;  %v2055_v5 = vsel %vm13255_vm11, %v8504_v40, %v2045_v13  ;;  %v2056_v1 = vsel %vm13256_vm7, %v8504_v40, %v2046_v46  ;;  %vm13257_vm13 = vcmp.eq.s32.totalorder %v4526_v45, 27 }
 0x2c2   : > { %v2203_v22 = vsel %vm13257_vm13, %v8564_v49, %v2193_v24  ;;  %vm13258_vm15 = vcmp.eq.s32.totalorder %v4633_v32, 13  ;;  %vm13259_vm3 = vcmp.eq.s32.totalorder %v4769_v29, 13  ;;  %vm13260_vm10 = vcmp.eq.s32.totalorder %v4905_v37, 13 }
 0x2c3   : > { %v2064_v2 = vsel %vm13258_vm15, %v8507_v39, %v2054_v28  ;;  %v2065_v12 = vsel %vm13259_vm3, %v8507_v39, %v2055_v5  ;;  %v2066_v53 = vsel %vm13260_vm10, %v8507_v39, %v2056_v1  ;;  %vm13261_vm11 = vcmp.eq.s32.totalorder %v4526_v45, 28 }
 0x2c4   : > { %v2213_v11 = vsel %vm13261_vm11, %v8567_v57, %v2203_v22  ;;  %vm13262_vm7 = vcmp.eq.s32.totalorder %v4633_v32, 14  ;;  %vm13263_vm13 = vcmp.eq.s32.totalorder %v4769_v29, 14  ;;  %vm13264_vm15 = vcmp.eq.s32.totalorder %v4905_v37, 14 }
 0x2c5   : > { %v2074_v3 = vsel %vm13262_vm7, %v8513_v31, %v2064_v2  ;;  %v2075_v17 = vsel %vm13263_vm13, %v8513_v31, %v2065_v12  ;;  %v2076_v59 = vsel %vm13264_vm15, %v8513_v31, %v2066_v53  ;;  %vm13265_vm3 = vcmp.eq.s32.totalorder %v4526_v45, 29 }
 0x2c6   : > { %v2223_v58 = vsel %vm13265_vm3, %v8573_v25, %v2213_v11  ;;  %vm13266_vm10 = vcmp.eq.s32.totalorder %v4633_v32, 15  ;;  %vm13267_vm11 = vcmp.eq.s32.totalorder %v4769_v29, 15  ;;  %vm13268_vm7 = vcmp.eq.s32.totalorder %v4905_v37, 15 }
 0x2c7   : > { %v2084_v4 = vsel %vm13266_vm10, %v8516_v18, %v2074_v3  ;;  %v2085_v43 = vsel %vm13267_vm11, %v8516_v18, %v2075_v17  ;;  %v2086_v35 = vsel %vm13268_vm7, %v8516_v18, %v2076_v59  ;;  %vm13269_vm13 = vcmp.eq.s32.totalorder %v4526_v45, 30 }
 0x2c8   : > { %v2233_v19 = vsel %vm13269_vm13, %v8576_v63, %v2223_v58  ;;  %vm13270_vm15 = vcmp.eq.s32.totalorder %v4633_v32, 16  ;;  %vm13271_vm3 = vcmp.eq.s32.totalorder %v4769_v29, 16  ;;  %vm13272_vm10 = vcmp.eq.s32.totalorder %v4905_v37, 16 }
 0x2c9   : > { %v2094_v41 = vsel %vm13270_vm15, %v8519_v15, %v2084_v4  ;;  %v2095_v36 = vsel %vm13271_vm3, %v8519_v15, %v2085_v43  ;;  %v2096_v21 = vsel %vm13272_vm10, %v8519_v15, %v2086_v35  ;;  %vm13273_vm11 = vcmp.eq.s32.totalorder %v4526_v45, 31 }
 0x2ca   : > { %v2243_v38 = vsel %vm13273_vm11, %v8579_v34, %v2233_v19  ;;  %vm13274_vm7 = vcmp.eq.s32.totalorder %v4633_v32, 17  ;;  %vm13275_vm13 = vcmp.eq.s32.totalorder %v4769_v29, 17  ;;  %vm13276_vm15 = vcmp.eq.s32.totalorder %v4905_v37, 17 }
 0x2cb   : > { %v2104_v27 = vsel %vm13274_vm7, %v8525_v30, %v2094_v41  ;;  %v2105_v13 = vsel %vm13275_vm13, %v8525_v30, %v2095_v36  ;;  %v2106_v46 = vsel %vm13276_vm15, %v8525_v30, %v2096_v21  ;;  %2252 = vst [vmem:[#allocation2 + $0x100] sm:$0xff] %v2243_v38  ;;  %vm13277_vm3 = vcmp.eq.s32.totalorder %v4633_v32, 18 }
 0x2cc   : > { %v2114_v24 = vsel %vm13277_vm3, %v8528_v55, %v2104_v27  ;;  %vm13278_vm10 = vcmp.eq.s32.totalorder %v4769_v29, 18  ;;  %vm13279_vm11 = vcmp.eq.s32.totalorder %v4905_v37, 18  ;;  %vm13280_vm7 = vcmp.eq.s32.totalorder %v4981_v48, 1 }
 0x2cd   : > { %v2115_v28 = vsel %vm13278_vm10, %v8528_v55, %v2105_v13  ;;  %v2116_v5 = vsel %vm13279_vm11, %v8528_v55, %v2106_v46  ;;  %v1947_v1 = vsel %vm13280_vm7, %v8272_v20, %v8260_v26  ;;  %vm13281_vm13 = vcmp.eq.s32.totalorder %v4633_v32, 19 }
 0x2ce   : > { %v2124_v22 = vsel %vm13281_vm13, %v8531_v0, %v2114_v24  ;;  %vm13282_vm15 = vcmp.eq.s32.totalorder %v4769_v29, 19  ;;  %vm13283_vm3 = vcmp.eq.s32.totalorder %v4905_v37, 19  ;;  %vm13284_vm10 = vcmp.eq.s32.totalorder %v4981_v48, 2 }
 0x2cf   : > { %v2125_v2 = vsel %vm13282_vm15, %v8531_v0, %v2115_v28  ;;  %v2126_v12 = vsel %vm13283_vm3, %v8531_v0, %v2116_v5  ;;  %v1957_v53 = vsel %vm13284_vm10, %v8303_v62, %v1947_v1  ;;  %vm13285_vm11 = vcmp.eq.s32.totalorder %v4633_v32, 20 }
 0x2d0   : > { %v2134_v11 = vsel %vm13285_vm11, %v8537_v10, %v2124_v22  ;;  %vm13286_vm7 = vcmp.eq.s32.totalorder %v4769_v29, 20  ;;  %vm13287_vm13 = vcmp.eq.s32.totalorder %v4905_v37, 20  ;;  %vm13288_vm15 = vcmp.eq.s32.totalorder %v4981_v48, 3 }
 0x2d1   : > { %v2135_v3 = vsel %vm13286_vm7, %v8537_v10, %v2125_v2  ;;  %v2136_v17 = vsel %vm13287_vm13, %v8537_v10, %v2126_v12  ;;  %v1967_v59 = vsel %vm13288_vm15, %v8335_v56, %v1957_v53  ;;  %vm13289_vm3 = vcmp.eq.s32.totalorder %v4633_v32, 21 }
 0x2d2   : > { %v2144_v58 = vsel %vm13289_vm3, %v8540_v6, %v2134_v11  ;;  %vm13290_vm10 = vcmp.eq.s32.totalorder %v4769_v29, 21  ;;  %vm13291_vm11 = vcmp.eq.s32.totalorder %v4905_v37, 21  ;;  %vm13292_vm7 = vcmp.eq.s32.totalorder %v4981_v48, 4 }
 0x2d3   : > { %v2145_v4 = vsel %vm13290_vm10, %v8540_v6, %v2135_v3  ;;  %v2146_v43 = vsel %vm13291_vm11, %v8540_v6, %v2136_v17  ;;  %v1977_v35 = vsel %vm13292_vm7, %v8367_v52, %v1967_v59  ;;  %vm13293_vm13 = vcmp.eq.s32.totalorder %v4633_v32, 22 }
 0x2d4   : > { %v2154_v19 = vsel %vm13293_vm13, %v8543_v60, %v2144_v58  ;;  %vm13294_vm15 = vcmp.eq.s32.totalorder %v4769_v29, 22  ;;  %vm13295_vm3 = vcmp.eq.s32.totalorder %v4905_v37, 22  ;;  %vm13296_vm10 = vcmp.eq.s32.totalorder %v4981_v48, 5 }
 0x2d5   : > { %v2155_v41 = vsel %vm13294_vm15, %v8543_v60, %v2145_v4  ;;  %v2156_v36 = vsel %vm13295_vm3, %v8543_v60, %v2146_v43  ;;  %v1987_v21 = vsel %vm13296_vm10, %v8399_v23, %v1977_v35  ;;  %vm13297_vm11 = vcmp.eq.s32.totalorder %v4633_v32, 23 }
 0x2d6   : > { %v2164_v38 = vsel %vm13297_vm11, %v8549_v51, %v2154_v19  ;;  %vm13298_vm7 = vcmp.eq.s32.totalorder %v4769_v29, 23  ;;  %vm13299_vm13 = vcmp.eq.s32.totalorder %v4905_v37, 23  ;;  %vm13300_vm15 = vcmp.eq.s32.totalorder %v4981_v48, 6 }
 0x2d7   : > { %v2165_v27 = vsel %vm13298_vm7, %v8549_v51, %v2155_v41  ;;  %v2166_v13 = vsel %vm13299_vm13, %v8549_v51, %v2156_v36  ;;  %v1997_v46 = vsel %vm13300_vm15, %v8431_v50, %v1987_v21  ;;  %vm13301_vm3 = vcmp.eq.s32.totalorder %v4633_v32, 24 }
 0x2d8   : > { %v2174_v24 = vsel %vm13301_vm3, %v8552_v7, %v2164_v38  ;;  %vm13302_vm10 = vcmp.eq.s32.totalorder %v4769_v29, 24  ;;  %vm13303_vm11 = vcmp.eq.s32.totalorder %v4905_v37, 24  ;;  %vm13304_vm7 = vcmp.eq.s32.totalorder %v4981_v48, 7 }
 0x2d9   : > { %v2175_v28 = vsel %vm13302_vm10, %v8552_v7, %v2165_v27  ;;  %v2176_v5 = vsel %vm13303_vm11, %v8552_v7, %v2166_v13  ;;  %v2007_v1 = vsel %vm13304_vm7, %v8463_v42, %v1997_v46  ;;  %vm13305_vm13 = vcmp.eq.s32.totalorder %v4633_v32, 25 }
 0x2da   : > { %v2184_v22 = vsel %vm13305_vm13, %v8555_v47, %v2174_v24  ;;  %vm13306_vm15 = vcmp.eq.s32.totalorder %v4769_v29, 25  ;;  %vm13307_vm3 = vcmp.eq.s32.totalorder %v4905_v37, 25  ;;  %vm13308_vm10 = vcmp.eq.s32.totalorder %v4981_v48, 8 }
 0x2db   : > { %v2185_v2 = vsel %vm13306_vm15, %v8555_v47, %v2175_v28  ;;  %v2186_v12 = vsel %vm13307_vm3, %v8555_v47, %v2176_v5  ;;  %v2017_v53 = vsel %vm13308_vm10, %v8489_v16, %v2007_v1  ;;  %vm13309_vm11 = vcmp.eq.s32.totalorder %v4633_v32, 26 }
 0x2dc   : > { %v2194_v11 = vsel %vm13309_vm11, %v8561_v8, %v2184_v22  ;;  %vm13310_vm7 = vcmp.eq.s32.totalorder %v4769_v29, 26  ;;  %vm13311_vm13 = vcmp.eq.s32.totalorder %v4905_v37, 26  ;;  %vm13312_vm15 = vcmp.eq.s32.totalorder %v4981_v48, 9 }
 0x2dd   : > { %v2195_v3 = vsel %vm13310_vm7, %v8561_v8, %v2185_v2  ;;  %v2196_v17 = vsel %vm13311_vm13, %v8561_v8, %v2186_v12  ;;  %v2027_v59 = vsel %vm13312_vm15, %v8492_v44, %v2017_v53  ;;  %vm13313_vm3 = vcmp.eq.s32.totalorder %v4633_v32, 27 }
 0x2de   : > { %v2204_v58 = vsel %vm13313_vm3, %v8564_v49, %v2194_v11  ;;  %vm13314_vm10 = vcmp.eq.s32.totalorder %v4769_v29, 27  ;;  %vm13315_vm11 = vcmp.eq.s32.totalorder %v4905_v37, 27  ;;  %vm13316_vm7 = vcmp.eq.s32.totalorder %v4981_v48, 10 }
 0x2df   : > { %v2205_v4 = vsel %vm13314_vm10, %v8564_v49, %v2195_v3  ;;  %v2206_v43 = vsel %vm13315_vm11, %v8564_v49, %v2196_v17  ;;  %v2037_v35 = vsel %vm13316_vm7, %v8495_v9, %v2027_v59  ;;  %vm13317_vm13 = vcmp.eq.s32.totalorder %v4633_v32, 28 }
 0x2e0   : > { %v2214_v19 = vsel %vm13317_vm13, %v8567_v57, %v2204_v58  ;;  %vm13318_vm15 = vcmp.eq.s32.totalorder %v4769_v29, 28  ;;  %vm13319_vm3 = vcmp.eq.s32.totalorder %v4905_v37, 28  ;;  %vm13320_vm10 = vcmp.eq.s32.totalorder %v4981_v48, 11 }
 0x2e1   : > { %v2215_v41 = vsel %vm13318_vm15, %v8567_v57, %v2205_v4  ;;  %v2216_v36 = vsel %vm13319_vm3, %v8567_v57, %v2206_v43  ;;  %v2047_v21 = vsel %vm13320_vm10, %v8501_v61, %v2037_v35  ;;  %vm13321_vm11 = vcmp.eq.s32.totalorder %v4633_v32, 29 }
 0x2e2   : > { %v2224_v38 = vsel %vm13321_vm11, %v8573_v25, %v2214_v19  ;;  %vm13322_vm7 = vcmp.eq.s32.totalorder %v4769_v29, 29  ;;  %vm13323_vm13 = vcmp.eq.s32.totalorder %v4905_v37, 29  ;;  %vm13324_vm15 = vcmp.eq.s32.totalorder %v4981_v48, 12 }
 0x2e3   : > { %v2225_v27 = vsel %vm13322_vm7, %v8573_v25, %v2215_v41  ;;  %v2226_v13 = vsel %vm13323_vm13, %v8573_v25, %v2216_v36  ;;  %v2057_v46 = vsel %vm13324_vm15, %v8504_v40, %v2047_v21  ;;  %vm13325_vm3 = vcmp.eq.s32.totalorder %v4633_v32, 30 }
 0x2e4   : > { %v2234_v24 = vsel %vm13325_vm3, %v8576_v63, %v2224_v38  ;;  %vm13326_vm10 = vcmp.eq.s32.totalorder %v4769_v29, 30  ;;  %vm13327_vm11 = vcmp.eq.s32.totalorder %v4905_v37, 30  ;;  %vm13328_vm7 = vcmp.eq.s32.totalorder %v4981_v48, 13 }
 0x2e5   : > { %v2235_v28 = vsel %vm13326_vm10, %v8576_v63, %v2225_v27  ;;  %v2236_v5 = vsel %vm13327_vm11, %v8576_v63, %v2226_v13  ;;  %v2067_v1 = vsel %vm13328_vm7, %v8507_v39, %v2057_v46  ;;  %vm13329_vm13 = vcmp.eq.s32.totalorder %v4633_v32, 31 }
 0x2e6   : > { %v2244_v22 = vsel %vm13329_vm13, %v8579_v34, %v2234_v24  ;;  %vm13330_vm15 = vcmp.eq.s32.totalorder %v4769_v29, 31  ;;  %vm13331_vm3 = vcmp.eq.s32.totalorder %v4905_v37, 31  ;;  %vm13332_vm10 = vcmp.eq.s32.totalorder %v4981_v48, 14 }
 0x2e7   : > { %v2245_v2 = vsel %vm13330_vm15, %v8579_v34, %v2235_v28  ;;  %v2246_v12 = vsel %vm13331_vm3, %v8579_v34, %v2236_v5  ;;  %v2077_v53 = vsel %vm13332_vm10, %v8513_v31, %v2067_v1  ;;  %2253 = vst [vmem:[#allocation2 + $0x108] sm:$0xff] %v2244_v22  ;;  %vm13333_vm11 = vcmp.eq.s32.totalorder %v4981_v48, 15 }
 0x2e8   : > { %2254 = vst [vmem:[#allocation2 + $0x110] sm:$0xff] %v2245_v2  ;;  %2255 = vst [vmem:[#allocation2 + $0x118] sm:$0xff] %v2246_v12  ;;  %v2087_v11 = vsel %vm13333_vm11, %v8516_v18, %v2077_v53  ;;  %vm13334_vm7 = vcmp.eq.s32.totalorder %v5102_v33, 1  ;;  %vm13335_vm13 = vcmp.eq.s32.totalorder %v5274_v54, 1  ;;  %vm13336_vm15 = vcmp.eq.s32.totalorder %v5479_v14, 1 }
 0x2e9   : > { %v1948_v3 = vsel %vm13334_vm7, %v8272_v20, %v8260_v26  ;;  %v1949_v17 = vsel %vm13335_vm13, %v8272_v20, %v8260_v26  ;;  %v1950_v59 = vsel %vm13336_vm15, %v8272_v20, %v8260_v26  ;;  %vm13337_vm3 = vcmp.eq.s32.totalorder %v4981_v48, 16 }
 0x2ea   : > { %v2097_v58 = vsel %vm13337_vm3, %v8519_v15, %v2087_v11  ;;  %vm13338_vm10 = vcmp.eq.s32.totalorder %v5102_v33, 2  ;;  %vm13339_vm11 = vcmp.eq.s32.totalorder %v5274_v54, 2  ;;  %vm13340_vm7 = vcmp.eq.s32.totalorder %v5479_v14, 2 }
 0x2eb   : > { %v1958_v4 = vsel %vm13338_vm10, %v8303_v62, %v1948_v3  ;;  %v1959_v43 = vsel %vm13339_vm11, %v8303_v62, %v1949_v17  ;;  %v1960_v35 = vsel %vm13340_vm7, %v8303_v62, %v1950_v59  ;;  %vm13341_vm13 = vcmp.eq.s32.totalorder %v4981_v48, 17 }
 0x2ec   : > { %v2107_v26 = vsel %vm13341_vm13, %v8525_v30, %v2097_v58  ;;  %vm13342_vm15 = vcmp.eq.s32.totalorder %v5102_v33, 3  ;;  %vm13343_vm3 = vcmp.eq.s32.totalorder %v5274_v54, 3  ;;  %vm13344_vm10 = vcmp.eq.s32.totalorder %v5479_v14, 3 }
 0x2ed   : > { %v1968_v20 = vsel %vm13342_vm15, %v8335_v56, %v1958_v4  ;;  %v1969_v19 = vsel %vm13343_vm3, %v8335_v56, %v1959_v43  ;;  %v1970_v41 = vsel %vm13344_vm10, %v8335_v56, %v1960_v35  ;;  %vm13345_vm11 = vcmp.eq.s32.totalorder %v4981_v48, 18 }
 0x2ee   : > { %v2117_v62 = vsel %vm13345_vm11, %v8528_v55, %v2107_v26  ;;  %vm13346_vm7 = vcmp.eq.s32.totalorder %v5102_v33, 4  ;;  %vm13347_vm13 = vcmp.eq.s32.totalorder %v5274_v54, 4  ;;  %vm13348_vm15 = vcmp.eq.s32.totalorder %v5479_v14, 4 }
 0x2ef   : > { %v1978_v36 = vsel %vm13346_vm7, %v8367_v52, %v1968_v20  ;;  %v1979_v21 = vsel %vm13347_vm13, %v8367_v52, %v1969_v19  ;;  %v1980_v38 = vsel %vm13348_vm15, %v8367_v52, %v1970_v41  ;;  %vm13349_vm3 = vcmp.eq.s32.totalorder %v4981_v48, 19 }
 0x2f0   : > { %v2127_v56 = vsel %vm13349_vm3, %v8531_v0, %v2117_v62  ;;  %vm13350_vm10 = vcmp.eq.s32.totalorder %v5102_v33, 5  ;;  %vm13351_vm11 = vcmp.eq.s32.totalorder %v5274_v54, 5  ;;  %vm13352_vm7 = vcmp.eq.s32.totalorder %v5479_v14, 5 }
 0x2f1   : > { %v1988_v27 = vsel %vm13350_vm10, %v8399_v23, %v1978_v36  ;;  %v1989_v13 = vsel %vm13351_vm11, %v8399_v23, %v1979_v21  ;;  %v1990_v46 = vsel %vm13352_vm7, %v8399_v23, %v1980_v38  ;;  %vm13353_vm13 = vcmp.eq.s32.totalorder %v4981_v48, 20 }
 0x2f2   : > { %v2137_v52 = vsel %vm13353_vm13, %v8537_v10, %v2127_v56  ;;  %vm13354_vm15 = vcmp.eq.s32.totalorder %v5102_v33, 6  ;;  %vm13355_vm3 = vcmp.eq.s32.totalorder %v5274_v54, 6  ;;  %vm13356_vm10 = vcmp.eq.s32.totalorder %v5479_v14, 6 }
 0x2f3   : > { %v1998_v24 = vsel %vm13354_vm15, %v8431_v50, %v1988_v27  ;;  %v1999_v28 = vsel %vm13355_vm3, %v8431_v50, %v1989_v13  ;;  %v2000_v5 = vsel %vm13356_vm10, %v8431_v50, %v1990_v46  ;;  %vm13357_vm11 = vcmp.eq.s32.totalorder %v4981_v48, 21 }
 0x2f4   : > { %v2147_v23 = vsel %vm13357_vm11, %v8540_v6, %v2137_v52  ;;  %vm13358_vm7 = vcmp.eq.s32.totalorder %v5102_v33, 7  ;;  %vm13359_vm13 = vcmp.eq.s32.totalorder %v5274_v54, 7  ;;  %vm13360_vm15 = vcmp.eq.s32.totalorder %v5479_v14, 7 }
 0x2f5   : > { %v2008_v1 = vsel %vm13358_vm7, %v8463_v42, %v1998_v24  ;;  %v2009_v22 = vsel %vm13359_vm13, %v8463_v42, %v1999_v28  ;;  %v2010_v2 = vsel %vm13360_vm15, %v8463_v42, %v2000_v5  ;;  %vm13361_vm3 = vcmp.eq.s32.totalorder %v4981_v48, 22 }
 0x2f6   : > { %v2157_v50 = vsel %vm13361_vm3, %v8543_v60, %v2147_v23  ;;  %vm13362_vm10 = vcmp.eq.s32.totalorder %v5102_v33, 8  ;;  %vm13363_vm11 = vcmp.eq.s32.totalorder %v5274_v54, 8  ;;  %vm13364_vm7 = vcmp.eq.s32.totalorder %v5479_v14, 8 }
 0x2f7   : > { %v2018_v12 = vsel %vm13362_vm10, %v8489_v16, %v2008_v1  ;;  %v2019_v53 = vsel %vm13363_vm11, %v8489_v16, %v2009_v22  ;;  %v2020_v11 = vsel %vm13364_vm7, %v8489_v16, %v2010_v2  ;;  %vm13365_vm13 = vcmp.eq.s32.totalorder %v4981_v48, 23 }
 0x2f8   : > { %v2167_v42 = vsel %vm13365_vm13, %v8549_v51, %v2157_v50  ;;  %vm13366_vm15 = vcmp.eq.s32.totalorder %v5102_v33, 9  ;;  %vm13367_vm3 = vcmp.eq.s32.totalorder %v5274_v54, 9  ;;  %vm13368_vm10 = vcmp.eq.s32.totalorder %v5479_v14, 9 }
 0x2f9   : > { %v2028_v3 = vsel %vm13366_vm15, %v8492_v44, %v2018_v12  ;;  %v2029_v17 = vsel %vm13367_vm3, %v8492_v44, %v2019_v53  ;;  %v2030_v59 = vsel %vm13368_vm10, %v8492_v44, %v2020_v11  ;;  %vm13369_vm11 = vcmp.eq.s32.totalorder %v4981_v48, 24 }
 0x2fa   : > { %v2177_v16 = vsel %vm13369_vm11, %v8552_v7, %v2167_v42  ;;  %vm13370_vm7 = vcmp.eq.s32.totalorder %v5102_v33, 10  ;;  %vm13371_vm13 = vcmp.eq.s32.totalorder %v5274_v54, 10  ;;  %vm13372_vm15 = vcmp.eq.s32.totalorder %v5479_v14, 10 }
 0x2fb   : > { %v2038_v58 = vsel %vm13370_vm7, %v8495_v9, %v2028_v3  ;;  %v2039_v4 = vsel %vm13371_vm13, %v8495_v9, %v2029_v17  ;;  %v2040_v43 = vsel %vm13372_vm15, %v8495_v9, %v2030_v59  ;;  %vm13373_vm3 = vcmp.eq.s32.totalorder %v4981_v48, 25 }
 0x2fc   : > { %v2187_v44 = vsel %vm13373_vm3, %v8555_v47, %v2177_v16  ;;  %vm13374_vm10 = vcmp.eq.s32.totalorder %v5102_v33, 11  ;;  %vm13375_vm11 = vcmp.eq.s32.totalorder %v5274_v54, 11  ;;  %vm13376_vm7 = vcmp.eq.s32.totalorder %v5479_v14, 11 }
 0x2fd   : > { %v2048_v35 = vsel %vm13374_vm10, %v8501_v61, %v2038_v58  ;;  %v2049_v26 = vsel %vm13375_vm11, %v8501_v61, %v2039_v4  ;;  %v2050_v20 = vsel %vm13376_vm7, %v8501_v61, %v2040_v43  ;;  %vm13377_vm13 = vcmp.eq.s32.totalorder %v4981_v48, 26 }
 0x2fe   : > { %v2197_v9 = vsel %vm13377_vm13, %v8561_v8, %v2187_v44  ;;  %vm13378_vm15 = vcmp.eq.s32.totalorder %v5102_v33, 12  ;;  %vm13379_vm3 = vcmp.eq.s32.totalorder %v5274_v54, 12  ;;  %vm13380_vm10 = vcmp.eq.s32.totalorder %v5479_v14, 12 }
 0x2ff   : > { %v2058_v19 = vsel %vm13378_vm15, %v8504_v40, %v2048_v35  ;;  %v2059_v41 = vsel %vm13379_vm3, %v8504_v40, %v2049_v26  ;;  %v2060_v62 = vsel %vm13380_vm10, %v8504_v40, %v2050_v20  ;;  %vm13381_vm11 = vcmp.eq.s32.totalorder %v4981_v48, 27 }
 0x300   : > { %v2207_v61 = vsel %vm13381_vm11, %v8564_v49, %v2197_v9  ;;  %vm13382_vm7 = vcmp.eq.s32.totalorder %v5102_v33, 13  ;;  %vm13383_vm13 = vcmp.eq.s32.totalorder %v5274_v54, 13  ;;  %vm13384_vm15 = vcmp.eq.s32.totalorder %v5479_v14, 13 }
 0x301   : > { %v2068_v36 = vsel %vm13382_vm7, %v8507_v39, %v2058_v19  ;;  %v2069_v21 = vsel %vm13383_vm13, %v8507_v39, %v2059_v41  ;;  %v2070_v38 = vsel %vm13384_vm15, %v8507_v39, %v2060_v62  ;;  %vm13385_vm3 = vcmp.eq.s32.totalorder %v4981_v48, 28 }
 0x302   : > { %v2217_v40 = vsel %vm13385_vm3, %v8567_v57, %v2207_v61  ;;  %vm13386_vm10 = vcmp.eq.s32.totalorder %v5102_v33, 14  ;;  %vm13387_vm11 = vcmp.eq.s32.totalorder %v5274_v54, 14  ;;  %vm13388_vm7 = vcmp.eq.s32.totalorder %v5479_v14, 14 }
 0x303   : > { %v2078_v56 = vsel %vm13386_vm10, %v8513_v31, %v2068_v36  ;;  %v2079_v27 = vsel %vm13387_vm11, %v8513_v31, %v2069_v21  ;;  %v2080_v13 = vsel %vm13388_vm7, %v8513_v31, %v2070_v38  ;;  %vm13389_vm13 = vcmp.eq.s32.totalorder %v4981_v48, 29 }
 0x304   : > { %v2227_v39 = vsel %vm13389_vm13, %v8573_v25, %v2217_v40  ;;  %vm13390_vm15 = vcmp.eq.s32.totalorder %v5102_v33, 15  ;;  %vm13391_vm3 = vcmp.eq.s32.totalorder %v5274_v54, 15  ;;  %vm13392_vm10 = vcmp.eq.s32.totalorder %v5479_v14, 15 }
 0x305   : > { %v2088_v46 = vsel %vm13390_vm15, %v8516_v18, %v2078_v56  ;;  %v2089_v52 = vsel %vm13391_vm3, %v8516_v18, %v2079_v27  ;;  %v2090_v24 = vsel %vm13392_vm10, %v8516_v18, %v2080_v13  ;;  %vm13393_vm11 = vcmp.eq.s32.totalorder %v4981_v48, 30 }
 0x306   : > { %v2237_v31 = vsel %vm13393_vm11, %v8576_v63, %v2227_v39  ;;  %vm13394_vm7 = vcmp.eq.s32.totalorder %v5102_v33, 16  ;;  %vm13395_vm13 = vcmp.eq.s32.totalorder %v5274_v54, 16  ;;  %vm13396_vm15 = vcmp.eq.s32.totalorder %v5479_v14, 16 }
 0x307   : > { %v2098_v28 = vsel %vm13394_vm7, %v8519_v15, %v2088_v46  ;;  %v2099_v5 = vsel %vm13395_vm13, %v8519_v15, %v2089_v52  ;;  %v2100_v23 = vsel %vm13396_vm15, %v8519_v15, %v2090_v24  ;;  %vm13397_vm3 = vcmp.eq.s32.totalorder %v4981_v48, 31 }
 0x308   : > { %v2247_v18 = vsel %vm13397_vm3, %v8579_v34, %v2237_v31  ;;  %vm13398_vm10 = vcmp.eq.s32.totalorder %v5102_v33, 17  ;;  %vm13399_vm11 = vcmp.eq.s32.totalorder %v5274_v54, 17  ;;  %vm13400_vm7 = vcmp.eq.s32.totalorder %v5479_v14, 17 }
 0x309   : > { %v2108_v1 = vsel %vm13398_vm10, %v8525_v30, %v2098_v28  ;;  %v2109_v22 = vsel %vm13399_vm11, %v8525_v30, %v2099_v5  ;;  %v2110_v2 = vsel %vm13400_vm7, %v8525_v30, %v2100_v23  ;;  %2256 = vst [vmem:[#allocation2 + $0x120] sm:$0xff] %v2247_v18  ;;  %vm13401_vm13 = vcmp.eq.s32.totalorder %v5102_v33, 18 }
 0x30a   : > { %v2118_v15 = vsel %vm13401_vm13, %v8528_v55, %v2108_v1  ;;  %vm13402_vm15 = vcmp.eq.s32.totalorder %v5274_v54, 18  ;;  %vm13403_vm3 = vcmp.eq.s32.totalorder %v5479_v14, 18  ;;  %v9184_v53 = vstv %s9080_s16  ;;  %s9345_s16 = sld [smem:[#allocation3 + $0x298]] }
 0x30b   : > { %v2119_v50 = vsel %vm13402_vm15, %v8528_v55, %v2109_v22  ;;  %v2120_v12 = vsel %vm13403_vm3, %v8528_v55, %v2110_v2  ;;  %vm13404_vm10 = vcmp.eq.s32.totalorder %v5102_v33, 19  ;;  %vm13405_vm11 = vcmp.eq.s32.totalorder %v5274_v54, 19 }
 0x30c   : > { %v2128_v30 = vsel %vm13404_vm10, %v8531_v0, %v2118_v15  ;;  %v2129_v11 = vsel %vm13405_vm11, %v8531_v0, %v2119_v50  ;;  %vm13406_vm7 = vcmp.eq.s32.totalorder %v5479_v14, 19  ;;  %v9198_v3 = vstv %s9094_s3  ;;  %s9347_s3 = sld [smem:[#allocation3 + $0x299]] }
 0x30d   : > { %v2130_v42 = vsel %vm13406_vm7, %v8531_v0, %v2120_v12  ;;  %vm13407_vm13 = vcmp.eq.s32.totalorder %v5102_v33, 20  ;;  %vm13408_vm15 = vcmp.eq.s32.totalorder %v5274_v54, 20  ;;  %vm13409_vm3 = vcmp.eq.s32.totalorder %v5479_v14, 20 }
 0x30e   : > { %v2138_v55 = vsel %vm13407_vm13, %v8537_v10, %v2128_v30  ;;  %v2139_v17 = vsel %vm13408_vm15, %v8537_v10, %v2129_v11  ;;  %v2140_v59 = vsel %vm13409_vm3, %v8537_v10, %v2130_v42  ;;  %vm13410_vm10 = vcmp.eq.s32.totalorder %v4526_v45, 1 }
 0x30f   : > { %v2264_v0 = vsel %vm13410_vm10, %v9198_v3, %v9184_v53  ;;  %vm13411_vm11 = vcmp.eq.s32.totalorder %v5102_v33, 21  ;;  %vm13412_vm7 = vcmp.eq.s32.totalorder %v5274_v54, 21  ;;  %v2150_v10 = vsel %vm575_vm5, %v8540_v6, %v2140_v59 }
 0x310   : > { %v2148_v16 = vsel %vm13411_vm11, %v8540_v6, %v2138_v55  ;;  %v2149_v58 = vsel %vm13412_vm7, %v8540_v6, %v2139_v17  ;;  %v9231_v4 = vstv %s9120_s4  ;;  %vm13413_vm13 = vcmp.eq.s32.totalorder %v5102_v33, 22  ;;  %s9361_s4 = sld [smem:[#allocation3 + $0x29a]] }
 0x311   : > { %v2158_v43 = vsel %vm13413_vm13, %v8543_v60, %v2148_v16  ;;  %vm13414_vm15 = vcmp.eq.s32.totalorder %v5274_v54, 22  ;;  %v2160_v35 = vsel %vm583_vm1, %v8543_v60, %v2150_v10  ;;  %vm13415_vm3 = vcmp.eq.s32.totalorder %v4526_v45, 2 }
 0x312   : > { %v2159_v44 = vsel %vm13414_vm15, %v8543_v60, %v2149_v58  ;;  %v2274_v6 = vsel %vm13415_vm3, %v9231_v4, %v2264_v0  ;;  %vm13416_vm10 = vcmp.eq.s32.totalorder %v5102_v33, 23  ;;  %vm13417_vm11 = vcmp.eq.s32.totalorder %v5274_v54, 23 }
 0x313   : > { %v2168_v26 = vsel %vm13416_vm10, %v8549_v51, %v2158_v43  ;;  %v2169_v20 = vsel %vm13417_vm11, %v8549_v51, %v2159_v44  ;;  %v2170_v60 = vsel %vm591_vm6, %v8549_v51, %v2160_v35  ;;  %v9263_v9 = vstv %s9146_s5  ;;  %s9363_s5 = sld [smem:[#allocation3 + $0x29b]] }
 0x314   : > { %vm13418_vm7 = vcmp.eq.s32.totalorder %v5102_v33, 24  ;;  %vm13419_vm13 = vcmp.eq.s32.totalorder %v5274_v54, 24  ;;  %v2180_v62 = vsel %vm599_vm8, %v8552_v7, %v2170_v60  ;;  %vm13420_vm15 = vcmp.eq.s32.totalorder %v4526_v45, 3 }
 0x315   : > { %v2178_v19 = vsel %vm13418_vm7, %v8552_v7, %v2168_v26  ;;  %v2179_v41 = vsel %vm13419_vm13, %v8552_v7, %v2169_v20  ;;  %v2284_v51 = vsel %vm13420_vm15, %v9263_v9, %v2274_v6  ;;  %vm13421_vm3 = vcmp.eq.s32.totalorder %v5102_v33, 25 }
 0x316   : > { %v2188_v61 = vsel %vm13421_vm3, %v8555_v47, %v2178_v19  ;;  %vm13422_vm10 = vcmp.eq.s32.totalorder %v5274_v54, 25  ;;  %v2190_v7 = vsel %vm607_vm2, %v8555_v47, %v2180_v62  ;;  %v9295_v21 = vstv %s9172_s8  ;;  %s9377_s8 = sld [smem:[#allocation3 + $0x29c]] }
 0x317   : > { %v2189_v36 = vsel %vm13422_vm10, %v8555_v47, %v2179_v41  ;;  %vm13423_vm11 = vcmp.eq.s32.totalorder %v5102_v33, 26  ;;  %vm13424_vm7 = vcmp.eq.s32.totalorder %v5274_v54, 26  ;;  %v2200_v56 = vsel %vm615_vm4, %v8561_v8, %v2190_v7 }
 0x318   : > { %v2198_v38 = vsel %vm13423_vm11, %v8561_v8, %v2188_v61  ;;  %v2199_v40 = vsel %vm13424_vm7, %v8561_v8, %v2189_v36  ;;  %vm13425_vm13 = vcmp.eq.s32.totalorder %v4526_v45, 4  ;;  %vm13426_vm15 = vcmp.eq.s32.totalorder %v5102_v33, 27 }
 0x319   : > { %v2294_v47 = vsel %vm13425_vm13, %v9295_v21, %v2284_v51  ;;  %v2208_v27 = vsel %vm13426_vm15, %v8564_v49, %v2198_v38  ;;  %vm13427_vm3 = vcmp.eq.s32.totalorder %v5274_v54, 27  ;;  %v2210_v8 = vsel %vm623_vm9, %v8564_v49, %v2200_v56 }
 0x31a   : > { %v2209_v13 = vsel %vm13427_vm3, %v8564_v49, %v2199_v40  ;;  %v9327_v39 = vstv %s9186_s18  ;;  %vm13428_vm10 = vcmp.eq.s32.totalorder %v5102_v33, 28  ;;  %vm13429_vm11 = vcmp.eq.s32.totalorder %v5274_v54, 28  ;;  %s9379_s18 = sld [smem:[#allocation3 + $0x29d]] }
 0x31b   : > { %v2218_v46 = vsel %vm13428_vm10, %v8567_v57, %v2208_v27  ;;  %v2219_v52 = vsel %vm13429_vm11, %v8567_v57, %v2209_v13  ;;  %v2220_v24 = vsel %vm631_vm0, %v8567_v57, %v2210_v8  ;;  %vm13430_vm7 = vcmp.eq.s32.totalorder %v4526_v45, 5 }
 0x31c   : > { %v2304_v49 = vsel %vm13430_vm7, %v9327_v39, %v2294_v47  ;;  %vm13431_vm13 = vcmp.eq.s32.totalorder %v5102_v33, 29  ;;  %vm13432_vm15 = vcmp.eq.s32.totalorder %v5274_v54, 29  ;;  %v2230_v57 = vsel %vm639_vm12, %v8573_v25, %v2220_v24 }
 0x31d   : > { %v2228_v31 = vsel %vm13431_vm13, %v8573_v25, %v2218_v46  ;;  %v2229_v28 = vsel %vm13432_vm15, %v8573_v25, %v2219_v52  ;;  %v9359_v5 = vstv %s9200_s21  ;;  %vm13433_vm3 = vcmp.eq.s32.totalorder %v5102_v33, 30  ;;  %s9393_s21 = sld [smem:[#allocation3 + $0x29e]] }
 0x31e   : > { %v2238_v23 = vsel %vm13433_vm3, %v8576_v63, %v2228_v31  ;;  %vm13434_vm10 = vcmp.eq.s32.totalorder %v5274_v54, 30  ;;  %v2240_v25 = vsel %vm647_vm14, %v8576_v63, %v2230_v57  ;;  %vm13435_vm11 = vcmp.eq.s32.totalorder %v4526_v45, 6 }
 0x31f   : > { %v2239_v18 = vsel %vm13434_vm10, %v8576_v63, %v2229_v28  ;;  %v2314_v1 = vsel %vm13435_vm11, %v9359_v5, %v2304_v49  ;;  %vm13436_vm7 = vcmp.eq.s32.totalorder %v5102_v33, 31  ;;  %vm13437_vm13 = vcmp.eq.s32.totalorder %v5274_v54, 31 }
 0x320   : > { %v2248_v22 = vsel %vm13436_vm7, %v8579_v34, %v2238_v23  ;;  %v2249_v63 = vsel %vm13437_vm13, %v8579_v34, %v2239_v18  ;;  %vm13438_vm15 = vcmp.eq.s32.totalorder %v5479_v14, 31  ;;  %v9391_v15 = vstv %s9202_s10  ;;  %s10006_s10 = sld [smem:[#allocation3 + $0x301]] }
 0x321   : > { %v2250_v2 = vsel %vm13438_vm15, %v8579_v34, %v2240_v25  ;;  %2257 = vst [vmem:[#allocation2 + $0x128] sm:$0xff] %v2248_v22  ;;  %2258 = vst [vmem:[#allocation2 + $0x130] sm:$0xff] %v2249_v63  ;;  %vm13439_vm3 = vcmp.eq.s32.totalorder %v4526_v45, 7  ;;  %v9401_v34 = vstv %s9217_s11  ;;  %v9404_v12 = vstv %s9219_s14  ;;  %s10032_s11 = sld [smem:[#allocation3 + $0x302]]  ;;  %s10058_s14 = sld [smem:[#allocation3 + $0x303]] }
 0x322   : > { %2259 = vst [vmem:[#allocation2 + $0x138] sm:$0xff] %v2250_v2  ;;  %v2324_v50 = vsel %vm13439_vm3, %v9391_v15, %v2314_v1  ;;  %v9407_v30 = vstv %s9233_s30  ;;  %vm13440_vm10 = vcmp.eq.s32.totalorder %v4526_v45, 8  ;;  %v9413_v42 = vstv %s9235_s22  ;;  %s10084_s30 = sld [smem:[#allocation3 + $0x304]]  ;;  %s10098_s22 = sld [smem:[#allocation3 + $0x305]] }
 0x323   : > { %v2334_v11 = vsel %vm13440_vm10, %v9401_v34, %v2324_v50  ;;  %v9416_v55 = vstv %s9249_s27  ;;  %v9419_v17 = vstv %s9251_s28  ;;  %vm13441_vm11 = vcmp.eq.s32.totalorder %v4526_v45, 9  ;;  %s10112_s27 = sld [smem:[#allocation3 + $0x306]]  ;;  %s10114_s28 = sld [smem:[#allocation3 + $0x307]] }
 0x324   : > { %v2344_v59 = vsel %vm13441_vm11, %v9404_v12, %v2334_v11  ;;  %v9425_v0 = vstv %s9265_s6  ;;  %v9428_v16 = vstv %s9267_s7  ;;  %v9431_v58 = vstv %s9281_s9  ;;  %s10129_s6 = sld [smem:[#allocation3 + $0x308]]  ;;  %s10131_s7 = sld [smem:[#allocation3 + $0x309]] }
 0x325   : > { %vm13442_vm7 = vcmp.eq.s32.totalorder %v4526_v45, 10  ;;  %v9437_v43 = vstv %s9283_s29  ;;  %v9440_v44 = vstv %s9297_s20  ;;  %v9443_v35 = vstv %s9299_s17  ;;  %s10145_s9 = sld [smem:[#allocation3 + $0x30a]]  ;;  %s10147_s29 = sld [smem:[#allocation3 + $0x30b]] }
 0x326   : > { %v2354_v10 = vsel %vm13442_vm7, %v9407_v30, %v2344_v59  ;;  %vm13443_vm13 = vcmp.eq.s32.totalorder %v4526_v45, 11  ;;  %v9449_v26 = vstv %s9313_s24  ;;  %v9452_v20 = vstv %s9315_s1  ;;  %s10161_s20 = sld [smem:[#allocation3 + $0x30c]]  ;;  %s10163_s17 = sld [smem:[#allocation3 + $0x30d]] }
 0x327   : > { %v2364_v6 = vsel %vm13443_vm13, %v9413_v42, %v2354_v10  ;;  %v9455_v60 = vstv %s9329_s15  ;;  %vm13444_vm15 = vcmp.eq.s32.totalorder %v4526_v45, 12  ;;  %v9461_v41 = vstv %s9331_s25  ;;  %s10177_s24 = sld [smem:[#allocation3 + $0x30e]]  ;;  %s10179_s1 = sld [smem:[#allocation3 + $0x30f]] }
 0x328   : > { %v2374_v19 = vsel %vm13444_vm15, %v9416_v55, %v2364_v6  ;;  %v9464_v62 = vstv %s9345_s16  ;;  %v9467_v51 = vstv %s9347_s3  ;;  %vm13445_vm3 = vcmp.eq.s32.totalorder %v4526_v45, 13  ;;  %s10193_s15 = sld [smem:[#allocation3 + $0x310]]  ;;  %s10195_s25 = sld [smem:[#allocation3 + $0x311]] }
 0x329   : > { %v2384_v61 = vsel %vm13445_vm3, %v9419_v17, %v2374_v19  ;;  %v9473_v36 = vstv %s9361_s4  ;;  %v9476_v7 = vstv %s9363_s5  ;;  %v9479_v38 = vstv %s9377_s8  ;;  %s10209_s16 = sld [smem:[#allocation3 + $0x312]]  ;;  %s10211_s3 = sld [smem:[#allocation3 + $0x313]] }
 0x32a   : > { %vm13446_vm10 = vcmp.eq.s32.totalorder %v4526_v45, 14  ;;  %v9485_v56 = vstv %s9379_s18  ;;  %v9488_v47 = vstv %s9393_s21  ;;  %v9491_v27 = vstv %s9395_s2  ;;  %s9992_s2 = sld [smem:[#allocation3 + $0x300]]  ;;  %s10225_s4 = sld [smem:[#allocation3 + $0x314]] }
 0x32b   : > { %v2394_v40 = vsel %vm13446_vm10, %v9425_v0, %v2384_v61  ;;  %vm13447_vm11 = vcmp.eq.s32.totalorder %v4526_v45, 15  ;;  %vm13448_vm7 = vcmp.eq.s32.totalorder %v4633_v32, 1  ;;  %vm13449_vm13 = vcmp.eq.s32.totalorder %v4769_v29, 1  ;;  %s10227_s5 = sld [smem:[#allocation3 + $0x315]]  ;;  %s10241_s8 = sld [smem:[#allocation3 + $0x316]] }
 0x32c   : > { %v2404_v13 = vsel %vm13447_vm11, %v9428_v16, %v2394_v40  ;;  %v2265_v8 = vsel %vm13448_vm7, %v9198_v3, %v9184_v53  ;;  %v2266_v46 = vsel %vm13449_vm13, %v9198_v3, %v9184_v53  ;;  %vm13450_vm15 = vcmp.eq.s32.totalorder %v4905_v37, 1  ;;  %s10243_s18 = sld [smem:[#allocation3 + $0x317]]  ;;  %s10257_s21 = sld [smem:[#allocation3 + $0x318]] }
 0x32d   : > { %v2267_v52 = vsel %vm13450_vm15, %v9198_v3, %v9184_v53  ;;  %vm13451_vm3 = vcmp.eq.s32.totalorder %v4526_v45, 16  ;;  %vm13452_vm10 = vcmp.eq.s32.totalorder %v4633_v32, 2  ;;  %vm13453_vm11 = vcmp.eq.s32.totalorder %v4769_v29, 2 }
 0x32e   : > { %v2414_v24 = vsel %vm13451_vm3, %v9431_v58, %v2404_v13  ;;  %v2275_v49 = vsel %vm13452_vm10, %v9231_v4, %v2265_v8  ;;  %v2276_v31 = vsel %vm13453_vm11, %v9231_v4, %v2266_v46  ;;  %vm13454_vm7 = vcmp.eq.s32.totalorder %v4905_v37, 2 }
 0x32f   : > { %v2277_v28 = vsel %vm13454_vm7, %v9231_v4, %v2267_v52  ;;  %vm13455_vm13 = vcmp.eq.s32.totalorder %v4526_v45, 17  ;;  %vm13456_vm15 = vcmp.eq.s32.totalorder %v4633_v32, 3  ;;  %vm13457_vm3 = vcmp.eq.s32.totalorder %v4769_v29, 3 }
 0x330   : > { %v2424_v57 = vsel %vm13455_vm13, %v9437_v43, %v2414_v24  ;;  %v2285_v23 = vsel %vm13456_vm15, %v9263_v9, %v2275_v49  ;;  %v2286_v18 = vsel %vm13457_vm3, %v9263_v9, %v2276_v31  ;;  %vm13458_vm10 = vcmp.eq.s32.totalorder %v4905_v37, 3 }
 0x331   : > { %v2287_v25 = vsel %vm13458_vm10, %v9263_v9, %v2277_v28  ;;  %vm13459_vm11 = vcmp.eq.s32.totalorder %v4526_v45, 18  ;;  %vm13460_vm7 = vcmp.eq.s32.totalorder %v4633_v32, 4  ;;  %vm13461_vm13 = vcmp.eq.s32.totalorder %v4769_v29, 4 }
 0x332   : > { %v2434_v1 = vsel %vm13459_vm11, %v9440_v44, %v2424_v57  ;;  %v2295_v22 = vsel %vm13460_vm7, %v9295_v21, %v2285_v23  ;;  %v2296_v63 = vsel %vm13461_vm13, %v9295_v21, %v2286_v18  ;;  %vm13462_vm15 = vcmp.eq.s32.totalorder %v4905_v37, 4 }
 0x333   : > { %v2297_v2 = vsel %vm13462_vm15, %v9295_v21, %v2287_v25  ;;  %vm13463_vm3 = vcmp.eq.s32.totalorder %v4526_v45, 19  ;;  %vm13464_vm10 = vcmp.eq.s32.totalorder %v4633_v32, 5  ;;  %vm13465_vm11 = vcmp.eq.s32.totalorder %v4769_v29, 5 }
 0x334   : > { %v2444_v50 = vsel %vm13463_vm3, %v9443_v35, %v2434_v1  ;;  %v2305_v11 = vsel %vm13464_vm10, %v9327_v39, %v2295_v22  ;;  %v2306_v59 = vsel %vm13465_vm11, %v9327_v39, %v2296_v63  ;;  %vm13466_vm7 = vcmp.eq.s32.totalorder %v4905_v37, 5 }
 0x335   : > { %v2307_v10 = vsel %vm13466_vm7, %v9327_v39, %v2297_v2  ;;  %vm13467_vm13 = vcmp.eq.s32.totalorder %v4526_v45, 20  ;;  %vm13468_vm15 = vcmp.eq.s32.totalorder %v4633_v32, 6  ;;  %vm13469_vm3 = vcmp.eq.s32.totalorder %v4769_v29, 6 }
 0x336   : > { %v2454_v6 = vsel %vm13467_vm13, %v9449_v26, %v2444_v50  ;;  %v2315_v19 = vsel %vm13468_vm15, %v9359_v5, %v2305_v11  ;;  %v2316_v61 = vsel %vm13469_vm3, %v9359_v5, %v2306_v59  ;;  %vm13470_vm10 = vcmp.eq.s32.totalorder %v4905_v37, 6 }
 0x337   : > { %v2317_v40 = vsel %vm13470_vm10, %v9359_v5, %v2307_v10  ;;  %vm13471_vm11 = vcmp.eq.s32.totalorder %v4526_v45, 21  ;;  %vm13472_vm7 = vcmp.eq.s32.totalorder %v4633_v32, 7  ;;  %vm13473_vm13 = vcmp.eq.s32.totalorder %v4769_v29, 7 }
 0x338   : > { %v2464_v13 = vsel %vm13471_vm11, %v9452_v20, %v2454_v6  ;;  %v2325_v8 = vsel %vm13472_vm7, %v9391_v15, %v2315_v19  ;;  %v2326_v46 = vsel %vm13473_vm13, %v9391_v15, %v2316_v61  ;;  %vm13474_vm15 = vcmp.eq.s32.totalorder %v4905_v37, 7 }
 0x339   : > { %v2327_v52 = vsel %vm13474_vm15, %v9391_v15, %v2317_v40  ;;  %vm13475_vm3 = vcmp.eq.s32.totalorder %v4526_v45, 22  ;;  %vm13476_vm10 = vcmp.eq.s32.totalorder %v4633_v32, 8  ;;  %vm13477_vm11 = vcmp.eq.s32.totalorder %v4769_v29, 8 }
 0x33a   : > { %v2474_v24 = vsel %vm13475_vm3, %v9455_v60, %v2464_v13  ;;  %v2335_v49 = vsel %vm13476_vm10, %v9401_v34, %v2325_v8  ;;  %v2336_v31 = vsel %vm13477_vm11, %v9401_v34, %v2326_v46  ;;  %vm13478_vm7 = vcmp.eq.s32.totalorder %v4905_v37, 8 }
 0x33b   : > { %v2337_v28 = vsel %vm13478_vm7, %v9401_v34, %v2327_v52  ;;  %vm13479_vm13 = vcmp.eq.s32.totalorder %v4526_v45, 23  ;;  %vm13480_vm15 = vcmp.eq.s32.totalorder %v4633_v32, 9  ;;  %vm13481_vm3 = vcmp.eq.s32.totalorder %v4769_v29, 9 }
 0x33c   : > { %v2484_v57 = vsel %vm13479_vm13, %v9461_v41, %v2474_v24  ;;  %v2345_v23 = vsel %vm13480_vm15, %v9404_v12, %v2335_v49  ;;  %v2346_v18 = vsel %vm13481_vm3, %v9404_v12, %v2336_v31  ;;  %vm13482_vm10 = vcmp.eq.s32.totalorder %v4905_v37, 9 }
 0x33d   : > { %v2347_v25 = vsel %vm13482_vm10, %v9404_v12, %v2337_v28  ;;  %vm13483_vm11 = vcmp.eq.s32.totalorder %v4526_v45, 24  ;;  %vm13484_vm7 = vcmp.eq.s32.totalorder %v4633_v32, 10  ;;  %vm13485_vm13 = vcmp.eq.s32.totalorder %v4769_v29, 10 }
 0x33e   : > { %v2494_v1 = vsel %vm13483_vm11, %v9464_v62, %v2484_v57  ;;  %v2355_v22 = vsel %vm13484_vm7, %v9407_v30, %v2345_v23  ;;  %v2356_v63 = vsel %vm13485_vm13, %v9407_v30, %v2346_v18  ;;  %vm13486_vm15 = vcmp.eq.s32.totalorder %v4905_v37, 10 }
 0x33f   : > { %v2357_v2 = vsel %vm13486_vm15, %v9407_v30, %v2347_v25  ;;  %vm13487_vm3 = vcmp.eq.s32.totalorder %v4526_v45, 25  ;;  %vm13488_vm10 = vcmp.eq.s32.totalorder %v4633_v32, 11  ;;  %vm13489_vm11 = vcmp.eq.s32.totalorder %v4769_v29, 11 }
 0x340   : > { %v2504_v50 = vsel %vm13487_vm3, %v9467_v51, %v2494_v1  ;;  %v2365_v11 = vsel %vm13488_vm10, %v9413_v42, %v2355_v22  ;;  %v2366_v59 = vsel %vm13489_vm11, %v9413_v42, %v2356_v63  ;;  %vm13490_vm7 = vcmp.eq.s32.totalorder %v4905_v37, 11 }
 0x341   : > { %v2367_v10 = vsel %vm13490_vm7, %v9413_v42, %v2357_v2  ;;  %vm13491_vm13 = vcmp.eq.s32.totalorder %v4526_v45, 26  ;;  %vm13492_vm15 = vcmp.eq.s32.totalorder %v4633_v32, 12  ;;  %vm13493_vm3 = vcmp.eq.s32.totalorder %v4769_v29, 12 }
 0x342   : > { %v2514_v6 = vsel %vm13491_vm13, %v9473_v36, %v2504_v50  ;;  %v2375_v19 = vsel %vm13492_vm15, %v9416_v55, %v2365_v11  ;;  %v2376_v61 = vsel %vm13493_vm3, %v9416_v55, %v2366_v59  ;;  %vm13494_vm10 = vcmp.eq.s32.totalorder %v4905_v37, 12 }
 0x343   : > { %v2377_v40 = vsel %vm13494_vm10, %v9416_v55, %v2367_v10  ;;  %vm13495_vm11 = vcmp.eq.s32.totalorder %v4526_v45, 27  ;;  %vm13496_vm7 = vcmp.eq.s32.totalorder %v4633_v32, 13  ;;  %vm13497_vm13 = vcmp.eq.s32.totalorder %v4769_v29, 13 }
 0x344   : > { %v2524_v13 = vsel %vm13495_vm11, %v9476_v7, %v2514_v6  ;;  %v2385_v8 = vsel %vm13496_vm7, %v9419_v17, %v2375_v19  ;;  %v2386_v46 = vsel %vm13497_vm13, %v9419_v17, %v2376_v61  ;;  %vm13498_vm15 = vcmp.eq.s32.totalorder %v4905_v37, 13 }
 0x345   : > { %v2387_v52 = vsel %vm13498_vm15, %v9419_v17, %v2377_v40  ;;  %vm13499_vm3 = vcmp.eq.s32.totalorder %v4526_v45, 28  ;;  %vm13500_vm10 = vcmp.eq.s32.totalorder %v4633_v32, 14  ;;  %vm13501_vm11 = vcmp.eq.s32.totalorder %v4769_v29, 14 }
 0x346   : > { %v2534_v24 = vsel %vm13499_vm3, %v9479_v38, %v2524_v13  ;;  %v2395_v49 = vsel %vm13500_vm10, %v9425_v0, %v2385_v8  ;;  %v2396_v31 = vsel %vm13501_vm11, %v9425_v0, %v2386_v46  ;;  %vm13502_vm7 = vcmp.eq.s32.totalorder %v4905_v37, 14 }
 0x347   : > { %v2397_v28 = vsel %vm13502_vm7, %v9425_v0, %v2387_v52  ;;  %vm13503_vm13 = vcmp.eq.s32.totalorder %v4526_v45, 29  ;;  %vm13504_vm15 = vcmp.eq.s32.totalorder %v4633_v32, 15  ;;  %vm13505_vm3 = vcmp.eq.s32.totalorder %v4769_v29, 15 }
 0x348   : > { %v2544_v57 = vsel %vm13503_vm13, %v9485_v56, %v2534_v24  ;;  %v2405_v23 = vsel %vm13504_vm15, %v9428_v16, %v2395_v49  ;;  %v2406_v18 = vsel %vm13505_vm3, %v9428_v16, %v2396_v31  ;;  %vm13506_vm10 = vcmp.eq.s32.totalorder %v4905_v37, 15 }
 0x349   : > { %v2407_v25 = vsel %vm13506_vm10, %v9428_v16, %v2397_v28  ;;  %vm13507_vm11 = vcmp.eq.s32.totalorder %v4526_v45, 30  ;;  %vm13508_vm7 = vcmp.eq.s32.totalorder %v4633_v32, 16  ;;  %vm13509_vm13 = vcmp.eq.s32.totalorder %v4769_v29, 16 }
 0x34a   : > { %v2554_v1 = vsel %vm13507_vm11, %v9488_v47, %v2544_v57  ;;  %v2415_v22 = vsel %vm13508_vm7, %v9431_v58, %v2405_v23  ;;  %v2416_v63 = vsel %vm13509_vm13, %v9431_v58, %v2406_v18  ;;  %vm13510_vm15 = vcmp.eq.s32.totalorder %v4905_v37, 16 }
 0x34b   : > { %v2417_v2 = vsel %vm13510_vm15, %v9431_v58, %v2407_v25  ;;  %vm13511_vm3 = vcmp.eq.s32.totalorder %v4526_v45, 31  ;;  %vm13512_vm10 = vcmp.eq.s32.totalorder %v4633_v32, 17  ;;  %vm13513_vm11 = vcmp.eq.s32.totalorder %v4769_v29, 17 }
 0x34c   : > { %v2564_v50 = vsel %vm13511_vm3, %v9491_v27, %v2554_v1  ;;  %v2425_v11 = vsel %vm13512_vm10, %v9437_v43, %v2415_v22  ;;  %v2426_v59 = vsel %vm13513_vm11, %v9437_v43, %v2416_v63  ;;  %vm13514_vm7 = vcmp.eq.s32.totalorder %v4905_v37, 17 }
 0x34d   : > { %v2427_v10 = vsel %vm13514_vm7, %v9437_v43, %v2417_v2  ;;  %2573 = vst [vmem:[#allocation2 + $0x140] sm:$0xff] %v2564_v50  ;;  %vm13515_vm13 = vcmp.eq.s32.totalorder %v4633_v32, 18  ;;  %vm13516_vm15 = vcmp.eq.s32.totalorder %v4769_v29, 18  ;;  %vm13517_vm3 = vcmp.eq.s32.totalorder %v4905_v37, 18 }
 0x34e   : > { %v2435_v6 = vsel %vm13515_vm13, %v9440_v44, %v2425_v11  ;;  %v2436_v19 = vsel %vm13516_vm15, %v9440_v44, %v2426_v59  ;;  %v2437_v61 = vsel %vm13517_vm3, %v9440_v44, %v2427_v10  ;;  %vm13518_vm10 = vcmp.eq.s32.totalorder %v4981_v48, 1 }
 0x34f   : > { %v2268_v40 = vsel %vm13518_vm10, %v9198_v3, %v9184_v53  ;;  %vm13519_vm11 = vcmp.eq.s32.totalorder %v4633_v32, 19  ;;  %vm13520_vm7 = vcmp.eq.s32.totalorder %v4769_v29, 19  ;;  %vm13521_vm13 = vcmp.eq.s32.totalorder %v4905_v37, 19 }
 0x350   : > { %v2445_v13 = vsel %vm13519_vm11, %v9443_v35, %v2435_v6  ;;  %v2446_v8 = vsel %vm13520_vm7, %v9443_v35, %v2436_v19  ;;  %v2447_v46 = vsel %vm13521_vm13, %v9443_v35, %v2437_v61  ;;  %vm13522_vm15 = vcmp.eq.s32.totalorder %v4981_v48, 2 }
 0x351   : > { %v2278_v52 = vsel %vm13522_vm15, %v9231_v4, %v2268_v40  ;;  %vm13523_vm3 = vcmp.eq.s32.totalorder %v4633_v32, 20  ;;  %vm13524_vm10 = vcmp.eq.s32.totalorder %v4769_v29, 20  ;;  %vm13525_vm11 = vcmp.eq.s32.totalorder %v4905_v37, 20 }
 0x352   : > { %v2455_v24 = vsel %vm13523_vm3, %v9449_v26, %v2445_v13  ;;  %v2456_v49 = vsel %vm13524_vm10, %v9449_v26, %v2446_v8  ;;  %v2457_v31 = vsel %vm13525_vm11, %v9449_v26, %v2447_v46  ;;  %vm13526_vm7 = vcmp.eq.s32.totalorder %v4981_v48, 3 }
 0x353   : > { %v2288_v28 = vsel %vm13526_vm7, %v9263_v9, %v2278_v52  ;;  %vm13527_vm13 = vcmp.eq.s32.totalorder %v4633_v32, 21  ;;  %vm13528_vm15 = vcmp.eq.s32.totalorder %v4769_v29, 21  ;;  %vm13529_vm3 = vcmp.eq.s32.totalorder %v4905_v37, 21 }
 0x354   : > { %v2465_v57 = vsel %vm13527_vm13, %v9452_v20, %v2455_v24  ;;  %v2466_v23 = vsel %vm13528_vm15, %v9452_v20, %v2456_v49  ;;  %v2467_v18 = vsel %vm13529_vm3, %v9452_v20, %v2457_v31  ;;  %vm13530_vm10 = vcmp.eq.s32.totalorder %v4981_v48, 4 }
 0x355   : > { %v2298_v25 = vsel %vm13530_vm10, %v9295_v21, %v2288_v28  ;;  %vm13531_vm11 = vcmp.eq.s32.totalorder %v4633_v32, 22  ;;  %vm13532_vm7 = vcmp.eq.s32.totalorder %v4769_v29, 22  ;;  %vm13533_vm13 = vcmp.eq.s32.totalorder %v4905_v37, 22 }
 0x356   : > { %v2475_v1 = vsel %vm13531_vm11, %v9455_v60, %v2465_v57  ;;  %v2476_v22 = vsel %vm13532_vm7, %v9455_v60, %v2466_v23  ;;  %v2477_v63 = vsel %vm13533_vm13, %v9455_v60, %v2467_v18  ;;  %vm13534_vm15 = vcmp.eq.s32.totalorder %v4981_v48, 5 }
 0x357   : > { %v2308_v2 = vsel %vm13534_vm15, %v9327_v39, %v2298_v25  ;;  %vm13535_vm3 = vcmp.eq.s32.totalorder %v4633_v32, 23  ;;  %vm13536_vm10 = vcmp.eq.s32.totalorder %v4769_v29, 23  ;;  %vm13537_vm11 = vcmp.eq.s32.totalorder %v4905_v37, 23 }
 0x358   : > { %v2485_v50 = vsel %vm13535_vm3, %v9461_v41, %v2475_v1  ;;  %v2486_v11 = vsel %vm13536_vm10, %v9461_v41, %v2476_v22  ;;  %v2487_v59 = vsel %vm13537_vm11, %v9461_v41, %v2477_v63  ;;  %vm13538_vm7 = vcmp.eq.s32.totalorder %v4981_v48, 6 }
 0x359   : > { %v2318_v10 = vsel %vm13538_vm7, %v9359_v5, %v2308_v2  ;;  %vm13539_vm13 = vcmp.eq.s32.totalorder %v4633_v32, 24  ;;  %vm13540_vm15 = vcmp.eq.s32.totalorder %v4769_v29, 24  ;;  %vm13541_vm3 = vcmp.eq.s32.totalorder %v4905_v37, 24 }
 0x35a   : > { %v2495_v6 = vsel %vm13539_vm13, %v9464_v62, %v2485_v50  ;;  %v2496_v19 = vsel %vm13540_vm15, %v9464_v62, %v2486_v11  ;;  %v2497_v61 = vsel %vm13541_vm3, %v9464_v62, %v2487_v59  ;;  %vm13542_vm10 = vcmp.eq.s32.totalorder %v4981_v48, 7 }
 0x35b   : > { %v2328_v40 = vsel %vm13542_vm10, %v9391_v15, %v2318_v10  ;;  %vm13543_vm11 = vcmp.eq.s32.totalorder %v4633_v32, 25  ;;  %vm13544_vm7 = vcmp.eq.s32.totalorder %v4769_v29, 25  ;;  %vm13545_vm13 = vcmp.eq.s32.totalorder %v4905_v37, 25 }
 0x35c   : > { %v2505_v13 = vsel %vm13543_vm11, %v9467_v51, %v2495_v6  ;;  %v2506_v8 = vsel %vm13544_vm7, %v9467_v51, %v2496_v19  ;;  %v2507_v46 = vsel %vm13545_vm13, %v9467_v51, %v2497_v61  ;;  %vm13546_vm15 = vcmp.eq.s32.totalorder %v4981_v48, 8 }
 0x35d   : > { %v2338_v52 = vsel %vm13546_vm15, %v9401_v34, %v2328_v40  ;;  %vm13547_vm3 = vcmp.eq.s32.totalorder %v4633_v32, 26  ;;  %vm13548_vm10 = vcmp.eq.s32.totalorder %v4769_v29, 26  ;;  %vm13549_vm11 = vcmp.eq.s32.totalorder %v4905_v37, 26 }
 0x35e   : > { %v2515_v24 = vsel %vm13547_vm3, %v9473_v36, %v2505_v13  ;;  %v2516_v49 = vsel %vm13548_vm10, %v9473_v36, %v2506_v8  ;;  %v2517_v31 = vsel %vm13549_vm11, %v9473_v36, %v2507_v46  ;;  %vm13550_vm7 = vcmp.eq.s32.totalorder %v4981_v48, 9 }
 0x35f   : > { %v2348_v28 = vsel %vm13550_vm7, %v9404_v12, %v2338_v52  ;;  %vm13551_vm13 = vcmp.eq.s32.totalorder %v4633_v32, 27  ;;  %vm13552_vm15 = vcmp.eq.s32.totalorder %v4769_v29, 27  ;;  %vm13553_vm3 = vcmp.eq.s32.totalorder %v4905_v37, 27 }
 0x360   : > { %v2525_v57 = vsel %vm13551_vm13, %v9476_v7, %v2515_v24  ;;  %v2526_v23 = vsel %vm13552_vm15, %v9476_v7, %v2516_v49  ;;  %v2527_v18 = vsel %vm13553_vm3, %v9476_v7, %v2517_v31  ;;  %vm13554_vm10 = vcmp.eq.s32.totalorder %v4981_v48, 10 }
 0x361   : > { %v2358_v25 = vsel %vm13554_vm10, %v9407_v30, %v2348_v28  ;;  %vm13555_vm11 = vcmp.eq.s32.totalorder %v4633_v32, 28  ;;  %vm13556_vm7 = vcmp.eq.s32.totalorder %v4769_v29, 28  ;;  %vm13557_vm13 = vcmp.eq.s32.totalorder %v4905_v37, 28 }
 0x362   : > { %v2535_v1 = vsel %vm13555_vm11, %v9479_v38, %v2525_v57  ;;  %v2536_v22 = vsel %vm13556_vm7, %v9479_v38, %v2526_v23  ;;  %v2537_v63 = vsel %vm13557_vm13, %v9479_v38, %v2527_v18  ;;  %vm13558_vm15 = vcmp.eq.s32.totalorder %v4981_v48, 11 }
 0x363   : > { %v2368_v2 = vsel %vm13558_vm15, %v9413_v42, %v2358_v25  ;;  %vm13559_vm3 = vcmp.eq.s32.totalorder %v4633_v32, 29  ;;  %vm13560_vm10 = vcmp.eq.s32.totalorder %v4769_v29, 29  ;;  %vm13561_vm11 = vcmp.eq.s32.totalorder %v4905_v37, 29 }
 0x364   : > { %v2545_v50 = vsel %vm13559_vm3, %v9485_v56, %v2535_v1  ;;  %v2546_v11 = vsel %vm13560_vm10, %v9485_v56, %v2536_v22  ;;  %v2547_v59 = vsel %vm13561_vm11, %v9485_v56, %v2537_v63  ;;  %vm13562_vm7 = vcmp.eq.s32.totalorder %v4981_v48, 12 }
 0x365   : > { %v2378_v10 = vsel %vm13562_vm7, %v9416_v55, %v2368_v2  ;;  %vm13563_vm13 = vcmp.eq.s32.totalorder %v4633_v32, 30  ;;  %vm13564_vm15 = vcmp.eq.s32.totalorder %v4769_v29, 30  ;;  %vm13565_vm3 = vcmp.eq.s32.totalorder %v4905_v37, 30 }
 0x366   : > { %v2555_v6 = vsel %vm13563_vm13, %v9488_v47, %v2545_v50  ;;  %v2556_v19 = vsel %vm13564_vm15, %v9488_v47, %v2546_v11  ;;  %v2557_v61 = vsel %vm13565_vm3, %v9488_v47, %v2547_v59  ;;  %vm13566_vm10 = vcmp.eq.s32.totalorder %v4981_v48, 13 }
 0x367   : > { %v2388_v40 = vsel %vm13566_vm10, %v9419_v17, %v2378_v10  ;;  %vm13567_vm11 = vcmp.eq.s32.totalorder %v4633_v32, 31  ;;  %vm13568_vm7 = vcmp.eq.s32.totalorder %v4769_v29, 31  ;;  %vm13569_vm13 = vcmp.eq.s32.totalorder %v4905_v37, 31 }
 0x368   : > { %v2565_v13 = vsel %vm13567_vm11, %v9491_v27, %v2555_v6  ;;  %v2566_v8 = vsel %vm13568_vm7, %v9491_v27, %v2556_v19  ;;  %v2567_v46 = vsel %vm13569_vm13, %v9491_v27, %v2557_v61  ;;  %vm13570_vm15 = vcmp.eq.s32.totalorder %v4981_v48, 14 }
 0x369   : > { %v2398_v52 = vsel %vm13570_vm15, %v9425_v0, %v2388_v40  ;;  %2574 = vst [vmem:[#allocation2 + $0x148] sm:$0xff] %v2565_v13  ;;  %2575 = vst [vmem:[#allocation2 + $0x150] sm:$0xff] %v2566_v8  ;;  %vm13571_vm3 = vcmp.eq.s32.totalorder %v4981_v48, 15  ;;  %vm13572_vm10 = vcmp.eq.s32.totalorder %v5102_v33, 1  ;;  %vm13573_vm11 = vcmp.eq.s32.totalorder %v5274_v54, 1 }
 0x36a   : > { %2576 = vst [vmem:[#allocation2 + $0x158] sm:$0xff] %v2567_v46  ;;  %v2408_v24 = vsel %vm13571_vm3, %v9428_v16, %v2398_v52  ;;  %v2269_v49 = vsel %vm13572_vm10, %v9198_v3, %v9184_v53  ;;  %v2270_v31 = vsel %vm13573_vm11, %v9198_v3, %v9184_v53  ;;  %vm13574_vm7 = vcmp.eq.s32.totalorder %v5479_v14, 1 }
 0x36b   : > { %v2271_v28 = vsel %vm13574_vm7, %v9198_v3, %v9184_v53  ;;  %vm13575_vm13 = vcmp.eq.s32.totalorder %v4981_v48, 16  ;;  %vm13576_vm15 = vcmp.eq.s32.totalorder %v5102_v33, 2  ;;  %vm13577_vm3 = vcmp.eq.s32.totalorder %v5274_v54, 2 }
 0x36c   : > { %v2418_v57 = vsel %vm13575_vm13, %v9431_v58, %v2408_v24  ;;  %v2279_v23 = vsel %vm13576_vm15, %v9231_v4, %v2269_v49  ;;  %v2280_v18 = vsel %vm13577_vm3, %v9231_v4, %v2270_v31  ;;  %vm13578_vm10 = vcmp.eq.s32.totalorder %v5479_v14, 2 }
 0x36d   : > { %v2281_v25 = vsel %vm13578_vm10, %v9231_v4, %v2271_v28  ;;  %vm13579_vm11 = vcmp.eq.s32.totalorder %v4981_v48, 17  ;;  %vm13580_vm7 = vcmp.eq.s32.totalorder %v5102_v33, 3  ;;  %vm13581_vm13 = vcmp.eq.s32.totalorder %v5274_v54, 3 }
 0x36e   : > { %v2428_v53 = vsel %vm13579_vm11, %v9437_v43, %v2418_v57  ;;  %v2289_v3 = vsel %vm13580_vm7, %v9263_v9, %v2279_v23  ;;  %v2290_v1 = vsel %vm13581_vm13, %v9263_v9, %v2280_v18  ;;  %vm13582_vm15 = vcmp.eq.s32.totalorder %v5479_v14, 3 }
 0x36f   : > { %v2291_v22 = vsel %vm13582_vm15, %v9263_v9, %v2281_v25  ;;  %vm13583_vm3 = vcmp.eq.s32.totalorder %v4981_v48, 18  ;;  %vm13584_vm10 = vcmp.eq.s32.totalorder %v5102_v33, 4  ;;  %vm13585_vm11 = vcmp.eq.s32.totalorder %v5274_v54, 4 }
 0x370   : > { %v2438_v4 = vsel %vm13583_vm3, %v9440_v44, %v2428_v53  ;;  %v2299_v63 = vsel %vm13584_vm10, %v9295_v21, %v2289_v3  ;;  %v2300_v2 = vsel %vm13585_vm11, %v9295_v21, %v2290_v1  ;;  %vm13586_vm7 = vcmp.eq.s32.totalorder %v5479_v14, 4 }
 0x371   : > { %v2301_v50 = vsel %vm13586_vm7, %v9295_v21, %v2291_v22  ;;  %vm13587_vm13 = vcmp.eq.s32.totalorder %v4981_v48, 19  ;;  %vm13588_vm15 = vcmp.eq.s32.totalorder %v5102_v33, 5  ;;  %vm13589_vm3 = vcmp.eq.s32.totalorder %v5274_v54, 5 }
 0x372   : > { %v2448_v9 = vsel %vm13587_vm13, %v9443_v35, %v2438_v4  ;;  %v2309_v11 = vsel %vm13588_vm15, %v9327_v39, %v2299_v63  ;;  %v2310_v59 = vsel %vm13589_vm3, %v9327_v39, %v2300_v2  ;;  %vm13590_vm10 = vcmp.eq.s32.totalorder %v5479_v14, 5 }
 0x373   : > { %v2311_v10 = vsel %vm13590_vm10, %v9327_v39, %v2301_v50  ;;  %vm13591_vm11 = vcmp.eq.s32.totalorder %v4981_v48, 20  ;;  %vm13592_vm7 = vcmp.eq.s32.totalorder %v5102_v33, 6  ;;  %vm13593_vm13 = vcmp.eq.s32.totalorder %v5274_v54, 6 }
 0x374   : > { %v2458_v21 = vsel %vm13591_vm11, %v9449_v26, %v2448_v9  ;;  %v2319_v6 = vsel %vm13592_vm7, %v9359_v5, %v2309_v11  ;;  %v2320_v19 = vsel %vm13593_vm13, %v9359_v5, %v2310_v59  ;;  %vm13594_vm15 = vcmp.eq.s32.totalorder %v5479_v14, 6 }
 0x375   : > { %v2321_v61 = vsel %vm13594_vm15, %v9359_v5, %v2311_v10  ;;  %vm13595_vm3 = vcmp.eq.s32.totalorder %v4981_v48, 21  ;;  %vm13596_vm10 = vcmp.eq.s32.totalorder %v5102_v33, 7  ;;  %vm13597_vm11 = vcmp.eq.s32.totalorder %v5274_v54, 7 }
 0x376   : > { %v2468_v39 = vsel %vm13595_vm3, %v9452_v20, %v2458_v21  ;;  %v2329_v40 = vsel %vm13596_vm10, %v9391_v15, %v2319_v6  ;;  %v2330_v13 = vsel %vm13597_vm11, %v9391_v15, %v2320_v19  ;;  %vm13598_vm7 = vcmp.eq.s32.totalorder %v5479_v14, 7 }
 0x377   : > { %v2331_v8 = vsel %vm13598_vm7, %v9391_v15, %v2321_v61  ;;  %vm13599_vm13 = vcmp.eq.s32.totalorder %v4981_v48, 22  ;;  %vm13600_vm15 = vcmp.eq.s32.totalorder %v5102_v33, 8  ;;  %vm13601_vm3 = vcmp.eq.s32.totalorder %v5274_v54, 8 }
 0x378   : > { %v2478_v5 = vsel %vm13599_vm13, %v9455_v60, %v2468_v39  ;;  %v2339_v46 = vsel %vm13600_vm15, %v9401_v34, %v2329_v40  ;;  %v2340_v52 = vsel %vm13601_vm3, %v9401_v34, %v2330_v13  ;;  %vm13602_vm10 = vcmp.eq.s32.totalorder %v5479_v14, 8 }
 0x379   : > { %v2341_v24 = vsel %vm13602_vm10, %v9401_v34, %v2331_v8  ;;  %vm13603_vm11 = vcmp.eq.s32.totalorder %v4981_v48, 23  ;;  %vm13604_vm7 = vcmp.eq.s32.totalorder %v5102_v33, 9  ;;  %vm13605_vm13 = vcmp.eq.s32.totalorder %v5274_v54, 9 }
 0x37a   : > { %v2488_v15 = vsel %vm13603_vm11, %v9461_v41, %v2478_v5  ;;  %v2349_v49 = vsel %vm13604_vm7, %v9404_v12, %v2339_v46  ;;  %v2350_v31 = vsel %vm13605_vm13, %v9404_v12, %v2340_v52  ;;  %vm13606_vm15 = vcmp.eq.s32.totalorder %v5479_v14, 9 }
 0x37b   : > { %v2351_v28 = vsel %vm13606_vm15, %v9404_v12, %v2341_v24  ;;  %vm13607_vm3 = vcmp.eq.s32.totalorder %v4981_v48, 24  ;;  %vm13608_vm10 = vcmp.eq.s32.totalorder %v5102_v33, 10  ;;  %vm13609_vm11 = vcmp.eq.s32.totalorder %v5274_v54, 10 }
 0x37c   : > { %v2498_v34 = vsel %vm13607_vm3, %v9464_v62, %v2488_v15  ;;  %v2359_v57 = vsel %vm13608_vm10, %v9407_v30, %v2349_v49  ;;  %v2360_v23 = vsel %vm13609_vm11, %v9407_v30, %v2350_v31  ;;  %vm13610_vm7 = vcmp.eq.s32.totalorder %v5479_v14, 10 }
 0x37d   : > { %v2361_v18 = vsel %vm13610_vm7, %v9407_v30, %v2351_v28  ;;  %vm13611_vm13 = vcmp.eq.s32.totalorder %v4981_v48, 25  ;;  %vm13612_vm15 = vcmp.eq.s32.totalorder %v5102_v33, 11  ;;  %vm13613_vm3 = vcmp.eq.s32.totalorder %v5274_v54, 11 }
 0x37e   : > { %v2508_v12 = vsel %vm13611_vm13, %v9467_v51, %v2498_v34  ;;  %v2369_v25 = vsel %vm13612_vm15, %v9413_v42, %v2359_v57  ;;  %v2370_v53 = vsel %vm13613_vm3, %v9413_v42, %v2360_v23  ;;  %vm13614_vm10 = vcmp.eq.s32.totalorder %v5479_v14, 11 }
 0x37f   : > { %v2371_v3 = vsel %vm13614_vm10, %v9413_v42, %v2361_v18  ;;  %vm13615_vm11 = vcmp.eq.s32.totalorder %v4981_v48, 26  ;;  %vm13616_vm7 = vcmp.eq.s32.totalorder %v5102_v33, 12  ;;  %vm13617_vm13 = vcmp.eq.s32.totalorder %v5274_v54, 12 }
 0x380   : > { %v2518_v30 = vsel %vm13615_vm11, %v9473_v36, %v2508_v12  ;;  %v2379_v1 = vsel %vm13616_vm7, %v9416_v55, %v2369_v25  ;;  %v2380_v22 = vsel %vm13617_vm13, %v9416_v55, %v2370_v53  ;;  %vm13618_vm15 = vcmp.eq.s32.totalorder %v5479_v14, 12 }
 0x381   : > { %v2381_v4 = vsel %vm13618_vm15, %v9416_v55, %v2371_v3  ;;  %vm13619_vm3 = vcmp.eq.s32.totalorder %v4981_v48, 27  ;;  %vm13620_vm10 = vcmp.eq.s32.totalorder %v5102_v33, 13  ;;  %vm13621_vm11 = vcmp.eq.s32.totalorder %v5274_v54, 13 }
 0x382   : > { %v2528_v42 = vsel %vm13619_vm3, %v9476_v7, %v2518_v30  ;;  %v2389_v63 = vsel %vm13620_vm10, %v9419_v17, %v2379_v1  ;;  %v2390_v2 = vsel %vm13621_vm11, %v9419_v17, %v2380_v22  ;;  %vm13622_vm7 = vcmp.eq.s32.totalorder %v5479_v14, 13 }
 0x383   : > { %v2391_v50 = vsel %vm13622_vm7, %v9419_v17, %v2381_v4  ;;  %vm13623_vm13 = vcmp.eq.s32.totalorder %v4981_v48, 28  ;;  %vm13624_vm15 = vcmp.eq.s32.totalorder %v5102_v33, 14  ;;  %vm13625_vm3 = vcmp.eq.s32.totalorder %v5274_v54, 14 }
 0x384   : > { %v2538_v55 = vsel %vm13623_vm13, %v9479_v38, %v2528_v42  ;;  %v2399_v9 = vsel %vm13624_vm15, %v9425_v0, %v2389_v63  ;;  %v2400_v11 = vsel %vm13625_vm3, %v9425_v0, %v2390_v2  ;;  %vm13626_vm10 = vcmp.eq.s32.totalorder %v5479_v14, 14 }
 0x385   : > { %v2401_v59 = vsel %vm13626_vm10, %v9425_v0, %v2391_v50  ;;  %vm13627_vm11 = vcmp.eq.s32.totalorder %v4981_v48, 29  ;;  %vm13628_vm7 = vcmp.eq.s32.totalorder %v5102_v33, 15  ;;  %vm13629_vm13 = vcmp.eq.s32.totalorder %v5274_v54, 15 }
 0x386   : > { %v2548_v17 = vsel %vm13627_vm11, %v9485_v56, %v2538_v55  ;;  %v2409_v10 = vsel %vm13628_vm7, %v9428_v16, %v2399_v9  ;;  %v2410_v21 = vsel %vm13629_vm13, %v9428_v16, %v2400_v11  ;;  %vm13630_vm15 = vcmp.eq.s32.totalorder %v5479_v14, 15 }
 0x387   : > { %v2411_v6 = vsel %vm13630_vm15, %v9428_v16, %v2401_v59  ;;  %vm13631_vm3 = vcmp.eq.s32.totalorder %v4981_v48, 30  ;;  %vm13632_vm10 = vcmp.eq.s32.totalorder %v5102_v33, 16  ;;  %vm13633_vm11 = vcmp.eq.s32.totalorder %v5274_v54, 16 }
 0x388   : > { %v2558_v0 = vsel %vm13631_vm3, %v9488_v47, %v2548_v17  ;;  %v2419_v19 = vsel %vm13632_vm10, %v9431_v58, %v2409_v10  ;;  %v2420_v61 = vsel %vm13633_vm11, %v9431_v58, %v2410_v21  ;;  %vm13634_vm7 = vcmp.eq.s32.totalorder %v5479_v14, 16 }
 0x389   : > { %v2421_v39 = vsel %vm13634_vm7, %v9431_v58, %v2411_v6  ;;  %vm13635_vm13 = vcmp.eq.s32.totalorder %v4981_v48, 31  ;;  %vm13636_vm15 = vcmp.eq.s32.totalorder %v5102_v33, 17  ;;  %vm13637_vm3 = vcmp.eq.s32.totalorder %v5274_v54, 17 }
 0x38a   : > { %v2568_v16 = vsel %vm13635_vm13, %v9491_v27, %v2558_v0  ;;  %v2429_v40 = vsel %vm13636_vm15, %v9437_v43, %v2419_v19  ;;  %v2430_v13 = vsel %vm13637_vm3, %v9437_v43, %v2420_v61  ;;  %vm13638_vm10 = vcmp.eq.s32.totalorder %v5479_v14, 17 }
 0x38b   : > { %v2431_v8 = vsel %vm13638_vm10, %v9437_v43, %v2421_v39  ;;  %2577 = vst [vmem:[#allocation2 + $0x160] sm:$0xff] %v2568_v16  ;;  %vm13639_vm11 = vcmp.eq.s32.totalorder %v5102_v33, 18  ;;  %vm13640_vm7 = vcmp.eq.s32.totalorder %v5274_v54, 18  ;;  %vm13641_vm13 = vcmp.eq.s32.totalorder %v5479_v14, 18 }
 0x38c   : > { %v2439_v58 = vsel %vm13639_vm11, %v9440_v44, %v2429_v40  ;;  %v2440_v5 = vsel %vm13640_vm7, %v9440_v44, %v2430_v13  ;;  %v2441_v46 = vsel %vm13641_vm13, %v9440_v44, %v2431_v8  ;;  %v10096_v52 = vstv %s9992_s2  ;;  %s10259_s2 = sld [smem:[#allocation3 + $0x319]] }
 0x38d   : > { %vm13642_vm15 = vcmp.eq.s32.totalorder %v5102_v33, 19  ;;  %vm13643_vm3 = vcmp.eq.s32.totalorder %v5274_v54, 19  ;;  %vm13644_vm10 = vcmp.eq.s32.totalorder %v5479_v14, 19  ;;  %v10110_v49 = vstv %s10006_s10  ;;  %s10273_s10 = sld [smem:[#allocation3 + $0x31a]] }
 0x38e   : > { %v2449_v43 = vsel %vm13642_vm15, %v9443_v35, %v2439_v58  ;;  %v2450_v24 = vsel %vm13643_vm3, %v9443_v35, %v2440_v5  ;;  %v2451_v15 = vsel %vm13644_vm10, %v9443_v35, %v2441_v46  ;;  %vm13645_vm11 = vcmp.eq.s32.totalorder %v5102_v33, 20 }
 0x38f   : > { %v2459_v44 = vsel %vm13645_vm11, %v9449_v26, %v2449_v43  ;;  %vm13646_vm7 = vcmp.eq.s32.totalorder %v5274_v54, 20  ;;  %vm13647_vm13 = vcmp.eq.s32.totalorder %v5479_v14, 20  ;;  %vm13648_vm15 = vcmp.eq.s32.totalorder %v4526_v45, 1 }
 0x390   : > { %v2460_v31 = vsel %vm13646_vm7, %v9449_v26, %v2450_v24  ;;  %v2461_v28 = vsel %vm13647_vm13, %v9449_v26, %v2451_v15  ;;  %v2585_v35 = vsel %vm13648_vm15, %v10110_v49, %v10096_v52  ;;  %vm13649_vm3 = vcmp.eq.s32.totalorder %v5102_v33, 21 }
 0x391   : > { %v2469_v34 = vsel %vm13649_vm3, %v9452_v20, %v2459_v44  ;;  %vm13650_vm10 = vcmp.eq.s32.totalorder %v5274_v54, 21  ;;  %v2471_v26 = vsel %vm575_vm5, %v9452_v20, %v2461_v28  ;;  %v10143_v23 = vstv %s10032_s11  ;;  %s10275_s11 = sld [smem:[#allocation3 + $0x31b]] }
 0x392   : > { %v2470_v57 = vsel %vm13650_vm10, %v9452_v20, %v2460_v31  ;;  %vm13651_vm11 = vcmp.eq.s32.totalorder %v5102_v33, 22  ;;  %vm13652_vm7 = vcmp.eq.s32.totalorder %v5274_v54, 22  ;;  %v2481_v25 = vsel %vm583_vm1, %v9455_v60, %v2471_v26 }
 0x393   : > { %v2479_v18 = vsel %vm13651_vm11, %v9455_v60, %v2469_v34  ;;  %v2480_v12 = vsel %vm13652_vm7, %v9455_v60, %v2470_v57  ;;  %vm13653_vm13 = vcmp.eq.s32.totalorder %v4526_v45, 2  ;;  %vm13654_vm15 = vcmp.eq.s32.totalorder %v5102_v33, 23 }
 0x394   : > { %v2595_v20 = vsel %vm13653_vm13, %v10143_v23, %v2585_v35  ;;  %v2489_v53 = vsel %vm13654_vm15, %v9461_v41, %v2479_v18  ;;  %vm13655_vm3 = vcmp.eq.s32.totalorder %v5274_v54, 23  ;;  %v2491_v60 = vsel %vm591_vm6, %v9461_v41, %v2481_v25 }
 0x395   : > { %v2490_v3 = vsel %vm13655_vm3, %v9461_v41, %v2480_v12  ;;  %v10175_v30 = vstv %s10058_s14  ;;  %vm13656_vm10 = vcmp.eq.s32.totalorder %v5102_v33, 24  ;;  %vm13657_vm11 = vcmp.eq.s32.totalorder %v5274_v54, 24  ;;  %s10289_s14 = sld [smem:[#allocation3 + $0x31c]] }
 0x396   : > { %v2499_v1 = vsel %vm13656_vm10, %v9464_v62, %v2489_v53  ;;  %v2500_v22 = vsel %vm13657_vm11, %v9464_v62, %v2490_v3  ;;  %v2501_v4 = vsel %vm599_vm8, %v9464_v62, %v2491_v60  ;;  %vm13658_vm7 = vcmp.eq.s32.totalorder %v4526_v45, 3 }
 0x397   : > { %v2605_v41 = vsel %vm13658_vm7, %v10175_v30, %v2595_v20  ;;  %vm13659_vm13 = vcmp.eq.s32.totalorder %v5102_v33, 25  ;;  %vm13660_vm15 = vcmp.eq.s32.totalorder %v5274_v54, 25  ;;  %v2511_v62 = vsel %vm607_vm2, %v9467_v51, %v2501_v4 }
 0x398   : > { %v2509_v42 = vsel %vm13659_vm13, %v9467_v51, %v2499_v1  ;;  %v2510_v63 = vsel %vm13660_vm15, %v9467_v51, %v2500_v22  ;;  %v10207_v2 = vstv %s10084_s30  ;;  %vm13661_vm3 = vcmp.eq.s32.totalorder %v5102_v33, 26  ;;  %s10291_s30 = sld [smem:[#allocation3 + $0x31d]] }
 0x399   : > { %v2519_v50 = vsel %vm13661_vm3, %v9473_v36, %v2509_v42  ;;  %vm13662_vm10 = vcmp.eq.s32.totalorder %v5274_v54, 26  ;;  %v2521_v9 = vsel %vm615_vm4, %v9473_v36, %v2511_v62  ;;  %vm13663_vm11 = vcmp.eq.s32.totalorder %v4526_v45, 4 }
 0x39a   : > { %v2520_v55 = vsel %vm13662_vm10, %v9473_v36, %v2510_v63  ;;  %v2615_v51 = vsel %vm13663_vm11, %v10207_v2, %v2605_v41  ;;  %vm13664_vm7 = vcmp.eq.s32.totalorder %v5102_v33, 27  ;;  %vm13665_vm13 = vcmp.eq.s32.totalorder %v5274_v54, 27 }
 0x39b   : > { %v2529_v11 = vsel %vm13664_vm7, %v9476_v7, %v2519_v50  ;;  %v2530_v59 = vsel %vm13665_vm13, %v9476_v7, %v2520_v55  ;;  %v2531_v36 = vsel %vm623_vm9, %v9476_v7, %v2521_v9  ;;  %v10239_v17 = vstv %s10098_s22  ;;  %s10305_s22 = sld [smem:[#allocation3 + $0x31e]] }
 0x39c   : > { %vm13666_vm15 = vcmp.eq.s32.totalorder %v5102_v33, 28  ;;  %vm13667_vm3 = vcmp.eq.s32.totalorder %v5274_v54, 28  ;;  %v2541_v6 = vsel %vm631_vm0, %v9479_v38, %v2531_v36  ;;  %vm13668_vm10 = vcmp.eq.s32.totalorder %v4526_v45, 5 }
 0x39d   : > { %v2539_v10 = vsel %vm13666_vm15, %v9479_v38, %v2529_v11  ;;  %v2540_v21 = vsel %vm13667_vm3, %v9479_v38, %v2530_v59  ;;  %v2625_v7 = vsel %vm13668_vm10, %v10239_v17, %v2615_v51  ;;  %vm13669_vm11 = vcmp.eq.s32.totalorder %v5102_v33, 29 }
 0x39e   : > { %v2549_v0 = vsel %vm13669_vm11, %v9485_v56, %v2539_v10  ;;  %vm13670_vm7 = vcmp.eq.s32.totalorder %v5274_v54, 29  ;;  %v2551_v38 = vsel %vm639_vm12, %v9485_v56, %v2541_v6  ;;  %v10271_v61 = vstv %s10112_s27  ;;  %s10307_s27 = sld [smem:[#allocation3 + $0x31f]] }
 0x39f   : > { %v2550_v19 = vsel %vm13670_vm7, %v9485_v56, %v2540_v21  ;;  %vm13671_vm13 = vcmp.eq.s32.totalorder %v5102_v33, 30  ;;  %vm13672_vm15 = vcmp.eq.s32.totalorder %v5274_v54, 30  ;;  %v2561_v56 = vsel %vm647_vm14, %v9488_v47, %v2551_v38 }
 0x3a0   : > { %v2559_v39 = vsel %vm13671_vm13, %v9488_v47, %v2549_v0  ;;  %v2560_v16 = vsel %vm13672_vm15, %v9488_v47, %v2550_v19  ;;  %vm13673_vm3 = vcmp.eq.s32.totalorder %v4526_v45, 6  ;;  %vm13674_vm10 = vcmp.eq.s32.totalorder %v5102_v33, 31 }
 0x3a1   : > { %v2635_v40 = vsel %vm13673_vm3, %v10271_v61, %v2625_v7  ;;  %v2569_v13 = vsel %vm13674_vm10, %v9491_v27, %v2559_v39  ;;  %vm13675_vm11 = vcmp.eq.s32.totalorder %v5274_v54, 31  ;;  %vm13676_vm7 = vcmp.eq.s32.totalorder %v5479_v14, 31 }
 0x3a2   : > { %v2570_v47 = vsel %vm13675_vm11, %v9491_v27, %v2560_v16  ;;  %v2571_v8 = vsel %vm13676_vm7, %v9491_v27, %v2561_v56  ;;  %v10303_v58 = vstv %s10114_s28  ;;  %2578 = vst [vmem:[#allocation2 + $0x168] sm:$0xff] %v2569_v13  ;;  %vm13677_vm13 = vcmp.eq.s32.totalorder %v4526_v45, 7  ;;  %s10904_s28 = sld [smem:[#allocation3 + $0x380]] }
 0x3a3   : > { %2579 = vst [vmem:[#allocation2 + $0x170] sm:$0xff] %v2570_v47  ;;  %2580 = vst [vmem:[#allocation2 + $0x178] sm:$0xff] %v2571_v8  ;;  %v2645_v5 = vsel %vm13677_vm13, %v10303_v58, %v2635_v40  ;;  %v10313_v27 = vstv %s10129_s6  ;;  %v10316_v46 = vstv %s10131_s7  ;;  %v10319_v43 = vstv %s10145_s9  ;;  %s10918_s6 = sld [smem:[#allocation3 + $0x381]]  ;;  %s10944_s7 = sld [smem:[#allocation3 + $0x382]] }
 0x3a4   : > { %vm13678_vm15 = vcmp.eq.s32.totalorder %v4526_v45, 8  ;;  %v10325_v15 = vstv %s10147_s29  ;;  %v10328_v44 = vstv %s10161_s20  ;;  %v10331_v31 = vstv %s10163_s17  ;;  %s10970_s9 = sld [smem:[#allocation3 + $0x383]]  ;;  %s10996_s29 = sld [smem:[#allocation3 + $0x384]] }
 0x3a5   : > { %v2655_v24 = vsel %vm13678_vm15, %v10313_v27, %v2645_v5  ;;  %vm13679_vm3 = vcmp.eq.s32.totalorder %v4526_v45, 9  ;;  %v10337_v35 = vstv %s10177_s24  ;;  %v10340_v34 = vstv %s10179_s1  ;;  %s11010_s20 = sld [smem:[#allocation3 + $0x385]]  ;;  %s11024_s17 = sld [smem:[#allocation3 + $0x386]] }
 0x3a6   : > { %v2665_v28 = vsel %vm13679_vm3, %v10316_v46, %v2655_v24  ;;  %v10343_v57 = vstv %s10193_s15  ;;  %vm13680_vm10 = vcmp.eq.s32.totalorder %v4526_v45, 10  ;;  %v10349_v18 = vstv %s10195_s25  ;;  %s11026_s24 = sld [smem:[#allocation3 + $0x387]]  ;;  %s11041_s1 = sld [smem:[#allocation3 + $0x388]] }
 0x3a7   : > { %v2675_v26 = vsel %vm13680_vm10, %v10319_v43, %v2665_v28  ;;  %v10352_v12 = vstv %s10209_s16  ;;  %v10355_v25 = vstv %s10211_s3  ;;  %vm13681_vm11 = vcmp.eq.s32.totalorder %v4526_v45, 11  ;;  %s11043_s15 = sld [smem:[#allocation3 + $0x389]]  ;;  %s11057_s25 = sld [smem:[#allocation3 + $0x38a]] }
 0x3a8   : > { %v2685_v20 = vsel %vm13681_vm11, %v10325_v15, %v2675_v26  ;;  %v10361_v53 = vstv %s10225_s4  ;;  %v10364_v3 = vstv %s10227_s5  ;;  %v10367_v60 = vstv %s10241_s8  ;;  %s11059_s16 = sld [smem:[#allocation3 + $0x38b]]  ;;  %s11073_s3 = sld [smem:[#allocation3 + $0x38c]] }
 0x3a9   : > { %vm13682_vm7 = vcmp.eq.s32.totalorder %v4526_v45, 12  ;;  %v10373_v22 = vstv %s10243_s18  ;;  %v10376_v4 = vstv %s10257_s21  ;;  %v10379_v41 = vstv %s10259_s2  ;;  %s11075_s4 = sld [smem:[#allocation3 + $0x38d]]  ;;  %s11089_s5 = sld [smem:[#allocation3 + $0x38e]] }
 0x3aa   : > { %v2695_v1 = vsel %vm13682_vm7, %v10328_v44, %v2685_v20  ;;  %vm13683_vm13 = vcmp.eq.s32.totalorder %v4526_v45, 13  ;;  %v10385_v63 = vstv %s10273_s10  ;;  %v10388_v62 = vstv %s10275_s11  ;;  %s11091_s8 = sld [smem:[#allocation3 + $0x38f]]  ;;  %s11105_s18 = sld [smem:[#allocation3 + $0x390]] }
 0x3ab   : > { %v2705_v42 = vsel %vm13683_vm13, %v10331_v31, %v2695_v1  ;;  %v10391_v50 = vstv %s10289_s14  ;;  %vm13684_vm15 = vcmp.eq.s32.totalorder %v4526_v45, 14  ;;  %v10397_v9 = vstv %s10291_s30  ;;  %s11107_s21 = sld [smem:[#allocation3 + $0x391]]  ;;  %s11121_s2 = sld [smem:[#allocation3 + $0x392]] }
 0x3ac   : > { %v2715_v55 = vsel %vm13684_vm15, %v10337_v35, %v2705_v42  ;;  %v10400_v51 = vstv %s10305_s22  ;;  %v10403_v11 = vstv %s10307_s27  ;;  %vm13685_vm3 = vcmp.eq.s32.totalorder %v4526_v45, 15  ;;  %s11123_s10 = sld [smem:[#allocation3 + $0x393]]  ;;  %s11137_s11 = sld [smem:[#allocation3 + $0x394]] }
 0x3ad   : > { %v2725_v59 = vsel %vm13685_vm3, %v10340_v34, %v2715_v55  ;;  %vm13686_vm10 = vcmp.eq.s32.totalorder %v4633_v32, 1  ;;  %vm13687_vm11 = vcmp.eq.s32.totalorder %v4769_v29, 1  ;;  %vm13688_vm7 = vcmp.eq.s32.totalorder %v4905_v37, 1  ;;  %s11139_s14 = sld [smem:[#allocation3 + $0x395]]  ;;  %s11153_s30 = sld [smem:[#allocation3 + $0x396]] }
 0x3ae   : > { %v2586_v36 = vsel %vm13686_vm10, %v10110_v49, %v10096_v52  ;;  %v2587_v10 = vsel %vm13687_vm11, %v10110_v49, %v10096_v52  ;;  %v2588_v21 = vsel %vm13688_vm7, %v10110_v49, %v10096_v52  ;;  %vm13689_vm13 = vcmp.eq.s32.totalorder %v4526_v45, 16  ;;  %s11155_s22 = sld [smem:[#allocation3 + $0x397]]  ;;  %s11169_s27 = sld [smem:[#allocation3 + $0x398]] }
 0x3af   : > { %v2735_v6 = vsel %vm13689_vm13, %v10343_v57, %v2725_v59  ;;  %vm13690_vm15 = vcmp.eq.s32.totalorder %v4633_v32, 2  ;;  %vm13691_vm3 = vcmp.eq.s32.totalorder %v4769_v29, 2  ;;  %vm13692_vm10 = vcmp.eq.s32.totalorder %v4905_v37, 2 }
 0x3b0   : > { %v2596_v7 = vsel %vm13690_vm15, %v10143_v23, %v2586_v36  ;;  %v2597_v0 = vsel %vm13691_vm3, %v10143_v23, %v2587_v10  ;;  %v2598_v19 = vsel %vm13692_vm10, %v10143_v23, %v2588_v21  ;;  %vm13693_vm11 = vcmp.eq.s32.totalorder %v4526_v45, 17 }
 0x3b1   : > { %v2745_v38 = vsel %vm13693_vm11, %v10349_v18, %v2735_v6  ;;  %vm13694_vm7 = vcmp.eq.s32.totalorder %v4633_v32, 3  ;;  %vm13695_vm13 = vcmp.eq.s32.totalorder %v4769_v29, 3  ;;  %vm13696_vm15 = vcmp.eq.s32.totalorder %v4905_v37, 3 }
 0x3b2   : > { %v2606_v39 = vsel %vm13694_vm7, %v10175_v30, %v2596_v7  ;;  %v2607_v16 = vsel %vm13695_vm13, %v10175_v30, %v2597_v0  ;;  %v2608_v56 = vsel %vm13696_vm15, %v10175_v30, %v2598_v19  ;;  %vm13697_vm3 = vcmp.eq.s32.totalorder %v4526_v45, 18 }
 0x3b3   : > { %v2755_v40 = vsel %vm13697_vm3, %v10352_v12, %v2745_v38  ;;  %vm13698_vm10 = vcmp.eq.s32.totalorder %v4633_v32, 4  ;;  %vm13699_vm11 = vcmp.eq.s32.totalorder %v4769_v29, 4  ;;  %vm13700_vm7 = vcmp.eq.s32.totalorder %v4905_v37, 4 }
 0x3b4   : > { %v2616_v13 = vsel %vm13698_vm10, %v10207_v2, %v2606_v39  ;;  %v2617_v47 = vsel %vm13699_vm11, %v10207_v2, %v2607_v16  ;;  %v2618_v8 = vsel %vm13700_vm7, %v10207_v2, %v2608_v56  ;;  %vm13701_vm13 = vcmp.eq.s32.totalorder %v4526_v45, 19 }
 0x3b5   : > { %v2765_v5 = vsel %vm13701_vm13, %v10355_v25, %v2755_v40  ;;  %vm13702_vm15 = vcmp.eq.s32.totalorder %v4633_v32, 5  ;;  %vm13703_vm3 = vcmp.eq.s32.totalorder %v4769_v29, 5  ;;  %vm13704_vm10 = vcmp.eq.s32.totalorder %v4905_v37, 5 }
 0x3b6   : > { %v2626_v24 = vsel %vm13702_vm15, %v10239_v17, %v2616_v13  ;;  %v2627_v28 = vsel %vm13703_vm3, %v10239_v17, %v2617_v47  ;;  %v2628_v26 = vsel %vm13704_vm10, %v10239_v17, %v2618_v8  ;;  %vm13705_vm11 = vcmp.eq.s32.totalorder %v4526_v45, 20 }
 0x3b7   : > { %v2775_v20 = vsel %vm13705_vm11, %v10361_v53, %v2765_v5  ;;  %vm13706_vm7 = vcmp.eq.s32.totalorder %v4633_v32, 6  ;;  %vm13707_vm13 = vcmp.eq.s32.totalorder %v4769_v29, 6  ;;  %vm13708_vm15 = vcmp.eq.s32.totalorder %v4905_v37, 6 }
 0x3b8   : > { %v2636_v1 = vsel %vm13706_vm7, %v10271_v61, %v2626_v24  ;;  %v2637_v42 = vsel %vm13707_vm13, %v10271_v61, %v2627_v28  ;;  %v2638_v55 = vsel %vm13708_vm15, %v10271_v61, %v2628_v26  ;;  %vm13709_vm3 = vcmp.eq.s32.totalorder %v4526_v45, 21 }
 0x3b9   : > { %v2785_v59 = vsel %vm13709_vm3, %v10364_v3, %v2775_v20  ;;  %vm13710_vm10 = vcmp.eq.s32.totalorder %v4633_v32, 7  ;;  %vm13711_vm11 = vcmp.eq.s32.totalorder %v4769_v29, 7  ;;  %vm13712_vm7 = vcmp.eq.s32.totalorder %v4905_v37, 7 }
 0x3ba   : > { %v2646_v36 = vsel %vm13710_vm10, %v10303_v58, %v2636_v1  ;;  %v2647_v10 = vsel %vm13711_vm11, %v10303_v58, %v2637_v42  ;;  %v2648_v21 = vsel %vm13712_vm7, %v10303_v58, %v2638_v55  ;;  %vm13713_vm13 = vcmp.eq.s32.totalorder %v4526_v45, 22 }
 0x3bb   : > { %v2795_v6 = vsel %vm13713_vm13, %v10367_v60, %v2785_v59  ;;  %vm13714_vm15 = vcmp.eq.s32.totalorder %v4633_v32, 8  ;;  %vm13715_vm3 = vcmp.eq.s32.totalorder %v4769_v29, 8  ;;  %vm13716_vm10 = vcmp.eq.s32.totalorder %v4905_v37, 8 }
 0x3bc   : > { %v2656_v7 = vsel %vm13714_vm15, %v10313_v27, %v2646_v36  ;;  %v2657_v0 = vsel %vm13715_vm3, %v10313_v27, %v2647_v10  ;;  %v2658_v19 = vsel %vm13716_vm10, %v10313_v27, %v2648_v21  ;;  %vm13717_vm11 = vcmp.eq.s32.totalorder %v4526_v45, 23 }
 0x3bd   : > { %v2805_v38 = vsel %vm13717_vm11, %v10373_v22, %v2795_v6  ;;  %vm13718_vm7 = vcmp.eq.s32.totalorder %v4633_v32, 9  ;;  %vm13719_vm13 = vcmp.eq.s32.totalorder %v4769_v29, 9  ;;  %vm13720_vm15 = vcmp.eq.s32.totalorder %v4905_v37, 9 }
 0x3be   : > { %v2666_v39 = vsel %vm13718_vm7, %v10316_v46, %v2656_v7  ;;  %v2667_v16 = vsel %vm13719_vm13, %v10316_v46, %v2657_v0  ;;  %v2668_v56 = vsel %vm13720_vm15, %v10316_v46, %v2658_v19  ;;  %vm13721_vm3 = vcmp.eq.s32.totalorder %v4526_v45, 24 }
 0x3bf   : > { %v2815_v40 = vsel %vm13721_vm3, %v10376_v4, %v2805_v38  ;;  %vm13722_vm10 = vcmp.eq.s32.totalorder %v4633_v32, 10  ;;  %vm13723_vm11 = vcmp.eq.s32.totalorder %v4769_v29, 10  ;;  %vm13724_vm7 = vcmp.eq.s32.totalorder %v4905_v37, 10 }
 0x3c0   : > { %v2676_v13 = vsel %vm13722_vm10, %v10319_v43, %v2666_v39  ;;  %v2677_v47 = vsel %vm13723_vm11, %v10319_v43, %v2667_v16  ;;  %v2678_v8 = vsel %vm13724_vm7, %v10319_v43, %v2668_v56  ;;  %vm13725_vm13 = vcmp.eq.s32.totalorder %v4526_v45, 25 }
 0x3c1   : > { %v2825_v5 = vsel %vm13725_vm13, %v10379_v41, %v2815_v40  ;;  %vm13726_vm15 = vcmp.eq.s32.totalorder %v4633_v32, 11  ;;  %vm13727_vm3 = vcmp.eq.s32.totalorder %v4769_v29, 11  ;;  %vm13728_vm10 = vcmp.eq.s32.totalorder %v4905_v37, 11 }
 0x3c2   : > { %v2686_v24 = vsel %vm13726_vm15, %v10325_v15, %v2676_v13  ;;  %v2687_v28 = vsel %vm13727_vm3, %v10325_v15, %v2677_v47  ;;  %v2688_v26 = vsel %vm13728_vm10, %v10325_v15, %v2678_v8  ;;  %vm13729_vm11 = vcmp.eq.s32.totalorder %v4526_v45, 26 }
 0x3c3   : > { %v2835_v20 = vsel %vm13729_vm11, %v10385_v63, %v2825_v5  ;;  %vm13730_vm7 = vcmp.eq.s32.totalorder %v4633_v32, 12  ;;  %vm13731_vm13 = vcmp.eq.s32.totalorder %v4769_v29, 12  ;;  %vm13732_vm15 = vcmp.eq.s32.totalorder %v4905_v37, 12 }
 0x3c4   : > { %v2696_v1 = vsel %vm13730_vm7, %v10328_v44, %v2686_v24  ;;  %v2697_v42 = vsel %vm13731_vm13, %v10328_v44, %v2687_v28  ;;  %v2698_v55 = vsel %vm13732_vm15, %v10328_v44, %v2688_v26  ;;  %vm13733_vm3 = vcmp.eq.s32.totalorder %v4526_v45, 27 }
 0x3c5   : > { %v2845_v59 = vsel %vm13733_vm3, %v10388_v62, %v2835_v20  ;;  %vm13734_vm10 = vcmp.eq.s32.totalorder %v4633_v32, 13  ;;  %vm13735_vm11 = vcmp.eq.s32.totalorder %v4769_v29, 13  ;;  %vm13736_vm7 = vcmp.eq.s32.totalorder %v4905_v37, 13 }
 0x3c6   : > { %v2706_v36 = vsel %vm13734_vm10, %v10331_v31, %v2696_v1  ;;  %v2707_v10 = vsel %vm13735_vm11, %v10331_v31, %v2697_v42  ;;  %v2708_v21 = vsel %vm13736_vm7, %v10331_v31, %v2698_v55  ;;  %vm13737_vm13 = vcmp.eq.s32.totalorder %v4526_v45, 28 }
 0x3c7   : > { %v2855_v6 = vsel %vm13737_vm13, %v10391_v50, %v2845_v59  ;;  %vm13738_vm15 = vcmp.eq.s32.totalorder %v4633_v32, 14  ;;  %vm13739_vm3 = vcmp.eq.s32.totalorder %v4769_v29, 14  ;;  %vm13740_vm10 = vcmp.eq.s32.totalorder %v4905_v37, 14 }
 0x3c8   : > { %v2716_v7 = vsel %vm13738_vm15, %v10337_v35, %v2706_v36  ;;  %v2717_v0 = vsel %vm13739_vm3, %v10337_v35, %v2707_v10  ;;  %v2718_v19 = vsel %vm13740_vm10, %v10337_v35, %v2708_v21  ;;  %vm13741_vm11 = vcmp.eq.s32.totalorder %v4526_v45, 29 }
 0x3c9   : > { %v2865_v38 = vsel %vm13741_vm11, %v10397_v9, %v2855_v6  ;;  %vm13742_vm7 = vcmp.eq.s32.totalorder %v4633_v32, 15  ;;  %vm13743_vm13 = vcmp.eq.s32.totalorder %v4769_v29, 15  ;;  %vm13744_vm15 = vcmp.eq.s32.totalorder %v4905_v37, 15 }
 0x3ca   : > { %v2726_v39 = vsel %vm13742_vm7, %v10340_v34, %v2716_v7  ;;  %v2727_v16 = vsel %vm13743_vm13, %v10340_v34, %v2717_v0  ;;  %v2728_v56 = vsel %vm13744_vm15, %v10340_v34, %v2718_v19  ;;  %vm13745_vm3 = vcmp.eq.s32.totalorder %v4526_v45, 30 }
 0x3cb   : > { %v2875_v40 = vsel %vm13745_vm3, %v10400_v51, %v2865_v38  ;;  %vm13746_vm10 = vcmp.eq.s32.totalorder %v4633_v32, 16  ;;  %vm13747_vm11 = vcmp.eq.s32.totalorder %v4769_v29, 16  ;;  %vm13748_vm7 = vcmp.eq.s32.totalorder %v4905_v37, 16 }
 0x3cc   : > { %v2736_v13 = vsel %vm13746_vm10, %v10343_v57, %v2726_v39  ;;  %v2737_v47 = vsel %vm13747_vm11, %v10343_v57, %v2727_v16  ;;  %v2738_v8 = vsel %vm13748_vm7, %v10343_v57, %v2728_v56  ;;  %vm13749_vm13 = vcmp.eq.s32.totalorder %v4526_v45, 31 }
 0x3cd   : > { %v2885_v5 = vsel %vm13749_vm13, %v10403_v11, %v2875_v40  ;;  %vm13750_vm15 = vcmp.eq.s32.totalorder %v4633_v32, 17  ;;  %vm13751_vm3 = vcmp.eq.s32.totalorder %v4769_v29, 17  ;;  %vm13752_vm10 = vcmp.eq.s32.totalorder %v4905_v37, 17 }
 0x3ce   : > { %v2746_v24 = vsel %vm13750_vm15, %v10349_v18, %v2736_v13  ;;  %v2747_v28 = vsel %vm13751_vm3, %v10349_v18, %v2737_v47  ;;  %v2748_v26 = vsel %vm13752_vm10, %v10349_v18, %v2738_v8  ;;  %2894 = vst [vmem:[#allocation2 + $0x180] sm:$0xff] %v2885_v5  ;;  %vm13753_vm11 = vcmp.eq.s32.totalorder %v4633_v32, 18 }
 0x3cf   : > { %v2756_v20 = vsel %vm13753_vm11, %v10352_v12, %v2746_v24  ;;  %vm13754_vm7 = vcmp.eq.s32.totalorder %v4769_v29, 18  ;;  %vm13755_vm13 = vcmp.eq.s32.totalorder %v4905_v37, 18  ;;  %vm13756_vm15 = vcmp.eq.s32.totalorder %v4981_v48, 1 }
 0x3d0   : > { %v2757_v1 = vsel %vm13754_vm7, %v10352_v12, %v2747_v28  ;;  %v2758_v42 = vsel %vm13755_vm13, %v10352_v12, %v2748_v26  ;;  %v2589_v55 = vsel %vm13756_vm15, %v10110_v49, %v10096_v52  ;;  %vm13757_vm3 = vcmp.eq.s32.totalorder %v4633_v32, 19 }
 0x3d1   : > { %v2766_v59 = vsel %vm13757_vm3, %v10355_v25, %v2756_v20  ;;  %vm13758_vm10 = vcmp.eq.s32.totalorder %v4769_v29, 19  ;;  %vm13759_vm11 = vcmp.eq.s32.totalorder %v4905_v37, 19  ;;  %vm13760_vm7 = vcmp.eq.s32.totalorder %v4981_v48, 2 }
 0x3d2   : > { %v2767_v36 = vsel %vm13758_vm10, %v10355_v25, %v2757_v1  ;;  %v2768_v10 = vsel %vm13759_vm11, %v10355_v25, %v2758_v42  ;;  %v2599_v21 = vsel %vm13760_vm7, %v10143_v23, %v2589_v55  ;;  %vm13761_vm13 = vcmp.eq.s32.totalorder %v4633_v32, 20 }
 0x3d3   : > { %v2776_v6 = vsel %vm13761_vm13, %v10361_v53, %v2766_v59  ;;  %vm13762_vm15 = vcmp.eq.s32.totalorder %v4769_v29, 20  ;;  %vm13763_vm3 = vcmp.eq.s32.totalorder %v4905_v37, 20  ;;  %vm13764_vm10 = vcmp.eq.s32.totalorder %v4981_v48, 3 }
 0x3d4   : > { %v2777_v7 = vsel %vm13762_vm15, %v10361_v53, %v2767_v36  ;;  %v2778_v0 = vsel %vm13763_vm3, %v10361_v53, %v2768_v10  ;;  %v2609_v19 = vsel %vm13764_vm10, %v10175_v30, %v2599_v21  ;;  %vm13765_vm11 = vcmp.eq.s32.totalorder %v4633_v32, 21 }
 0x3d5   : > { %v2786_v38 = vsel %vm13765_vm11, %v10364_v3, %v2776_v6  ;;  %vm13766_vm7 = vcmp.eq.s32.totalorder %v4769_v29, 21  ;;  %vm13767_vm13 = vcmp.eq.s32.totalorder %v4905_v37, 21  ;;  %vm13768_vm15 = vcmp.eq.s32.totalorder %v4981_v48, 4 }
 0x3d6   : > { %v2787_v39 = vsel %vm13766_vm7, %v10364_v3, %v2777_v7  ;;  %v2788_v16 = vsel %vm13767_vm13, %v10364_v3, %v2778_v0  ;;  %v2619_v56 = vsel %vm13768_vm15, %v10207_v2, %v2609_v19  ;;  %vm13769_vm3 = vcmp.eq.s32.totalorder %v4633_v32, 22 }
 0x3d7   : > { %v2796_v40 = vsel %vm13769_vm3, %v10367_v60, %v2786_v38  ;;  %vm13770_vm10 = vcmp.eq.s32.totalorder %v4769_v29, 22  ;;  %vm13771_vm11 = vcmp.eq.s32.totalorder %v4905_v37, 22  ;;  %vm13772_vm7 = vcmp.eq.s32.totalorder %v4981_v48, 5 }
 0x3d8   : > { %v2797_v13 = vsel %vm13770_vm10, %v10367_v60, %v2787_v39  ;;  %v2798_v47 = vsel %vm13771_vm11, %v10367_v60, %v2788_v16  ;;  %v2629_v8 = vsel %vm13772_vm7, %v10239_v17, %v2619_v56  ;;  %vm13773_vm13 = vcmp.eq.s32.totalorder %v4633_v32, 23 }
 0x3d9   : > { %v2806_v5 = vsel %vm13773_vm13, %v10373_v22, %v2796_v40  ;;  %vm13774_vm15 = vcmp.eq.s32.totalorder %v4769_v29, 23  ;;  %vm13775_vm3 = vcmp.eq.s32.totalorder %v4905_v37, 23  ;;  %vm13776_vm10 = vcmp.eq.s32.totalorder %v4981_v48, 6 }
 0x3da   : > { %v2807_v24 = vsel %vm13774_vm15, %v10373_v22, %v2797_v13  ;;  %v2808_v28 = vsel %vm13775_vm3, %v10373_v22, %v2798_v47  ;;  %v2639_v26 = vsel %vm13776_vm10, %v10271_v61, %v2629_v8  ;;  %vm13777_vm11 = vcmp.eq.s32.totalorder %v4633_v32, 24 }
 0x3db   : > { %v2816_v20 = vsel %vm13777_vm11, %v10376_v4, %v2806_v5  ;;  %vm13778_vm7 = vcmp.eq.s32.totalorder %v4769_v29, 24  ;;  %vm13779_vm13 = vcmp.eq.s32.totalorder %v4905_v37, 24  ;;  %vm13780_vm15 = vcmp.eq.s32.totalorder %v4981_v48, 7 }
 0x3dc   : > { %v2817_v1 = vsel %vm13778_vm7, %v10376_v4, %v2807_v24  ;;  %v2818_v42 = vsel %vm13779_vm13, %v10376_v4, %v2808_v28  ;;  %v2649_v55 = vsel %vm13780_vm15, %v10303_v58, %v2639_v26  ;;  %vm13781_vm3 = vcmp.eq.s32.totalorder %v4633_v32, 25 }
 0x3dd   : > { %v2826_v59 = vsel %vm13781_vm3, %v10379_v41, %v2816_v20  ;;  %vm13782_vm10 = vcmp.eq.s32.totalorder %v4769_v29, 25  ;;  %vm13783_vm11 = vcmp.eq.s32.totalorder %v4905_v37, 25  ;;  %vm13784_vm7 = vcmp.eq.s32.totalorder %v4981_v48, 8 }
 0x3de   : > { %v2827_v36 = vsel %vm13782_vm10, %v10379_v41, %v2817_v1  ;;  %v2828_v10 = vsel %vm13783_vm11, %v10379_v41, %v2818_v42  ;;  %v2659_v21 = vsel %vm13784_vm7, %v10313_v27, %v2649_v55  ;;  %vm13785_vm13 = vcmp.eq.s32.totalorder %v4633_v32, 26 }
 0x3df   : > { %v2836_v6 = vsel %vm13785_vm13, %v10385_v63, %v2826_v59  ;;  %vm13786_vm15 = vcmp.eq.s32.totalorder %v4769_v29, 26  ;;  %vm13787_vm3 = vcmp.eq.s32.totalorder %v4905_v37, 26  ;;  %vm13788_vm10 = vcmp.eq.s32.totalorder %v4981_v48, 9 }
 0x3e0   : > { %v2837_v7 = vsel %vm13786_vm15, %v10385_v63, %v2827_v36  ;;  %v2838_v0 = vsel %vm13787_vm3, %v10385_v63, %v2828_v10  ;;  %v2669_v19 = vsel %vm13788_vm10, %v10316_v46, %v2659_v21  ;;  %vm13789_vm11 = vcmp.eq.s32.totalorder %v4633_v32, 27 }
 0x3e1   : > { %v2846_v38 = vsel %vm13789_vm11, %v10388_v62, %v2836_v6  ;;  %vm13790_vm7 = vcmp.eq.s32.totalorder %v4769_v29, 27  ;;  %vm13791_vm13 = vcmp.eq.s32.totalorder %v4905_v37, 27  ;;  %vm13792_vm15 = vcmp.eq.s32.totalorder %v4981_v48, 10 }
 0x3e2   : > { %v2847_v39 = vsel %vm13790_vm7, %v10388_v62, %v2837_v7  ;;  %v2848_v16 = vsel %vm13791_vm13, %v10388_v62, %v2838_v0  ;;  %v2679_v56 = vsel %vm13792_vm15, %v10319_v43, %v2669_v19  ;;  %vm13793_vm3 = vcmp.eq.s32.totalorder %v4633_v32, 28 }
 0x3e3   : > { %v2856_v40 = vsel %vm13793_vm3, %v10391_v50, %v2846_v38  ;;  %vm13794_vm10 = vcmp.eq.s32.totalorder %v4769_v29, 28  ;;  %vm13795_vm11 = vcmp.eq.s32.totalorder %v4905_v37, 28  ;;  %vm13796_vm7 = vcmp.eq.s32.totalorder %v4981_v48, 11 }
 0x3e4   : > { %v2857_v13 = vsel %vm13794_vm10, %v10391_v50, %v2847_v39  ;;  %v2858_v47 = vsel %vm13795_vm11, %v10391_v50, %v2848_v16  ;;  %v2689_v8 = vsel %vm13796_vm7, %v10325_v15, %v2679_v56  ;;  %vm13797_vm13 = vcmp.eq.s32.totalorder %v4633_v32, 29 }
 0x3e5   : > { %v2866_v5 = vsel %vm13797_vm13, %v10397_v9, %v2856_v40  ;;  %vm13798_vm15 = vcmp.eq.s32.totalorder %v4769_v29, 29  ;;  %vm13799_vm3 = vcmp.eq.s32.totalorder %v4905_v37, 29  ;;  %vm13800_vm10 = vcmp.eq.s32.totalorder %v4981_v48, 12 }
 0x3e6   : > { %v2867_v24 = vsel %vm13798_vm15, %v10397_v9, %v2857_v13  ;;  %v2868_v28 = vsel %vm13799_vm3, %v10397_v9, %v2858_v47  ;;  %v2699_v26 = vsel %vm13800_vm10, %v10328_v44, %v2689_v8  ;;  %vm13801_vm11 = vcmp.eq.s32.totalorder %v4633_v32, 30 }
 0x3e7   : > { %v2876_v20 = vsel %vm13801_vm11, %v10400_v51, %v2866_v5  ;;  %vm13802_vm7 = vcmp.eq.s32.totalorder %v4769_v29, 30  ;;  %vm13803_vm13 = vcmp.eq.s32.totalorder %v4905_v37, 30  ;;  %vm13804_vm15 = vcmp.eq.s32.totalorder %v4981_v48, 13 }
 0x3e8   : > { %v2877_v1 = vsel %vm13802_vm7, %v10400_v51, %v2867_v24  ;;  %v2878_v42 = vsel %vm13803_vm13, %v10400_v51, %v2868_v28  ;;  %v2709_v55 = vsel %vm13804_vm15, %v10331_v31, %v2699_v26  ;;  %vm13805_vm3 = vcmp.eq.s32.totalorder %v4633_v32, 31 }
 0x3e9   : > { %v2886_v59 = vsel %vm13805_vm3, %v10403_v11, %v2876_v20  ;;  %vm13806_vm10 = vcmp.eq.s32.totalorder %v4769_v29, 31  ;;  %vm13807_vm11 = vcmp.eq.s32.totalorder %v4905_v37, 31  ;;  %vm13808_vm7 = vcmp.eq.s32.totalorder %v4981_v48, 14 }
 0x3ea   : > { %v2887_v36 = vsel %vm13806_vm10, %v10403_v11, %v2877_v1  ;;  %v2888_v10 = vsel %vm13807_vm11, %v10403_v11, %v2878_v42  ;;  %v2719_v21 = vsel %vm13808_vm7, %v10337_v35, %v2709_v55  ;;  %2895 = vst [vmem:[#allocation2 + $0x188] sm:$0xff] %v2886_v59  ;;  %vm13809_vm13 = vcmp.eq.s32.totalorder %v4981_v48, 15 }
 0x3eb   : > { %2896 = vst [vmem:[#allocation2 + $0x190] sm:$0xff] %v2887_v36  ;;  %2897 = vst [vmem:[#allocation2 + $0x198] sm:$0xff] %v2888_v10  ;;  %v2729_v6 = vsel %vm13809_vm13, %v10340_v34, %v2719_v21  ;;  %vm13810_vm15 = vcmp.eq.s32.totalorder %v5102_v33, 1  ;;  %vm13811_vm3 = vcmp.eq.s32.totalorder %v5274_v54, 1  ;;  %vm13812_vm10 = vcmp.eq.s32.totalorder %v5479_v14, 1 }
 0x3ec   : > { %v2590_v7 = vsel %vm13810_vm15, %v10110_v49, %v10096_v52  ;;  %v2591_v0 = vsel %vm13811_vm3, %v10110_v49, %v10096_v52  ;;  %v2592_v19 = vsel %vm13812_vm10, %v10110_v49, %v10096_v52  ;;  %vm13813_vm11 = vcmp.eq.s32.totalorder %v4981_v48, 16 }
 0x3ed   : > { %v2739_v38 = vsel %vm13813_vm11, %v10343_v57, %v2729_v6  ;;  %vm13814_vm7 = vcmp.eq.s32.totalorder %v5102_v33, 2  ;;  %vm13815_vm13 = vcmp.eq.s32.totalorder %v5274_v54, 2  ;;  %vm13816_vm15 = vcmp.eq.s32.totalorder %v5479_v14, 2 }
 0x3ee   : > { %v2600_v39 = vsel %vm13814_vm7, %v10143_v23, %v2590_v7  ;;  %v2601_v16 = vsel %vm13815_vm13, %v10143_v23, %v2591_v0  ;;  %v2602_v56 = vsel %vm13816_vm15, %v10143_v23, %v2592_v19  ;;  %vm13817_vm3 = vcmp.eq.s32.totalorder %v4981_v48, 17 }
 0x3ef   : > { %v2749_v52 = vsel %vm13817_vm3, %v10349_v18, %v2739_v38  ;;  %vm13818_vm10 = vcmp.eq.s32.totalorder %v5102_v33, 3  ;;  %vm13819_vm11 = vcmp.eq.s32.totalorder %v5274_v54, 3  ;;  %vm13820_vm7 = vcmp.eq.s32.totalorder %v5479_v14, 3 }
 0x3f0   : > { %v2610_v49 = vsel %vm13818_vm10, %v10175_v30, %v2600_v39  ;;  %v2611_v40 = vsel %vm13819_vm11, %v10175_v30, %v2601_v16  ;;  %v2612_v13 = vsel %vm13820_vm7, %v10175_v30, %v2602_v56  ;;  %vm13821_vm13 = vcmp.eq.s32.totalorder %v4981_v48, 18 }
 0x3f1   : > { %v2759_v23 = vsel %vm13821_vm13, %v10352_v12, %v2749_v52  ;;  %vm13822_vm15 = vcmp.eq.s32.totalorder %v5102_v33, 4  ;;  %vm13823_vm3 = vcmp.eq.s32.totalorder %v5274_v54, 4  ;;  %vm13824_vm10 = vcmp.eq.s32.totalorder %v5479_v14, 4 }
 0x3f2   : > { %v2620_v47 = vsel %vm13822_vm15, %v10207_v2, %v2610_v49  ;;  %v2621_v8 = vsel %vm13823_vm3, %v10207_v2, %v2611_v40  ;;  %v2622_v5 = vsel %vm13824_vm10, %v10207_v2, %v2612_v13  ;;  %vm13825_vm11 = vcmp.eq.s32.totalorder %v4981_v48, 19 }
 0x3f3   : > { %v2769_v30 = vsel %vm13825_vm11, %v10355_v25, %v2759_v23  ;;  %vm13826_vm7 = vcmp.eq.s32.totalorder %v5102_v33, 5  ;;  %vm13827_vm13 = vcmp.eq.s32.totalorder %v5274_v54, 5  ;;  %vm13828_vm15 = vcmp.eq.s32.totalorder %v5479_v14, 5 }
 0x3f4   : > { %v2630_v24 = vsel %vm13826_vm7, %v10239_v17, %v2620_v47  ;;  %v2631_v28 = vsel %vm13827_vm13, %v10239_v17, %v2621_v8  ;;  %v2632_v26 = vsel %vm13828_vm15, %v10239_v17, %v2622_v5  ;;  %vm13829_vm3 = vcmp.eq.s32.totalorder %v4981_v48, 20 }
 0x3f5   : > { %v2779_v2 = vsel %vm13829_vm3, %v10361_v53, %v2769_v30  ;;  %vm13830_vm10 = vcmp.eq.s32.totalorder %v5102_v33, 6  ;;  %vm13831_vm11 = vcmp.eq.s32.totalorder %v5274_v54, 6  ;;  %vm13832_vm7 = vcmp.eq.s32.totalorder %v5479_v14, 6 }
 0x3f6   : > { %v2640_v20 = vsel %vm13830_vm10, %v10271_v61, %v2630_v24  ;;  %v2641_v1 = vsel %vm13831_vm11, %v10271_v61, %v2631_v28  ;;  %v2642_v42 = vsel %vm13832_vm7, %v10271_v61, %v2632_v26  ;;  %vm13833_vm13 = vcmp.eq.s32.totalorder %v4981_v48, 21 }
 0x3f7   : > { %v2789_v17 = vsel %vm13833_vm13, %v10364_v3, %v2779_v2  ;;  %vm13834_vm15 = vcmp.eq.s32.totalorder %v5102_v33, 7  ;;  %vm13835_vm3 = vcmp.eq.s32.totalorder %v5274_v54, 7  ;;  %vm13836_vm10 = vcmp.eq.s32.totalorder %v5479_v14, 7 }
 0x3f8   : > { %v2650_v55 = vsel %vm13834_vm15, %v10303_v58, %v2640_v20  ;;  %v2651_v59 = vsel %vm13835_vm3, %v10303_v58, %v2641_v1  ;;  %v2652_v36 = vsel %vm13836_vm10, %v10303_v58, %v2642_v42  ;;  %vm13837_vm11 = vcmp.eq.s32.totalorder %v4981_v48, 22 }
 0x3f9   : > { %v2799_v61 = vsel %vm13837_vm11, %v10367_v60, %v2789_v17  ;;  %vm13838_vm7 = vcmp.eq.s32.totalorder %v5102_v33, 8  ;;  %vm13839_vm13 = vcmp.eq.s32.totalorder %v5274_v54, 8  ;;  %vm13840_vm15 = vcmp.eq.s32.totalorder %v5479_v14, 8 }
 0x3fa   : > { %v2660_v10 = vsel %vm13838_vm7, %v10313_v27, %v2650_v55  ;;  %v2661_v21 = vsel %vm13839_vm13, %v10313_v27, %v2651_v59  ;;  %v2662_v6 = vsel %vm13840_vm15, %v10313_v27, %v2652_v36  ;;  %vm13841_vm3 = vcmp.eq.s32.totalorder %v4981_v48, 23 }
 0x3fb   : > { %v2809_v58 = vsel %vm13841_vm3, %v10373_v22, %v2799_v61  ;;  %vm13842_vm10 = vcmp.eq.s32.totalorder %v5102_v33, 9  ;;  %vm13843_vm11 = vcmp.eq.s32.totalorder %v5274_v54, 9  ;;  %vm13844_vm7 = vcmp.eq.s32.totalorder %v5479_v14, 9 }
 0x3fc   : > { %v2670_v7 = vsel %vm13842_vm10, %v10316_v46, %v2660_v10  ;;  %v2671_v0 = vsel %vm13843_vm11, %v10316_v46, %v2661_v21  ;;  %v2672_v19 = vsel %vm13844_vm7, %v10316_v46, %v2662_v6  ;;  %vm13845_vm13 = vcmp.eq.s32.totalorder %v4981_v48, 24 }
 0x3fd   : > { %v2819_v27 = vsel %vm13845_vm13, %v10376_v4, %v2809_v58  ;;  %vm13846_vm15 = vcmp.eq.s32.totalorder %v5102_v33, 10  ;;  %vm13847_vm3 = vcmp.eq.s32.totalorder %v5274_v54, 10  ;;  %vm13848_vm10 = vcmp.eq.s32.totalorder %v5479_v14, 10 }
 0x3fe   : > { %v2680_v38 = vsel %vm13846_vm15, %v10319_v43, %v2670_v7  ;;  %v2681_v39 = vsel %vm13847_vm3, %v10319_v43, %v2671_v0  ;;  %v2682_v16 = vsel %vm13848_vm10, %v10319_v43, %v2672_v19  ;;  %vm13849_vm11 = vcmp.eq.s32.totalorder %v4981_v48, 25 }
 0x3ff   : > { %v2829_v46 = vsel %vm13849_vm11, %v10379_v41, %v2819_v27  ;;  %vm13850_vm7 = vcmp.eq.s32.totalorder %v5102_v33, 11  ;;  %vm13851_vm13 = vcmp.eq.s32.totalorder %v5274_v54, 11  ;;  %vm13852_vm15 = vcmp.eq.s32.totalorder %v5479_v14, 11 }
 0x400   : > { %v2690_v56 = vsel %vm13850_vm7, %v10325_v15, %v2680_v38  ;;  %v2691_v52 = vsel %vm13851_vm13, %v10325_v15, %v2681_v39  ;;  %v2692_v49 = vsel %vm13852_vm15, %v10325_v15, %v2682_v16  ;;  %vm13853_vm3 = vcmp.eq.s32.totalorder %v4981_v48, 26 }
 0x401   : > { %v2839_v43 = vsel %vm13853_vm3, %v10385_v63, %v2829_v46  ;;  %vm13854_vm10 = vcmp.eq.s32.totalorder %v5102_v33, 12  ;;  %vm13855_vm11 = vcmp.eq.s32.totalorder %v5274_v54, 12  ;;  %vm13856_vm7 = vcmp.eq.s32.totalorder %v5479_v14, 12 }
 0x402   : > { %v2700_v40 = vsel %vm13854_vm10, %v10328_v44, %v2690_v56  ;;  %v2701_v13 = vsel %vm13855_vm11, %v10328_v44, %v2691_v52  ;;  %v2702_v23 = vsel %vm13856_vm7, %v10328_v44, %v2692_v49  ;;  %vm13857_vm13 = vcmp.eq.s32.totalorder %v4981_v48, 27 }
 0x403   : > { %v2849_v15 = vsel %vm13857_vm13, %v10388_v62, %v2839_v43  ;;  %vm13858_vm15 = vcmp.eq.s32.totalorder %v5102_v33, 13  ;;  %vm13859_vm3 = vcmp.eq.s32.totalorder %v5274_v54, 13  ;;  %vm13860_vm10 = vcmp.eq.s32.totalorder %v5479_v14, 13 }
 0x404   : > { %v2710_v47 = vsel %vm13858_vm15, %v10331_v31, %v2700_v40  ;;  %v2711_v8 = vsel %vm13859_vm3, %v10331_v31, %v2701_v13  ;;  %v2712_v5 = vsel %vm13860_vm10, %v10331_v31, %v2702_v23  ;;  %vm13861_vm11 = vcmp.eq.s32.totalorder %v4981_v48, 28 }
 0x405   : > { %v2859_v44 = vsel %vm13861_vm11, %v10391_v50, %v2849_v15  ;;  %vm13862_vm7 = vcmp.eq.s32.totalorder %v5102_v33, 14  ;;  %vm13863_vm13 = vcmp.eq.s32.totalorder %v5274_v54, 14  ;;  %vm13864_vm15 = vcmp.eq.s32.totalorder %v5479_v14, 14 }
 0x406   : > { %v2720_v30 = vsel %vm13862_vm7, %v10337_v35, %v2710_v47  ;;  %v2721_v24 = vsel %vm13863_vm13, %v10337_v35, %v2711_v8  ;;  %v2722_v28 = vsel %vm13864_vm15, %v10337_v35, %v2712_v5  ;;  %vm13865_vm3 = vcmp.eq.s32.totalorder %v4981_v48, 29 }
 0x407   : > { %v2869_v31 = vsel %vm13865_vm3, %v10397_v9, %v2859_v44  ;;  %vm13866_vm10 = vcmp.eq.s32.totalorder %v5102_v33, 15  ;;  %vm13867_vm11 = vcmp.eq.s32.totalorder %v5274_v54, 15  ;;  %vm13868_vm7 = vcmp.eq.s32.totalorder %v5479_v14, 15 }
 0x408   : > { %v2730_v26 = vsel %vm13866_vm10, %v10340_v34, %v2720_v30  ;;  %v2731_v2 = vsel %vm13867_vm11, %v10340_v34, %v2721_v24  ;;  %v2732_v20 = vsel %vm13868_vm7, %v10340_v34, %v2722_v28  ;;  %vm13869_vm13 = vcmp.eq.s32.totalorder %v4981_v48, 30 }
 0x409   : > { %v2879_v35 = vsel %vm13869_vm13, %v10400_v51, %v2869_v31  ;;  %vm13870_vm15 = vcmp.eq.s32.totalorder %v5102_v33, 16  ;;  %vm13871_vm3 = vcmp.eq.s32.totalorder %v5274_v54, 16  ;;  %vm13872_vm10 = vcmp.eq.s32.totalorder %v5479_v14, 16 }
 0x40a   : > { %v2740_v1 = vsel %vm13870_vm15, %v10343_v57, %v2730_v26  ;;  %v2741_v42 = vsel %vm13871_vm3, %v10343_v57, %v2731_v2  ;;  %v2742_v17 = vsel %vm13872_vm10, %v10343_v57, %v2732_v20  ;;  %vm13873_vm11 = vcmp.eq.s32.totalorder %v4981_v48, 31 }
 0x40b   : > { %v2889_v34 = vsel %vm13873_vm11, %v10403_v11, %v2879_v35  ;;  %vm13874_vm7 = vcmp.eq.s32.totalorder %v5102_v33, 17  ;;  %vm13875_vm13 = vcmp.eq.s32.totalorder %v5274_v54, 17  ;;  %vm13876_vm15 = vcmp.eq.s32.totalorder %v5479_v14, 17 }
 0x40c   : > { %v2750_v55 = vsel %vm13874_vm7, %v10349_v18, %v2740_v1  ;;  %v2751_v59 = vsel %vm13875_vm13, %v10349_v18, %v2741_v42  ;;  %v2752_v36 = vsel %vm13876_vm15, %v10349_v18, %v2742_v17  ;;  %2898 = vst [vmem:[#allocation2 + $0x1a0] sm:$0xff] %v2889_v34  ;;  %vm13877_vm3 = vcmp.eq.s32.totalorder %v5102_v33, 18 }
 0x40d   : > { %v2760_v57 = vsel %vm13877_vm3, %v10352_v12, %v2750_v55  ;;  %vm13878_vm10 = vcmp.eq.s32.totalorder %v5274_v54, 18  ;;  %vm13879_vm11 = vcmp.eq.s32.totalorder %v5479_v14, 18  ;;  %v11008_v21 = vstv %s10904_s28  ;;  %s11171_s28 = sld [smem:[#allocation3 + $0x399]] }
 0x40e   : > { %v2761_v61 = vsel %vm13878_vm10, %v10352_v12, %v2751_v59  ;;  %v2762_v10 = vsel %vm13879_vm11, %v10352_v12, %v2752_v36  ;;  %vm13880_vm7 = vcmp.eq.s32.totalorder %v5102_v33, 19  ;;  %vm13881_vm13 = vcmp.eq.s32.totalorder %v5274_v54, 19 }
 0x40f   : > { %v2770_v18 = vsel %vm13880_vm7, %v10355_v25, %v2760_v57  ;;  %v2771_v6 = vsel %vm13881_vm13, %v10355_v25, %v2761_v61  ;;  %vm13882_vm15 = vcmp.eq.s32.totalorder %v5479_v14, 19  ;;  %v11022_v7 = vstv %s10918_s6  ;;  %s11185_s6 = sld [smem:[#allocation3 + $0x39a]] }
 0x410   : > { %v2772_v58 = vsel %vm13882_vm15, %v10355_v25, %v2762_v10  ;;  %vm13883_vm3 = vcmp.eq.s32.totalorder %v5102_v33, 20  ;;  %vm13884_vm10 = vcmp.eq.s32.totalorder %v5274_v54, 20  ;;  %vm13885_vm11 = vcmp.eq.s32.totalorder %v5479_v14, 20 }
 0x411   : > { %v2780_v12 = vsel %vm13883_vm3, %v10361_v53, %v2770_v18  ;;  %v2781_v0 = vsel %vm13884_vm10, %v10361_v53, %v2771_v6  ;;  %v2782_v19 = vsel %vm13885_vm11, %v10361_v53, %v2772_v58  ;;  %vm13886_vm7 = vcmp.eq.s32.totalorder %v4526_v45, 1 }
 0x412   : > { %v2906_v25 = vsel %vm13886_vm7, %v11022_v7, %v11008_v21  ;;  %vm13887_vm13 = vcmp.eq.s32.totalorder %v5102_v33, 21  ;;  %vm13888_vm15 = vcmp.eq.s32.totalorder %v5274_v54, 21  ;;  %v2792_v53 = vsel %vm575_vm5, %v10364_v3, %v2782_v19 }
 0x413   : > { %v2790_v27 = vsel %vm13887_vm13, %v10364_v3, %v2780_v12  ;;  %v2791_v38 = vsel %vm13888_vm15, %v10364_v3, %v2781_v0  ;;  %v11055_v39 = vstv %s10944_s7  ;;  %vm13889_vm3 = vcmp.eq.s32.totalorder %v5102_v33, 22  ;;  %s11187_s7 = sld [smem:[#allocation3 + $0x39b]] }
 0x414   : > { %v2800_v16 = vsel %vm13889_vm3, %v10367_v60, %v2790_v27  ;;  %vm13890_vm10 = vcmp.eq.s32.totalorder %v5274_v54, 22  ;;  %v2802_v56 = vsel %vm583_vm1, %v10367_v60, %v2792_v53  ;;  %vm13891_vm11 = vcmp.eq.s32.totalorder %v4526_v45, 2 }
 0x415   : > { %v2801_v46 = vsel %vm13890_vm10, %v10367_v60, %v2791_v38  ;;  %v2916_v3 = vsel %vm13891_vm11, %v11055_v39, %v2906_v25  ;;  %vm13892_vm7 = vcmp.eq.s32.totalorder %v5102_v33, 23  ;;  %vm13893_vm13 = vcmp.eq.s32.totalorder %v5274_v54, 23 }
 0x416   : > { %v2810_v52 = vsel %vm13892_vm7, %v10373_v22, %v2800_v16  ;;  %v2811_v49 = vsel %vm13893_vm13, %v10373_v22, %v2801_v46  ;;  %v2812_v60 = vsel %vm591_vm6, %v10373_v22, %v2802_v56  ;;  %v11087_v43 = vstv %s10970_s9  ;;  %s11201_s9 = sld [smem:[#allocation3 + $0x39c]] }
 0x417   : > { %vm13894_vm15 = vcmp.eq.s32.totalorder %v5102_v33, 24  ;;  %vm13895_vm3 = vcmp.eq.s32.totalorder %v5274_v54, 24  ;;  %v2822_v23 = vsel %vm599_vm8, %v10376_v4, %v2812_v60  ;;  %vm13896_vm10 = vcmp.eq.s32.totalorder %v4526_v45, 3 }
 0x418   : > { %v2820_v40 = vsel %vm13894_vm15, %v10376_v4, %v2810_v52  ;;  %v2821_v13 = vsel %vm13895_vm3, %v10376_v4, %v2811_v49  ;;  %v2926_v22 = vsel %vm13896_vm10, %v11087_v43, %v2916_v3  ;;  %vm13897_vm11 = vcmp.eq.s32.totalorder %v5102_v33, 25 }
 0x419   : > { %v2830_v15 = vsel %vm13897_vm11, %v10379_v41, %v2820_v40  ;;  %vm13898_vm7 = vcmp.eq.s32.totalorder %v5274_v54, 25  ;;  %v2832_v4 = vsel %vm607_vm2, %v10379_v41, %v2822_v23  ;;  %v11119_v8 = vstv %s10996_s29  ;;  %s11203_s29 = sld [smem:[#allocation3 + $0x39d]] }
 0x41a   : > { %v2831_v47 = vsel %vm13898_vm7, %v10379_v41, %v2821_v13  ;;  %vm13899_vm13 = vcmp.eq.s32.totalorder %v5102_v33, 26  ;;  %vm13900_vm15 = vcmp.eq.s32.totalorder %v5274_v54, 26  ;;  %v2842_v30 = vsel %vm615_vm4, %v10385_v63, %v2832_v4 }
 0x41b   : > { %v2840_v5 = vsel %vm13899_vm13, %v10385_v63, %v2830_v15  ;;  %v2841_v44 = vsel %vm13900_vm15, %v10385_v63, %v2831_v47  ;;  %vm13901_vm3 = vcmp.eq.s32.totalorder %v4526_v45, 4  ;;  %vm13902_vm10 = vcmp.eq.s32.totalorder %v5102_v33, 27 }
 0x41c   : > { %v2936_v41 = vsel %vm13901_vm3, %v11119_v8, %v2926_v22  ;;  %v2850_v24 = vsel %vm13902_vm10, %v10388_v62, %v2840_v5  ;;  %vm13903_vm11 = vcmp.eq.s32.totalorder %v5274_v54, 27  ;;  %v2852_v63 = vsel %vm623_vm9, %v10388_v62, %v2842_v30 }
 0x41d   : > { %v2851_v28 = vsel %vm13903_vm11, %v10388_v62, %v2841_v44  ;;  %v11151_v31 = vstv %s11010_s20  ;;  %vm13904_vm7 = vcmp.eq.s32.totalorder %v5102_v33, 28  ;;  %vm13905_vm13 = vcmp.eq.s32.totalorder %v5274_v54, 28  ;;  %s11217_s20 = sld [smem:[#allocation3 + $0x39e]] }
 0x41e   : > { %v2860_v26 = vsel %vm13904_vm7, %v10391_v50, %v2850_v24  ;;  %v2861_v2 = vsel %vm13905_vm13, %v10391_v50, %v2851_v28  ;;  %v2862_v20 = vsel %vm631_vm0, %v10391_v50, %v2852_v63  ;;  %vm13906_vm15 = vcmp.eq.s32.totalorder %v4526_v45, 5 }
 0x41f   : > { %v2946_v62 = vsel %vm13906_vm15, %v11151_v31, %v2936_v41  ;;  %vm13907_vm3 = vcmp.eq.s32.totalorder %v5102_v33, 29  ;;  %vm13908_vm10 = vcmp.eq.s32.totalorder %v5274_v54, 29  ;;  %v2872_v50 = vsel %vm639_vm12, %v10397_v9, %v2862_v20 }
 0x420   : > { %v2870_v35 = vsel %vm13907_vm3, %v10397_v9, %v2860_v26  ;;  %v2871_v1 = vsel %vm13908_vm10, %v10397_v9, %v2861_v2  ;;  %v11183_v42 = vstv %s11024_s17  ;;  %vm13909_vm11 = vcmp.eq.s32.totalorder %v5102_v33, 30  ;;  %s11219_s17 = sld [smem:[#allocation3 + $0x39f]] }
 0x421   : > { %v2880_v17 = vsel %vm13909_vm11, %v10400_v51, %v2870_v35  ;;  %vm13910_vm7 = vcmp.eq.s32.totalorder %v5274_v54, 30  ;;  %v2882_v9 = vsel %vm647_vm14, %v10400_v51, %v2872_v50  ;;  %vm13911_vm13 = vcmp.eq.s32.totalorder %v4526_v45, 6 }
 0x422   : > { %v2881_v34 = vsel %vm13910_vm7, %v10400_v51, %v2871_v1  ;;  %v2956_v55 = vsel %vm13911_vm13, %v11183_v42, %v2946_v62  ;;  %vm13912_vm15 = vcmp.eq.s32.totalorder %v5102_v33, 31  ;;  %vm13913_vm3 = vcmp.eq.s32.totalorder %v5274_v54, 31 }
 0x423   : > { %v2890_v59 = vsel %vm13912_vm15, %v10403_v11, %v2880_v17  ;;  %v2891_v51 = vsel %vm13913_vm3, %v10403_v11, %v2881_v34  ;;  %vm13914_vm10 = vcmp.eq.s32.totalorder %v5479_v14, 31  ;;  %v11215_v57 = vstv %s11026_s24 }
 0x424   : > { %v2892_v36 = vsel %vm13914_vm10, %v10403_v11, %v2882_v9  ;;  %2899 = vst [vmem:[#allocation2 + $0x1a8] sm:$0xff] %v2890_v59  ;;  %2900 = vst [vmem:[#allocation2 + $0x1b0] sm:$0xff] %v2891_v51  ;;  %vm13915_vm11 = vcmp.eq.s32.totalorder %v4526_v45, 7  ;;  %v11225_v11 = vstv %s11041_s1  ;;  %v11228_v10 = vstv %s11043_s15 }
 0x425   : > { %2901 = vst [vmem:[#allocation2 + $0x1b8] sm:$0xff] %v2892_v36  ;;  %v2966_v61 = vsel %vm13915_vm11, %v11215_v57, %v2956_v55  ;;  %v11231_v18 = vstv %s11057_s25  ;;  %vm13916_vm7 = vcmp.eq.s32.totalorder %v4526_v45, 8  ;;  %v11237_v58 = vstv %s11059_s16 }
 0x426   : > { %v2976_v6 = vsel %vm13916_vm7, %v11225_v11, %v2966_v61  ;;  %v11240_v12 = vstv %s11073_s3  ;;  %v11243_v0 = vstv %s11075_s4  ;;  %vm13917_vm13 = vcmp.eq.s32.totalorder %v4526_v45, 9 }
 0x427   : > { %v2986_v19 = vsel %vm13917_vm13, %v11228_v10, %v2976_v6  ;;  %v11249_v25 = vstv %s11089_s5  ;;  %v11252_v27 = vstv %s11091_s8  ;;  %v11255_v38 = vstv %s11105_s18 }
 0x428   : > { %vm13918_vm15 = vcmp.eq.s32.totalorder %v4526_v45, 10  ;;  %v11261_v16 = vstv %s11107_s21  ;;  %v11264_v46 = vstv %s11121_s2  ;;  %v11267_v56 = vstv %s11123_s10 }
 0x429   : > { %v2996_v53 = vsel %vm13918_vm15, %v11231_v18, %v2986_v19  ;;  %vm13919_vm3 = vcmp.eq.s32.totalorder %v4526_v45, 11  ;;  %v11273_v52 = vstv %s11137_s11  ;;  %v11276_v49 = vstv %s11139_s14 }
 0x42a   : > { %v3006_v3 = vsel %vm13919_vm3, %v11237_v58, %v2996_v53  ;;  %v11279_v60 = vstv %s11153_s30  ;;  %vm13920_vm10 = vcmp.eq.s32.totalorder %v4526_v45, 12  ;;  %v11285_v13 = vstv %s11155_s22 }
 0x42b   : > { %v3016_v40 = vsel %vm13920_vm10, %v11240_v12, %v3006_v3  ;;  %v11288_v23 = vstv %s11169_s27  ;;  %v11291_v22 = vstv %s11171_s28  ;;  %vm13921_vm11 = vcmp.eq.s32.totalorder %v4526_v45, 13 }
 0x42c   : > { %v3026_v15 = vsel %vm13921_vm11, %v11243_v0, %v3016_v40  ;;  %v11297_v47 = vstv %s11185_s6  ;;  %v11300_v4 = vstv %s11187_s7  ;;  %v11303_v5 = vstv %s11201_s9 }
 0x42d   : > { %vm13922_vm7 = vcmp.eq.s32.totalorder %v4526_v45, 14  ;;  %v11309_v30 = vstv %s11203_s29  ;;  %v11312_v41 = vstv %s11217_s20  ;;  %v11315_v24 = vstv %s11219_s17 }
 0x42e   : > { %v3036_v44 = vsel %vm13922_vm7, %v11249_v25, %v3026_v15  ;;  %vm13923_vm13 = vcmp.eq.s32.totalorder %v4526_v45, 15  ;;  %vm13924_vm15 = vcmp.eq.s32.totalorder %v4633_v32, 1  ;;  %vm13925_vm3 = vcmp.eq.s32.totalorder %v4769_v29, 1 }
 0x42f   : > { %v3046_v28 = vsel %vm13923_vm13, %v11252_v27, %v3036_v44  ;;  %v2907_v63 = vsel %vm13924_vm15, %v11022_v7, %v11008_v21  ;;  %v2908_v26 = vsel %vm13925_vm3, %v11022_v7, %v11008_v21  ;;  %vm13926_vm10 = vcmp.eq.s32.totalorder %v4905_v37, 1 }
 0x430   : > { %v2909_v2 = vsel %vm13926_vm10, %v11022_v7, %v11008_v21  ;;  %vm13927_vm11 = vcmp.eq.s32.totalorder %v4526_v45, 16  ;;  %vm13928_vm7 = vcmp.eq.s32.totalorder %v4633_v32, 2  ;;  %vm13929_vm13 = vcmp.eq.s32.totalorder %v4769_v29, 2 }
 0x431   : > { %v3056_v20 = vsel %vm13927_vm11, %v11255_v38, %v3046_v28  ;;  %v2917_v62 = vsel %vm13928_vm7, %v11055_v39, %v2907_v63  ;;  %v2918_v35 = vsel %vm13929_vm13, %v11055_v39, %v2908_v26  ;;  %vm13930_vm15 = vcmp.eq.s32.totalorder %v4905_v37, 2 }
 0x432   : > { %v2919_v1 = vsel %vm13930_vm15, %v11055_v39, %v2909_v2  ;;  %vm13931_vm3 = vcmp.eq.s32.totalorder %v4526_v45, 17  ;;  %vm13932_vm10 = vcmp.eq.s32.totalorder %v4633_v32, 3  ;;  %vm13933_vm11 = vcmp.eq.s32.totalorder %v4769_v29, 3 }
 0x433   : > { %v3066_v50 = vsel %vm13931_vm3, %v11261_v16, %v3056_v20  ;;  %v2927_v17 = vsel %vm13932_vm10, %v11087_v43, %v2917_v62  ;;  %v2928_v34 = vsel %vm13933_vm11, %v11087_v43, %v2918_v35  ;;  %vm13934_vm7 = vcmp.eq.s32.totalorder %v4905_v37, 3 }
 0x434   : > { %v2929_v9 = vsel %vm13934_vm7, %v11087_v43, %v2919_v1  ;;  %vm13935_vm13 = vcmp.eq.s32.totalorder %v4526_v45, 18  ;;  %vm13936_vm15 = vcmp.eq.s32.totalorder %v4633_v32, 4  ;;  %vm13937_vm3 = vcmp.eq.s32.totalorder %v4769_v29, 4 }
 0x435   : > { %v3076_v55 = vsel %vm13935_vm13, %v11264_v46, %v3066_v50  ;;  %v2937_v59 = vsel %vm13936_vm15, %v11119_v8, %v2927_v17  ;;  %v2938_v51 = vsel %vm13937_vm3, %v11119_v8, %v2928_v34  ;;  %vm13938_vm10 = vcmp.eq.s32.totalorder %v4905_v37, 4 }
 0x436   : > { %v2939_v36 = vsel %vm13938_vm10, %v11119_v8, %v2929_v9  ;;  %vm13939_vm11 = vcmp.eq.s32.totalorder %v4526_v45, 19  ;;  %vm13940_vm7 = vcmp.eq.s32.totalorder %v4633_v32, 5  ;;  %vm13941_vm13 = vcmp.eq.s32.totalorder %v4769_v29, 5 }
 0x437   : > { %v3086_v61 = vsel %vm13939_vm11, %v11267_v56, %v3076_v55  ;;  %v2947_v6 = vsel %vm13940_vm7, %v11151_v31, %v2937_v59  ;;  %v2948_v19 = vsel %vm13941_vm13, %v11151_v31, %v2938_v51  ;;  %vm13942_vm15 = vcmp.eq.s32.totalorder %v4905_v37, 5 }
 0x438   : > { %v2949_v53 = vsel %vm13942_vm15, %v11151_v31, %v2939_v36  ;;  %vm13943_vm3 = vcmp.eq.s32.totalorder %v4526_v45, 20  ;;  %vm13944_vm10 = vcmp.eq.s32.totalorder %v4633_v32, 6  ;;  %vm13945_vm11 = vcmp.eq.s32.totalorder %v4769_v29, 6 }
 0x439   : > { %v3096_v3 = vsel %vm13943_vm3, %v11273_v52, %v3086_v61  ;;  %v2957_v40 = vsel %vm13944_vm10, %v11183_v42, %v2947_v6  ;;  %v2958_v15 = vsel %vm13945_vm11, %v11183_v42, %v2948_v19  ;;  %vm13946_vm7 = vcmp.eq.s32.totalorder %v4905_v37, 6 }
 0x43a   : > { %v2959_v44 = vsel %vm13946_vm7, %v11183_v42, %v2949_v53  ;;  %vm13947_vm13 = vcmp.eq.s32.totalorder %v4526_v45, 21  ;;  %vm13948_vm15 = vcmp.eq.s32.totalorder %v4633_v32, 7  ;;  %vm13949_vm3 = vcmp.eq.s32.totalorder %v4769_v29, 7 }
 0x43b   : > { %v3106_v28 = vsel %vm13947_vm13, %v11276_v49, %v3096_v3  ;;  %v2967_v63 = vsel %vm13948_vm15, %v11215_v57, %v2957_v40  ;;  %v2968_v26 = vsel %vm13949_vm3, %v11215_v57, %v2958_v15  ;;  %vm13950_vm10 = vcmp.eq.s32.totalorder %v4905_v37, 7 }
 0x43c   : > { %v2969_v2 = vsel %vm13950_vm10, %v11215_v57, %v2959_v44  ;;  %vm13951_vm11 = vcmp.eq.s32.totalorder %v4526_v45, 22  ;;  %vm13952_vm7 = vcmp.eq.s32.totalorder %v4633_v32, 8  ;;  %vm13953_vm13 = vcmp.eq.s32.totalorder %v4769_v29, 8 }
 0x43d   : > { %v3116_v20 = vsel %vm13951_vm11, %v11279_v60, %v3106_v28  ;;  %v2977_v62 = vsel %vm13952_vm7, %v11225_v11, %v2967_v63  ;;  %v2978_v35 = vsel %vm13953_vm13, %v11225_v11, %v2968_v26  ;;  %vm13954_vm15 = vcmp.eq.s32.totalorder %v4905_v37, 8 }
 0x43e   : > { %v2979_v1 = vsel %vm13954_vm15, %v11225_v11, %v2969_v2  ;;  %vm13955_vm3 = vcmp.eq.s32.totalorder %v4526_v45, 23  ;;  %vm13956_vm10 = vcmp.eq.s32.totalorder %v4633_v32, 9  ;;  %vm13957_vm11 = vcmp.eq.s32.totalorder %v4769_v29, 9 }
 0x43f   : > { %v3126_v50 = vsel %vm13955_vm3, %v11285_v13, %v3116_v20  ;;  %v2987_v17 = vsel %vm13956_vm10, %v11228_v10, %v2977_v62  ;;  %v2988_v34 = vsel %vm13957_vm11, %v11228_v10, %v2978_v35  ;;  %vm13958_vm7 = vcmp.eq.s32.totalorder %v4905_v37, 9 }
 0x440   : > { %v2989_v9 = vsel %vm13958_vm7, %v11228_v10, %v2979_v1  ;;  %vm13959_vm13 = vcmp.eq.s32.totalorder %v4526_v45, 24  ;;  %vm13960_vm15 = vcmp.eq.s32.totalorder %v4633_v32, 10  ;;  %vm13961_vm3 = vcmp.eq.s32.totalorder %v4769_v29, 10 }
 0x441   : > { %v3136_v55 = vsel %vm13959_vm13, %v11288_v23, %v3126_v50  ;;  %v2997_v59 = vsel %vm13960_vm15, %v11231_v18, %v2987_v17  ;;  %v2998_v51 = vsel %vm13961_vm3, %v11231_v18, %v2988_v34  ;;  %vm13962_vm10 = vcmp.eq.s32.totalorder %v4905_v37, 10 }
 0x442   : > { %v2999_v36 = vsel %vm13962_vm10, %v11231_v18, %v2989_v9  ;;  %vm13963_vm11 = vcmp.eq.s32.totalorder %v4526_v45, 25  ;;  %vm13964_vm7 = vcmp.eq.s32.totalorder %v4633_v32, 11  ;;  %vm13965_vm13 = vcmp.eq.s32.totalorder %v4769_v29, 11 }
 0x443   : > { %v3146_v61 = vsel %vm13963_vm11, %v11291_v22, %v3136_v55  ;;  %v3007_v6 = vsel %vm13964_vm7, %v11237_v58, %v2997_v59  ;;  %v3008_v19 = vsel %vm13965_vm13, %v11237_v58, %v2998_v51  ;;  %vm13966_vm15 = vcmp.eq.s32.totalorder %v4905_v37, 11 }
 0x444   : > { %v3009_v53 = vsel %vm13966_vm15, %v11237_v58, %v2999_v36  ;;  %vm13967_vm3 = vcmp.eq.s32.totalorder %v4526_v45, 26  ;;  %vm13968_vm10 = vcmp.eq.s32.totalorder %v4633_v32, 12  ;;  %vm13969_vm11 = vcmp.eq.s32.totalorder %v4769_v29, 12 }
 0x445   : > { %v3156_v3 = vsel %vm13967_vm3, %v11297_v47, %v3146_v61  ;;  %v3017_v40 = vsel %vm13968_vm10, %v11240_v12, %v3007_v6  ;;  %v3018_v15 = vsel %vm13969_vm11, %v11240_v12, %v3008_v19  ;;  %vm13970_vm7 = vcmp.eq.s32.totalorder %v4905_v37, 12 }
 0x446   : > { %v3019_v44 = vsel %vm13970_vm7, %v11240_v12, %v3009_v53  ;;  %vm13971_vm13 = vcmp.eq.s32.totalorder %v4526_v45, 27  ;;  %vm13972_vm15 = vcmp.eq.s32.totalorder %v4633_v32, 13  ;;  %vm13973_vm3 = vcmp.eq.s32.totalorder %v4769_v29, 13 }
 0x447   : > { %v3166_v28 = vsel %vm13971_vm13, %v11300_v4, %v3156_v3  ;;  %v3027_v63 = vsel %vm13972_vm15, %v11243_v0, %v3017_v40  ;;  %v3028_v26 = vsel %vm13973_vm3, %v11243_v0, %v3018_v15  ;;  %vm13974_vm10 = vcmp.eq.s32.totalorder %v4905_v37, 13 }
 0x448   : > { %v3029_v2 = vsel %vm13974_vm10, %v11243_v0, %v3019_v44  ;;  %vm13975_vm11 = vcmp.eq.s32.totalorder %v4526_v45, 28  ;;  %vm13976_vm7 = vcmp.eq.s32.totalorder %v4633_v32, 14  ;;  %vm13977_vm13 = vcmp.eq.s32.totalorder %v4769_v29, 14 }
 0x449   : > { %v3176_v20 = vsel %vm13975_vm11, %v11303_v5, %v3166_v28  ;;  %v3037_v62 = vsel %vm13976_vm7, %v11249_v25, %v3027_v63  ;;  %v3038_v35 = vsel %vm13977_vm13, %v11249_v25, %v3028_v26  ;;  %vm13978_vm15 = vcmp.eq.s32.totalorder %v4905_v37, 14 }
 0x44a   : > { %v3039_v1 = vsel %vm13978_vm15, %v11249_v25, %v3029_v2  ;;  %vm13979_vm3 = vcmp.eq.s32.totalorder %v4526_v45, 29  ;;  %vm13980_vm10 = vcmp.eq.s32.totalorder %v4633_v32, 15  ;;  %vm13981_vm11 = vcmp.eq.s32.totalorder %v4769_v29, 15 }
 0x44b   : > { %v3186_v50 = vsel %vm13979_vm3, %v11309_v30, %v3176_v20  ;;  %v3047_v17 = vsel %vm13980_vm10, %v11252_v27, %v3037_v62  ;;  %v3048_v34 = vsel %vm13981_vm11, %v11252_v27, %v3038_v35  ;;  %vm13982_vm7 = vcmp.eq.s32.totalorder %v4905_v37, 15 }
 0x44c   : > { %v3049_v9 = vsel %vm13982_vm7, %v11252_v27, %v3039_v1  ;;  %vm13983_vm13 = vcmp.eq.s32.totalorder %v4526_v45, 30  ;;  %vm13984_vm15 = vcmp.eq.s32.totalorder %v4633_v32, 16  ;;  %vm13985_vm3 = vcmp.eq.s32.totalorder %v4769_v29, 16 }
 0x44d   : > { %v3196_v55 = vsel %vm13983_vm13, %v11312_v41, %v3186_v50  ;;  %v3057_v59 = vsel %vm13984_vm15, %v11255_v38, %v3047_v17  ;;  %v3058_v51 = vsel %vm13985_vm3, %v11255_v38, %v3048_v34  ;;  %vm13986_vm10 = vcmp.eq.s32.totalorder %v4905_v37, 16 }
 0x44e   : > { %v3059_v36 = vsel %vm13986_vm10, %v11255_v38, %v3049_v9  ;;  %vm13987_vm11 = vcmp.eq.s32.totalorder %v4526_v45, 31  ;;  %vm13988_vm7 = vcmp.eq.s32.totalorder %v4633_v32, 17  ;;  %vm13989_vm13 = vcmp.eq.s32.totalorder %v4769_v29, 17 }
 0x44f   : > { %v3206_v61 = vsel %vm13987_vm11, %v11315_v24, %v3196_v55  ;;  %v3067_v6 = vsel %vm13988_vm7, %v11261_v16, %v3057_v59  ;;  %v3068_v19 = vsel %vm13989_vm13, %v11261_v16, %v3058_v51  ;;  %vm13990_vm15 = vcmp.eq.s32.totalorder %v4905_v37, 17 }
 0x450   : > { %v3069_v53 = vsel %vm13990_vm15, %v11261_v16, %v3059_v36  ;;  %3215 = vst [vmem:[#allocation2 + $0x1c0] sm:$0xff] %v3206_v61  ;;  %vm13991_vm3 = vcmp.eq.s32.totalorder %v4633_v32, 18  ;;  %vm13992_vm10 = vcmp.eq.s32.totalorder %v4769_v29, 18  ;;  %vm13993_vm11 = vcmp.eq.s32.totalorder %v4905_v37, 18 }
 0x451   : > { %v3077_v3 = vsel %vm13991_vm3, %v11264_v46, %v3067_v6  ;;  %v3078_v45 = vsel %vm13992_vm10, %v11264_v46, %v3068_v19  ;;  %v3079_v40 = vsel %vm13993_vm11, %v11264_v46, %v3069_v53  ;;  %vm13994_vm7 = vcmp.eq.s32.totalorder %v4981_v48, 1 }
 0x452   : > { %v2910_v15 = vsel %vm13994_vm7, %v11022_v7, %v11008_v21  ;;  %vm13995_vm13 = vcmp.eq.s32.totalorder %v4633_v32, 19  ;;  %vm13996_vm15 = vcmp.eq.s32.totalorder %v4769_v29, 19  ;;  %vm13997_vm3 = vcmp.eq.s32.totalorder %v4905_v37, 19 }
 0x453   : > { %v3087_v44 = vsel %vm13995_vm13, %v11267_v56, %v3077_v3  ;;  %v3088_v28 = vsel %vm13996_vm15, %v11267_v56, %v3078_v45  ;;  %v3089_v63 = vsel %vm13997_vm3, %v11267_v56, %v3079_v40  ;;  %vm13998_vm10 = vcmp.eq.s32.totalorder %v4981_v48, 2 }
 0x454   : > { %v2920_v26 = vsel %vm13998_vm10, %v11055_v39, %v2910_v15  ;;  %vm13999_vm11 = vcmp.eq.s32.totalorder %v4633_v32, 20  ;;  %vm14000_vm7 = vcmp.eq.s32.totalorder %v4769_v29, 20  ;;  %vm14001_vm13 = vcmp.eq.s32.totalorder %v4905_v37, 20 }
 0x455   : > { %v3097_v2 = vsel %vm13999_vm11, %v11273_v52, %v3087_v44  ;;  %v3098_v20 = vsel %vm14000_vm7, %v11273_v52, %v3088_v28  ;;  %v3099_v62 = vsel %vm14001_vm13, %v11273_v52, %v3089_v63  ;;  %vm14002_vm15 = vcmp.eq.s32.totalorder %v4981_v48, 3 }
 0x456   : > { %v2930_v35 = vsel %vm14002_vm15, %v11087_v43, %v2920_v26  ;;  %vm14003_vm3 = vcmp.eq.s32.totalorder %v4633_v32, 21  ;;  %vm14004_vm10 = vcmp.eq.s32.totalorder %v4769_v29, 21  ;;  %vm14005_vm11 = vcmp.eq.s32.totalorder %v4905_v37, 21 }
 0x457   : > { %v3107_v1 = vsel %vm14003_vm3, %v11276_v49, %v3097_v2  ;;  %v3108_v50 = vsel %vm14004_vm10, %v11276_v49, %v3098_v20  ;;  %v3109_v17 = vsel %vm14005_vm11, %v11276_v49, %v3099_v62  ;;  %vm14006_vm7 = vcmp.eq.s32.totalorder %v4981_v48, 4 }
 0x458   : > { %v2940_v34 = vsel %vm14006_vm7, %v11119_v8, %v2930_v35  ;;  %vm14007_vm13 = vcmp.eq.s32.totalorder %v4633_v32, 22  ;;  %vm14008_vm15 = vcmp.eq.s32.totalorder %v4769_v29, 22  ;;  %vm14009_vm3 = vcmp.eq.s32.totalorder %v4905_v37, 22 }
 0x459   : > { %v3117_v9 = vsel %vm14007_vm13, %v11279_v60, %v3107_v1  ;;  %v3118_v55 = vsel %vm14008_vm15, %v11279_v60, %v3108_v50  ;;  %v3119_v59 = vsel %vm14009_vm3, %v11279_v60, %v3109_v17  ;;  %vm14010_vm10 = vcmp.eq.s32.totalorder %v4981_v48, 5 }
 0x45a   : > { %v2950_v51 = vsel %vm14010_vm10, %v11151_v31, %v2940_v34  ;;  %vm14011_vm11 = vcmp.eq.s32.totalorder %v4633_v32, 23  ;;  %vm14012_vm7 = vcmp.eq.s32.totalorder %v4769_v29, 23  ;;  %vm14013_vm13 = vcmp.eq.s32.totalorder %v4905_v37, 23 }
 0x45b   : > { %v3127_v36 = vsel %vm14011_vm11, %v11285_v13, %v3117_v9  ;;  %v3128_v61 = vsel %vm14012_vm7, %v11285_v13, %v3118_v55  ;;  %v3129_v6 = vsel %vm14013_vm13, %v11285_v13, %v3119_v59  ;;  %vm14014_vm15 = vcmp.eq.s32.totalorder %v4981_v48, 6 }
 0x45c   : > { %v2960_v19 = vsel %vm14014_vm15, %v11183_v42, %v2950_v51  ;;  %vm14015_vm3 = vcmp.eq.s32.totalorder %v4633_v32, 24  ;;  %vm14016_vm10 = vcmp.eq.s32.totalorder %v4769_v29, 24  ;;  %vm14017_vm11 = vcmp.eq.s32.totalorder %v4905_v37, 24 }
 0x45d   : > { %v3137_v53 = vsel %vm14015_vm3, %v11288_v23, %v3127_v36  ;;  %v3138_v3 = vsel %vm14016_vm10, %v11288_v23, %v3128_v61  ;;  %v3139_v45 = vsel %vm14017_vm11, %v11288_v23, %v3129_v6  ;;  %vm14018_vm7 = vcmp.eq.s32.totalorder %v4981_v48, 7 }
 0x45e   : > { %v2970_v40 = vsel %vm14018_vm7, %v11215_v57, %v2960_v19  ;;  %vm14019_vm13 = vcmp.eq.s32.totalorder %v4633_v32, 25  ;;  %vm14020_vm15 = vcmp.eq.s32.totalorder %v4769_v29, 25  ;;  %vm14021_vm3 = vcmp.eq.s32.totalorder %v4905_v37, 25 }
 0x45f   : > { %v3147_v15 = vsel %vm14019_vm13, %v11291_v22, %v3137_v53  ;;  %v3148_v44 = vsel %vm14020_vm15, %v11291_v22, %v3138_v3  ;;  %v3149_v28 = vsel %vm14021_vm3, %v11291_v22, %v3139_v45  ;;  %vm14022_vm10 = vcmp.eq.s32.totalorder %v4981_v48, 8 }
 0x460   : > { %v2980_v63 = vsel %vm14022_vm10, %v11225_v11, %v2970_v40  ;;  %vm14023_vm11 = vcmp.eq.s32.totalorder %v4633_v32, 26  ;;  %vm14024_vm7 = vcmp.eq.s32.totalorder %v4769_v29, 26  ;;  %vm14025_vm13 = vcmp.eq.s32.totalorder %v4905_v37, 26 }
 0x461   : > { %v3157_v26 = vsel %vm14023_vm11, %v11297_v47, %v3147_v15  ;;  %v3158_v2 = vsel %vm14024_vm7, %v11297_v47, %v3148_v44  ;;  %v3159_v20 = vsel %vm14025_vm13, %v11297_v47, %v3149_v28  ;;  %vm14026_vm15 = vcmp.eq.s32.totalorder %v4981_v48, 9 }
 0x462   : > { %v2990_v62 = vsel %vm14026_vm15, %v11228_v10, %v2980_v63  ;;  %vm14027_vm3 = vcmp.eq.s32.totalorder %v4633_v32, 27  ;;  %vm14028_vm10 = vcmp.eq.s32.totalorder %v4769_v29, 27  ;;  %vm14029_vm11 = vcmp.eq.s32.totalorder %v4905_v37, 27 }
 0x463   : > { %v3167_v35 = vsel %vm14027_vm3, %v11300_v4, %v3157_v26  ;;  %v3168_v1 = vsel %vm14028_vm10, %v11300_v4, %v3158_v2  ;;  %v3169_v50 = vsel %vm14029_vm11, %v11300_v4, %v3159_v20  ;;  %vm14030_vm7 = vcmp.eq.s32.totalorder %v4981_v48, 10 }
 0x464   : > { %v3000_v17 = vsel %vm14030_vm7, %v11231_v18, %v2990_v62  ;;  %vm14031_vm13 = vcmp.eq.s32.totalorder %v4633_v32, 28  ;;  %vm14032_vm15 = vcmp.eq.s32.totalorder %v4769_v29, 28  ;;  %vm14033_vm3 = vcmp.eq.s32.totalorder %v4905_v37, 28 }
 0x465   : > { %v3177_v34 = vsel %vm14031_vm13, %v11303_v5, %v3167_v35  ;;  %v3178_v9 = vsel %vm14032_vm15, %v11303_v5, %v3168_v1  ;;  %v3179_v55 = vsel %vm14033_vm3, %v11303_v5, %v3169_v50  ;;  %vm14034_vm10 = vcmp.eq.s32.totalorder %v4981_v48, 11 }
 0x466   : > { %v3010_v59 = vsel %vm14034_vm10, %v11237_v58, %v3000_v17  ;;  %vm14035_vm11 = vcmp.eq.s32.totalorder %v4633_v32, 29  ;;  %vm14036_vm7 = vcmp.eq.s32.totalorder %v4769_v29, 29  ;;  %vm14037_vm13 = vcmp.eq.s32.totalorder %v4905_v37, 29 }
 0x467   : > { %v3187_v51 = vsel %vm14035_vm11, %v11309_v30, %v3177_v34  ;;  %v3188_v36 = vsel %vm14036_vm7, %v11309_v30, %v3178_v9  ;;  %v3189_v61 = vsel %vm14037_vm13, %v11309_v30, %v3179_v55  ;;  %vm14038_vm15 = vcmp.eq.s32.totalorder %v4981_v48, 12 }
 0x468   : > { %v3020_v6 = vsel %vm14038_vm15, %v11240_v12, %v3010_v59  ;;  %vm14039_vm3 = vcmp.eq.s32.totalorder %v4633_v32, 30  ;;  %vm14040_vm10 = vcmp.eq.s32.totalorder %v4769_v29, 30  ;;  %vm14041_vm11 = vcmp.eq.s32.totalorder %v4905_v37, 30 }
 0x469   : > { %v3197_v19 = vsel %vm14039_vm3, %v11312_v41, %v3187_v51  ;;  %v3198_v53 = vsel %vm14040_vm10, %v11312_v41, %v3188_v36  ;;  %v3199_v3 = vsel %vm14041_vm11, %v11312_v41, %v3189_v61  ;;  %vm14042_vm7 = vcmp.eq.s32.totalorder %v4981_v48, 13 }
 0x46a   : > { %v3030_v45 = vsel %vm14042_vm7, %v11243_v0, %v3020_v6  ;;  %vm14043_vm13 = vcmp.eq.s32.totalorder %v4633_v32, 31  ;;  %vm14044_vm15 = vcmp.eq.s32.totalorder %v4769_v29, 31  ;;  %vm14045_vm3 = vcmp.eq.s32.totalorder %v4905_v37, 31 }
 0x46b   : > { %v3207_v40 = vsel %vm14043_vm13, %v11315_v24, %v3197_v19  ;;  %v3208_v15 = vsel %vm14044_vm15, %v11315_v24, %v3198_v53  ;;  %v3209_v44 = vsel %vm14045_vm3, %v11315_v24, %v3199_v3  ;;  %vm14046_vm10 = vcmp.eq.s32.totalorder %v4981_v48, 14 }
 0x46c   : > { %v3040_v28 = vsel %vm14046_vm10, %v11249_v25, %v3030_v45  ;;  %3216 = vst [vmem:[#allocation2 + $0x1c8] sm:$0xff] %v3207_v40  ;;  %3217 = vst [vmem:[#allocation2 + $0x1d0] sm:$0xff] %v3208_v15  ;;  %vm14047_vm11 = vcmp.eq.s32.totalorder %v4981_v48, 15  ;;  %vm14048_vm7 = vcmp.eq.s32.totalorder %v5102_v33, 1  ;;  %vm14049_vm13 = vcmp.eq.s32.totalorder %v5274_v54, 1 }
 0x46d   : > { %3218 = vst [vmem:[#allocation2 + $0x1d8] sm:$0xff] %v3209_v44  ;;  %v3050_v32 = vsel %vm14047_vm11, %v11252_v27, %v3040_v28  ;;  %v2911_v29 = vsel %vm14048_vm7, %v11022_v7, %v11008_v21  ;;  %v2912_v37 = vsel %vm14049_vm13, %v11022_v7, %v11008_v21  ;;  %vm14050_vm15 = vcmp.eq.s32.totalorder %v5479_v14, 1 }
 0x46e   : > { %v2913_v63 = vsel %vm14050_vm15, %v11022_v7, %v11008_v21  ;;  %vm14051_vm3 = vcmp.eq.s32.totalorder %v4981_v48, 16  ;;  %vm14052_vm10 = vcmp.eq.s32.totalorder %v5102_v33, 2  ;;  %vm14053_vm11 = vcmp.eq.s32.totalorder %v5274_v54, 2 }
 0x46f   : > { %v3060_v26 = vsel %vm14051_vm3, %v11255_v38, %v3050_v32  ;;  %v2921_v2 = vsel %vm14052_vm10, %v11055_v39, %v2911_v29  ;;  %v2922_v20 = vsel %vm14053_vm11, %v11055_v39, %v2912_v37  ;;  %vm14054_vm7 = vcmp.eq.s32.totalorder %v5479_v14, 2 }
 0x470   : > { %v2923_v62 = vsel %vm14054_vm7, %v11055_v39, %v2913_v63  ;;  %vm14055_vm13 = vcmp.eq.s32.totalorder %v4981_v48, 17  ;;  %vm14056_vm15 = vcmp.eq.s32.totalorder %v5102_v33, 3  ;;  %vm14057_vm3 = vcmp.eq.s32.totalorder %v5274_v54, 3 }
 0x471   : > { %v3070_v21 = vsel %vm14055_vm13, %v11261_v16, %v3060_v26  ;;  %v2931_v7 = vsel %vm14056_vm15, %v11087_v43, %v2921_v2  ;;  %v2932_v35 = vsel %vm14057_vm3, %v11087_v43, %v2922_v20  ;;  %vm14058_vm10 = vcmp.eq.s32.totalorder %v5479_v14, 3 }
 0x472   : > { %v2933_v1 = vsel %vm14058_vm10, %v11087_v43, %v2923_v62  ;;  %vm14059_vm11 = vcmp.eq.s32.totalorder %v4981_v48, 18  ;;  %vm14060_vm7 = vcmp.eq.s32.totalorder %v5102_v33, 4  ;;  %vm14061_vm13 = vcmp.eq.s32.totalorder %v5274_v54, 4 }
 0x473   : > { %v3080_v39 = vsel %vm14059_vm11, %v11264_v46, %v3070_v21  ;;  %v2941_v50 = vsel %vm14060_vm7, %v11119_v8, %v2931_v7  ;;  %v2942_v17 = vsel %vm14061_vm13, %v11119_v8, %v2932_v35  ;;  %vm14062_vm15 = vcmp.eq.s32.totalorder %v5479_v14, 4 }
 0x474   : > { %v2943_v34 = vsel %vm14062_vm15, %v11119_v8, %v2933_v1  ;;  %vm14063_vm3 = vcmp.eq.s32.totalorder %v4981_v48, 19  ;;  %vm14064_vm10 = vcmp.eq.s32.totalorder %v5102_v33, 5  ;;  %vm14065_vm11 = vcmp.eq.s32.totalorder %v5274_v54, 5 }
 0x475   : > { %v3090_v43 = vsel %vm14063_vm3, %v11267_v56, %v3080_v39  ;;  %v2951_v9 = vsel %vm14064_vm10, %v11151_v31, %v2941_v50  ;;  %v2952_v55 = vsel %vm14065_vm11, %v11151_v31, %v2942_v17  ;;  %vm14066_vm7 = vcmp.eq.s32.totalorder %v5479_v14, 5 }
 0x476   : > { %v2953_v59 = vsel %vm14066_vm7, %v11151_v31, %v2943_v34  ;;  %vm14067_vm13 = vcmp.eq.s32.totalorder %v4981_v48, 20  ;;  %vm14068_vm15 = vcmp.eq.s32.totalorder %v5102_v33, 6  ;;  %vm14069_vm3 = vcmp.eq.s32.totalorder %v5274_v54, 6 }
 0x477   : > { %v3100_v8 = vsel %vm14067_vm13, %v11273_v52, %v3090_v43  ;;  %v2961_v51 = vsel %vm14068_vm15, %v11183_v42, %v2951_v9  ;;  %v2962_v36 = vsel %vm14069_vm3, %v11183_v42, %v2952_v55  ;;  %vm14070_vm10 = vcmp.eq.s32.totalorder %v5479_v14, 6 }
 0x478   : > { %v2963_v61 = vsel %vm14070_vm10, %v11183_v42, %v2953_v59  ;;  %vm14071_vm11 = vcmp.eq.s32.totalorder %v4981_v48, 21  ;;  %vm14072_vm7 = vcmp.eq.s32.totalorder %v5102_v33, 7  ;;  %vm14073_vm13 = vcmp.eq.s32.totalorder %v5274_v54, 7 }
 0x479   : > { %v3110_v31 = vsel %vm14071_vm11, %v11276_v49, %v3100_v8  ;;  %v2971_v6 = vsel %vm14072_vm7, %v11215_v57, %v2961_v51  ;;  %v2972_v19 = vsel %vm14073_vm13, %v11215_v57, %v2962_v36  ;;  %vm14074_vm15 = vcmp.eq.s32.totalorder %v5479_v14, 7 }
 0x47a   : > { %v2973_v53 = vsel %vm14074_vm15, %v11215_v57, %v2963_v61  ;;  %vm14075_vm3 = vcmp.eq.s32.totalorder %v4981_v48, 22  ;;  %vm14076_vm10 = vcmp.eq.s32.totalorder %v5102_v33, 8  ;;  %vm14077_vm11 = vcmp.eq.s32.totalorder %v5274_v54, 8 }
 0x47b   : > { %v3120_v42 = vsel %vm14075_vm3, %v11279_v60, %v3110_v31  ;;  %v2981_v3 = vsel %vm14076_vm10, %v11225_v11, %v2971_v6  ;;  %v2982_v45 = vsel %vm14077_vm11, %v11225_v11, %v2972_v19  ;;  %vm14078_vm7 = vcmp.eq.s32.totalorder %v5479_v14, 8 }
 0x47c   : > { %v2983_v40 = vsel %vm14078_vm7, %v11225_v11, %v2973_v53  ;;  %vm14079_vm13 = vcmp.eq.s32.totalorder %v4981_v48, 23  ;;  %vm14080_vm15 = vcmp.eq.s32.totalorder %v5102_v33, 9  ;;  %vm14081_vm3 = vcmp.eq.s32.totalorder %v5274_v54, 9 }
 0x47d   : > { %v3130_v57 = vsel %vm14079_vm13, %v11285_v13, %v3120_v42  ;;  %v2991_v15 = vsel %vm14080_vm15, %v11228_v10, %v2981_v3  ;;  %v2992_v44 = vsel %vm14081_vm3, %v11228_v10, %v2982_v45  ;;  %vm14082_vm10 = vcmp.eq.s32.totalorder %v5479_v14, 9 }
 0x47e   : > { %v2993_v28 = vsel %vm14082_vm10, %v11228_v10, %v2983_v40  ;;  %vm14083_vm11 = vcmp.eq.s32.totalorder %v4981_v48, 24  ;;  %vm14084_vm7 = vcmp.eq.s32.totalorder %v5102_v33, 10  ;;  %vm14085_vm13 = vcmp.eq.s32.totalorder %v5274_v54, 10 }
 0x47f   : > { %v3140_v11 = vsel %vm14083_vm11, %v11288_v23, %v3130_v57  ;;  %v3001_v32 = vsel %vm14084_vm7, %v11231_v18, %v2991_v15  ;;  %v3002_v29 = vsel %vm14085_vm13, %v11231_v18, %v2992_v44  ;;  %vm14086_vm15 = vcmp.eq.s32.totalorder %v5479_v14, 10 }
 0x480   : > { %v3003_v37 = vsel %vm14086_vm15, %v11231_v18, %v2993_v28  ;;  %vm14087_vm3 = vcmp.eq.s32.totalorder %v4981_v48, 25  ;;  %vm14088_vm10 = vcmp.eq.s32.totalorder %v5102_v33, 11  ;;  %vm14089_vm11 = vcmp.eq.s32.totalorder %v5274_v54, 11 }
 0x481   : > { %v3150_v10 = vsel %vm14087_vm3, %v11291_v22, %v3140_v11  ;;  %v3011_v63 = vsel %vm14088_vm10, %v11237_v58, %v3001_v32  ;;  %v3012_v26 = vsel %vm14089_vm11, %v11237_v58, %v3002_v29  ;;  %vm14090_vm7 = vcmp.eq.s32.totalorder %v5479_v14, 11 }
 0x482   : > { %v3013_v2 = vsel %vm14090_vm7, %v11237_v58, %v3003_v37  ;;  %vm14091_vm13 = vcmp.eq.s32.totalorder %v4981_v48, 26  ;;  %vm14092_vm15 = vcmp.eq.s32.totalorder %v5102_v33, 12  ;;  %vm14093_vm3 = vcmp.eq.s32.totalorder %v5274_v54, 12 }
 0x483   : > { %v3160_v18 = vsel %vm14091_vm13, %v11297_v47, %v3150_v10  ;;  %v3021_v20 = vsel %vm14092_vm15, %v11240_v12, %v3011_v63  ;;  %v3022_v62 = vsel %vm14093_vm3, %v11240_v12, %v3012_v26  ;;  %vm14094_vm10 = vcmp.eq.s32.totalorder %v5479_v14, 12 }
 0x484   : > { %v3023_v21 = vsel %vm14094_vm10, %v11240_v12, %v3013_v2  ;;  %vm14095_vm11 = vcmp.eq.s32.totalorder %v4981_v48, 27  ;;  %vm14096_vm7 = vcmp.eq.s32.totalorder %v5102_v33, 13  ;;  %vm14097_vm13 = vcmp.eq.s32.totalorder %v5274_v54, 13 }
 0x485   : > { %v3170_v58 = vsel %vm14095_vm11, %v11300_v4, %v3160_v18  ;;  %v3031_v7 = vsel %vm14096_vm7, %v11243_v0, %v3021_v20  ;;  %v3032_v35 = vsel %vm14097_vm13, %v11243_v0, %v3022_v62  ;;  %vm14098_vm15 = vcmp.eq.s32.totalorder %v5479_v14, 13 }
 0x486   : > { %v3033_v1 = vsel %vm14098_vm15, %v11243_v0, %v3023_v21  ;;  %vm14099_vm3 = vcmp.eq.s32.totalorder %v4981_v48, 28  ;;  %vm14100_vm10 = vcmp.eq.s32.totalorder %v5102_v33, 14  ;;  %vm14101_vm11 = vcmp.eq.s32.totalorder %v5274_v54, 14 }
 0x487   : > { %v3180_v12 = vsel %vm14099_vm3, %v11303_v5, %v3170_v58  ;;  %v3041_v39 = vsel %vm14100_vm10, %v11249_v25, %v3031_v7  ;;  %v3042_v50 = vsel %vm14101_vm11, %v11249_v25, %v3032_v35  ;;  %vm14102_vm7 = vcmp.eq.s32.totalorder %v5479_v14, 14 }
 0x488   : > { %v3043_v17 = vsel %vm14102_vm7, %v11249_v25, %v3033_v1  ;;  %vm14103_vm13 = vcmp.eq.s32.totalorder %v4981_v48, 29  ;;  %vm14104_vm15 = vcmp.eq.s32.totalorder %v5102_v33, 15  ;;  %vm14105_vm3 = vcmp.eq.s32.totalorder %v5274_v54, 15 }
 0x489   : > { %v3190_v0 = vsel %vm14103_vm13, %v11309_v30, %v3180_v12  ;;  %v3051_v34 = vsel %vm14104_vm15, %v11252_v27, %v3041_v39  ;;  %v3052_v43 = vsel %vm14105_vm3, %v11252_v27, %v3042_v50  ;;  %vm14106_vm10 = vcmp.eq.s32.totalorder %v5479_v14, 15 }
 0x48a   : > { %v3053_v9 = vsel %vm14106_vm10, %v11252_v27, %v3043_v17  ;;  %vm14107_vm11 = vcmp.eq.s32.totalorder %v4981_v48, 30  ;;  %vm14108_vm7 = vcmp.eq.s32.totalorder %v5102_v33, 16  ;;  %vm14109_vm13 = vcmp.eq.s32.totalorder %v5274_v54, 16 }
 0x48b   : > { %v3200_v25 = vsel %vm14107_vm11, %v11312_v41, %v3190_v0  ;;  %v3061_v55 = vsel %vm14108_vm7, %v11255_v38, %v3051_v34  ;;  %v3062_v59 = vsel %vm14109_vm13, %v11255_v38, %v3052_v43  ;;  %vm14110_vm15 = vcmp.eq.s32.totalorder %v5479_v14, 16 }
 0x48c   : > { %v3063_v8 = vsel %vm14110_vm15, %v11255_v38, %v3053_v9  ;;  %vm14111_vm3 = vcmp.eq.s32.totalorder %v4981_v48, 31  ;;  %vm14112_vm10 = vcmp.eq.s32.totalorder %v5102_v33, 17  ;;  %vm14113_vm11 = vcmp.eq.s32.totalorder %v5274_v54, 17 }
 0x48d   : > { %v3210_v27 = vsel %vm14111_vm3, %v11315_v24, %v3200_v25  ;;  %v3071_v51 = vsel %vm14112_vm10, %v11261_v16, %v3061_v55  ;;  %v3072_v36 = vsel %vm14113_vm11, %v11261_v16, %v3062_v59  ;;  %vm14114_vm7 = vcmp.eq.s32.totalorder %v5479_v14, 17 }
 0x48e   : > { %v3073_v61 = vsel %vm14114_vm7, %v11261_v16, %v3063_v8  ;;  %3219 = vst [vmem:[#allocation2 + $0x1e0] sm:$0xff] %v3210_v27  ;;  %vm14115_vm13 = vcmp.eq.s32.totalorder %v5102_v33, 18  ;;  %vm14116_vm15 = vcmp.eq.s32.totalorder %v5274_v54, 18  ;;  %vm14117_vm3 = vcmp.eq.s32.totalorder %v5479_v14, 18 }
 0x48f   : > { %v3081_v38 = vsel %vm14115_vm13, %v11264_v46, %v3071_v51  ;;  %v3082_v48 = vsel %vm14116_vm15, %v11264_v46, %v3072_v36  ;;  %v3083_v31 = vsel %vm14117_vm3, %v11264_v46, %v3073_v61  ;;  %vm14118_vm10 = vcmp.eq.s32.totalorder %v5102_v33, 19 }
 0x490   : > { %v3091_v6 = vsel %vm14118_vm10, %v11267_v56, %v3081_v38  ;;  %vm14119_vm11 = vcmp.eq.s32.totalorder %v5274_v54, 19  ;;  %vm14120_vm7 = vcmp.eq.s32.totalorder %v5479_v14, 19  ;;  %vm14121_vm13 = vcmp.eq.s32.totalorder %v5102_v33, 20 }
 0x491   : > { %v3092_v16 = vsel %vm14119_vm11, %v11267_v56, %v3082_v48  ;;  %v3093_v19 = vsel %vm14120_vm7, %v11267_v56, %v3083_v31  ;;  %v3101_v53 = vsel %vm14121_vm13, %v11273_v52, %v3091_v6  ;;  %vm14122_vm15 = vcmp.eq.s32.totalorder %v5274_v54, 20 }
 0x492   : > { %v3102_v46 = vsel %vm14122_vm15, %v11273_v52, %v3092_v16  ;;  %vm14123_vm3 = vcmp.eq.s32.totalorder %v5479_v14, 20  ;;  %vm14124_vm10 = vcmp.eq.s32.totalorder %v5102_v33, 21  ;;  %vm14125_vm11 = vcmp.eq.s32.totalorder %v5274_v54, 21 }
 0x493   : > { %v3103_v42 = vsel %vm14123_vm3, %v11273_v52, %v3093_v19  ;;  %v3111_v3 = vsel %vm14124_vm10, %v11276_v49, %v3101_v53  ;;  %v3112_v56 = vsel %vm14125_vm11, %v11276_v49, %v3102_v46  ;;  %vm14126_vm7 = vcmp.eq.s32.totalorder %v5102_v33, 22 }
 0x494   : > { %v3113_v45 = vsel %vm575_vm5, %v11276_v49, %v3103_v42  ;;  %v3121_v40 = vsel %vm14126_vm7, %v11279_v60, %v3111_v3  ;;  %vm14127_vm13 = vcmp.eq.s32.totalorder %v5274_v54, 22  ;;  %vm14128_vm15 = vcmp.eq.s32.totalorder %v5102_v33, 23 }
 0x495   : > { %v3122_v52 = vsel %vm14127_vm13, %v11279_v60, %v3112_v56  ;;  %v3123_v57 = vsel %vm583_vm1, %v11279_v60, %v3113_v45  ;;  %v3131_v15 = vsel %vm14128_vm15, %v11285_v13, %v3121_v40  ;;  %vm14129_vm3 = vcmp.eq.s32.totalorder %v5274_v54, 23 }
 0x496   : > { %v3132_v49 = vsel %vm14129_vm3, %v11285_v13, %v3122_v52  ;;  %v3133_v44 = vsel %vm591_vm6, %v11285_v13, %v3123_v57  ;;  %vm14130_vm5 = vcmp.eq.s32.totalorder %v5102_v33, 24  ;;  %vm14131_vm10 = vcmp.eq.s32.totalorder %v5274_v54, 24 }
 0x497   : > { %v3141_v28 = vsel %vm14130_vm5, %v11288_v23, %v3131_v15  ;;  %v3142_v60 = vsel %vm14131_vm10, %v11288_v23, %v3132_v49  ;;  %v3143_v11 = vsel %vm599_vm8, %v11288_v23, %v3133_v44  ;;  %vm14132_vm1 = vcmp.eq.s32.totalorder %v5102_v33, 25 }
 0x498   : > { %v3151_v32 = vsel %vm14132_vm1, %v11291_v22, %v3141_v28  ;;  %vm14133_vm11 = vcmp.eq.s32.totalorder %v5274_v54, 25  ;;  %v3153_v29 = vsel %vm607_vm2, %v11291_v22, %v3143_v11  ;;  %vm14134_vm6 = vcmp.eq.s32.totalorder %v5102_v33, 26 }
 0x499   : > { %v3152_v13 = vsel %vm14133_vm11, %v11291_v22, %v3142_v60  ;;  %v3161_v37 = vsel %vm14134_vm6, %v11297_v47, %v3151_v32  ;;  %vm14135_vm7 = vcmp.eq.s32.totalorder %v5274_v54, 26  ;;  %v3163_v10 = vsel %vm615_vm4, %v11297_v47, %v3153_v29 }
 0x49a   : > { %v3162_v23 = vsel %vm14135_vm7, %v11297_v47, %v3152_v13  ;;  %vm14136_vm8 = vcmp.eq.s32.totalorder %v5102_v33, 27  ;;  %vm14137_vm13 = vcmp.eq.s32.totalorder %v5274_v54, 27  ;;  %v3173_v26 = vsel %vm623_vm9, %v11300_v4, %v3163_v10 }
 0x49b   : > { %v3171_v63 = vsel %vm14136_vm8, %v11300_v4, %v3161_v37  ;;  %v3172_v22 = vsel %vm14137_vm13, %v11300_v4, %v3162_v23  ;;  %vm14138_vm2 = vcmp.eq.s32.totalorder %v5102_v33, 28  ;;  %vm14139_vm15 = vcmp.eq.s32.totalorder %v5274_v54, 28 }
 0x49c   : > { %v3181_v2 = vsel %vm14138_vm2, %v11303_v5, %v3171_v63  ;;  %v3182_v47 = vsel %vm14139_vm15, %v11303_v5, %v3172_v22  ;;  %v3183_v18 = vsel %vm631_vm0, %v11303_v5, %v3173_v26  ;;  %vm14140_vm4 = vcmp.eq.s32.totalorder %v5102_v33, 29 }
 0x49d   : > { %v3191_v20 = vsel %vm14140_vm4, %v11309_v30, %v3181_v2  ;;  %vm14141_vm3 = vcmp.eq.s32.totalorder %v5274_v54, 29  ;;  %v3193_v62 = vsel %vm639_vm12, %v11309_v30, %v3183_v18  ;;  %vm14142_vm9 = vcmp.eq.s32.totalorder %v5102_v33, 30 }
 0x49e   : > { %v3192_v4 = vsel %vm14141_vm3, %v11309_v30, %v3182_v47  ;;  %v3201_v21 = vsel %vm14142_vm9, %v11312_v41, %v3191_v20  ;;  %vm14143_vm5 = vcmp.eq.s32.totalorder %v5274_v54, 30  ;;  %v3203_v58 = vsel %vm647_vm14, %v11312_v41, %v3193_v62 }
 0x49f   : > { %v3202_v5 = vsel %vm14143_vm5, %v11312_v41, %v3192_v4  ;;  %vm14144_vm0 = vcmp.eq.s32.totalorder %v5102_v33, 31  ;;  %vm14145_vm10 = vcmp.eq.s32.totalorder %v5274_v54, 31  ;;  %vm14146_vm12 = vcmp.eq.s32.totalorder %v5479_v14, 31 }
 0x4a0   : > { %v3211_v7 = vsel %vm14144_vm0, %v11315_v24, %v3201_v21  ;;  %v3212_v30 = vsel %vm14145_vm10, %v11315_v24, %v3202_v5  ;;  %v3213_v35 = vsel %vm14146_vm12, %v11315_v24, %v3203_v58 }
 0x4a1   : > { %3220 = vst [vmem:[#allocation2 + $0x1e8] sm:$0xff] %v3211_v7  ;;  %3221 = vst [vmem:[#allocation2 + $0x1f0] sm:$0xff] %v3212_v30 }
 0x4a2   : > { %3222 = vst [vmem:[#allocation2 + $0x1f8] sm:$0xff] %v3213_v35 }
 0x4a3 PF: > { %v3223_v33 = vld [vmem:[%s4303_s23] sm:$0xff]  ;;  %v3224_v54 = vld [vmem:[%s4303_s23 + $0x8] sm:$0xff]  ;;  %v3225_v14 = vld [vmem:[%s4303_s23 + $0x10] sm:$0xff]  ;;  %s3480_s24 = scalar_lea.sflag [#allocation5], %s4299_s0 }
 0x4a4   : > { %v3287_v41 = vld [vmem:[#allocation2] sm:$0xff]  ;;  %v3288_v12 = vld [vmem:[#allocation2 + $0x8] sm:$0xff]  ;;  %v3289_v24 = vld [vmem:[#allocation2 + $0x10] sm:$0xff] }
 0x4a5   : > { %v3351_v1 = vadd.f32 %v3287_v41, %v3223_v33  ;;  %v3352_v39 = vadd.f32 %v3288_v12, %v3224_v54  ;;  %v3353_v50 = vadd.f32 %v3289_v24, %v3225_v14  ;;  %v3226_v17 = vld [vmem:[%s4303_s23 + $0x18] sm:$0xff]  ;;  %v3227_v34 = vld [vmem:[%s4303_s23 + $0x20] sm:$0xff]  ;;  %v3228_v25 = vld [vmem:[%s4303_s23 + $0x28] sm:$0xff] }
 0x4a6   : > { %v3290_v0 = vld [vmem:[#allocation2 + $0x18] sm:$0xff]  ;;  %v3291_v9 = vld [vmem:[#allocation2 + $0x20] sm:$0xff]  ;;  %v3292_v55 = vld [vmem:[#allocation2 + $0x28] sm:$0xff] }
 0x4a7   : > { %3415 = vst [vmem:[%s4309_s19] sm:$0xff] %v3351_v1  ;;  %v3354_v43 = vadd.f32 %v3290_v0, %v3226_v17  ;;  %3416 = vst [vmem:[%s4309_s19 + $0x8] sm:$0xff] %v3352_v39  ;;  %v3355_v59 = vadd.f32 %v3291_v9, %v3227_v34  ;;  %v3356_v8 = vadd.f32 %v3292_v55, %v3228_v25  ;;  %v3229_v27 = vld [vmem:[%s4303_s23 + $0x30] sm:$0xff]  ;;  %v3230_v36 = vld [vmem:[%s4303_s23 + $0x38] sm:$0xff] }
 0x4a8   : > { %3417 = vst [vmem:[%s4309_s19 + $0x10] sm:$0xff] %v3353_v50  ;;  %v3293_v51 = vld [vmem:[#allocation2 + $0x30] sm:$0xff]  ;;  %v3294_v38 = vld [vmem:[#allocation2 + $0x38] sm:$0xff]  ;;  %v3231_v48 = vld [vmem:[%s4303_s23 + $0x40] sm:$0xff] }
 0x4a9   : > { %3418 = vst [vmem:[%s4309_s19 + $0x18] sm:$0xff] %v3354_v43  ;;  %v3357_v61 = vadd.f32 %v3293_v51, %v3229_v27  ;;  %v3295_v31 = vld [vmem:[#allocation2 + $0x40] sm:$0xff]  ;;  %3419 = vst [vmem:[%s4309_s19 + $0x20] sm:$0xff] %v3355_v59  ;;  %v3358_v6 = vadd.f32 %v3294_v38, %v3230_v36  ;;  %v3232_v19 = vld [vmem:[%s4303_s23 + $0x48] sm:$0xff] }
 0x4aa   : > { %3420 = vst [vmem:[%s4309_s19 + $0x28] sm:$0xff] %v3356_v8  ;;  %v3359_v16 = vadd.f32 %v3295_v31, %v3231_v48  ;;  %v3296_v53 = vld [vmem:[#allocation2 + $0x48] sm:$0xff]  ;;  %v3233_v46 = vld [vmem:[%s4303_s23 + $0x50] sm:$0xff]  ;;  %v3234_v56 = vld [vmem:[%s4303_s23 + $0x58] sm:$0xff] }
 0x4ab   : > { %3421 = vst [vmem:[%s4309_s19 + $0x30] sm:$0xff] %v3357_v61  ;;  %v3360_v42 = vadd.f32 %v3296_v53, %v3232_v19  ;;  %v3297_v3 = vld [vmem:[#allocation2 + $0x50] sm:$0xff]  ;;  %v3298_v45 = vld [vmem:[#allocation2 + $0x58] sm:$0xff]  ;;  %3422 = vst [vmem:[%s4309_s19 + $0x38] sm:$0xff] %v3358_v6 }
 0x4ac   : > { %3423 = vst [vmem:[%s4309_s19 + $0x40] sm:$0xff] %v3359_v16  ;;  %v3361_v40 = vadd.f32 %v3297_v3, %v3233_v46  ;;  %v3362_v52 = vadd.f32 %v3298_v45, %v3234_v56  ;;  %v3235_v57 = vld [vmem:[%s4303_s23 + $0x60] sm:$0xff]  ;;  %v3236_v49 = vld [vmem:[%s4303_s23 + $0x68] sm:$0xff]  ;;  %v3237_v60 = vld [vmem:[%s4303_s23 + $0x70] sm:$0xff] }
 0x4ad   : > { %v3299_v15 = vld [vmem:[#allocation2 + $0x60] sm:$0xff]  ;;  %3424 = vst [vmem:[%s4309_s19 + $0x48] sm:$0xff] %v3360_v42  ;;  %v3300_v28 = vld [vmem:[#allocation2 + $0x68] sm:$0xff]  ;;  %v3301_v11 = vld [vmem:[#allocation2 + $0x70] sm:$0xff] }
 0x4ae   : > { %v3363_v44 = vadd.f32 %v3299_v15, %v3235_v57  ;;  %3425 = vst [vmem:[%s4309_s19 + $0x50] sm:$0xff] %v3361_v40  ;;  %3426 = vst [vmem:[%s4309_s19 + $0x58] sm:$0xff] %v3362_v52  ;;  %v3364_v32 = vadd.f32 %v3300_v28, %v3236_v49  ;;  %v3365_v13 = vadd.f32 %v3301_v11, %v3237_v60  ;;  %v3238_v29 = vld [vmem:[%s4303_s23 + $0x78] sm:$0xff]  ;;  %v3239_v23 = vld [vmem:[%s4303_s23 + $0x80] sm:$0xff] }
 0x4af   : > { %v3302_v37 = vld [vmem:[#allocation2 + $0x78] sm:$0xff]  ;;  %v3303_v63 = vld [vmem:[#allocation2 + $0x80] sm:$0xff]  ;;  %v3240_v22 = vld [vmem:[%s4303_s23 + $0x88] sm:$0xff] }
 0x4b0   : > { %3427 = vst [vmem:[%s4309_s19 + $0x60] sm:$0xff] %v3363_v44  ;;  %v3366_v10 = vadd.f32 %v3302_v37, %v3238_v29  ;;  %v3304_v26 = vld [vmem:[#allocation2 + $0x88] sm:$0xff]  ;;  %3428 = vst [vmem:[%s4309_s19 + $0x68] sm:$0xff] %v3364_v32  ;;  %v3367_v2 = vadd.f32 %v3303_v63, %v3239_v23  ;;  %v3241_v18 = vld [vmem:[%s4303_s23 + $0x90] sm:$0xff] }
 0x4b1   : > { %3429 = vst [vmem:[%s4309_s19 + $0x70] sm:$0xff] %v3365_v13  ;;  %v3368_v47 = vadd.f32 %v3304_v26, %v3240_v22  ;;  %v3305_v20 = vld [vmem:[#allocation2 + $0x90] sm:$0xff]  ;;  %v3242_v4 = vld [vmem:[%s4303_s23 + $0x98] sm:$0xff]  ;;  %v3243_v5 = vld [vmem:[%s4303_s23 + $0xa0] sm:$0xff] }
 0x4b2   : > { %3430 = vst [vmem:[%s4309_s19 + $0x78] sm:$0xff] %v3366_v10  ;;  %v3369_v62 = vadd.f32 %v3305_v20, %v3241_v18  ;;  %v3306_v21 = vld [vmem:[#allocation2 + $0x98] sm:$0xff]  ;;  %v3307_v58 = vld [vmem:[#allocation2 + $0xa0] sm:$0xff]  ;;  %3431 = vst [vmem:[%s4309_s19 + $0x80] sm:$0xff] %v3367_v2 }
 0x4b3   : > { %3432 = vst [vmem:[%s4309_s19 + $0x88] sm:$0xff] %v3368_v47  ;;  %v3370_v7 = vadd.f32 %v3306_v21, %v3242_v4  ;;  %v3371_v30 = vadd.f32 %v3307_v58, %v3243_v5  ;;  %v3244_v35 = vld [vmem:[%s4303_s23 + $0xa8] sm:$0xff]  ;;  %v3245_v41 = vld [vmem:[%s4303_s23 + $0xb0] sm:$0xff]  ;;  %v3246_v12 = vld [vmem:[%s4303_s23 + $0xb8] sm:$0xff] }
 0x4b4   : > { %v3308_v33 = vld [vmem:[#allocation2 + $0xa8] sm:$0xff]  ;;  %3433 = vst [vmem:[%s4309_s19 + $0x90] sm:$0xff] %v3369_v62  ;;  %v3309_v1 = vld [vmem:[#allocation2 + $0xb0] sm:$0xff]  ;;  %v3310_v14 = vld [vmem:[#allocation2 + $0xb8] sm:$0xff] }
 0x4b5   : > { %v3372_v54 = vadd.f32 %v3308_v33, %v3244_v35  ;;  %3434 = vst [vmem:[%s4309_s19 + $0x98] sm:$0xff] %v3370_v7  ;;  %3435 = vst [vmem:[%s4309_s19 + $0xa0] sm:$0xff] %v3371_v30  ;;  %v3373_v24 = vadd.f32 %v3309_v1, %v3245_v41  ;;  %v3374_v39 = vadd.f32 %v3310_v14, %v3246_v12  ;;  %v3247_v50 = vld [vmem:[%s4303_s23 + $0xc0] sm:$0xff]  ;;  %v3248_v0 = vld [vmem:[%s4303_s23 + $0xc8] sm:$0xff] }
 0x4b6   : > { %v3311_v17 = vld [vmem:[#allocation2 + $0xc0] sm:$0xff]  ;;  %v3312_v43 = vld [vmem:[#allocation2 + $0xc8] sm:$0xff]  ;;  %v3249_v9 = vld [vmem:[%s4303_s23 + $0xd0] sm:$0xff] }
 0x4b7   : > { %3436 = vst [vmem:[%s4309_s19 + $0xa8] sm:$0xff] %v3372_v54  ;;  %v3375_v34 = vadd.f32 %v3311_v17, %v3247_v50  ;;  %v3313_v25 = vld [vmem:[#allocation2 + $0xd0] sm:$0xff]  ;;  %3437 = vst [vmem:[%s4309_s19 + $0xb0] sm:$0xff] %v3373_v24  ;;  %v3376_v55 = vadd.f32 %v3312_v43, %v3248_v0  ;;  %v3250_v8 = vld [vmem:[%s4303_s23 + $0xd8] sm:$0xff] }
 0x4b8   : > { %3438 = vst [vmem:[%s4309_s19 + $0xb8] sm:$0xff] %v3374_v39  ;;  %v3377_v59 = vadd.f32 %v3313_v25, %v3249_v9  ;;  %v3314_v27 = vld [vmem:[#allocation2 + $0xd8] sm:$0xff]  ;;  %v3251_v51 = vld [vmem:[%s4303_s23 + $0xe0] sm:$0xff]  ;;  %v3252_v38 = vld [vmem:[%s4303_s23 + $0xe8] sm:$0xff] }
 0x4b9   : > { %3439 = vst [vmem:[%s4309_s19 + $0xc0] sm:$0xff] %v3375_v34  ;;  %v3378_v36 = vadd.f32 %v3314_v27, %v3250_v8  ;;  %v3315_v61 = vld [vmem:[#allocation2 + $0xe0] sm:$0xff]  ;;  %v3316_v48 = vld [vmem:[#allocation2 + $0xe8] sm:$0xff]  ;;  %3440 = vst [vmem:[%s4309_s19 + $0xc8] sm:$0xff] %v3376_v55 }
 0x4ba   : > { %3441 = vst [vmem:[%s4309_s19 + $0xd0] sm:$0xff] %v3377_v59  ;;  %v3379_v31 = vadd.f32 %v3315_v61, %v3251_v51  ;;  %v3380_v6 = vadd.f32 %v3316_v48, %v3252_v38  ;;  %v3253_v16 = vld [vmem:[%s4303_s23 + $0xf0] sm:$0xff]  ;;  %v3254_v53 = vld [vmem:[%s4303_s23 + $0xf8] sm:$0xff]  ;;  %v3255_v3 = vld [vmem:[%s4303_s23 + $0x100] sm:$0xff] }
 0x4bb   : > { %v3317_v19 = vld [vmem:[#allocation2 + $0xf0] sm:$0xff]  ;;  %3442 = vst [vmem:[%s4309_s19 + $0xd8] sm:$0xff] %v3378_v36  ;;  %v3318_v42 = vld [vmem:[#allocation2 + $0xf8] sm:$0xff]  ;;  %v3319_v56 = vld [vmem:[#allocation2 + $0x100] sm:$0xff] }
 0x4bc   : > { %v3381_v46 = vadd.f32 %v3317_v19, %v3253_v16  ;;  %3443 = vst [vmem:[%s4309_s19 + $0xe0] sm:$0xff] %v3379_v31  ;;  %3444 = vst [vmem:[%s4309_s19 + $0xe8] sm:$0xff] %v3380_v6  ;;  %v3382_v45 = vadd.f32 %v3318_v42, %v3254_v53  ;;  %v3383_v40 = vadd.f32 %v3319_v56, %v3255_v3  ;;  %v3256_v52 = vld [vmem:[%s4303_s23 + $0x108] sm:$0xff]  ;;  %v3257_v15 = vld [vmem:[%s4303_s23 + $0x110] sm:$0xff] }
 0x4bd   : > { %v3320_v57 = vld [vmem:[#allocation2 + $0x108] sm:$0xff]  ;;  %v3321_v44 = vld [vmem:[#allocation2 + $0x110] sm:$0xff]  ;;  %v3258_v28 = vld [vmem:[%s4303_s23 + $0x118] sm:$0xff] }
 0x4be   : > { %3445 = vst [vmem:[%s4309_s19 + $0xf0] sm:$0xff] %v3381_v46  ;;  %v3384_v49 = vadd.f32 %v3320_v57, %v3256_v52  ;;  %v3322_v60 = vld [vmem:[#allocation2 + $0x118] sm:$0xff]  ;;  %3446 = vst [vmem:[%s4309_s19 + $0xf8] sm:$0xff] %v3382_v45  ;;  %v3385_v11 = vadd.f32 %v3321_v44, %v3257_v15  ;;  %v3259_v13 = vld [vmem:[%s4303_s23 + $0x120] sm:$0xff] }
 0x4bf   : > { %3447 = vst [vmem:[%s4309_s19 + $0x100] sm:$0xff] %v3383_v40  ;;  %v3386_v32 = vadd.f32 %v3322_v60, %v3258_v28  ;;  %v3323_v29 = vld [vmem:[#allocation2 + $0x120] sm:$0xff]  ;;  %v3260_v37 = vld [vmem:[%s4303_s23 + $0x128] sm:$0xff]  ;;  %v3261_v63 = vld [vmem:[%s4303_s23 + $0x130] sm:$0xff] }
 0x4c0   : > { %3448 = vst [vmem:[%s4309_s19 + $0x108] sm:$0xff] %v3384_v49  ;;  %v3387_v23 = vadd.f32 %v3323_v29, %v3259_v13  ;;  %v3324_v10 = vld [vmem:[#allocation2 + $0x128] sm:$0xff]  ;;  %v3325_v22 = vld [vmem:[#allocation2 + $0x130] sm:$0xff]  ;;  %3449 = vst [vmem:[%s4309_s19 + $0x110] sm:$0xff] %v3385_v11 }
 0x4c1   : > { %3450 = vst [vmem:[%s4309_s19 + $0x118] sm:$0xff] %v3386_v32  ;;  %v3388_v26 = vadd.f32 %v3324_v10, %v3260_v37  ;;  %v3389_v2 = vadd.f32 %v3325_v22, %v3261_v63  ;;  %v3262_v47 = vld [vmem:[%s4303_s23 + $0x138] sm:$0xff]  ;;  %v3263_v20 = vld [vmem:[%s4303_s23 + $0x140] sm:$0xff]  ;;  %v3264_v21 = vld [vmem:[%s4303_s23 + $0x148] sm:$0xff] }
 0x4c2   : > { %v3326_v18 = vld [vmem:[#allocation2 + $0x138] sm:$0xff]  ;;  %3451 = vst [vmem:[%s4309_s19 + $0x120] sm:$0xff] %v3387_v23  ;;  %v3327_v62 = vld [vmem:[#allocation2 + $0x140] sm:$0xff]  ;;  %v3328_v5 = vld [vmem:[#allocation2 + $0x148] sm:$0xff] }
 0x4c3   : > { %v3390_v4 = vadd.f32 %v3326_v18, %v3262_v47  ;;  %3452 = vst [vmem:[%s4309_s19 + $0x128] sm:$0xff] %v3388_v26  ;;  %3453 = vst [vmem:[%s4309_s19 + $0x130] sm:$0xff] %v3389_v2  ;;  %v3391_v58 = vadd.f32 %v3327_v62, %v3263_v20  ;;  %v3392_v7 = vadd.f32 %v3328_v5, %v3264_v21  ;;  %v3265_v30 = vld [vmem:[%s4303_s23 + $0x150] sm:$0xff]  ;;  %v3266_v33 = vld [vmem:[%s4303_s23 + $0x158] sm:$0xff] }
 0x4c4   : > { %v3329_v35 = vld [vmem:[#allocation2 + $0x150] sm:$0xff]  ;;  %v3330_v54 = vld [vmem:[#allocation2 + $0x158] sm:$0xff]  ;;  %v3267_v1 = vld [vmem:[%s4303_s23 + $0x160] sm:$0xff] }
 0x4c5   : > { %3454 = vst [vmem:[%s4309_s19 + $0x138] sm:$0xff] %v3390_v4  ;;  %v3393_v41 = vadd.f32 %v3329_v35, %v3265_v30  ;;  %v3331_v12 = vld [vmem:[#allocation2 + $0x160] sm:$0xff]  ;;  %3455 = vst [vmem:[%s4309_s19 + $0x140] sm:$0xff] %v3391_v58  ;;  %v3394_v14 = vadd.f32 %v3330_v54, %v3266_v33  ;;  %v3268_v39 = vld [vmem:[%s4303_s23 + $0x168] sm:$0xff] }
 0x4c6   : > { %3456 = vst [vmem:[%s4309_s19 + $0x148] sm:$0xff] %v3392_v7  ;;  %v3395_v24 = vadd.f32 %v3331_v12, %v3267_v1  ;;  %v3332_v50 = vld [vmem:[#allocation2 + $0x168] sm:$0xff]  ;;  %v3269_v17 = vld [vmem:[%s4303_s23 + $0x170] sm:$0xff]  ;;  %v3270_v43 = vld [vmem:[%s4303_s23 + $0x178] sm:$0xff] }
 0x4c7   : > { %3457 = vst [vmem:[%s4309_s19 + $0x150] sm:$0xff] %v3393_v41  ;;  %v3396_v0 = vadd.f32 %v3332_v50, %v3268_v39  ;;  %v3333_v34 = vld [vmem:[#allocation2 + $0x170] sm:$0xff]  ;;  %v3334_v9 = vld [vmem:[#allocation2 + $0x178] sm:$0xff]  ;;  %3458 = vst [vmem:[%s4309_s19 + $0x158] sm:$0xff] %v3394_v14 }
 0x4c8   : > { %3459 = vst [vmem:[%s4309_s19 + $0x160] sm:$0xff] %v3395_v24  ;;  %v3397_v25 = vadd.f32 %v3333_v34, %v3269_v17  ;;  %v3398_v55 = vadd.f32 %v3334_v9, %v3270_v43  ;;  %v3271_v59 = vld [vmem:[%s4303_s23 + $0x180] sm:$0xff]  ;;  %v3272_v27 = vld [vmem:[%s4303_s23 + $0x188] sm:$0xff]  ;;  %v3273_v61 = vld [vmem:[%s4303_s23 + $0x190] sm:$0xff] }
 0x4c9   : > { %v3335_v8 = vld [vmem:[#allocation2 + $0x180] sm:$0xff]  ;;  %3460 = vst [vmem:[%s4309_s19 + $0x168] sm:$0xff] %v3396_v0  ;;  %v3336_v36 = vld [vmem:[#allocation2 + $0x188] sm:$0xff]  ;;  %v3337_v38 = vld [vmem:[#allocation2 + $0x190] sm:$0xff] }
 0x4ca   : > { %v3399_v51 = vadd.f32 %v3335_v8, %v3271_v59  ;;  %3461 = vst [vmem:[%s4309_s19 + $0x170] sm:$0xff] %v3397_v25  ;;  %3462 = vst [vmem:[%s4309_s19 + $0x178] sm:$0xff] %v3398_v55  ;;  %v3400_v48 = vadd.f32 %v3336_v36, %v3272_v27  ;;  %v3401_v31 = vadd.f32 %v3337_v38, %v3273_v61  ;;  %v3274_v6 = vld [vmem:[%s4303_s23 + $0x198] sm:$0xff]  ;;  %v3275_v19 = vld [vmem:[%s4303_s23 + $0x1a0] sm:$0xff] }
 0x4cb   : > { %v3338_v16 = vld [vmem:[#allocation2 + $0x198] sm:$0xff]  ;;  %v3339_v46 = vld [vmem:[#allocation2 + $0x1a0] sm:$0xff]  ;;  %v3276_v42 = vld [vmem:[%s4303_s23 + $0x1a8] sm:$0xff] }
 0x4cc   : > { %3463 = vst [vmem:[%s4309_s19 + $0x180] sm:$0xff] %v3399_v51  ;;  %v3402_v53 = vadd.f32 %v3338_v16, %v3274_v6  ;;  %v3340_v3 = vld [vmem:[#allocation2 + $0x1a8] sm:$0xff]  ;;  %3464 = vst [vmem:[%s4309_s19 + $0x188] sm:$0xff] %v3400_v48  ;;  %v3403_v56 = vadd.f32 %v3339_v46, %v3275_v19  ;;  %v3277_v40 = vld [vmem:[%s4303_s23 + $0x1b0] sm:$0xff] }
 0x4cd   : > { %3465 = vst [vmem:[%s4309_s19 + $0x190] sm:$0xff] %v3401_v31  ;;  %v3404_v45 = vadd.f32 %v3340_v3, %v3276_v42  ;;  %v3341_v52 = vld [vmem:[#allocation2 + $0x1b0] sm:$0xff]  ;;  %v3278_v57 = vld [vmem:[%s4303_s23 + $0x1b8] sm:$0xff]  ;;  %v3279_v44 = vld [vmem:[%s4303_s23 + $0x1c0] sm:$0xff] }
 0x4ce   : > { %3466 = vst [vmem:[%s4309_s19 + $0x198] sm:$0xff] %v3402_v53  ;;  %v3405_v15 = vadd.f32 %v3341_v52, %v3277_v40  ;;  %v3342_v49 = vld [vmem:[#allocation2 + $0x1b8] sm:$0xff]  ;;  %v3343_v28 = vld [vmem:[#allocation2 + $0x1c0] sm:$0xff]  ;;  %3467 = vst [vmem:[%s4309_s19 + $0x1a0] sm:$0xff] %v3403_v56 }
 0x4cf   : > { %3468 = vst [vmem:[%s4309_s19 + $0x1a8] sm:$0xff] %v3404_v45  ;;  %v3406_v60 = vadd.f32 %v3342_v49, %v3278_v57  ;;  %v3407_v11 = vadd.f32 %v3343_v28, %v3279_v44  ;;  %v3280_v32 = vld [vmem:[%s4303_s23 + $0x1c8] sm:$0xff]  ;;  %v3281_v29 = vld [vmem:[%s4303_s23 + $0x1d0] sm:$0xff]  ;;  %v3282_v10 = vld [vmem:[%s4303_s23 + $0x1d8] sm:$0xff] }
 0x4d0   : > { %v3344_v13 = vld [vmem:[#allocation2 + $0x1c8] sm:$0xff]  ;;  %3469 = vst [vmem:[%s4309_s19 + $0x1b0] sm:$0xff] %v3405_v15  ;;  %v3345_v23 = vld [vmem:[#allocation2 + $0x1d0] sm:$0xff]  ;;  %v3346_v63 = vld [vmem:[#allocation2 + $0x1d8] sm:$0xff] }
 0x4d1   : > { %v3408_v37 = vadd.f32 %v3344_v13, %v3280_v32  ;;  %3470 = vst [vmem:[%s4309_s19 + $0x1b8] sm:$0xff] %v3406_v60  ;;  %3471 = vst [vmem:[%s4309_s19 + $0x1c0] sm:$0xff] %v3407_v11  ;;  %v3409_v22 = vadd.f32 %v3345_v23, %v3281_v29  ;;  %v3410_v26 = vadd.f32 %v3346_v63, %v3282_v10  ;;  %v3283_v2 = vld [vmem:[%s4303_s23 + $0x1e0] sm:$0xff]  ;;  %v3284_v18 = vld [vmem:[%s4303_s23 + $0x1e8] sm:$0xff] }
 0x4d2   : > { %v3347_v47 = vld [vmem:[#allocation2 + $0x1e0] sm:$0xff]  ;;  %v3348_v4 = vld [vmem:[#allocation2 + $0x1e8] sm:$0xff]  ;;  %v3285_v62 = vld [vmem:[%s4303_s23 + $0x1f0] sm:$0xff] }
 0x4d3   : > { %3472 = vst [vmem:[%s4309_s19 + $0x1c8] sm:$0xff] %v3408_v37  ;;  %v3411_v20 = vadd.f32 %v3347_v47, %v3283_v2  ;;  %v3349_v21 = vld [vmem:[#allocation2 + $0x1f0] sm:$0xff]  ;;  %3473 = vst [vmem:[%s4309_s19 + $0x1d0] sm:$0xff] %v3409_v22  ;;  %v3412_v5 = vadd.f32 %v3348_v4, %v3284_v18  ;;  %v3286_v7 = vld [vmem:[%s4303_s23 + $0x1f8] sm:$0xff] }
 0x4d4   : > { %3474 = vst [vmem:[%s4309_s19 + $0x1d8] sm:$0xff] %v3410_v26  ;;  %v3413_v58 = vadd.f32 %v3349_v21, %v3285_v62  ;;  %v3350_v30 = vld [vmem:[#allocation2 + $0x1f8] sm:$0xff] }
 0x4d5   : > { %3475 = vst [vmem:[%s4309_s19 + $0x1e0] sm:$0xff] %v3411_v20  ;;  %v3414_v35 = vadd.f32 %v3350_v30, %v3286_v7  ;;  %3476 = vst [vmem:[%s4309_s19 + $0x1e8] sm:$0xff] %v3412_v5 }
 0x4d6   : > { %3477 = vst [vmem:[%s4309_s19 + $0x1f0] sm:$0xff] %v3413_v58 }
 0x4d7   : > { %3478 = vst [vmem:[%s4309_s19 + $0x1f8] sm:$0xff] %v3414_v35 }
 0x4d8   : > { %s3907_s1 = sshll.u32 %s4130_s13, 3  ;;  %s3908_s15 = sshll.u32 %s4126_s12, 7 }
 0x4d9   : > { %s3492_s25 = sadd.s32 %s3908_s15, %s3907_s1  ;;  %s3511_s23 = sshll.u32 %s4309_s19, 4  ;;  %s3512_s23 = int_to_ptr.vmem [resolvable:$true] %s3511_s23 }
 0x4da   : > { %s3909_s16 = sshll.u32 %s3492_s25, 7  ;;  %s14147_s5 = sld [smem:[#allocation29_spill]] }
 0x4db   : > { %s4151_s8 = smov 1024   ;;  %p14148_p8 = scmp.ne.s32.totalorder %s12441_s26, 0 }
 0x4dc   : > { %s4152_s18 = smov 2048   ;;  %s4153_s21 = smov 8  }
 0x4dd   : > { %3941 = sst [smem:[#allocation12]] (%p14148_p8), %s4151_s8  ;;  %s4154_s13 = smov 128  }
 0x4de   : > { %3942 = sst [smem:[#allocation12 + $0x1]] (%p14148_p8), %s4152_s18  ;;  %s4155_s12 = smov [#allocation11]  }
 0x4df   : > { %3943 = sst [smem:[#allocation12 + $0x2]] (%p14148_p8), %s4153_s21  ;;  %s4156_s19 = smov 0  }
 0x4e0   : > { %s3494_s0 = scalar_lea.hbm %s14147_s5, %s3909_s16  ;;  %3944 = sst [smem:[#allocation12 + $0x3]] (%p14148_p8), %s4154_s13 }
 0x4e1   : > { %3945 = sst [smem:[#allocation12 + $0x4]] (%p14148_p8), %s4154_s13 }
 0x4e2   : > { %3946 = sst [smem:[#allocation12 + $0x5]] (%p14148_p8), %s4153_s21 }
 0x4e3   : > { %3947 = dma.general (%p14148_p8), %s3512_s23, 8192, %s3494_s0, %s3480_s24, %s4155_s12, [#allocation12], %s4156_s19, 0  }
 0x4e4 PF: > { %s14149_s2 = sld [smem:[#allocation22_spill]]  ;;  %s14150_s10 = sld [smem:[#allocation17_spill]] }
 0x4e5   : > { %s14151_s11 = sld [smem:[#allocation25_spill]] }
 0x4ea   : > { %p3959_p9 = scmp.ge.s32.totalorder %s14149_s2, 2  ;;  %s3539_s14 = sand.u32 1, %s14150_s10  }
 0x4eb   : > { %p14152_p13 = scmp.ne.s32.totalorder %s14151_s11, 0  ;;  %s3540_s30 = scalar_lea.sflag [#allocation5], %s3539_s14 }
 0x4ed   : > { %p3954_p2 = pnand %p3959_p9, %p14152_p13 }
 0x4ef   : > { %4109 = dma.done.wait (!%p3954_p2), %s3540_s30, 8192  }
 0x4f0   : > { %4111 = vsyncadd (!%p3954_p2), %s3540_s30, 4294959104  ;;  %s19_s16 = sadd.s32 1, %s14149_s2   ;;  %s14153_s9 = sld [smem:[#allocation18_spill]] }
 0x4f1   : > { %p16_p1 = scmp.ge.s32.totalorder %s19_s16, 6   ;;  %s14154_s10 = sld [smem:[#allocation19_spill]] }
 0x4f2   : > { %s14155_s11 = sld [smem:[#allocation26_spill]]  ;;  %s14156_s12 = sld [smem:[#allocation20_spill]] }
 0x4f3   : > { %s14157_s13 = sld [smem:[#allocation21_spill]]  ;;  %s14158_s14 = sld [smem:[#allocation23_spill]] }
 0x4f4   : > { %s14159_s15 = sld [smem:[#allocation24_spill]]  ;;  %18 = sbr.rel (!%p16_p1) target bundleno = 12 (0xc), region = 99 }
 0x4fb   :  { %3545 = vsyncpa [#allocation4], 1 }
 0x4fc   :  { %3547 = vsyncpa [#allocation4 + $0x1], 1 }
 0x4fd   :  { %3548 = vsyncpa [#allocation5], 1 }
 0x4fe   :  { %3550 = vsyncpa [#allocation5 + $0x1], 1 }
 0x4ff   :  { %3551 = vsyncpa [#allocation6], 1 }
 0x500   :  { %3553 = vsyncpa [#allocation6 + $0x1], 1 }

</bundles_post_ra>
